<compile_context>
chip_gen: v5e
topology: v5e:2x2
jax: 0.10.0
libtpu: 0.0.40
codegen_flags: <defaults>
</compile_context>

<pallas_src>
import functools

import numpy as np
import jax
import jax.numpy as jnp
from jax import lax
from jax.experimental import pallas as pl
from jax.experimental.pallas import tpu as pltpu


# (qd, qh, qw) shift combinations shared by the kernel and the weight scatter.
_Q_LIST = [(qd, qh, qw) for qd in (-1, 0, 1) for qh in (-1, 0, 1) for qw in (-1, 0, 1)]


def _round_up(x, m):
    return (x + m - 1) // m * m


# -----------------------------------------------------------------------------
# Pallas kernel 1: fused Conv3d(3,3,3 pad=1, bias) + ReLU + MaxPool3d(2,2)
# -----------------------------------------------------------------------------
def _conv_pool_relu_kernel(xm1_ref, x0_ref, xp1_ref, w_ref, b_ref, o_ref, ops_ref,
                           *, cout, r_rows, f2, wo, flat_pad):
    """One grid step = one (batch element, pooled-depth row).

    xm1/x0/xp1 : (8*Cin, Lp)   pool-de-interleaved, padded input rows m-1, m, m+1
    w_ref      : (8*Cout, 27*8*Cin)  scattered conv weights (all 8 pool positions at once)
    b_ref      : (Cout, 1)
    o_ref      : (Cout, F2)    conv+bias+pool+ReLU on the padded (Ho+2)x(Wo+2) lane grid
    ops_ref    : (27*8*Cin, F2) VMEM scratch: in-kernel im2col from 27 lane-shifted slices
    """
    xs = (xm1_ref, x0_ref, xp1_ref)
    for qi, (qd, qh, qw) in enumerate(_Q_LIST):
        start = flat_pad + qh * (wo + 2) + qw          # static lane offset
        ops_ref[qi * r_rows:(qi + 1) * r_rows, :] = xs[qd + 1][:, pl.ds(start, f2)]
    res = jnp.dot(w_ref[...], ops_ref[...], preferred_element_type=jnp.float32)
    m = res[0:cout]
    for v in range(1, 8):                               # 2x2x2 max-pool over window pos.
        m = jnp.maximum(m, res[v * cout:(v + 1) * cout])
    # per-channel bias commutes with the window max; ReLU commutes with max.
    o_ref[...] = jnp.maximum(m + b_ref[...], 0.0).astype(o_ref.dtype)


def _pool_conv_weight(w):
    """Scatter Conv3d weights (Cout, Cin, 3,3,3) into the (8*Cout, 27*8*Cin) matrix used by
    the fused kernel.  Rows = (pool-window v, Cout); cols = (shift q, pool-phase r, Cin).
    Each (v, tap) pair maps to exactly one (q, r) column (2*q + r = pool_pos + tap - 1)."""
    cout, cin = w.shape[0], w.shape[1]
    place = np.zeros((8, 27 * 8, 27), dtype=np.float32)
    for v in range(8):
        pd, ph, pw = (v >> 2) & 1, (v >> 1) & 1, v & 1
        for qi, (qd, qh, qw) in enumerate(_Q_LIST):
            for rd in (0, 1):
                kd = 2 * qd + rd + 1 - pd
                if not 0 <= kd <= 2:
                    continue
                for rh in (0, 1):
                    kh = 2 * qh + rh + 1 - ph
                    if not 0 <= kh <= 2:
                        continue
                    for rw in (0, 1):
                        kw = 2 * qw + rw + 1 - pw
                        if not 0 <= kw <= 2:
                            continue
                        r = rd * 4 + rh * 2 + rw
                        kidx = (kd * 3 + kh) * 3 + kw
                        place[v, qi * 8 + r, kidx] = 1.0
    wt = jnp.transpose(w, (0, 2, 3, 4, 1)).reshape(cout, 27, cin).astype(jnp.float32)
    wm = jnp.einsum("vqk,cki->vcqi", jnp.asarray(place), wt)   # exact one-hot placement
    return wm.reshape(8 * cout, 27 * 8 * cin)


def conv_block(x, w, b, *, compute_dtype=jnp.bfloat16):
    """Fused Conv3d(k=3, pad=1, bias) -> ReLU -> MaxPool3d(2, 2) (floor mode, odd dims OK).

    x: (N, Cin, D, H, W) -> (N, Cout, D//2, H//2, W//2) in compute_dtype.
    """
    N, Cin, D, H, W = x.shape
    Cout = w.shape[0]
    Do, Ho, Wo = D // 2, H // 2, W // 2
    R = 8 * Cin
    F2 = (Ho + 2) * (Wo + 2)
    flat_pad = Wo + 3
    Lp = F2 + 2 * flat_pad

    # Cheap host prep (~1-2 passes over input-sized data, no 27x inflation): zero-pad so
    # the pooled index groups cover the conv's "same" padding, de-interleave the 2x2x2
    # pool phase onto the sublane axis, flatten the padded (Ho+2, Wo+2) grid onto lanes.
    xq = jnp.pad(x.astype(compute_dtype),
                 ((0, 0), (0, 0),
                  (2, 2 * Do + 2 - D), (2, 2 * Ho + 2 - H), (2, 2 * Wo + 2 - W)))
    xg = xq.reshape(N, Cin, Do + 2, 2, Ho + 2, 2, Wo + 2, 2)
    xg = jnp.transpose(xg, (0, 2, 3, 5, 7, 1, 4, 6))
    xg = xg.reshape(N, Do + 2, R, (Ho + 2) * (Wo + 2))
    xg = jnp.pad(xg, ((0, 0), (0, 0), (0, 0), (flat_pad, flat_pad)))   # (N, Do+2, R, Lp)

    w_mat = _pool_conv_weight(w).astype(compute_dtype)                 # (8*Cout, 27*R)
    b_col = b.reshape(Cout, 1).astype(jnp.float32)

    kernel = functools.partial(_conv_pool_relu_kernel, cout=Cout, r_rows=R, f2=F2,
                               wo=Wo, flat_pad=flat_pad)
    out = pl.pallas_call(
        kernel,
        out_shape=jax.ShapeDtypeStruct((N, Do, Cout, F2), compute_dtype),
        grid_spec=pltpu.PrefetchScalarGridSpec(
            num_scalar_prefetch=0,
            grid=(N, Do),
            in_specs=[
                # same array passed 3x: pooled-depth rows i, i+1, i+2 (i.e. m-1, m, m+1)
                pl.BlockSpec((None, None, R, Lp), lambda n, i: (n, i, 0, 0)),
                pl.BlockSpec((None, None, R, Lp), lambda n, i: (n, i + 1, 0, 0)),
                pl.BlockSpec((None, None, R, Lp), lambda n, i: (n, i + 2, 0, 0)),
                pl.BlockSpec((8 * Cout, 27 * R), lambda n, i: (0, 0)),
                pl.BlockSpec((Cout, 1), lambda n, i: (0, 0)),
            ],
            out_specs=pl.BlockSpec((None, None, Cout, F2), lambda n, i: (n, i, 0, 0)),
            scratch_shapes=[pltpu.VMEM((27 * R, F2), compute_dtype)],
        ),
        compiler_params=pltpu.CompilerParams(
            dimension_semantics=("parallel", "parallel")),
        cost_estimate=pl.CostEstimate(
            flops=2 * (8 * Cout) * (27 * R) * F2 * N * Do,
            transcendentals=0,
            bytes_accessed=2 * (3 * N * Do * R * Lp + N * Do * Cout * F2
                                + 8 * Cout * 27 * R)),
    )(xg, xg, xg, w_mat, b_col)

    # Crop the padded ring and restore NCDHW for the next layer / torch-order flatten.
    out = out.reshape(N, Do, Cout, Ho + 2, Wo + 2)[:, :, :, 1:Ho + 1, 1:Wo + 1]
    return jnp.transpose(out, (0, 2, 1, 3, 4))


# -----------------------------------------------------------------------------
# Pallas kernels 2+3: MLP head.  fc1 is tiled (H1 "parallel" x F "arbitrary" with a VMEM
# f32 accumulator); fc2+BN+ReLU and the final Linear stay fused in a tiny second call.
# BatchNorm1d (inference, running stats) is folded into the weights/bias (exact).
# -----------------------------------------------------------------------------
def _fc1_kernel(x_ref, w_ref, b_ref, o_ref, acc_ref):
    @pl.when(pl.program_id(1) == 0)
    def _():
        acc_ref[...] = jnp.zeros_like(acc_ref)
    acc_ref[...] += jnp.dot(x_ref[...], w_ref[...], preferred_element_type=jnp.float32)

    @pl.when(pl.program_id(1) == pl.num_programs(1) - 1)
    def _():
        o_ref[...] = jnp.maximum(acc_ref[...] + b_ref[...], 0.0).astype(o_ref.dtype)


def _head_kernel(h_ref, w2_ref, b2_ref, w3_ref, b3_ref, o_ref):
    h2 = jnp.maximum(
        jnp.dot(h_ref[...], w2_ref[...], preferred_element_type=jnp.float32) + b2_ref[...],
        0.0)
    o_ref[...] = (jnp.dot(h2.astype(w3_ref.dtype), w3_ref[...],
                          preferred_element_type=jnp.float32) + b3_ref[...])


def _fold_bn(w, b, gamma, beta, mean, var, *, eps=1e-5):
    scale = gamma / jnp.sqrt(var + eps)
    return w.T * scale[None, :], (b - mean) * scale + beta


def mlp_head(x_flat, params, *, compute_dtype=jnp.bfloat16, tile_f=512, tile_h1=512):
    N, F = x_flat.shape
    w1, b1 = _fold_bn(params["fc1_w"], params["fc1_b"], params["bn1_gamma"],
                      params["bn1_beta"], params["bn1_mean"], params["bn1_var"])
    w2, b2 = _fold_bn(params["fc2_w"], params["fc2_b"], params["bn2_gamma"],
                      params["bn2_beta"], params["bn2_mean"], params["bn2_var"])
    w3, b3 = params["out_w"].T, params["out_b"]
    H1, H2, NC = w1.shape[1], w2.shape[1], w3.shape[1]

    tf = min(tile_f, _round_up(F, 128))
    th1 = min(tile_h1, _round_up(H1, 128))
    Fp, H1p = _round_up(F, tf), _round_up(H1, th1)

    xq = jnp.pad(x_flat.astype(compute_dtype), ((0, 0), (0, Fp - F)))
    w1q = jnp.pad(w1.astype(compute_dtype), ((0, Fp - F), (0, H1p - H1)))
    b1q = jnp.pad(b1.astype(jnp.float32)[None, :], ((0, 0), (0, H1p - H1)))

    h1 = pl.pallas_call(
        _fc1_kernel,
        out_shape=jax.ShapeDtypeStruct((N, H1p), compute_dtype),
        grid_spec=pltpu.PrefetchScalarGridSpec(
            num_scalar_prefetch=0,
            grid=(H1p // th1, Fp // tf),
            in_specs=[
                pl.BlockSpec((N, tf), lambda h, f: (0, f)),
                pl.BlockSpec((tf, th1), lambda h, f: (f, h)),
                pl.BlockSpec((1, th1), lambda h, f: (0, h)),
            ],
            out_specs=pl.BlockSpec((N, th1), lambda h, f: (0, h)),
            scratch_shapes=[pltpu.VMEM((N, th1), jnp.float32)],
        ),
        compiler_params=pltpu.CompilerParams(
            dimension_semantics=("parallel", "arbitrary")),
        cost_estimate=pl.CostEstimate(
            flops=2 * N * Fp * H1p, transcendentals=0,
            bytes_accessed=2 * (N * Fp + Fp * H1p + N * H1p)),
    )(xq, w1q, b1q)

    # Padded h1 columns hit zero rows of w2 -> padding is inert.
    w2q = jnp.pad(w2.astype(compute_dtype), ((0, H1p - H1), (0, 0)))
    logits = pl.pallas_call(
        _head_kernel,
        out_shape=jax.ShapeDtypeStruct((N, NC), jnp.float32),
        cost_estimate=pl.CostEstimate(
            flops=2 * N * (H1p * H2 + H2 * NC), transcendentals=0,
            bytes_accessed=2 * (N * H1p + H1p * H2 + H2 * NC)),
    )(h1, w2q, b2.astype(jnp.float32)[None, :],
      w3.astype(compute_dtype), b3.astype(jnp.float32)[None, :])
    return logits


# -----------------------------------------------------------------------------
# Full forward (inference semantics)
# -----------------------------------------------------------------------------
def dsa_3d_cnn_forward(x, params, *, compute_dtype=jnp.bfloat16):
    """x: (N, Cin, D, H, W) float32 -> logits (N, num_classes) float32."""
    y = conv_block(x, params["conv1_w"], params["conv1_b"], compute_dtype=compute_dtype)
    y = conv_block(y, params["conv2_w"], params["conv2_b"], compute_dtype=compute_dtype)
    y = conv_block(y, params["conv3_w"], params["conv3_b"], compute_dtype=compute_dtype)
    x_flat = y.reshape(y.shape[0], -1)          # torch's x.view(N, -1) (C-major) order
    # TODO(synk): nn.Dropout(0.5)/nn.Dropout(drop_prob) are train-mode modules built inline
    # in the torch forward; modeled here as eval-mode identity (no stochastic mask).
    return mlp_head(x_flat, params, compute_dtype=compute_dtype)


# -----------------------------------------------------------------------------
# Pure-JAX reference (same bf16 operand rounding / f32 accumulation as the kernels)
# -----------------------------------------------------------------------------
def dsa_3d_cnn_reference(x, params, *, compute_dtype=jnp.bfloat16, eps=1e-5):
    cd = compute_dtype

    def block(y, w, b):
        y = lax.conv_general_dilated(
            y.astype(cd), w.astype(cd), (1, 1, 1), ((1, 1), (1, 1), (1, 1)),
            dimension_numbers=("NCDHW", "OIDHW", "NCDHW"),
            preferred_element_type=jnp.float32)
        y = jnp.maximum(y + b.reshape(1, -1, 1, 1, 1).astype(jnp.float32), 0.0)
        y = lax.reduce_window(y, -jnp.inf, lax.max,
                              (1, 1, 2, 2, 2), (1, 1, 2, 2, 2), "VALID")
        return y.astype(cd)

    y = block(x, params["conv1_w"], params["conv1_b"])
    y = block(y, params["conv2_w"], params["conv2_b"])
    y = block(y, params["conv3_w"], params["conv3_b"])
    h = y.reshape(y.shape[0], -1)

    w1, b1 = _fold_bn(params["fc1_w"], params["fc1_b"], params["bn1_gamma"],
                      params["bn1_beta"], params["bn1_mean"], params["bn1_var"], eps=eps)
    w2, b2 = _fold_bn(params["fc2_w"], params["fc2_b"], params["bn2_gamma"],
                      params["bn2_beta"], params["bn2_mean"], params["bn2_var"], eps=eps)
    h = jnp.maximum(jnp.dot(h.astype(cd), w1.astype(cd),
                            preferred_element_type=jnp.float32) + b1, 0.0).astype(cd)
    h = jnp.maximum(jnp.dot(h, w2.astype(cd),
                            preferred_element_type=jnp.float32) + b2, 0.0).astype(cd)
    return jnp.dot(h, params["out_w"].T.astype(cd),
                   preferred_element_type=jnp.float32) + params["out_b"]


# -----------------------------------------------------------------------------
if __name__ == "__main__":
    key = jax.random.PRNGKey(0)
    ks = jax.random.split(key, 24)

    # Scaled-down shapes consistent with the module (real model: 110^3 spatial, fc 2000/500).
    N, Cin = 2, 1
    D = H = W = 16
    C = 8                                            # conv channels (as in the module)
    F = C * (D // 8) * (H // 8) * (W // 8)           # flattened features after 3 pools = 64
    H1, H2, NUM_CLASSES = 128, 64, 2

    def nrm(k, shape, s=0.1):
        return jax.random.normal(k, shape, dtype=jnp.float32) * s

    x = jax.random.normal(ks[0], (N, Cin, D, H, W), dtype=jnp.float32)
    params = {
        "conv1_w": nrm(ks[1], (C, Cin, 3, 3, 3), 0.3), "conv1_b": nrm(ks[2], (C,)),
        "conv2_w": nrm(ks[3], (C, C, 3, 3, 3), 0.05),  "conv2_b": nrm(ks[4], (C,)),
        "conv3_w": nrm(ks[5], (C, C, 3, 3, 3), 0.05),  "conv3_b": nrm(ks[6], (C,)),
        "fc1_w": nrm(ks[7], (H1, F)),  "fc1_b": nrm(ks[8], (H1,)),
        "bn1_gamma": 1.0 + nrm(ks[9], (H1,)),  "bn1_beta": nrm(ks[10], (H1,)),
        "bn1_mean": nrm(ks[11], (H1,)),
        "bn1_var": 1.0 + jnp.abs(nrm(ks[12], (H1,))),
        "fc2_w": nrm(ks[13], (H2, H1)), "fc2_b": nrm(ks[14], (H2,)),
        "bn2_gamma": 1.0 + nrm(ks[15], (H2,)), "bn2_beta": nrm(ks[16], (H2,)),
        "bn2_mean": nrm(ks[17], (H2,)),
        "bn2_var": 1.0 + jnp.abs(nrm(ks[18], (H2,))),
        "out_w": nrm(ks[19], (NUM_CLASSES, H2)), "out_b": nrm(ks[20], (NUM_CLASSES,)),
    }

    fwd = jax.jit(dsa_3d_cnn_forward)
    logits = jax.block_until_ready(fwd(x, params))

    ref = jax.block_until_ready(dsa_3d_cnn_reference(x, params))
    assert logits.shape == (N, NUM_CLASSES), logits.shape
    max_err = float(jnp.max(jnp.abs(logits - ref)))
    # bf16 operands / f32 accumulation on both paths; residual diff is summation order
    # plus occasional 1-ulp bf16 flips on intermediate activations.
    assert jnp.allclose(logits, ref, atol=1e-2, rtol=1e-2), max_err

    print("KERNEL_OK")
</pallas_src>

<mosaic_0001>
module attributes {stable_mosaic.version = 11 : i64} {
  func.func @_conv_pool_relu_kernel(%arg0: i32, %arg1: i32, %arg2: memref<1x1x8x122xbf16, #tpu.memory_space<vmem>>, %arg3: memref<1x1x8x122xbf16, #tpu.memory_space<vmem>>, %arg4: memref<1x1x8x122xbf16, #tpu.memory_space<vmem>>, %arg5: memref<64x216xbf16, #tpu.memory_space<vmem>>, %arg6: memref<8x1xf32, #tpu.memory_space<vmem>>, %arg7: memref<1x1x8x100xbf16, #tpu.memory_space<vmem>>, %arg8: memref<216x100xbf16, #tpu.memory_space<vmem>>) attributes {dimension_semantics = [#tpu.dimension_semantics<parallel>, #tpu.dimension_semantics<parallel>], iteration_bounds = array<i64: 2, 8>, scalar_prefetch = 0 : i64, scratch_operands = 1 : i64, tpu.core_type = #tpu.core_type<tc>, window_params = [{transform_indices = @transform_0, window_bounds = array<i64: 1, 1, 8, 122>}, {transform_indices = @transform_1, window_bounds = array<i64: 1, 1, 8, 122>}, {transform_indices = @transform_2, window_bounds = array<i64: 1, 1, 8, 122>}, {pipeline_mode = #tpu.pipeline_mode<synchronous>, transform_indices = @transform_3, window_bounds = array<i64: 64, 216>}, {pipeline_mode = #tpu.pipeline_mode<synchronous>, transform_indices = @transform_4, window_bounds = array<i64: 8, 1>}, {transform_indices = @transform_5, window_bounds = array<i64: 1, 1, 8, 100>}]} {
    %c0 = arith.constant 0 : index
    %c0_0 = arith.constant 0 : index
    %c0_1 = arith.constant 0 : index
    %c0_2 = arith.constant 0 : index
    %0 = vector.load %arg2[%c0, %c0_0, %c0_1, %c0_2] : memref<1x1x8x122xbf16, #tpu.memory_space<vmem>>, vector<1x1x8x100xbf16>
    %1 = vector.shape_cast %0 : vector<1x1x8x100xbf16> to vector<8x100xbf16>
    %c0_3 = arith.constant 0 : index
    %c0_4 = arith.constant 0 : index
    %2 = vector.load %arg8[%c0_3, %c0_4] : memref<216x100xbf16, #tpu.memory_space<vmem>>, vector<8x100xbf16>
    tpu.vector_store %arg8[%c0_3, %c0_4], %1 {strides = array<i32>} : memref<216x100xbf16, #tpu.memory_space<vmem>>, vector<8x100xbf16>,
    %c0_5 = arith.constant 0 : index
    %c0_6 = arith.constant 0 : index
    %c0_7 = arith.constant 0 : index
    %c1 = arith.constant 1 : index
    %3 = vector.load %arg2[%c0_5, %c0_6, %c0_7, %c1] : memref<1x1x8x122xbf16, #tpu.memory_space<vmem>>, vector<1x1x8x100xbf16>
    %4 = vector.shape_cast %3 : vector<1x1x8x100xbf16> to vector<8x100xbf16>
    %c8 = arith.constant 8 : index
    %c0_8 = arith.constant 0 : index
    %5 = vector.load %arg8[%c8, %c0_8] : memref<216x100xbf16, #tpu.memory_space<vmem>>, vector<8x100xbf16>
    tpu.vector_store %arg8[%c8, %c0_8], %4 {strides = array<i32>} : memref<216x100xbf16, #tpu.memory_space<vmem>>, vector<8x100xbf16>,
    %c0_9 = arith.constant 0 : index
    %c0_10 = arith.constant 0 : index
    %c0_11 = arith.constant 0 : index
    %c2 = arith.constant 2 : index
    %6 = vector.load %arg2[%c0_9, %c0_10, %c0_11, %c2] : memref<1x1x8x122xbf16, #tpu.memory_space<vmem>>, vector<1x1x8x100xbf16>
    %7 = vector.shape_cast %6 : vector<1x1x8x100xbf16> to vector<8x100xbf16>
    %c16 = arith.constant 16 : index
    %c0_12 = arith.constant 0 : index
    %8 = vector.load %arg8[%c16, %c0_12] : memref<216x100xbf16, #tpu.memory_space<vmem>>, vector<8x100xbf16>
    tpu.vector_store %arg8[%c16, %c0_12], %7 {strides = array<i32>} : memref<216x100xbf16, #tpu.memory_space<vmem>>, vector<8x100xbf16>,
    %c0_13 = arith.constant 0 : index
    %c0_14 = arith.constant 0 : index
    %c0_15 = arith.constant 0 : index
    %c10 = arith.constant 10 : index
    %9 = vector.load %arg2[%c0_13, %c0_14, %c0_15, %c10] : memref<1x1x8x122xbf16, #tpu.memory_space<vmem>>, vector<1x1x8x100xbf16>
    %10 = vector.shape_cast %9 : vector<1x1x8x100xbf16> to vector<8x100xbf16>
    %c24 = arith.constant 24 : index
    %c0_16 = arith.constant 0 : index
    %11 = vector.load %arg8[%c24, %c0_16] : memref<216x100xbf16, #tpu.memory_space<vmem>>, vector<8x100xbf16>
    tpu.vector_store %arg8[%c24, %c0_16], %10 {strides = array<i32>} : memref<216x100xbf16, #tpu.memory_space<vmem>>, vector<8x100xbf16>,
    %c0_17 = arith.constant 0 : index
    %c0_18 = arith.constant 0 : index
    %c0_19 = arith.constant 0 : index
    %c11 = arith.constant 11 : index
    %12 = vector.load %arg2[%c0_17, %c0_18, %c0_19, %c11] : memref<1x1x8x122xbf16, #tpu.memory_space<vmem>>, vector<1x1x8x100xbf16>
    %13 = vector.shape_cast %12 : vector<1x1x8x100xbf16> to vector<8x100xbf16>
    %c32 = arith.constant 32 : index
    %c0_20 = arith.constant 0 : index
    %14 = vector.load %arg8[%c32, %c0_20] : memref<216x100xbf16, #tpu.memory_space<vmem>>, vector<8x100xbf16>
    tpu.vector_store %arg8[%c32, %c0_20], %13 {strides = array<i32>} : memref<216x100xbf16, #tpu.memory_space<vmem>>, vector<8x100xbf16>,
    %c0_21 = arith.constant 0 : index
    %c0_22 = arith.constant 0 : index
    %c0_23 = arith.constant 0 : index
    %c12 = arith.constant 12 : index
    %15 = vector.load %arg2[%c0_21, %c0_22, %c0_23, %c12] : memref<1x1x8x122xbf16, #tpu.memory_space<vmem>>, vector<1x1x8x100xbf16>
    %16 = vector.shape_cast %15 : vector<1x1x8x100xbf16> to vector<8x100xbf16>
    %c40 = arith.constant 40 : index
    %c0_24 = arith.constant 0 : index
    %17 = vector.load %arg8[%c40, %c0_24] : memref<216x100xbf16, #tpu.memory_space<vmem>>, vector<8x100xbf16>
    tpu.vector_store %arg8[%c40, %c0_24], %16 {strides = array<i32>} : memref<216x100xbf16, #tpu.memory_space<vmem>>, vector<8x100xbf16>,
    %c0_25 = arith.constant 0 : index
    %c0_26 = arith.constant 0 : index
    %c0_27 = arith.constant 0 : index
    %c20 = arith.constant 20 : index
    %18 = vector.load %arg2[%c0_25, %c0_26, %c0_27, %c20] : memref<1x1x8x122xbf16, #tpu.memory_space<vmem>>, vector<1x1x8x100xbf16>
    %19 = vector.shape_cast %18 : vector<1x1x8x100xbf16> to vector<8x100xbf16>
    %c48 = arith.constant 48 : index
    %c0_28 = arith.constant 0 : index
    %20 = vector.load %arg8[%c48, %c0_28] : memref<216x100xbf16, #tpu.memory_space<vmem>>, vector<8x100xbf16>
    tpu.vector_store %arg8[%c48, %c0_28], %19 {strides = array<i32>} : memref<216x100xbf16, #tpu.memory_space<vmem>>, vector<8x100xbf16>,
    %c0_29 = arith.constant 0 : index
    %c0_30 = arith.constant 0 : index
    %c0_31 = arith.constant 0 : index
    %c21 = arith.constant 21 : index
    %21 = vector.load %arg2[%c0_29, %c0_30, %c0_31, %c21] : memref<1x1x8x122xbf16, #tpu.memory_space<vmem>>, vector<1x1x8x100xbf16>
    %22 = vector.shape_cast %21 : vector<1x1x8x100xbf16> to vector<8x100xbf16>
    %c56 = arith.constant 56 : index
    %c0_32 = arith.constant 0 : index
    %23 = vector.load %arg8[%c56, %c0_32] : memref<216x100xbf16, #tpu.memory_space<vmem>>, vector<8x100xbf16>
    tpu.vector_store %arg8[%c56, %c0_32], %22 {strides = array<i32>} : memref<216x100xbf16, #tpu.memory_space<vmem>>, vector<8x100xbf16>,
    %c0_33 = arith.constant 0 : index
    %c0_34 = arith.constant 0 : index
    %c0_35 = arith.constant 0 : index
    %c22 = arith.constant 22 : index
    %24 = vector.load %arg2[%c0_33, %c0_34, %c0_35, %c22] : memref<1x1x8x122xbf16, #tpu.memory_space<vmem>>, vector<1x1x8x100xbf16>
    %25 = vector.shape_cast %24 : vector<1x1x8x100xbf16> to vector<8x100xbf16>
    %c64 = arith.constant 64 : index
    %c0_36 = arith.constant 0 : index
    %26 = vector.load %arg8[%c64, %c0_36] : memref<216x100xbf16, #tpu.memory_space<vmem>>, vector<8x100xbf16>
    tpu.vector_store %arg8[%c64, %c0_36], %25 {strides = array<i32>} : memref<216x100xbf16, #tpu.memory_space<vmem>>, vector<8x100xbf16>,
    %c0_37 = arith.constant 0 : index
    %c0_38 = arith.constant 0 : index
    %c0_39 = arith.constant 0 : index
    %c0_40 = arith.constant 0 : index
    %27 = vector.load %arg3[%c0_37, %c0_38, %c0_39, %c0_40] : memref<1x1x8x122xbf16, #tpu.memory_space<vmem>>, vector<1x1x8x100xbf16>
    %28 = vector.shape_cast %27 : vector<1x1x8x100xbf16> to vector<8x100xbf16>
    %c72 = arith.constant 72 : index
    %c0_41 = arith.constant 0 : index
    %29 = vector.load %arg8[%c72, %c0_41] : memref<216x100xbf16, #tpu.memory_space<vmem>>, vector<8x100xbf16>
    tpu.vector_store %arg8[%c72, %c0_41], %28 {strides = array<i32>} : memref<216x100xbf16, #tpu.memory_space<vmem>>, vector<8x100xbf16>,
    %c0_42 = arith.constant 0 : index
    %c0_43 = arith.constant 0 : index
    %c0_44 = arith.constant 0 : index
    %c1_45 = arith.constant 1 : index
    %30 = vector.load %arg3[%c0_42, %c0_43, %c0_44, %c1_45] : memref<1x1x8x122xbf16, #tpu.memory_space<vmem>>, vector<1x1x8x100xbf16>
    %31 = vector.shape_cast %30 : vector<1x1x8x100xbf16> to vector<8x100xbf16>
    %c80 = arith.constant 80 : index
    %c0_46 = arith.constant 0 : index
    %32 = vector.load %arg8[%c80, %c0_46] : memref<216x100xbf16, #tpu.memory_space<vmem>>, vector<8x100xbf16>
    tpu.vector_store %arg8[%c80, %c0_46], %31 {strides = array<i32>} : memref<216x100xbf16, #tpu.memory_space<vmem>>, vector<8x100xbf16>,
    %c0_47 = arith.constant 0 : index
    %c0_48 = arith.constant 0 : index
    %c0_49 = arith.constant 0 : index
    %c2_50 = arith.constant 2 : index
    %33 = vector.load %arg3[%c0_47, %c0_48, %c0_49, %c2_50] : memref<1x1x8x122xbf16, #tpu.memory_space<vmem>>, vector<1x1x8x100xbf16>
    %34 = vector.shape_cast %33 : vector<1x1x8x100xbf16> to vector<8x100xbf16>
    %c88 = arith.constant 88 : index
    %c0_51 = arith.constant 0 : index
    %35 = vector.load %arg8[%c88, %c0_51] : memref<216x100xbf16, #tpu.memory_space<vmem>>, vector<8x100xbf16>
    tpu.vector_store %arg8[%c88, %c0_51], %34 {strides = array<i32>} : memref<216x100xbf16, #tpu.memory_space<vmem>>, vector<8x100xbf16>,
    %c0_52 = arith.constant 0 : index
    %c0_53 = arith.constant 0 : index
    %c0_54 = arith.constant 0 : index
    %c10_55 = arith.constant 10 : index
    %36 = vector.load %arg3[%c0_52, %c0_53, %c0_54, %c10_55] : memref<1x1x8x122xbf16, #tpu.memory_space<vmem>>, vector<1x1x8x100xbf16>
    %37 = vector.shape_cast %36 : vector<1x1x8x100xbf16> to vector<8x100xbf16>
    %c96 = arith.constant 96 : index
    %c0_56 = arith.constant 0 : index
    %38 = vector.load %arg8[%c96, %c0_56] : memref<216x100xbf16, #tpu.memory_space<vmem>>, vector<8x100xbf16>
    tpu.vector_store %arg8[%c96, %c0_56], %37 {strides = array<i32>} : memref<216x100xbf16, #tpu.memory_space<vmem>>, vector<8x100xbf16>,
    %c0_57 = arith.constant 0 : index
    %c0_58 = arith.constant 0 : index
    %c0_59 = arith.constant 0 : index
    %c11_60 = arith.constant 11 : index
    %39 = vector.load %arg3[%c0_57, %c0_58, %c0_59, %c11_60] : memref<1x1x8x122xbf16, #tpu.memory_space<vmem>>, vector<1x1x8x100xbf16>
    %40 = vector.shape_cast %39 : vector<1x1x8x100xbf16> to vector<8x100xbf16>
    %c104 = arith.constant 104 : index
    %c0_61 = arith.constant 0 : index
    %41 = vector.load %arg8[%c104, %c0_61] : memref<216x100xbf16, #tpu.memory_space<vmem>>, vector<8x100xbf16>
    tpu.vector_store %arg8[%c104, %c0_61], %40 {strides = array<i32>} : memref<216x100xbf16, #tpu.memory_space<vmem>>, vector<8x100xbf16>,
    %c0_62 = arith.constant 0 : index
    %c0_63 = arith.constant 0 : index
    %c0_64 = arith.constant 0 : index
    %c12_65 = arith.constant 12 : index
    %42 = vector.load %arg3[%c0_62, %c0_63, %c0_64, %c12_65] : memref<1x1x8x122xbf16, #tpu.memory_space<vmem>>, vector<1x1x8x100xbf16>
    %43 = vector.shape_cast %42 : vector<1x1x8x100xbf16> to vector<8x100xbf16>
    %c112 = arith.constant 112 : index
    %c0_66 = arith.constant 0 : index
    %44 = vector.load %arg8[%c112, %c0_66] : memref<216x100xbf16, #tpu.memory_space<vmem>>, vector<8x100xbf16>
    tpu.vector_store %arg8[%c112, %c0_66], %43 {strides = array<i32>} : memref<216x100xbf16, #tpu.memory_space<vmem>>, vector<8x100xbf16>,
    %c0_67 = arith.constant 0 : index
    %c0_68 = arith.constant 0 : index
    %c0_69 = arith.constant 0 : index
    %c20_70 = arith.constant 20 : index
    %45 = vector.load %arg3[%c0_67, %c0_68, %c0_69, %c20_70] : memref<1x1x8x122xbf16, #tpu.memory_space<vmem>>, vector<1x1x8x100xbf16>
    %46 = vector.shape_cast %45 : vector<1x1x8x100xbf16> to vector<8x100xbf16>
    %c120 = arith.constant 120 : index
    %c0_71 = arith.constant 0 : index
    %47 = vector.load %arg8[%c120, %c0_71] : memref<216x100xbf16, #tpu.memory_space<vmem>>, vector<8x100xbf16>
    tpu.vector_store %arg8[%c120, %c0_71], %46 {strides = array<i32>} : memref<216x100xbf16, #tpu.memory_space<vmem>>, vector<8x100xbf16>,
    %c0_72 = arith.constant 0 : index
    %c0_73 = arith.constant 0 : index
    %c0_74 = arith.constant 0 : index
    %c21_75 = arith.constant 21 : index
    %48 = vector.load %arg3[%c0_72, %c0_73, %c0_74, %c21_75] : memref<1x1x8x122xbf16, #tpu.memory_space<vmem>>, vector<1x1x8x100xbf16>
    %49 = vector.shape_cast %48 : vector<1x1x8x100xbf16> to vector<8x100xbf16>
    %c128 = arith.constant 128 : index
    %c0_76 = arith.constant 0 : index
    %50 = vector.load %arg8[%c128, %c0_76] : memref<216x100xbf16, #tpu.memory_space<vmem>>, vector<8x100xbf16>
    tpu.vector_store %arg8[%c128, %c0_76], %49 {strides = array<i32>} : memref<216x100xbf16, #tpu.memory_space<vmem>>, vector<8x100xbf16>,
    %c0_77 = arith.constant 0 : index
    %c0_78 = arith.constant 0 : index
    %c0_79 = arith.constant 0 : index
    %c22_80 = arith.constant 22 : index
    %51 = vector.load %arg3[%c0_77, %c0_78, %c0_79, %c22_80] : memref<1x1x8x122xbf16, #tpu.memory_space<vmem>>, vector<1x1x8x100xbf16>
    %52 = vector.shape_cast %51 : vector<1x1x8x100xbf16> to vector<8x100xbf16>
    %c136 = arith.constant 136 : index
    %c0_81 = arith.constant 0 : index
    %53 = vector.load %arg8[%c136, %c0_81] : memref<216x100xbf16, #tpu.memory_space<vmem>>, vector<8x100xbf16>
    tpu.vector_store %arg8[%c136, %c0_81], %52 {strides = array<i32>} : memref<216x100xbf16, #tpu.memory_space<vmem>>, vector<8x100xbf16>,
    %c0_82 = arith.constant 0 : index
    %c0_83 = arith.constant 0 : index
    %c0_84 = arith.constant 0 : index
    %c0_85 = arith.constant 0 : index
    %54 = vector.load %arg4[%c0_82, %c0_83, %c0_84, %c0_85] : memref<1x1x8x122xbf16, #tpu.memory_space<vmem>>, vector<1x1x8x100xbf16>
    %55 = vector.shape_cast %54 : vector<1x1x8x100xbf16> to vector<8x100xbf16>
    %c144 = arith.constant 144 : index
    %c0_86 = arith.constant 0 : index
    %56 = vector.load %arg8[%c144, %c0_86] : memref<216x100xbf16, #tpu.memory_space<vmem>>, vector<8x100xbf16>
    tpu.vector_store %arg8[%c144, %c0_86], %55 {strides = array<i32>} : memref<216x100xbf16, #tpu.memory_space<vmem>>, vector<8x100xbf16>,
    %c0_87 = arith.constant 0 : index
    %c0_88 = arith.constant 0 : index
    %c0_89 = arith.constant 0 : index
    %c1_90 = arith.constant 1 : index
    %57 = vector.load %arg4[%c0_87, %c0_88, %c0_89, %c1_90] : memref<1x1x8x122xbf16, #tpu.memory_space<vmem>>, vector<1x1x8x100xbf16>
    %58 = vector.shape_cast %57 : vector<1x1x8x100xbf16> to vector<8x100xbf16>
    %c152 = arith.constant 152 : index
    %c0_91 = arith.constant 0 : index
    %59 = vector.load %arg8[%c152, %c0_91] : memref<216x100xbf16, #tpu.memory_space<vmem>>, vector<8x100xbf16>
    tpu.vector_store %arg8[%c152, %c0_91], %58 {strides = array<i32>} : memref<216x100xbf16, #tpu.memory_space<vmem>>, vector<8x100xbf16>,
    %c0_92 = arith.constant 0 : index
    %c0_93 = arith.constant 0 : index
    %c0_94 = arith.constant 0 : index
    %c2_95 = arith.constant 2 : index
    %60 = vector.load %arg4[%c0_92, %c0_93, %c0_94, %c2_95] : memref<1x1x8x122xbf16, #tpu.memory_space<vmem>>, vector<1x1x8x100xbf16>
    %61 = vector.shape_cast %60 : vector<1x1x8x100xbf16> to vector<8x100xbf16>
    %c160 = arith.constant 160 : index
    %c0_96 = arith.constant 0 : index
    %62 = vector.load %arg8[%c160, %c0_96] : memref<216x100xbf16, #tpu.memory_space<vmem>>, vector<8x100xbf16>
    tpu.vector_store %arg8[%c160, %c0_96], %61 {strides = array<i32>} : memref<216x100xbf16, #tpu.memory_space<vmem>>, vector<8x100xbf16>,
    %c0_97 = arith.constant 0 : index
    %c0_98 = arith.constant 0 : index
    %c0_99 = arith.constant 0 : index
    %c10_100 = arith.constant 10 : index
    %63 = vector.load %arg4[%c0_97, %c0_98, %c0_99, %c10_100] : memref<1x1x8x122xbf16, #tpu.memory_space<vmem>>, vector<1x1x8x100xbf16>
    %64 = vector.shape_cast %63 : vector<1x1x8x100xbf16> to vector<8x100xbf16>
    %c168 = arith.constant 168 : index
    %c0_101 = arith.constant 0 : index
    %65 = vector.load %arg8[%c168, %c0_101] : memref<216x100xbf16, #tpu.memory_space<vmem>>, vector<8x100xbf16>
    tpu.vector_store %arg8[%c168, %c0_101], %64 {strides = array<i32>} : memref<216x100xbf16, #tpu.memory_space<vmem>>, vector<8x100xbf16>,
    %c0_102 = arith.constant 0 : index
    %c0_103 = arith.constant 0 : index
    %c0_104 = arith.constant 0 : index
    %c11_105 = arith.constant 11 : index
    %66 = vector.load %arg4[%c0_102, %c0_103, %c0_104, %c11_105] : memref<1x1x8x122xbf16, #tpu.memory_space<vmem>>, vector<1x1x8x100xbf16>
    %67 = vector.shape_cast %66 : vector<1x1x8x100xbf16> to vector<8x100xbf16>
    %c176 = arith.constant 176 : index
    %c0_106 = arith.constant 0 : index
    %68 = vector.load %arg8[%c176, %c0_106] : memref<216x100xbf16, #tpu.memory_space<vmem>>, vector<8x100xbf16>
    tpu.vector_store %arg8[%c176, %c0_106], %67 {strides = array<i32>} : memref<216x100xbf16, #tpu.memory_space<vmem>>, vector<8x100xbf16>,
    %c0_107 = arith.constant 0 : index
    %c0_108 = arith.constant 0 : index
    %c0_109 = arith.constant 0 : index
    %c12_110 = arith.constant 12 : index
    %69 = vector.load %arg4[%c0_107, %c0_108, %c0_109, %c12_110] : memref<1x1x8x122xbf16, #tpu.memory_space<vmem>>, vector<1x1x8x100xbf16>
    %70 = vector.shape_cast %69 : vector<1x1x8x100xbf16> to vector<8x100xbf16>
    %c184 = arith.constant 184 : index
    %c0_111 = arith.constant 0 : index
    %71 = vector.load %arg8[%c184, %c0_111] : memref<216x100xbf16, #tpu.memory_space<vmem>>, vector<8x100xbf16>
    tpu.vector_store %arg8[%c184, %c0_111], %70 {strides = array<i32>} : memref<216x100xbf16, #tpu.memory_space<vmem>>, vector<8x100xbf16>,
    %c0_112 = arith.constant 0 : index
    %c0_113 = arith.constant 0 : index
    %c0_114 = arith.constant 0 : index
    %c20_115 = arith.constant 20 : index
    %72 = vector.load %arg4[%c0_112, %c0_113, %c0_114, %c20_115] : memref<1x1x8x122xbf16, #tpu.memory_space<vmem>>, vector<1x1x8x100xbf16>
    %73 = vector.shape_cast %72 : vector<1x1x8x100xbf16> to vector<8x100xbf16>
    %c192 = arith.constant 192 : index
    %c0_116 = arith.constant 0 : index
    %74 = vector.load %arg8[%c192, %c0_116] : memref<216x100xbf16, #tpu.memory_space<vmem>>, vector<8x100xbf16>
    tpu.vector_store %arg8[%c192, %c0_116], %73 {strides = array<i32>} : memref<216x100xbf16, #tpu.memory_space<vmem>>, vector<8x100xbf16>,
    %c0_117 = arith.constant 0 : index
    %c0_118 = arith.constant 0 : index
    %c0_119 = arith.constant 0 : index
    %c21_120 = arith.constant 21 : index
    %75 = vector.load %arg4[%c0_117, %c0_118, %c0_119, %c21_120] : memref<1x1x8x122xbf16, #tpu.memory_space<vmem>>, vector<1x1x8x100xbf16>
    %76 = vector.shape_cast %75 : vector<1x1x8x100xbf16> to vector<8x100xbf16>
    %c200 = arith.constant 200 : index
    %c0_121 = arith.constant 0 : index
    %77 = vector.load %arg8[%c200, %c0_121] : memref<216x100xbf16, #tpu.memory_space<vmem>>, vector<8x100xbf16>
    tpu.vector_store %arg8[%c200, %c0_121], %76 {strides = array<i32>} : memref<216x100xbf16, #tpu.memory_space<vmem>>, vector<8x100xbf16>,
    %c0_122 = arith.constant 0 : index
    %c0_123 = arith.constant 0 : index
    %c0_124 = arith.constant 0 : index
    %c22_125 = arith.constant 22 : index
    %78 = vector.load %arg4[%c0_122, %c0_123, %c0_124, %c22_125] : memref<1x1x8x122xbf16, #tpu.memory_space<vmem>>, vector<1x1x8x100xbf16>
    %79 = vector.shape_cast %78 : vector<1x1x8x100xbf16> to vector<8x100xbf16>
    %c208 = arith.constant 208 : index
    %c0_126 = arith.constant 0 : index
    %80 = vector.load %arg8[%c208, %c0_126] : memref<216x100xbf16, #tpu.memory_space<vmem>>, vector<8x100xbf16>
    tpu.vector_store %arg8[%c208, %c0_126], %79 {strides = array<i32>} : memref<216x100xbf16, #tpu.memory_space<vmem>>, vector<8x100xbf16>,
    %c0_127 = arith.constant 0 : index
    %c0_128 = arith.constant 0 : index
    %81 = vector.load %arg5[%c0_127, %c0_128] : memref<64x216xbf16, #tpu.memory_space<vmem>>, vector<64x216xbf16>
    %c0_129 = arith.constant 0 : index
    %c0_130 = arith.constant 0 : index
    %82 = vector.load %arg8[%c0_129, %c0_130] : memref<216x100xbf16, #tpu.memory_space<vmem>>, vector<216x100xbf16>
    %cst = arith.constant dense<0.000000e+00> : vector<64x100xf32>
    %83 = tpu.matmul %81, %82, %cst {dimension_numbers = #tpu.dot_dimension_numbers<[1], [0], [0], [1], [0, 0, 1, 1], [], []>} : vector<64x216xbf16>, vector<216x100xbf16>, vector<64x100xf32> -> vector<64x100xf32>
    %84 = vector.extract_strided_slice %83 {offsets = [0, 0], sizes = [8, 100], strides = [1, 1]} : vector<64x100xf32> to vector<8x100xf32>
    %85 = vector.extract_strided_slice %83 {offsets = [8, 0], sizes = [8, 100], strides = [1, 1]} : vector<64x100xf32> to vector<8x100xf32>
    %86 = arith.maximumf %84, %85 : vector<8x100xf32>
    %87 = vector.extract_strided_slice %83 {offsets = [16, 0], sizes = [8, 100], strides = [1, 1]} : vector<64x100xf32> to vector<8x100xf32>
    %88 = arith.maximumf %86, %87 : vector<8x100xf32>
    %89 = vector.extract_strided_slice %83 {offsets = [24, 0], sizes = [8, 100], strides = [1, 1]} : vector<64x100xf32> to vector<8x100xf32>
    %90 = arith.maximumf %88, %89 : vector<8x100xf32>
    %91 = vector.extract_strided_slice %83 {offsets = [32, 0], sizes = [8, 100], strides = [1, 1]} : vector<64x100xf32> to vector<8x100xf32>
    %92 = arith.maximumf %90, %91 : vector<8x100xf32>
    %93 = vector.extract_strided_slice %83 {offsets = [40, 0], sizes = [8, 100], strides = [1, 1]} : vector<64x100xf32> to vector<8x100xf32>
    %94 = arith.maximumf %92, %93 : vector<8x100xf32>
    %95 = vector.extract_strided_slice %83 {offsets = [48, 0], sizes = [8, 100], strides = [1, 1]} : vector<64x100xf32> to vector<8x100xf32>
    %96 = arith.maximumf %94, %95 : vector<8x100xf32>
    %97 = vector.extract_strided_slice %83 {offsets = [56, 0], sizes = [8, 100], strides = [1, 1]} : vector<64x100xf32> to vector<8x100xf32>
    %98 = arith.maximumf %96, %97 : vector<8x100xf32>
    %c0_131 = arith.constant 0 : index
    %c0_132 = arith.constant 0 : index
    %99 = vector.load %arg6[%c0_131, %c0_132] : memref<8x1xf32, #tpu.memory_space<vmem>>, vector<8x1xf32>
    %100 = vector.broadcast %99 : vector<8x1xf32> to vector<8x100xf32>
    %101 = arith.addf %98, %100 : vector<8x100xf32>
    %cst_133 = arith.constant 0.000000e+00 : f32
    %102 = vector.broadcast %cst_133 : f32 to vector<8x100xf32>
    %103 = arith.maximumf %101, %102 : vector<8x100xf32>
    %104 = arith.truncf %103 : vector<8x100xf32> to vector<8x100xbf16>
    %c0_134 = arith.constant 0 : index
    %c0_135 = arith.constant 0 : index
    %c0_136 = arith.constant 0 : index
    %c0_137 = arith.constant 0 : index
    %105 = vector.load %arg7[%c0_134, %c0_135, %c0_136, %c0_137] : memref<1x1x8x100xbf16, #tpu.memory_space<vmem>>, vector<1x1x8x100xbf16>
    %106 = vector.shape_cast %105 : vector<1x1x8x100xbf16> to vector<8x100xbf16>
    %107 = vector.shape_cast %104 : vector<8x100xbf16> to vector<1x1x8x100xbf16>
    tpu.vector_store %arg7[%c0_134, %c0_135, %c0_136, %c0_137], %107 {strides = array<i32>} : memref<1x1x8x100xbf16, #tpu.memory_space<vmem>>, vector<1x1x8x100xbf16>,
    return
  }
  func.func @transform_0(%arg0: i32, %arg1: i32) -> (i32, i32, i32, i32) {
    %c0_i32 = arith.constant 0 : i32
    %c0_i32_0 = arith.constant 0 : i32
    %c0_i32_1 = arith.constant 0 : i32
    return %arg0, %arg1, %c0_i32, %c0_i32_0 : i32, i32, i32, i32
  }
  func.func @transform_1(%arg0: i32, %arg1: i32) -> (i32, i32, i32, i32) {
    %c1_i32 = arith.constant 1 : i32
    %0 = arith.addi %arg1, %c1_i32 : i32
    %c0_i32 = arith.constant 0 : i32
    %c0_i32_0 = arith.constant 0 : i32
    %c0_i32_1 = arith.constant 0 : i32
    return %arg0, %0, %c0_i32, %c0_i32_0 : i32, i32, i32, i32
  }
  func.func @transform_2(%arg0: i32, %arg1: i32) -> (i32, i32, i32, i32) {
    %c2_i32 = arith.constant 2 : i32
    %0 = arith.addi %arg1, %c2_i32 : i32
    %c0_i32 = arith.constant 0 : i32
    %c0_i32_0 = arith.constant 0 : i32
    %c0_i32_1 = arith.constant 0 : i32
    return %arg0, %0, %c0_i32, %c0_i32_0 : i32, i32, i32, i32
  }
  func.func @transform_3(%arg0: i32, %arg1: i32) -> (i32, i32) {
    %c0_i32 = arith.constant 0 : i32
    %c0_i32_0 = arith.constant 0 : i32
    %c0_i32_1 = arith.constant 0 : i32
    return %c0_i32, %c0_i32_0 : i32, i32
  }
  func.func @transform_4(%arg0: i32, %arg1: i32) -> (i32, i32) {
    %c0_i32 = arith.constant 0 : i32
    %c0_i32_0 = arith.constant 0 : i32
    %c0_i32_1 = arith.constant 0 : i32
    return %c0_i32, %c0_i32_0 : i32, i32
  }
  func.func @transform_5(%arg0: i32, %arg1: i32) -> (i32, i32, i32, i32) {
    %c0_i32 = arith.constant 0 : i32
    %c0_i32_0 = arith.constant 0 : i32
    %c0_i32_1 = arith.constant 0 : i32
    return %arg0, %arg1, %c0_i32, %c0_i32_0 : i32, i32, i32, i32
  }
}

module attributes {stable_mosaic.version = 11 : i64} {
  func.func @_conv_pool_relu_kernel(%arg0: i32, %arg1: i32, %arg2: memref<1x1x64x50xbf16, #tpu.memory_space<vmem>>, %arg3: memref<1x1x64x50xbf16, #tpu.memory_space<vmem>>, %arg4: memref<1x1x64x50xbf16, #tpu.memory_space<vmem>>, %arg5: memref<64x1728xbf16, #tpu.memory_space<vmem>>, %arg6: memref<8x1xf32, #tpu.memory_space<vmem>>, %arg7: memref<1x1x8x36xbf16, #tpu.memory_space<vmem>>, %arg8: memref<1728x36xbf16, #tpu.memory_space<vmem>>) attributes {dimension_semantics = [#tpu.dimension_semantics<parallel>, #tpu.dimension_semantics<parallel>], iteration_bounds = array<i64: 2, 4>, scalar_prefetch = 0 : i64, scratch_operands = 1 : i64, tpu.core_type = #tpu.core_type<tc>, window_params = [{transform_indices = @transform_0, window_bounds = array<i64: 1, 1, 64, 50>}, {transform_indices = @transform_1, window_bounds = array<i64: 1, 1, 64, 50>}, {transform_indices = @transform_2, window_bounds = array<i64: 1, 1, 64, 50>}, {pipeline_mode = #tpu.pipeline_mode<synchronous>, transform_indices = @transform_3, window_bounds = array<i64: 64, 1728>}, {pipeline_mode = #tpu.pipeline_mode<synchronous>, transform_indices = @transform_4, window_bounds = array<i64: 8, 1>}, {transform_indices = @transform_5, window_bounds = array<i64: 1, 1, 8, 36>}]} {
    %c0 = arith.constant 0 : index
    %c0_0 = arith.constant 0 : index
    %c0_1 = arith.constant 0 : index
    %c0_2 = arith.constant 0 : index
    %0 = vector.load %arg2[%c0, %c0_0, %c0_1, %c0_2] : memref<1x1x64x50xbf16, #tpu.memory_space<vmem>>, vector<1x1x64x36xbf16>
    %1 = vector.shape_cast %0 : vector<1x1x64x36xbf16> to vector<64x36xbf16>
    %c0_3 = arith.constant 0 : index
    %c0_4 = arith.constant 0 : index
    %2 = vector.load %arg8[%c0_3, %c0_4] : memref<1728x36xbf16, #tpu.memory_space<vmem>>, vector<64x36xbf16>
    tpu.vector_store %arg8[%c0_3, %c0_4], %1 {strides = array<i32>} : memref<1728x36xbf16, #tpu.memory_space<vmem>>, vector<64x36xbf16>,
    %c0_5 = arith.constant 0 : index
    %c0_6 = arith.constant 0 : index
    %c0_7 = arith.constant 0 : index
    %c1 = arith.constant 1 : index
    %3 = vector.load %arg2[%c0_5, %c0_6, %c0_7, %c1] : memref<1x1x64x50xbf16, #tpu.memory_space<vmem>>, vector<1x1x64x36xbf16>
    %4 = vector.shape_cast %3 : vector<1x1x64x36xbf16> to vector<64x36xbf16>
    %c64 = arith.constant 64 : index
    %c0_8 = arith.constant 0 : index
    %5 = vector.load %arg8[%c64, %c0_8] : memref<1728x36xbf16, #tpu.memory_space<vmem>>, vector<64x36xbf16>
    tpu.vector_store %arg8[%c64, %c0_8], %4 {strides = array<i32>} : memref<1728x36xbf16, #tpu.memory_space<vmem>>, vector<64x36xbf16>,
    %c0_9 = arith.constant 0 : index
    %c0_10 = arith.constant 0 : index
    %c0_11 = arith.constant 0 : index
    %c2 = arith.constant 2 : index
    %6 = vector.load %arg2[%c0_9, %c0_10, %c0_11, %c2] : memref<1x1x64x50xbf16, #tpu.memory_space<vmem>>, vector<1x1x64x36xbf16>
    %7 = vector.shape_cast %6 : vector<1x1x64x36xbf16> to vector<64x36xbf16>
    %c128 = arith.constant 128 : index
    %c0_12 = arith.constant 0 : index
    %8 = vector.load %arg8[%c128, %c0_12] : memref<1728x36xbf16, #tpu.memory_space<vmem>>, vector<64x36xbf16>
    tpu.vector_store %arg8[%c128, %c0_12], %7 {strides = array<i32>} : memref<1728x36xbf16, #tpu.memory_space<vmem>>, vector<64x36xbf16>,
    %c0_13 = arith.constant 0 : index
    %c0_14 = arith.constant 0 : index
    %c0_15 = arith.constant 0 : index
    %c6 = arith.constant 6 : index
    %9 = vector.load %arg2[%c0_13, %c0_14, %c0_15, %c6] : memref<1x1x64x50xbf16, #tpu.memory_space<vmem>>, vector<1x1x64x36xbf16>
    %10 = vector.shape_cast %9 : vector<1x1x64x36xbf16> to vector<64x36xbf16>
    %c192 = arith.constant 192 : index
    %c0_16 = arith.constant 0 : index
    %11 = vector.load %arg8[%c192, %c0_16] : memref<1728x36xbf16, #tpu.memory_space<vmem>>, vector<64x36xbf16>
    tpu.vector_store %arg8[%c192, %c0_16], %10 {strides = array<i32>} : memref<1728x36xbf16, #tpu.memory_space<vmem>>, vector<64x36xbf16>,
    %c0_17 = arith.constant 0 : index
    %c0_18 = arith.constant 0 : index
    %c0_19 = arith.constant 0 : index
    %c7 = arith.constant 7 : index
    %12 = vector.load %arg2[%c0_17, %c0_18, %c0_19, %c7] : memref<1x1x64x50xbf16, #tpu.memory_space<vmem>>, vector<1x1x64x36xbf16>
    %13 = vector.shape_cast %12 : vector<1x1x64x36xbf16> to vector<64x36xbf16>
    %c256 = arith.constant 256 : index
    %c0_20 = arith.constant 0 : index
    %14 = vector.load %arg8[%c256, %c0_20] : memref<1728x36xbf16, #tpu.memory_space<vmem>>, vector<64x36xbf16>
    tpu.vector_store %arg8[%c256, %c0_20], %13 {strides = array<i32>} : memref<1728x36xbf16, #tpu.memory_space<vmem>>, vector<64x36xbf16>,
    %c0_21 = arith.constant 0 : index
    %c0_22 = arith.constant 0 : index
    %c0_23 = arith.constant 0 : index
    %c8 = arith.constant 8 : index
    %15 = vector.load %arg2[%c0_21, %c0_22, %c0_23, %c8] : memref<1x1x64x50xbf16, #tpu.memory_space<vmem>>, vector<1x1x64x36xbf16>
    %16 = vector.shape_cast %15 : vector<1x1x64x36xbf16> to vector<64x36xbf16>
    %c320 = arith.constant 320 : index
    %c0_24 = arith.constant 0 : index
    %17 = vector.load %arg8[%c320, %c0_24] : memref<1728x36xbf16, #tpu.memory_space<vmem>>, vector<64x36xbf16>
    tpu.vector_store %arg8[%c320, %c0_24], %16 {strides = array<i32>} : memref<1728x36xbf16, #tpu.memory_space<vmem>>, vector<64x36xbf16>,
    %c0_25 = arith.constant 0 : index
    %c0_26 = arith.constant 0 : index
    %c0_27 = arith.constant 0 : index
    %c12 = arith.constant 12 : index
    %18 = vector.load %arg2[%c0_25, %c0_26, %c0_27, %c12] : memref<1x1x64x50xbf16, #tpu.memory_space<vmem>>, vector<1x1x64x36xbf16>
    %19 = vector.shape_cast %18 : vector<1x1x64x36xbf16> to vector<64x36xbf16>
    %c384 = arith.constant 384 : index
    %c0_28 = arith.constant 0 : index
    %20 = vector.load %arg8[%c384, %c0_28] : memref<1728x36xbf16, #tpu.memory_space<vmem>>, vector<64x36xbf16>
    tpu.vector_store %arg8[%c384, %c0_28], %19 {strides = array<i32>} : memref<1728x36xbf16, #tpu.memory_space<vmem>>, vector<64x36xbf16>,
    %c0_29 = arith.constant 0 : index
    %c0_30 = arith.constant 0 : index
    %c0_31 = arith.constant 0 : index
    %c13 = arith.constant 13 : index
    %21 = vector.load %arg2[%c0_29, %c0_30, %c0_31, %c13] : memref<1x1x64x50xbf16, #tpu.memory_space<vmem>>, vector<1x1x64x36xbf16>
    %22 = vector.shape_cast %21 : vector<1x1x64x36xbf16> to vector<64x36xbf16>
    %c448 = arith.constant 448 : index
    %c0_32 = arith.constant 0 : index
    %23 = vector.load %arg8[%c448, %c0_32] : memref<1728x36xbf16, #tpu.memory_space<vmem>>, vector<64x36xbf16>
    tpu.vector_store %arg8[%c448, %c0_32], %22 {strides = array<i32>} : memref<1728x36xbf16, #tpu.memory_space<vmem>>, vector<64x36xbf16>,
    %c0_33 = arith.constant 0 : index
    %c0_34 = arith.constant 0 : index
    %c0_35 = arith.constant 0 : index
    %c14 = arith.constant 14 : index
    %24 = vector.load %arg2[%c0_33, %c0_34, %c0_35, %c14] : memref<1x1x64x50xbf16, #tpu.memory_space<vmem>>, vector<1x1x64x36xbf16>
    %25 = vector.shape_cast %24 : vector<1x1x64x36xbf16> to vector<64x36xbf16>
    %c512 = arith.constant 512 : index
    %c0_36 = arith.constant 0 : index
    %26 = vector.load %arg8[%c512, %c0_36] : memref<1728x36xbf16, #tpu.memory_space<vmem>>, vector<64x36xbf16>
    tpu.vector_store %arg8[%c512, %c0_36], %25 {strides = array<i32>} : memref<1728x36xbf16, #tpu.memory_space<vmem>>, vector<64x36xbf16>,
    %c0_37 = arith.constant 0 : index
    %c0_38 = arith.constant 0 : index
    %c0_39 = arith.constant 0 : index
    %c0_40 = arith.constant 0 : index
    %27 = vector.load %arg3[%c0_37, %c0_38, %c0_39, %c0_40] : memref<1x1x64x50xbf16, #tpu.memory_space<vmem>>, vector<1x1x64x36xbf16>
    %28 = vector.shape_cast %27 : vector<1x1x64x36xbf16> to vector<64x36xbf16>
    %c576 = arith.constant 576 : index
    %c0_41 = arith.constant 0 : index
    %29 = vector.load %arg8[%c576, %c0_41] : memref<1728x36xbf16, #tpu.memory_space<vmem>>, vector<64x36xbf16>
    tpu.vector_store %arg8[%c576, %c0_41], %28 {strides = array<i32>} : memref<1728x36xbf16, #tpu.memory_space<vmem>>, vector<64x36xbf16>,
    %c0_42 = arith.constant 0 : index
    %c0_43 = arith.constant 0 : index
    %c0_44 = arith.constant 0 : index
    %c1_45 = arith.constant 1 : index
    %30 = vector.load %arg3[%c0_42, %c0_43, %c0_44, %c1_45] : memref<1x1x64x50xbf16, #tpu.memory_space<vmem>>, vector<1x1x64x36xbf16>
    %31 = vector.shape_cast %30 : vector<1x1x64x36xbf16> to vector<64x36xbf16>
    %c640 = arith.constant 640 : index
    %c0_46 = arith.constant 0 : index
    %32 = vector.load %arg8[%c640, %c0_46] : memref<1728x36xbf16, #tpu.memory_space<vmem>>, vector<64x36xbf16>
    tpu.vector_store %arg8[%c640, %c0_46], %31 {strides = array<i32>} : memref<1728x36xbf16, #tpu.memory_space<vmem>>, vector<64x36xbf16>,
    %c0_47 = arith.constant 0 : index
    %c0_48 = arith.constant 0 : index
    %c0_49 = arith.constant 0 : index
    %c2_50 = arith.constant 2 : index
    %33 = vector.load %arg3[%c0_47, %c0_48, %c0_49, %c2_50] : memref<1x1x64x50xbf16, #tpu.memory_space<vmem>>, vector<1x1x64x36xbf16>
    %34 = vector.shape_cast %33 : vector<1x1x64x36xbf16> to vector<64x36xbf16>
    %c704 = arith.constant 704 : index
    %c0_51 = arith.constant 0 : index
    %35 = vector.load %arg8[%c704, %c0_51] : memref<1728x36xbf16, #tpu.memory_space<vmem>>, vector<64x36xbf16>
    tpu.vector_store %arg8[%c704, %c0_51], %34 {strides = array<i32>} : memref<1728x36xbf16, #tpu.memory_space<vmem>>, vector<64x36xbf16>,
    %c0_52 = arith.constant 0 : index
    %c0_53 = arith.constant 0 : index
    %c0_54 = arith.constant 0 : index
    %c6_55 = arith.constant 6 : index
    %36 = vector.load %arg3[%c0_52, %c0_53, %c0_54, %c6_55] : memref<1x1x64x50xbf16, #tpu.memory_space<vmem>>, vector<1x1x64x36xbf16>
    %37 = vector.shape_cast %36 : vector<1x1x64x36xbf16> to vector<64x36xbf16>
    %c768 = arith.constant 768 : index
    %c0_56 = arith.constant 0 : index
    %38 = vector.load %arg8[%c768, %c0_56] : memref<1728x36xbf16, #tpu.memory_space<vmem>>, vector<64x36xbf16>
    tpu.vector_store %arg8[%c768, %c0_56], %37 {strides = array<i32>} : memref<1728x36xbf16, #tpu.memory_space<vmem>>, vector<64x36xbf16>,
    %c0_57 = arith.constant 0 : index
    %c0_58 = arith.constant 0 : index
    %c0_59 = arith.constant 0 : index
    %c7_60 = arith.constant 7 : index
    %39 = vector.load %arg3[%c0_57, %c0_58, %c0_59, %c7_60] : memref<1x1x64x50xbf16, #tpu.memory_space<vmem>>, vector<1x1x64x36xbf16>
    %40 = vector.shape_cast %39 : vector<1x1x64x36xbf16> to vector<64x36xbf16>
    %c832 = arith.constant 832 : index
    %c0_61 = arith.constant 0 : index
    %41 = vector.load %arg8[%c832, %c0_61] : memref<1728x36xbf16, #tpu.memory_space<vmem>>, vector<64x36xbf16>
    tpu.vector_store %arg8[%c832, %c0_61], %40 {strides = array<i32>} : memref<1728x36xbf16, #tpu.memory_space<vmem>>, vector<64x36xbf16>,
    %c0_62 = arith.constant 0 : index
    %c0_63 = arith.constant 0 : index
    %c0_64 = arith.constant 0 : index
    %c8_65 = arith.constant 8 : index
    %42 = vector.load %arg3[%c0_62, %c0_63, %c0_64, %c8_65] : memref<1x1x64x50xbf16, #tpu.memory_space<vmem>>, vector<1x1x64x36xbf16>
    %43 = vector.shape_cast %42 : vector<1x1x64x36xbf16> to vector<64x36xbf16>
    %c896 = arith.constant 896 : index
    %c0_66 = arith.constant 0 : index
    %44 = vector.load %arg8[%c896, %c0_66] : memref<1728x36xbf16, #tpu.memory_space<vmem>>, vector<64x36xbf16>
    tpu.vector_store %arg8[%c896, %c0_66], %43 {strides = array<i32>} : memref<1728x36xbf16, #tpu.memory_space<vmem>>, vector<64x36xbf16>,
    %c0_67 = arith.constant 0 : index
    %c0_68 = arith.constant 0 : index
    %c0_69 = arith.constant 0 : index
    %c12_70 = arith.constant 12 : index
    %45 = vector.load %arg3[%c0_67, %c0_68, %c0_69, %c12_70] : memref<1x1x64x50xbf16, #tpu.memory_space<vmem>>, vector<1x1x64x36xbf16>
    %46 = vector.shape_cast %45 : vector<1x1x64x36xbf16> to vector<64x36xbf16>
    %c960 = arith.constant 960 : index
    %c0_71 = arith.constant 0 : index
    %47 = vector.load %arg8[%c960, %c0_71] : memref<1728x36xbf16, #tpu.memory_space<vmem>>, vector<64x36xbf16>
    tpu.vector_store %arg8[%c960, %c0_71], %46 {strides = array<i32>} : memref<1728x36xbf16, #tpu.memory_space<vmem>>, vector<64x36xbf16>,
    %c0_72 = arith.constant 0 : index
    %c0_73 = arith.constant 0 : index
    %c0_74 = arith.constant 0 : index
    %c13_75 = arith.constant 13 : index
    %48 = vector.load %arg3[%c0_72, %c0_73, %c0_74, %c13_75] : memref<1x1x64x50xbf16, #tpu.memory_space<vmem>>, vector<1x1x64x36xbf16>
    %49 = vector.shape_cast %48 : vector<1x1x64x36xbf16> to vector<64x36xbf16>
    %c1024 = arith.constant 1024 : index
    %c0_76 = arith.constant 0 : index
    %50 = vector.load %arg8[%c1024, %c0_76] : memref<1728x36xbf16, #tpu.memory_space<vmem>>, vector<64x36xbf16>
    tpu.vector_store %arg8[%c1024, %c0_76], %49 {strides = array<i32>} : memref<1728x36xbf16, #tpu.memory_space<vmem>>, vector<64x36xbf16>,
    %c0_77 = arith.constant 0 : index
    %c0_78 = arith.constant 0 : index
    %c0_79 = arith.constant 0 : index
    %c14_80 = arith.constant 14 : index
    %51 = vector.load %arg3[%c0_77, %c0_78, %c0_79, %c14_80] : memref<1x1x64x50xbf16, #tpu.memory_space<vmem>>, vector<1x1x64x36xbf16>
    %52 = vector.shape_cast %51 : vector<1x1x64x36xbf16> to vector<64x36xbf16>
    %c1088 = arith.constant 1088 : index
    %c0_81 = arith.constant 0 : index
    %53 = vector.load %arg8[%c1088, %c0_81] : memref<1728x36xbf16, #tpu.memory_space<vmem>>, vector<64x36xbf16>
    tpu.vector_store %arg8[%c1088, %c0_81], %52 {strides = array<i32>} : memref<1728x36xbf16, #tpu.memory_space<vmem>>, vector<64x36xbf16>,
    %c0_82 = arith.constant 0 : index
    %c0_83 = arith.constant 0 : index
    %c0_84 = arith.constant 0 : index
    %c0_85 = arith.constant 0 : index
    %54 = vector.load %arg4[%c0_82, %c0_83, %c0_84, %c0_85] : memref<1x1x64x50xbf16, #tpu.memory_space<vmem>>, vector<1x1x64x36xbf16>
    %55 = vector.shape_cast %54 : vector<1x1x64x36xbf16> to vector<64x36xbf16>
    %c1152 = arith.constant 1152 : index
    %c0_86 = arith.constant 0 : index
    %56 = vector.load %arg8[%c1152, %c0_86] : memref<1728x36xbf16, #tpu.memory_space<vmem>>, vector<64x36xbf16>
    tpu.vector_store %arg8[%c1152, %c0_86], %55 {strides = array<i32>} : memref<1728x36xbf16, #tpu.memory_space<vmem>>, vector<64x36xbf16>,
    %c0_87 = arith.constant 0 : index
    %c0_88 = arith.constant 0 : index
    %c0_89 = arith.constant 0 : index
    %c1_90 = arith.constant 1 : index
    %57 = vector.load %arg4[%c0_87, %c0_88, %c0_89, %c1_90] : memref<1x1x64x50xbf16, #tpu.memory_space<vmem>>, vector<1x1x64x36xbf16>
    %58 = vector.shape_cast %57 : vector<1x1x64x36xbf16> to vector<64x36xbf16>
    %c1216 = arith.constant 1216 : index
    %c0_91 = arith.constant 0 : index
    %59 = vector.load %arg8[%c1216, %c0_91] : memref<1728x36xbf16, #tpu.memory_space<vmem>>, vector<64x36xbf16>
    tpu.vector_store %arg8[%c1216, %c0_91], %58 {strides = array<i32>} : memref<1728x36xbf16, #tpu.memory_space<vmem>>, vector<64x36xbf16>,
    %c0_92 = arith.constant 0 : index
    %c0_93 = arith.constant 0 : index
    %c0_94 = arith.constant 0 : index
    %c2_95 = arith.constant 2 : index
    %60 = vector.load %arg4[%c0_92, %c0_93, %c0_94, %c2_95] : memref<1x1x64x50xbf16, #tpu.memory_space<vmem>>, vector<1x1x64x36xbf16>
    %61 = vector.shape_cast %60 : vector<1x1x64x36xbf16> to vector<64x36xbf16>
    %c1280 = arith.constant 1280 : index
    %c0_96 = arith.constant 0 : index
    %62 = vector.load %arg8[%c1280, %c0_96] : memref<1728x36xbf16, #tpu.memory_space<vmem>>, vector<64x36xbf16>
    tpu.vector_store %arg8[%c1280, %c0_96], %61 {strides = array<i32>} : memref<1728x36xbf16, #tpu.memory_space<vmem>>, vector<64x36xbf16>,
    %c0_97 = arith.constant 0 : index
    %c0_98 = arith.constant 0 : index
    %c0_99 = arith.constant 0 : index
    %c6_100 = arith.constant 6 : index
    %63 = vector.load %arg4[%c0_97, %c0_98, %c0_99, %c6_100] : memref<1x1x64x50xbf16, #tpu.memory_space<vmem>>, vector<1x1x64x36xbf16>
    %64 = vector.shape_cast %63 : vector<1x1x64x36xbf16> to vector<64x36xbf16>
    %c1344 = arith.constant 1344 : index
    %c0_101 = arith.constant 0 : index
    %65 = vector.load %arg8[%c1344, %c0_101] : memref<1728x36xbf16, #tpu.memory_space<vmem>>, vector<64x36xbf16>
    tpu.vector_store %arg8[%c1344, %c0_101], %64 {strides = array<i32>} : memref<1728x36xbf16, #tpu.memory_space<vmem>>, vector<64x36xbf16>,
    %c0_102 = arith.constant 0 : index
    %c0_103 = arith.constant 0 : index
    %c0_104 = arith.constant 0 : index
    %c7_105 = arith.constant 7 : index
    %66 = vector.load %arg4[%c0_102, %c0_103, %c0_104, %c7_105] : memref<1x1x64x50xbf16, #tpu.memory_space<vmem>>, vector<1x1x64x36xbf16>
    %67 = vector.shape_cast %66 : vector<1x1x64x36xbf16> to vector<64x36xbf16>
    %c1408 = arith.constant 1408 : index
    %c0_106 = arith.constant 0 : index
    %68 = vector.load %arg8[%c1408, %c0_106] : memref<1728x36xbf16, #tpu.memory_space<vmem>>, vector<64x36xbf16>
    tpu.vector_store %arg8[%c1408, %c0_106], %67 {strides = array<i32>} : memref<1728x36xbf16, #tpu.memory_space<vmem>>, vector<64x36xbf16>,
    %c0_107 = arith.constant 0 : index
    %c0_108 = arith.constant 0 : index
    %c0_109 = arith.constant 0 : index
    %c8_110 = arith.constant 8 : index
    %69 = vector.load %arg4[%c0_107, %c0_108, %c0_109, %c8_110] : memref<1x1x64x50xbf16, #tpu.memory_space<vmem>>, vector<1x1x64x36xbf16>
    %70 = vector.shape_cast %69 : vector<1x1x64x36xbf16> to vector<64x36xbf16>
    %c1472 = arith.constant 1472 : index
    %c0_111 = arith.constant 0 : index
    %71 = vector.load %arg8[%c1472, %c0_111] : memref<1728x36xbf16, #tpu.memory_space<vmem>>, vector<64x36xbf16>
    tpu.vector_store %arg8[%c1472, %c0_111], %70 {strides = array<i32>} : memref<1728x36xbf16, #tpu.memory_space<vmem>>, vector<64x36xbf16>,
    %c0_112 = arith.constant 0 : index
    %c0_113 = arith.constant 0 : index
    %c0_114 = arith.constant 0 : index
    %c12_115 = arith.constant 12 : index
    %72 = vector.load %arg4[%c0_112, %c0_113, %c0_114, %c12_115] : memref<1x1x64x50xbf16, #tpu.memory_space<vmem>>, vector<1x1x64x36xbf16>
    %73 = vector.shape_cast %72 : vector<1x1x64x36xbf16> to vector<64x36xbf16>
    %c1536 = arith.constant 1536 : index
    %c0_116 = arith.constant 0 : index
    %74 = vector.load %arg8[%c1536, %c0_116] : memref<1728x36xbf16, #tpu.memory_space<vmem>>, vector<64x36xbf16>
    tpu.vector_store %arg8[%c1536, %c0_116], %73 {strides = array<i32>} : memref<1728x36xbf16, #tpu.memory_space<vmem>>, vector<64x36xbf16>,
    %c0_117 = arith.constant 0 : index
    %c0_118 = arith.constant 0 : index
    %c0_119 = arith.constant 0 : index
    %c13_120 = arith.constant 13 : index
    %75 = vector.load %arg4[%c0_117, %c0_118, %c0_119, %c13_120] : memref<1x1x64x50xbf16, #tpu.memory_space<vmem>>, vector<1x1x64x36xbf16>
    %76 = vector.shape_cast %75 : vector<1x1x64x36xbf16> to vector<64x36xbf16>
    %c1600 = arith.constant 1600 : index
    %c0_121 = arith.constant 0 : index
    %77 = vector.load %arg8[%c1600, %c0_121] : memref<1728x36xbf16, #tpu.memory_space<vmem>>, vector<64x36xbf16>
    tpu.vector_store %arg8[%c1600, %c0_121], %76 {strides = array<i32>} : memref<1728x36xbf16, #tpu.memory_space<vmem>>, vector<64x36xbf16>,
    %c0_122 = arith.constant 0 : index
    %c0_123 = arith.constant 0 : index
    %c0_124 = arith.constant 0 : index
    %c14_125 = arith.constant 14 : index
    %78 = vector.load %arg4[%c0_122, %c0_123, %c0_124, %c14_125] : memref<1x1x64x50xbf16, #tpu.memory_space<vmem>>, vector<1x1x64x36xbf16>
    %79 = vector.shape_cast %78 : vector<1x1x64x36xbf16> to vector<64x36xbf16>
    %c1664 = arith.constant 1664 : index
    %c0_126 = arith.constant 0 : index
    %80 = vector.load %arg8[%c1664, %c0_126] : memref<1728x36xbf16, #tpu.memory_space<vmem>>, vector<64x36xbf16>
    tpu.vector_store %arg8[%c1664, %c0_126], %79 {strides = array<i32>} : memref<1728x36xbf16, #tpu.memory_space<vmem>>, vector<64x36xbf16>,
    %c0_127 = arith.constant 0 : index
    %c0_128 = arith.constant 0 : index
    %81 = vector.load %arg5[%c0_127, %c0_128] : memref<64x1728xbf16, #tpu.memory_space<vmem>>, vector<64x1728xbf16>
    %c0_129 = arith.constant 0 : index
    %c0_130 = arith.constant 0 : index
    %82 = vector.load %arg8[%c0_129, %c0_130] : memref<1728x36xbf16, #tpu.memory_space<vmem>>, vector<1728x36xbf16>
    %cst = arith.constant dense<0.000000e+00> : vector<64x36xf32>
    %83 = tpu.matmul %81, %82, %cst {dimension_numbers = #tpu.dot_dimension_numbers<[1], [0], [0], [1], [0, 0, 1, 1], [], []>} : vector<64x1728xbf16>, vector<1728x36xbf16>, vector<64x36xf32> -> vector<64x36xf32>
    %84 = vector.extract_strided_slice %83 {offsets = [0, 0], sizes = [8, 36], strides = [1, 1]} : vector<64x36xf32> to vector<8x36xf32>
    %85 = vector.extract_strided_slice %83 {offsets = [8, 0], sizes = [8, 36], strides = [1, 1]} : vector<64x36xf32> to vector<8x36xf32>
    %86 = arith.maximumf %84, %85 : vector<8x36xf32>
    %87 = vector.extract_strided_slice %83 {offsets = [16, 0], sizes = [8, 36], strides = [1, 1]} : vector<64x36xf32> to vector<8x36xf32>
    %88 = arith.maximumf %86, %87 : vector<8x36xf32>
    %89 = vector.extract_strided_slice %83 {offsets = [24, 0], sizes = [8, 36], strides = [1, 1]} : vector<64x36xf32> to vector<8x36xf32>
    %90 = arith.maximumf %88, %89 : vector<8x36xf32>
    %91 = vector.extract_strided_slice %83 {offsets = [32, 0], sizes = [8, 36], strides = [1, 1]} : vector<64x36xf32> to vector<8x36xf32>
    %92 = arith.maximumf %90, %91 : vector<8x36xf32>
    %93 = vector.extract_strided_slice %83 {offsets = [40, 0], sizes = [8, 36], strides = [1, 1]} : vector<64x36xf32> to vector<8x36xf32>
    %94 = arith.maximumf %92, %93 : vector<8x36xf32>
    %95 = vector.extract_strided_slice %83 {offsets = [48, 0], sizes = [8, 36], strides = [1, 1]} : vector<64x36xf32> to vector<8x36xf32>
    %96 = arith.maximumf %94, %95 : vector<8x36xf32>
    %97 = vector.extract_strided_slice %83 {offsets = [56, 0], sizes = [8, 36], strides = [1, 1]} : vector<64x36xf32> to vector<8x36xf32>
    %98 = arith.maximumf %96, %97 : vector<8x36xf32>
    %c0_131 = arith.constant 0 : index
    %c0_132 = arith.constant 0 : index
    %99 = vector.load %arg6[%c0_131, %c0_132] : memref<8x1xf32, #tpu.memory_space<vmem>>, vector<8x1xf32>
    %100 = vector.broadcast %99 : vector<8x1xf32> to vector<8x36xf32>
    %101 = arith.addf %98, %100 : vector<8x36xf32>
    %cst_133 = arith.constant 0.000000e+00 : f32
    %102 = vector.broadcast %cst_133 : f32 to vector<8x36xf32>
    %103 = arith.maximumf %101, %102 : vector<8x36xf32>
    %104 = arith.truncf %103 : vector<8x36xf32> to vector<8x36xbf16>
    %c0_134 = arith.constant 0 : index
    %c0_135 = arith.constant 0 : index
    %c0_136 = arith.constant 0 : index
    %c0_137 = arith.constant 0 : index
    %105 = vector.load %arg7[%c0_134, %c0_135, %c0_136, %c0_137] : memref<1x1x8x36xbf16, #tpu.memory_space<vmem>>, vector<1x1x8x36xbf16>
    %106 = vector.shape_cast %105 : vector<1x1x8x36xbf16> to vector<8x36xbf16>
    %107 = vector.shape_cast %104 : vector<8x36xbf16> to vector<1x1x8x36xbf16>
    tpu.vector_store %arg7[%c0_134, %c0_135, %c0_136, %c0_137], %107 {strides = array<i32>} : memref<1x1x8x36xbf16, #tpu.memory_space<vmem>>, vector<1x1x8x36xbf16>,
    return
  }
  func.func @transform_0(%arg0: i32, %arg1: i32) -> (i32, i32, i32, i32) {
    %c0_i32 = arith.constant 0 : i32
    %c0_i32_0 = arith.constant 0 : i32
    %c0_i32_1 = arith.constant 0 : i32
    return %arg0, %arg1, %c0_i32, %c0_i32_0 : i32, i32, i32, i32
  }
  func.func @transform_1(%arg0: i32, %arg1: i32) -> (i32, i32, i32, i32) {
    %c1_i32 = arith.constant 1 : i32
    %0 = arith.addi %arg1, %c1_i32 : i32
    %c0_i32 = arith.constant 0 : i32
    %c0_i32_0 = arith.constant 0 : i32
    %c0_i32_1 = arith.constant 0 : i32
    return %arg0, %0, %c0_i32, %c0_i32_0 : i32, i32, i32, i32
  }
  func.func @transform_2(%arg0: i32, %arg1: i32) -> (i32, i32, i32, i32) {
    %c2_i32 = arith.constant 2 : i32
    %0 = arith.addi %arg1, %c2_i32 : i32
    %c0_i32 = arith.constant 0 : i32
    %c0_i32_0 = arith.constant 0 : i32
    %c0_i32_1 = arith.constant 0 : i32
    return %arg0, %0, %c0_i32, %c0_i32_0 : i32, i32, i32, i32
  }
  func.func @transform_3(%arg0: i32, %arg1: i32) -> (i32, i32) {
    %c0_i32 = arith.constant 0 : i32
    %c0_i32_0 = arith.constant 0 : i32
    %c0_i32_1 = arith.constant 0 : i32
    return %c0_i32, %c0_i32_0 : i32, i32
  }
  func.func @transform_4(%arg0: i32, %arg1: i32) -> (i32, i32) {
    %c0_i32 = arith.constant 0 : i32
    %c0_i32_0 = arith.constant 0 : i32
    %c0_i32_1 = arith.constant 0 : i32
    return %c0_i32, %c0_i32_0 : i32, i32
  }
  func.func @transform_5(%arg0: i32, %arg1: i32) -> (i32, i32, i32, i32) {
    %c0_i32 = arith.constant 0 : i32
    %c0_i32_0 = arith.constant 0 : i32
    %c0_i32_1 = arith.constant 0 : i32
    return %arg0, %arg1, %c0_i32, %c0_i32_0 : i32, i32, i32, i32
  }
}

module attributes {stable_mosaic.version = 11 : i64} {
  func.func @_conv_pool_relu_kernel(%arg0: i32, %arg1: i32, %arg2: memref<1x1x64x26xbf16, #tpu.memory_space<vmem>>, %arg3: memref<1x1x64x26xbf16, #tpu.memory_space<vmem>>, %arg4: memref<1x1x64x26xbf16, #tpu.memory_space<vmem>>, %arg5: memref<64x1728xbf16, #tpu.memory_space<vmem>>, %arg6: memref<8x1xf32, #tpu.memory_space<vmem>>, %arg7: memref<1x1x8x16xbf16, #tpu.memory_space<vmem>>, %arg8: memref<1728x16xbf16, #tpu.memory_space<vmem>>) attributes {dimension_semantics = [#tpu.dimension_semantics<parallel>, #tpu.dimension_semantics<parallel>], iteration_bounds = array<i64: 2, 2>, scalar_prefetch = 0 : i64, scratch_operands = 1 : i64, tpu.core_type = #tpu.core_type<tc>, window_params = [{transform_indices = @transform_0, window_bounds = array<i64: 1, 1, 64, 26>}, {transform_indices = @transform_1, window_bounds = array<i64: 1, 1, 64, 26>}, {transform_indices = @transform_2, window_bounds = array<i64: 1, 1, 64, 26>}, {pipeline_mode = #tpu.pipeline_mode<synchronous>, transform_indices = @transform_3, window_bounds = array<i64: 64, 1728>}, {pipeline_mode = #tpu.pipeline_mode<synchronous>, transform_indices = @transform_4, window_bounds = array<i64: 8, 1>}, {transform_indices = @transform_5, window_bounds = array<i64: 1, 1, 8, 16>}]} {
    %c0 = arith.constant 0 : index
    %c0_0 = arith.constant 0 : index
    %c0_1 = arith.constant 0 : index
    %c0_2 = arith.constant 0 : index
    %0 = vector.load %arg2[%c0, %c0_0, %c0_1, %c0_2] : memref<1x1x64x26xbf16, #tpu.memory_space<vmem>>, vector<1x1x64x16xbf16>
    %1 = vector.shape_cast %0 : vector<1x1x64x16xbf16> to vector<64x16xbf16>
    %c0_3 = arith.constant 0 : index
    %c0_4 = arith.constant 0 : index
    %2 = vector.load %arg8[%c0_3, %c0_4] : memref<1728x16xbf16, #tpu.memory_space<vmem>>, vector<64x16xbf16>
    tpu.vector_store %arg8[%c0_3, %c0_4], %1 {strides = array<i32>} : memref<1728x16xbf16, #tpu.memory_space<vmem>>, vector<64x16xbf16>,
    %c0_5 = arith.constant 0 : index
    %c0_6 = arith.constant 0 : index
    %c0_7 = arith.constant 0 : index
    %c1 = arith.constant 1 : index
    %3 = vector.load %arg2[%c0_5, %c0_6, %c0_7, %c1] : memref<1x1x64x26xbf16, #tpu.memory_space<vmem>>, vector<1x1x64x16xbf16>
    %4 = vector.shape_cast %3 : vector<1x1x64x16xbf16> to vector<64x16xbf16>
    %c64 = arith.constant 64 : index
    %c0_8 = arith.constant 0 : index
    %5 = vector.load %arg8[%c64, %c0_8] : memref<1728x16xbf16, #tpu.memory_space<vmem>>, vector<64x16xbf16>
    tpu.vector_store %arg8[%c64, %c0_8], %4 {strides = array<i32>} : memref<1728x16xbf16, #tpu.memory_space<vmem>>, vector<64x16xbf16>,
    %c0_9 = arith.constant 0 : index
    %c0_10 = arith.constant 0 : index
    %c0_11 = arith.constant 0 : index
    %c2 = arith.constant 2 : index
    %6 = vector.load %arg2[%c0_9, %c0_10, %c0_11, %c2] : memref<1x1x64x26xbf16, #tpu.memory_space<vmem>>, vector<1x1x64x16xbf16>
    %7 = vector.shape_cast %6 : vector<1x1x64x16xbf16> to vector<64x16xbf16>
    %c128 = arith.constant 128 : index
    %c0_12 = arith.constant 0 : index
    %8 = vector.load %arg8[%c128, %c0_12] : memref<1728x16xbf16, #tpu.memory_space<vmem>>, vector<64x16xbf16>
    tpu.vector_store %arg8[%c128, %c0_12], %7 {strides = array<i32>} : memref<1728x16xbf16, #tpu.memory_space<vmem>>, vector<64x16xbf16>,
    %c0_13 = arith.constant 0 : index
    %c0_14 = arith.constant 0 : index
    %c0_15 = arith.constant 0 : index
    %c4 = arith.constant 4 : index
    %9 = vector.load %arg2[%c0_13, %c0_14, %c0_15, %c4] : memref<1x1x64x26xbf16, #tpu.memory_space<vmem>>, vector<1x1x64x16xbf16>
    %10 = vector.shape_cast %9 : vector<1x1x64x16xbf16> to vector<64x16xbf16>
    %c192 = arith.constant 192 : index
    %c0_16 = arith.constant 0 : index
    %11 = vector.load %arg8[%c192, %c0_16] : memref<1728x16xbf16, #tpu.memory_space<vmem>>, vector<64x16xbf16>
    tpu.vector_store %arg8[%c192, %c0_16], %10 {strides = array<i32>} : memref<1728x16xbf16, #tpu.memory_space<vmem>>, vector<64x16xbf16>,
    %c0_17 = arith.constant 0 : index
    %c0_18 = arith.constant 0 : index
    %c0_19 = arith.constant 0 : index
    %c5 = arith.constant 5 : index
    %12 = vector.load %arg2[%c0_17, %c0_18, %c0_19, %c5] : memref<1x1x64x26xbf16, #tpu.memory_space<vmem>>, vector<1x1x64x16xbf16>
    %13 = vector.shape_cast %12 : vector<1x1x64x16xbf16> to vector<64x16xbf16>
    %c256 = arith.constant 256 : index
    %c0_20 = arith.constant 0 : index
    %14 = vector.load %arg8[%c256, %c0_20] : memref<1728x16xbf16, #tpu.memory_space<vmem>>, vector<64x16xbf16>
    tpu.vector_store %arg8[%c256, %c0_20], %13 {strides = array<i32>} : memref<1728x16xbf16, #tpu.memory_space<vmem>>, vector<64x16xbf16>,
    %c0_21 = arith.constant 0 : index
    %c0_22 = arith.constant 0 : index
    %c0_23 = arith.constant 0 : index
    %c6 = arith.constant 6 : index
    %15 = vector.load %arg2[%c0_21, %c0_22, %c0_23, %c6] : memref<1x1x64x26xbf16, #tpu.memory_space<vmem>>, vector<1x1x64x16xbf16>
    %16 = vector.shape_cast %15 : vector<1x1x64x16xbf16> to vector<64x16xbf16>
    %c320 = arith.constant 320 : index
    %c0_24 = arith.constant 0 : index
    %17 = vector.load %arg8[%c320, %c0_24] : memref<1728x16xbf16, #tpu.memory_space<vmem>>, vector<64x16xbf16>
    tpu.vector_store %arg8[%c320, %c0_24], %16 {strides = array<i32>} : memref<1728x16xbf16, #tpu.memory_space<vmem>>, vector<64x16xbf16>,
    %c0_25 = arith.constant 0 : index
    %c0_26 = arith.constant 0 : index
    %c0_27 = arith.constant 0 : index
    %c8 = arith.constant 8 : index
    %18 = vector.load %arg2[%c0_25, %c0_26, %c0_27, %c8] : memref<1x1x64x26xbf16, #tpu.memory_space<vmem>>, vector<1x1x64x16xbf16>
    %19 = vector.shape_cast %18 : vector<1x1x64x16xbf16> to vector<64x16xbf16>
    %c384 = arith.constant 384 : index
    %c0_28 = arith.constant 0 : index
    %20 = vector.load %arg8[%c384, %c0_28] : memref<1728x16xbf16, #tpu.memory_space<vmem>>, vector<64x16xbf16>
    tpu.vector_store %arg8[%c384, %c0_28], %19 {strides = array<i32>} : memref<1728x16xbf16, #tpu.memory_space<vmem>>, vector<64x16xbf16>,
    %c0_29 = arith.constant 0 : index
    %c0_30 = arith.constant 0 : index
    %c0_31 = arith.constant 0 : index
    %c9 = arith.constant 9 : index
    %21 = vector.load %arg2[%c0_29, %c0_30, %c0_31, %c9] : memref<1x1x64x26xbf16, #tpu.memory_space<vmem>>, vector<1x1x64x16xbf16>
    %22 = vector.shape_cast %21 : vector<1x1x64x16xbf16> to vector<64x16xbf16>
    %c448 = arith.constant 448 : index
    %c0_32 = arith.constant 0 : index
    %23 = vector.load %arg8[%c448, %c0_32] : memref<1728x16xbf16, #tpu.memory_space<vmem>>, vector<64x16xbf16>
    tpu.vector_store %arg8[%c448, %c0_32], %22 {strides = array<i32>} : memref<1728x16xbf16, #tpu.memory_space<vmem>>, vector<64x16xbf16>,
    %c0_33 = arith.constant 0 : index
    %c0_34 = arith.constant 0 : index
    %c0_35 = arith.constant 0 : index
    %c10 = arith.constant 10 : index
    %24 = vector.load %arg2[%c0_33, %c0_34, %c0_35, %c10] : memref<1x1x64x26xbf16, #tpu.memory_space<vmem>>, vector<1x1x64x16xbf16>
    %25 = vector.shape_cast %24 : vector<1x1x64x16xbf16> to vector<64x16xbf16>
    %c512 = arith.constant 512 : index
    %c0_36 = arith.constant 0 : index
    %26 = vector.load %arg8[%c512, %c0_36] : memref<1728x16xbf16, #tpu.memory_space<vmem>>, vector<64x16xbf16>
    tpu.vector_store %arg8[%c512, %c0_36], %25 {strides = array<i32>} : memref<1728x16xbf16, #tpu.memory_space<vmem>>, vector<64x16xbf16>,
    %c0_37 = arith.constant 0 : index
    %c0_38 = arith.constant 0 : index
    %c0_39 = arith.constant 0 : index
    %c0_40 = arith.constant 0 : index
    %27 = vector.load %arg3[%c0_37, %c0_38, %c0_39, %c0_40] : memref<1x1x64x26xbf16, #tpu.memory_space<vmem>>, vector<1x1x64x16xbf16>
    %28 = vector.shape_cast %27 : vector<1x1x64x16xbf16> to vector<64x16xbf16>
    %c576 = arith.constant 576 : index
    %c0_41 = arith.constant 0 : index
    %29 = vector.load %arg8[%c576, %c0_41] : memref<1728x16xbf16, #tpu.memory_space<vmem>>, vector<64x16xbf16>
    tpu.vector_store %arg8[%c576, %c0_41], %28 {strides = array<i32>} : memref<1728x16xbf16, #tpu.memory_space<vmem>>, vector<64x16xbf16>,
    %c0_42 = arith.constant 0 : index
    %c0_43 = arith.constant 0 : index
    %c0_44 = arith.constant 0 : index
    %c1_45 = arith.constant 1 : index
    %30 = vector.load %arg3[%c0_42, %c0_43, %c0_44, %c1_45] : memref<1x1x64x26xbf16, #tpu.memory_space<vmem>>, vector<1x1x64x16xbf16>
    %31 = vector.shape_cast %30 : vector<1x1x64x16xbf16> to vector<64x16xbf16>
    %c640 = arith.constant 640 : index
    %c0_46 = arith.constant 0 : index
    %32 = vector.load %arg8[%c640, %c0_46] : memref<1728x16xbf16, #tpu.memory_space<vmem>>, vector<64x16xbf16>
    tpu.vector_store %arg8[%c640, %c0_46], %31 {strides = array<i32>} : memref<1728x16xbf16, #tpu.memory_space<vmem>>, vector<64x16xbf16>,
    %c0_47 = arith.constant 0 : index
    %c0_48 = arith.constant 0 : index
    %c0_49 = arith.constant 0 : index
    %c2_50 = arith.constant 2 : index
    %33 = vector.load %arg3[%c0_47, %c0_48, %c0_49, %c2_50] : memref<1x1x64x26xbf16, #tpu.memory_space<vmem>>, vector<1x1x64x16xbf16>
    %34 = vector.shape_cast %33 : vector<1x1x64x16xbf16> to vector<64x16xbf16>
    %c704 = arith.constant 704 : index
    %c0_51 = arith.constant 0 : index
    %35 = vector.load %arg8[%c704, %c0_51] : memref<1728x16xbf16, #tpu.memory_space<vmem>>, vector<64x16xbf16>
    tpu.vector_store %arg8[%c704, %c0_51], %34 {strides = array<i32>} : memref<1728x16xbf16, #tpu.memory_space<vmem>>, vector<64x16xbf16>,
    %c0_52 = arith.constant 0 : index
    %c0_53 = arith.constant 0 : index
    %c0_54 = arith.constant 0 : index
    %c4_55 = arith.constant 4 : index
    %36 = vector.load %arg3[%c0_52, %c0_53, %c0_54, %c4_55] : memref<1x1x64x26xbf16, #tpu.memory_space<vmem>>, vector<1x1x64x16xbf16>
    %37 = vector.shape_cast %36 : vector<1x1x64x16xbf16> to vector<64x16xbf16>
    %c768 = arith.constant 768 : index
    %c0_56 = arith.constant 0 : index
    %38 = vector.load %arg8[%c768, %c0_56] : memref<1728x16xbf16, #tpu.memory_space<vmem>>, vector<64x16xbf16>
    tpu.vector_store %arg8[%c768, %c0_56], %37 {strides = array<i32>} : memref<1728x16xbf16, #tpu.memory_space<vmem>>, vector<64x16xbf16>,
    %c0_57 = arith.constant 0 : index
    %c0_58 = arith.constant 0 : index
    %c0_59 = arith.constant 0 : index
    %c5_60 = arith.constant 5 : index
    %39 = vector.load %arg3[%c0_57, %c0_58, %c0_59, %c5_60] : memref<1x1x64x26xbf16, #tpu.memory_space<vmem>>, vector<1x1x64x16xbf16>
    %40 = vector.shape_cast %39 : vector<1x1x64x16xbf16> to vector<64x16xbf16>
    %c832 = arith.constant 832 : index
    %c0_61 = arith.constant 0 : index
    %41 = vector.load %arg8[%c832, %c0_61] : memref<1728x16xbf16, #tpu.memory_space<vmem>>, vector<64x16xbf16>
    tpu.vector_store %arg8[%c832, %c0_61], %40 {strides = array<i32>} : memref<1728x16xbf16, #tpu.memory_space<vmem>>, vector<64x16xbf16>,
    %c0_62 = arith.constant 0 : index
    %c0_63 = arith.constant 0 : index
    %c0_64 = arith.constant 0 : index
    %c6_65 = arith.constant 6 : index
    %42 = vector.load %arg3[%c0_62, %c0_63, %c0_64, %c6_65] : memref<1x1x64x26xbf16, #tpu.memory_space<vmem>>, vector<1x1x64x16xbf16>
    %43 = vector.shape_cast %42 : vector<1x1x64x16xbf16> to vector<64x16xbf16>
    %c896 = arith.constant 896 : index
    %c0_66 = arith.constant 0 : index
    %44 = vector.load %arg8[%c896, %c0_66] : memref<1728x16xbf16, #tpu.memory_space<vmem>>, vector<64x16xbf16>
    tpu.vector_store %arg8[%c896, %c0_66], %43 {strides = array<i32>} : memref<1728x16xbf16, #tpu.memory_space<vmem>>, vector<64x16xbf16>,
    %c0_67 = arith.constant 0 : index
    %c0_68 = arith.constant 0 : index
    %c0_69 = arith.constant 0 : index
    %c8_70 = arith.constant 8 : index
    %45 = vector.load %arg3[%c0_67, %c0_68, %c0_69, %c8_70] : memref<1x1x64x26xbf16, #tpu.memory_space<vmem>>, vector<1x1x64x16xbf16>
    %46 = vector.shape_cast %45 : vector<1x1x64x16xbf16> to vector<64x16xbf16>
    %c960 = arith.constant 960 : index
    %c0_71 = arith.constant 0 : index
    %47 = vector.load %arg8[%c960, %c0_71] : memref<1728x16xbf16, #tpu.memory_space<vmem>>, vector<64x16xbf16>
    tpu.vector_store %arg8[%c960, %c0_71], %46 {strides = array<i32>} : memref<1728x16xbf16, #tpu.memory_space<vmem>>, vector<64x16xbf16>,
    %c0_72 = arith.constant 0 : index
    %c0_73 = arith.constant 0 : index
    %c0_74 = arith.constant 0 : index
    %c9_75 = arith.constant 9 : index
    %48 = vector.load %arg3[%c0_72, %c0_73, %c0_74, %c9_75] : memref<1x1x64x26xbf16, #tpu.memory_space<vmem>>, vector<1x1x64x16xbf16>
    %49 = vector.shape_cast %48 : vector<1x1x64x16xbf16> to vector<64x16xbf16>
    %c1024 = arith.constant 1024 : index
    %c0_76 = arith.constant 0 : index
    %50 = vector.load %arg8[%c1024, %c0_76] : memref<1728x16xbf16, #tpu.memory_space<vmem>>, vector<64x16xbf16>
    tpu.vector_store %arg8[%c1024, %c0_76], %49 {strides = array<i32>} : memref<1728x16xbf16, #tpu.memory_space<vmem>>, vector<64x16xbf16>,
    %c0_77 = arith.constant 0 : index
    %c0_78 = arith.constant 0 : index
    %c0_79 = arith.constant 0 : index
    %c10_80 = arith.constant 10 : index
    %51 = vector.load %arg3[%c0_77, %c0_78, %c0_79, %c10_80] : memref<1x1x64x26xbf16, #tpu.memory_space<vmem>>, vector<1x1x64x16xbf16>
    %52 = vector.shape_cast %51 : vector<1x1x64x16xbf16> to vector<64x16xbf16>
    %c1088 = arith.constant 1088 : index
    %c0_81 = arith.constant 0 : index
    %53 = vector.load %arg8[%c1088, %c0_81] : memref<1728x16xbf16, #tpu.memory_space<vmem>>, vector<64x16xbf16>
    tpu.vector_store %arg8[%c1088, %c0_81], %52 {strides = array<i32>} : memref<1728x16xbf16, #tpu.memory_space<vmem>>, vector<64x16xbf16>,
    %c0_82 = arith.constant 0 : index
    %c0_83 = arith.constant 0 : index
    %c0_84 = arith.constant 0 : index
    %c0_85 = arith.constant 0 : index
    %54 = vector.load %arg4[%c0_82, %c0_83, %c0_84, %c0_85] : memref<1x1x64x26xbf16, #tpu.memory_space<vmem>>, vector<1x1x64x16xbf16>
    %55 = vector.shape_cast %54 : vector<1x1x64x16xbf16> to vector<64x16xbf16>
    %c1152 = arith.constant 1152 : index
    %c0_86 = arith.constant 0 : index
    %56 = vector.load %arg8[%c1152, %c0_86] : memref<1728x16xbf16, #tpu.memory_space<vmem>>, vector<64x16xbf16>
    tpu.vector_store %arg8[%c1152, %c0_86], %55 {strides = array<i32>} : memref<1728x16xbf16, #tpu.memory_space<vmem>>, vector<64x16xbf16>,
    %c0_87 = arith.constant 0 : index
    %c0_88 = arith.constant 0 : index
    %c0_89 = arith.constant 0 : index
    %c1_90 = arith.constant 1 : index
    %57 = vector.load %arg4[%c0_87, %c0_88, %c0_89, %c1_90] : memref<1x1x64x26xbf16, #tpu.memory_space<vmem>>, vector<1x1x64x16xbf16>
    %58 = vector.shape_cast %57 : vector<1x1x64x16xbf16> to vector<64x16xbf16>
    %c1216 = arith.constant 1216 : index
    %c0_91 = arith.constant 0 : index
    %59 = vector.load %arg8[%c1216, %c0_91] : memref<1728x16xbf16, #tpu.memory_space<vmem>>, vector<64x16xbf16>
    tpu.vector_store %arg8[%c1216, %c0_91], %58 {strides = array<i32>} : memref<1728x16xbf16, #tpu.memory_space<vmem>>, vector<64x16xbf16>,
    %c0_92 = arith.constant 0 : index
    %c0_93 = arith.constant 0 : index
    %c0_94 = arith.constant 0 : index
    %c2_95 = arith.constant 2 : index
    %60 = vector.load %arg4[%c0_92, %c0_93, %c0_94, %c2_95] : memref<1x1x64x26xbf16, #tpu.memory_space<vmem>>, vector<1x1x64x16xbf16>
    %61 = vector.shape_cast %60 : vector<1x1x64x16xbf16> to vector<64x16xbf16>
    %c1280 = arith.constant 1280 : index
    %c0_96 = arith.constant 0 : index
    %62 = vector.load %arg8[%c1280, %c0_96] : memref<1728x16xbf16, #tpu.memory_space<vmem>>, vector<64x16xbf16>
    tpu.vector_store %arg8[%c1280, %c0_96], %61 {strides = array<i32>} : memref<1728x16xbf16, #tpu.memory_space<vmem>>, vector<64x16xbf16>,
    %c0_97 = arith.constant 0 : index
    %c0_98 = arith.constant 0 : index
    %c0_99 = arith.constant 0 : index
    %c4_100 = arith.constant 4 : index
    %63 = vector.load %arg4[%c0_97, %c0_98, %c0_99, %c4_100] : memref<1x1x64x26xbf16, #tpu.memory_space<vmem>>, vector<1x1x64x16xbf16>
    %64 = vector.shape_cast %63 : vector<1x1x64x16xbf16> to vector<64x16xbf16>
    %c1344 = arith.constant 1344 : index
    %c0_101 = arith.constant 0 : index
    %65 = vector.load %arg8[%c1344, %c0_101] : memref<1728x16xbf16, #tpu.memory_space<vmem>>, vector<64x16xbf16>
    tpu.vector_store %arg8[%c1344, %c0_101], %64 {strides = array<i32>} : memref<1728x16xbf16, #tpu.memory_space<vmem>>, vector<64x16xbf16>,
    %c0_102 = arith.constant 0 : index
    %c0_103 = arith.constant 0 : index
    %c0_104 = arith.constant 0 : index
    %c5_105 = arith.constant 5 : index
    %66 = vector.load %arg4[%c0_102, %c0_103, %c0_104, %c5_105] : memref<1x1x64x26xbf16, #tpu.memory_space<vmem>>, vector<1x1x64x16xbf16>
    %67 = vector.shape_cast %66 : vector<1x1x64x16xbf16> to vector<64x16xbf16>
    %c1408 = arith.constant 1408 : index
    %c0_106 = arith.constant 0 : index
    %68 = vector.load %arg8[%c1408, %c0_106] : memref<1728x16xbf16, #tpu.memory_space<vmem>>, vector<64x16xbf16>
    tpu.vector_store %arg8[%c1408, %c0_106], %67 {strides = array<i32>} : memref<1728x16xbf16, #tpu.memory_space<vmem>>, vector<64x16xbf16>,
    %c0_107 = arith.constant 0 : index
    %c0_108 = arith.constant 0 : index
    %c0_109 = arith.constant 0 : index
    %c6_110 = arith.constant 6 : index
    %69 = vector.load %arg4[%c0_107, %c0_108, %c0_109, %c6_110] : memref<1x1x64x26xbf16, #tpu.memory_space<vmem>>, vector<1x1x64x16xbf16>
    %70 = vector.shape_cast %69 : vector<1x1x64x16xbf16> to vector<64x16xbf16>
    %c1472 = arith.constant 1472 : index
    %c0_111 = arith.constant 0 : index
    %71 = vector.load %arg8[%c1472, %c0_111] : memref<1728x16xbf16, #tpu.memory_space<vmem>>, vector<64x16xbf16>
    tpu.vector_store %arg8[%c1472, %c0_111], %70 {strides = array<i32>} : memref<1728x16xbf16, #tpu.memory_space<vmem>>, vector<64x16xbf16>,
    %c0_112 = arith.constant 0 : index
    %c0_113 = arith.constant 0 : index
    %c0_114 = arith.constant 0 : index
    %c8_115 = arith.constant 8 : index
    %72 = vector.load %arg4[%c0_112, %c0_113, %c0_114, %c8_115] : memref<1x1x64x26xbf16, #tpu.memory_space<vmem>>, vector<1x1x64x16xbf16>
    %73 = vector.shape_cast %72 : vector<1x1x64x16xbf16> to vector<64x16xbf16>
    %c1536 = arith.constant 1536 : index
    %c0_116 = arith.constant 0 : index
    %74 = vector.load %arg8[%c1536, %c0_116] : memref<1728x16xbf16, #tpu.memory_space<vmem>>, vector<64x16xbf16>
    tpu.vector_store %arg8[%c1536, %c0_116], %73 {strides = array<i32>} : memref<1728x16xbf16, #tpu.memory_space<vmem>>, vector<64x16xbf16>,
    %c0_117 = arith.constant 0 : index
    %c0_118 = arith.constant 0 : index
    %c0_119 = arith.constant 0 : index
    %c9_120 = arith.constant 9 : index
    %75 = vector.load %arg4[%c0_117, %c0_118, %c0_119, %c9_120] : memref<1x1x64x26xbf16, #tpu.memory_space<vmem>>, vector<1x1x64x16xbf16>
    %76 = vector.shape_cast %75 : vector<1x1x64x16xbf16> to vector<64x16xbf16>
    %c1600 = arith.constant 1600 : index
    %c0_121 = arith.constant 0 : index
    %77 = vector.load %arg8[%c1600, %c0_121] : memref<1728x16xbf16, #tpu.memory_space<vmem>>, vector<64x16xbf16>
    tpu.vector_store %arg8[%c1600, %c0_121], %76 {strides = array<i32>} : memref<1728x16xbf16, #tpu.memory_space<vmem>>, vector<64x16xbf16>,
    %c0_122 = arith.constant 0 : index
    %c0_123 = arith.constant 0 : index
    %c0_124 = arith.constant 0 : index
    %c10_125 = arith.constant 10 : index
    %78 = vector.load %arg4[%c0_122, %c0_123, %c0_124, %c10_125] : memref<1x1x64x26xbf16, #tpu.memory_space<vmem>>, vector<1x1x64x16xbf16>
    %79 = vector.shape_cast %78 : vector<1x1x64x16xbf16> to vector<64x16xbf16>
    %c1664 = arith.constant 1664 : index
    %c0_126 = arith.constant 0 : index
    %80 = vector.load %arg8[%c1664, %c0_126] : memref<1728x16xbf16, #tpu.memory_space<vmem>>, vector<64x16xbf16>
    tpu.vector_store %arg8[%c1664, %c0_126], %79 {strides = array<i32>} : memref<1728x16xbf16, #tpu.memory_space<vmem>>, vector<64x16xbf16>,
    %c0_127 = arith.constant 0 : index
    %c0_128 = arith.constant 0 : index
    %81 = vector.load %arg5[%c0_127, %c0_128] : memref<64x1728xbf16, #tpu.memory_space<vmem>>, vector<64x1728xbf16>
    %c0_129 = arith.constant 0 : index
    %c0_130 = arith.constant 0 : index
    %82 = vector.load %arg8[%c0_129, %c0_130] : memref<1728x16xbf16, #tpu.memory_space<vmem>>, vector<1728x16xbf16>
    %cst = arith.constant dense<0.000000e+00> : vector<64x16xf32>
    %83 = tpu.matmul %81, %82, %cst {dimension_numbers = #tpu.dot_dimension_numbers<[1], [0], [0], [1], [0, 0, 1, 1], [], []>} : vector<64x1728xbf16>, vector<1728x16xbf16>, vector<64x16xf32> -> vector<64x16xf32>
    %84 = vector.extract_strided_slice %83 {offsets = [0, 0], sizes = [8, 16], strides = [1, 1]} : vector<64x16xf32> to vector<8x16xf32>
    %85 = vector.extract_strided_slice %83 {offsets = [8, 0], sizes = [8, 16], strides = [1, 1]} : vector<64x16xf32> to vector<8x16xf32>
    %86 = arith.maximumf %84, %85 : vector<8x16xf32>
    %87 = vector.extract_strided_slice %83 {offsets = [16, 0], sizes = [8, 16], strides = [1, 1]} : vector<64x16xf32> to vector<8x16xf32>
    %88 = arith.maximumf %86, %87 : vector<8x16xf32>
    %89 = vector.extract_strided_slice %83 {offsets = [24, 0], sizes = [8, 16], strides = [1, 1]} : vector<64x16xf32> to vector<8x16xf32>
    %90 = arith.maximumf %88, %89 : vector<8x16xf32>
    %91 = vector.extract_strided_slice %83 {offsets = [32, 0], sizes = [8, 16], strides = [1, 1]} : vector<64x16xf32> to vector<8x16xf32>
    %92 = arith.maximumf %90, %91 : vector<8x16xf32>
    %93 = vector.extract_strided_slice %83 {offsets = [40, 0], sizes = [8, 16], strides = [1, 1]} : vector<64x16xf32> to vector<8x16xf32>
    %94 = arith.maximumf %92, %93 : vector<8x16xf32>
    %95 = vector.extract_strided_slice %83 {offsets = [48, 0], sizes = [8, 16], strides = [1, 1]} : vector<64x16xf32> to vector<8x16xf32>
    %96 = arith.maximumf %94, %95 : vector<8x16xf32>
    %97 = vector.extract_strided_slice %83 {offsets = [56, 0], sizes = [8, 16], strides = [1, 1]} : vector<64x16xf32> to vector<8x16xf32>
    %98 = arith.maximumf %96, %97 : vector<8x16xf32>
    %c0_131 = arith.constant 0 : index
    %c0_132 = arith.constant 0 : index
    %99 = vector.load %arg6[%c0_131, %c0_132] : memref<8x1xf32, #tpu.memory_space<vmem>>, vector<8x1xf32>
    %100 = vector.broadcast %99 : vector<8x1xf32> to vector<8x16xf32>
    %101 = arith.addf %98, %100 : vector<8x16xf32>
    %cst_133 = arith.constant 0.000000e+00 : f32
    %102 = vector.broadcast %cst_133 : f32 to vector<8x16xf32>
    %103 = arith.maximumf %101, %102 : vector<8x16xf32>
    %104 = arith.truncf %103 : vector<8x16xf32> to vector<8x16xbf16>
    %c0_134 = arith.constant 0 : index
    %c0_135 = arith.constant 0 : index
    %c0_136 = arith.constant 0 : index
    %c0_137 = arith.constant 0 : index
    %105 = vector.load %arg7[%c0_134, %c0_135, %c0_136, %c0_137] : memref<1x1x8x16xbf16, #tpu.memory_space<vmem>>, vector<1x1x8x16xbf16>
    %106 = vector.shape_cast %105 : vector<1x1x8x16xbf16> to vector<8x16xbf16>
    %107 = vector.shape_cast %104 : vector<8x16xbf16> to vector<1x1x8x16xbf16>
    tpu.vector_store %arg7[%c0_134, %c0_135, %c0_136, %c0_137], %107 {strides = array<i32>} : memref<1x1x8x16xbf16, #tpu.memory_space<vmem>>, vector<1x1x8x16xbf16>,
    return
  }
  func.func @transform_0(%arg0: i32, %arg1: i32) -> (i32, i32, i32, i32) {
    %c0_i32 = arith.constant 0 : i32
    %c0_i32_0 = arith.constant 0 : i32
    %c0_i32_1 = arith.constant 0 : i32
    return %arg0, %arg1, %c0_i32, %c0_i32_0 : i32, i32, i32, i32
  }
  func.func @transform_1(%arg0: i32, %arg1: i32) -> (i32, i32, i32, i32) {
    %c1_i32 = arith.constant 1 : i32
    %0 = arith.addi %arg1, %c1_i32 : i32
    %c0_i32 = arith.constant 0 : i32
    %c0_i32_0 = arith.constant 0 : i32
    %c0_i32_1 = arith.constant 0 : i32
    return %arg0, %0, %c0_i32, %c0_i32_0 : i32, i32, i32, i32
  }
  func.func @transform_2(%arg0: i32, %arg1: i32) -> (i32, i32, i32, i32) {
    %c2_i32 = arith.constant 2 : i32
    %0 = arith.addi %arg1, %c2_i32 : i32
    %c0_i32 = arith.constant 0 : i32
    %c0_i32_0 = arith.constant 0 : i32
    %c0_i32_1 = arith.constant 0 : i32
    return %arg0, %0, %c0_i32, %c0_i32_0 : i32, i32, i32, i32
  }
  func.func @transform_3(%arg0: i32, %arg1: i32) -> (i32, i32) {
    %c0_i32 = arith.constant 0 : i32
    %c0_i32_0 = arith.constant 0 : i32
    %c0_i32_1 = arith.constant 0 : i32
    return %c0_i32, %c0_i32_0 : i32, i32
  }
  func.func @transform_4(%arg0: i32, %arg1: i32) -> (i32, i32) {
    %c0_i32 = arith.constant 0 : i32
    %c0_i32_0 = arith.constant 0 : i32
    %c0_i32_1 = arith.constant 0 : i32
    return %c0_i32, %c0_i32_0 : i32, i32
  }
  func.func @transform_5(%arg0: i32, %arg1: i32) -> (i32, i32, i32, i32) {
    %c0_i32 = arith.constant 0 : i32
    %c0_i32_0 = arith.constant 0 : i32
    %c0_i32_1 = arith.constant 0 : i32
    return %arg0, %arg1, %c0_i32, %c0_i32_0 : i32, i32, i32, i32
  }
}

module attributes {stable_mosaic.version = 11 : i64} {
  func.func @_fc1_kernel(%arg0: i32, %arg1: i32, %arg2: memref<2x128xbf16, #tpu.memory_space<vmem>>, %arg3: memref<128x128xbf16, #tpu.memory_space<vmem>>, %arg4: memref<1x128xf32, #tpu.memory_space<vmem>>, %arg5: memref<2x128xbf16, #tpu.memory_space<vmem>>, %arg6: memref<2x128xf32, #tpu.memory_space<vmem>>) attributes {dimension_semantics = [#tpu.dimension_semantics<parallel>, #tpu.dimension_semantics<arbitrary>], iteration_bounds = array<i64: 1, 1>, scalar_prefetch = 0 : i64, scratch_operands = 1 : i64, tpu.core_type = #tpu.core_type<tc>, window_params = [{transform_indices = @transform_0, window_bounds = array<i64: 2, 128>}, {transform_indices = @transform_1, window_bounds = array<i64: 128, 128>}, {transform_indices = @transform_2, window_bounds = array<i64: 1, 128>}, {transform_indices = @transform_3, window_bounds = array<i64: 2, 128>}]} {
    %c0_i32 = arith.constant 0 : i32
    %0 = arith.cmpi eq, %arg1, %c0_i32 : i32
    %1 = arith.extui %0 : i1 to i32
    %c0_i32_0 = arith.constant 0 : i32
    %2 = arith.cmpi ne, %1, %c0_i32_0 : i32
    scf.if %2 {
      %cst_10 = arith.constant 0.000000e+00 : f32
      %12 = vector.broadcast %cst_10 : f32 to vector<2x128xf32>
      %c0_11 = arith.constant 0 : index
      %c0_12 = arith.constant 0 : index
      %13 = vector.load %arg6[%c0_11, %c0_12] : memref<2x128xf32, #tpu.memory_space<vmem>>, vector<2x128xf32>
      tpu.vector_store %arg6[%c0_11, %c0_12], %12 {strides = array<i32>} : memref<2x128xf32, #tpu.memory_space<vmem>>, vector<2x128xf32>,
    } else {
    }
    %c0 = arith.constant 0 : index
    %c0_1 = arith.constant 0 : index
    %3 = vector.load %arg6[%c0, %c0_1] : memref<2x128xf32, #tpu.memory_space<vmem>>, vector<2x128xf32>
    %c0_2 = arith.constant 0 : index
    %c0_3 = arith.constant 0 : index
    %4 = vector.load %arg2[%c0_2, %c0_3] : memref<2x128xbf16, #tpu.memory_space<vmem>>, vector<2x128xbf16>
    %c0_4 = arith.constant 0 : index
    %c0_5 = arith.constant 0 : index
    %5 = vector.load %arg3[%c0_4, %c0_5] : memref<128x128xbf16, #tpu.memory_space<vmem>>, vector<128x128xbf16>
    %cst = arith.constant dense<0.000000e+00> : vector<2x128xf32>
    %6 = tpu.matmul %4, %5, %cst {dimension_numbers = #tpu.dot_dimension_numbers<[1], [0], [0], [1], [0, 0, 1, 1], [], []>} : vector<2x128xbf16>, vector<128x128xbf16>, vector<2x128xf32> -> vector<2x128xf32>
    %7 = arith.addf %3, %6 : vector<2x128xf32>
    %c0_6 = arith.constant 0 : index
    %c0_7 = arith.constant 0 : index
    %8 = vector.load %arg6[%c0_6, %c0_7] : memref<2x128xf32, #tpu.memory_space<vmem>>, vector<2x128xf32>
    tpu.vector_store %arg6[%c0_6, %c0_7], %7 {strides = array<i32>} : memref<2x128xf32, #tpu.memory_space<vmem>>, vector<2x128xf32>,
    %c0_i32_8 = arith.constant 0 : i32
    %9 = arith.cmpi eq, %arg1, %c0_i32_8 : i32
    %10 = arith.extui %9 : i1 to i32
    %c0_i32_9 = arith.constant 0 : i32
    %11 = arith.cmpi ne, %10, %c0_i32_9 : i32
    scf.if %11 {
      %c0_10 = arith.constant 0 : index
      %c0_11 = arith.constant 0 : index
      %12 = vector.load %arg6[%c0_10, %c0_11] : memref<2x128xf32, #tpu.memory_space<vmem>>, vector<2x128xf32>
      %c0_12 = arith.constant 0 : index
      %c0_13 = arith.constant 0 : index
      %13 = vector.load %arg4[%c0_12, %c0_13] : memref<1x128xf32, #tpu.memory_space<vmem>>, vector<1x128xf32>
      %14 = vector.broadcast %13 : vector<1x128xf32> to vector<2x128xf32>
      %15 = arith.addf %12, %14 : vector<2x128xf32>
      %cst_14 = arith.constant 0.000000e+00 : f32
      %16 = vector.broadcast %cst_14 : f32 to vector<2x128xf32>
      %17 = arith.maximumf %15, %16 : vector<2x128xf32>
      %18 = arith.truncf %17 : vector<2x128xf32> to vector<2x128xbf16>
      %c0_15 = arith.constant 0 : index
      %c0_16 = arith.constant 0 : index
      %19 = vector.load %arg5[%c0_15, %c0_16] : memref<2x128xbf16, #tpu.memory_space<vmem>>, vector<2x128xbf16>
      tpu.vector_store %arg5[%c0_15, %c0_16], %18 {strides = array<i32>} : memref<2x128xbf16, #tpu.memory_space<vmem>>, vector<2x128xbf16>,
    } else {
    }
    return
  }
  func.func @transform_0(%arg0: i32, %arg1: i32) -> (i32, i32) {
    %c0_i32 = arith.constant 0 : i32
    %c0_i32_0 = arith.constant 0 : i32
    return %c0_i32, %arg1 : i32, i32
  }
  func.func @transform_1(%arg0: i32, %arg1: i32) -> (i32, i32) {
    %c0_i32 = arith.constant 0 : i32
    return %arg1, %arg0 : i32, i32
  }
  func.func @transform_2(%arg0: i32, %arg1: i32) -> (i32, i32) {
    %c0_i32 = arith.constant 0 : i32
    %c0_i32_0 = arith.constant 0 : i32
    return %c0_i32, %arg0 : i32, i32
  }
  func.func @transform_3(%arg0: i32, %arg1: i32) -> (i32, i32) {
    %c0_i32 = arith.constant 0 : i32
    %c0_i32_0 = arith.constant 0 : i32
    return %c0_i32, %arg0 : i32, i32
  }
}

module attributes {stable_mosaic.version = 11 : i64} {
  func.func @_head_kernel(%arg0: memref<2x128xbf16, #tpu.memory_space<vmem>>, %arg1: memref<128x64xbf16, #tpu.memory_space<vmem>>, %arg2: memref<1x64xf32, #tpu.memory_space<vmem>>, %arg3: memref<64x2xbf16, #tpu.memory_space<vmem>>, %arg4: memref<1x2xf32, #tpu.memory_space<vmem>>, %arg5: memref<2x2xf32, #tpu.memory_space<vmem>>) attributes {dimension_semantics = [], scalar_prefetch = 0 : i64, scratch_operands = 0 : i64, tpu.core_type = #tpu.core_type<tc>} {
    %c0 = arith.constant 0 : index
    %c0_0 = arith.constant 0 : index
    %0 = vector.load %arg0[%c0, %c0_0] : memref<2x128xbf16, #tpu.memory_space<vmem>>, vector<2x128xbf16>
    %c0_1 = arith.constant 0 : index
    %c0_2 = arith.constant 0 : index
    %1 = vector.load %arg1[%c0_1, %c0_2] : memref<128x64xbf16, #tpu.memory_space<vmem>>, vector<128x64xbf16>
    %cst = arith.constant dense<0.000000e+00> : vector<2x64xf32>
    %2 = tpu.matmul %0, %1, %cst {dimension_numbers = #tpu.dot_dimension_numbers<[1], [0], [0], [1], [0, 0, 1, 1], [], []>} : vector<2x128xbf16>, vector<128x64xbf16>, vector<2x64xf32> -> vector<2x64xf32>
    %c0_3 = arith.constant 0 : index
    %c0_4 = arith.constant 0 : index
    %3 = vector.load %arg2[%c0_3, %c0_4] : memref<1x64xf32, #tpu.memory_space<vmem>>, vector<1x64xf32>
    %4 = vector.broadcast %3 : vector<1x64xf32> to vector<2x64xf32>
    %5 = arith.addf %2, %4 : vector<2x64xf32>
    %cst_5 = arith.constant 0.000000e+00 : f32
    %6 = vector.broadcast %cst_5 : f32 to vector<2x64xf32>
    %7 = arith.maximumf %5, %6 : vector<2x64xf32>
    %8 = arith.truncf %7 : vector<2x64xf32> to vector<2x64xbf16>
    %c0_6 = arith.constant 0 : index
    %c0_7 = arith.constant 0 : index
    %9 = vector.load %arg3[%c0_6, %c0_7] : memref<64x2xbf16, #tpu.memory_space<vmem>>, vector<64x2xbf16>
    %cst_8 = arith.constant dense<0.000000e+00> : vector<2x2xf32>
    %10 = tpu.matmul %8, %9, %cst_8 {dimension_numbers = #tpu.dot_dimension_numbers<[1], [0], [0], [1], [0, 0, 1, 1], [], []>} : vector<2x64xbf16>, vector<64x2xbf16>, vector<2x2xf32> -> vector<2x2xf32>
    %c0_9 = arith.constant 0 : index
    %c0_10 = arith.constant 0 : index
    %11 = vector.load %arg4[%c0_9, %c0_10] : memref<1x2xf32, #tpu.memory_space<vmem>>, vector<1x2xf32>
    %12 = vector.broadcast %11 : vector<1x2xf32> to vector<2x2xf32>
    %13 = arith.addf %10, %12 : vector<2x2xf32>
    %c0_11 = arith.constant 0 : index
    %c0_12 = arith.constant 0 : index
    %14 = vector.load %arg5[%c0_11, %c0_12] : memref<2x2xf32, #tpu.memory_space<vmem>>, vector<2x2xf32>
    tpu.vector_store %arg5[%c0_11, %c0_12], %13 {strides = array<i32>} : memref<2x2xf32, #tpu.memory_space<vmem>>, vector<2x2xf32>,
    return
  }
}

</mosaic_0001>

<bundles_post_ra>
// kernel: dsa_3d_cnn_forward.5
= control target key start
LH: loop header
LB: loop body
LE: loop exit
PB: predicated region body
PF: predicated region fallthrough
CT: control target
= control target key end

     0   :  { %s1115_s18 = smov 0   ;;  %s1117_s19 = smov 0   ;;  %s1326_s0 = inlined_call_operand.vmem [shape: bf16[2,10,8,122], index: 0, kind: input, shape index: {}, may-alias: {0,1,2}]   ;;  %s1327_s1 = inlined_call_operand.vmem [shape: bf16[2,10,8,122], index: 1, kind: input, shape index: {}, may-alias: {0,1,2}]   ;;  %s1328_s2 = inlined_call_operand.vmem [shape: bf16[2,10,8,122], index: 2, kind: input, shape index: {}, may-alias: {0,1,2}]   ;;  %s1329_s3 = inlined_call_operand.vmem [shape: bf16[64,216], index: 3, kind: input, shape index: {}]   ;;  %s1330_s4 = inlined_call_operand.vmem [shape: f32[8,1], index: 4, kind: input, shape index: {}]   ;;  %s1331_s5 = inlined_call_operand.vmem [shape: bf16[2,8,8,100], index: 5, kind: output, shape index: {}]  }
   0x1   :  { %s1119_s20 = smov 0   ;;  %s1121_s21 = smov 0  }
   0x2   :  { %s1123_s22 = smov 0  }
   0x3 LB: > { %s24_s23 = sadd.s32 1, %s1066_s20  ;;  %s27_s24 = sadd.s32 1, %s1070_s21  ;;  %s1074_s22 = sphi %s1123_s22, %s15_s22   ;;  %s1070_s21 = sphi %s1121_s21, %s1335_s21   ;;  %s1066_s20 = sphi %s1119_s20, %s1334_s20   ;;  %s1062_s19 = sphi %s1117_s19, %s1333_s19   ;;  %s1058_s18 = sphi %s1115_s18, %s1332_s18  }
   0x4   : > { %p25_p0 = scmp.ge.s32.totalorder %s24_s23, 8  ;;  %p854_p1 = scmp.ge.s32.totalorder %s1074_s22, 1 }
   0x5   : > { %p244_p2 = scmp.lt.s32.totalorder %s1074_s22, 17 }
   0x6   : > { %s1337_s23 = smov (%p25_p0, %s24_s23), 0  ;;  %s1339_s24 = smov (!%p25_p0, %s27_s24), %s1070_s21 }
   0x7   : > { %p245_p3 = pnand %p854_p1, %p244_p2  ;;  %p29_p4 = scmp.ge.s32.totalorder %s1339_s24, 2 }
   0x8   : > { %p296_p5 = scmp.lt.s32.totalorder (!%p245_p3), %s1062_s19, 1  ;;  %s314_s25 = sadd.s32 (!%p245_p3), 2, %s1058_s18 }
   0x9   : > { %s1341_s24 = smov (%p29_p4, %s1339_s24), 0  ;;  %248 = sbr.rel (%p245_p3) target bundleno = 377 (0x179), region = 40 }
   0xa   : > { %p317_p6 = scmp.lt.s32.totalorder (!%p245_p3), %s314_s25, 9  ;;  %s304_s27 = sadd.s32 (!%p245_p3), 1, %s1058_s18 }
   0xb   : > { %p307_p7 = scmp.lt.s32.totalorder (!%p245_p3), %s304_s27, 9  ;;  %s1076_s8 = smov (!%p245_p3), 106  }
   0xc   : > { %s1077_s9 = smov (!%p245_p3), 107   ;;  %s1078_s15 = smov (!%p245_p3), 108  }
   0xd   : > { %s1079_s16 = smov (!%p245_p3), 116   ;;  %s1080_s17 = smov (!%p245_p3), 117  }
   0xe   : > { %s1343_s19 = smov (!%p296_p5, %s1062_s19), 1  ;;  %s1345_s25 = smov (!%p317_p6, %s314_s25), 9  ;;  %vm334_vm0 = vcmask 814080   ;;  %vm649_vm1 = vcmask 1043456   ;;  %v952_v59 = vld [vmem:[%s1329_s3 + $0x14] sm:$0xf] }
   0xf   : > { %s1151_s26 = smul.u32 10, %s1343_s19  ;;  %s1347_s27 = smov (!%p307_p7, %s304_s27), 9  ;;  %v872_v60 = vld [vmem:[%s1329_s3 + $0x18] sm:$0xf0]  ;;  %v950_v61 = vld [vmem:[%s1329_s3 + $0x4] sm:$0xf] }
  0x10   : > { %p298_p8 = scmp.lt.s32.totalorder %s1058_s18, 9  ;;  %s1083_s30 = smov 127   ;;  %v864_v62 = vld [vmem:[%s1329_s3 + $0x8] sm:$0xf0]  ;;  %vm636_vm2 = vcmask 719872  }
  0x11   : > { %s320_s28 = sadd.s32 %s1151_s26, %s1345_s25  ;;  %s310_s10 = sadd.s32 %s1151_s26, %s1347_s27 }
  0x12   : > { %s857_s29 = sshll.u32 %s320_s28, 2  ;;  %s856_s11 = sshll.u32 %s310_s10, 2 }
  0x13   : > { %s1158_s7 = scalar_lea.vmem %s1328_s2, %s857_s29  ;;  %s1168_s14 = scalar_lea.vmem %s1327_s1, %s856_s11 }
  0x14   : > { %v478_v0 = vld [vmem:[%s1158_s7] sm:$0xf]  ;;  %s1081_s25 = smov 118   ;;  %s1082_s27 = smov 126  }
  0x15   : > { %v472_v1 = vld [vmem:[%s1158_s7] sm:$0xf]  ;;  %480 = vrot.lane.b32.xlu0 %v478_v0, %s1076_s8  ;;  %s299_s28 = scalar_select %p298_p8, %s1058_s18, 9 }
  0x16   : > { %474 = vrot.lane.b32.xlu1 %v472_v1, %s1077_s9  ;;  %v466_v2 = vld [vmem:[%s1158_s7] sm:$0xf]  ;;  %p326_p9 = scmp.lt.s32.totalorder %s1058_s18, 7  ;;  %s858_s11 = sshll.u32 %s1343_s19, 3 }
  0x17   : > { %v410_v3 = vld [vmem:[%s1168_s14] sm:$0xf]  ;;  %s301_s29 = sadd.s32 %s1151_s26, %s299_s28 }
  0x18   : > { %v416_v4 = vld [vmem:[%s1168_s14] sm:$0xf]  ;;  %s855_s6 = sshll.u32 %s301_s29, 2  ;;  %s1349_s18 = smov (!%p326_p9, %s1058_s18), 7 }
  0x19   : > { %418 = vrot.lane.b32.xlu2 %v416_v4, %s1078_s15  ;;  %v454_v5 = vld [vmem:[%s1158_s7] sm:$0xf]  ;;  %s1198_s12 = scalar_lea.vmem %s1326_s0, %s855_s6 }
  0x1a   : > { %v460_v6 = vld [vmem:[%s1158_s7] sm:$0xf] }
  0x1b   : > { %v398_v7 = vld [vmem:[%s1168_s14] sm:$0xf] }
  0x1c   : > { %v404_v8 = vld [vmem:[%s1168_s14] sm:$0xf] }
  0x1d   : > { %468 = vrot.lane.b32.xlu0 %v466_v2, %s1078_s15  ;;  %v442_v9 = vld [vmem:[%s1158_s7] sm:$0xf]  ;;  %v875_v2 = vor.u32 %v952_v59, %v872_v60 }
  0x1e   : > { %412 = vrot.lane.b32.xlu1 %v410_v3, %s1079_s16  ;;  %v448_v10 = vld [vmem:[%s1158_s7] sm:$0xf]  ;;  %v867_v3 = vor.u32 %v950_v61, %v864_v62 }
  0x1f   : > { %v386_v11 = vld [vmem:[%s1168_s14] sm:$0xf] }
  0x20   : > { %v436_v12 = vld [vmem:[%s1158_s7] sm:$0xf] }
  0x21   : > { %456 = vrot.lane.b32.xlu2 %v454_v5, %s1080_s17  ;;  %v392_v13 = vld [vmem:[%s1168_s14] sm:$0xf] }
  0x22   : > { %v378_v14 = vld [vmem:[%s1198_s12] sm:$0xf] }
  0x23   : > { %v428_v15 = vld [vmem:[%s1168_s14] sm:$0xf] }
  0x24   : > { %v422_v16 = vld [vmem:[%s1168_s14] sm:$0xf] }
  0x25   : > { %462 = vrot.lane.b32.xlu0 %v460_v6, %s1079_s16  ;;  %v366_v17 = vld [vmem:[%s1198_s12] sm:$0xf] }
  0x26   : > { %400 = vrot.lane.b32.xlu1 %v398_v7, %s1081_s25  ;;  %v372_v18 = vld [vmem:[%s1198_s12] sm:$0xf] }
  0x27   : > { %v354_v19 = vld [vmem:[%s1198_s12] sm:$0xf] }
  0x28   : > { %v360_v20 = vld [vmem:[%s1198_s12] sm:$0xf] }
  0x29   : > { %406 = vrot.lane.b32.xlu2 %v404_v8, %s1080_s17  ;;  %v348_v21 = vld [vmem:[%s1198_s12] sm:$0xf]  ;;  %v1084_v8 = vmov 0  }
  0x2a   : > { %v342_v22 = vld [vmem:[%s1198_s12] sm:$0xf]  ;;  %1035 = vset.pattern.permute.xlu0 %v1084_v8 }
  0x2b   : > { %v336_v23 = vld [vmem:[%s1198_s12] sm:$0xf] }
  0x2c   : > { %v434_v29 = vld [vmem:[%s1158_s7] sm:$0xf] }
  0x2d   : > { %444 = vrot.lane.b32.xlu0 %v442_v9, %s1082_s27  ;;  %435 = vst.msk [vmem:[#allocation2 + $0x48] sm:$0xf] %vm334_vm0, %v434_v29  ;;  %v384_v30 = vld [vmem:[%s1168_s14] sm:$0xf] }
  0x2e   : > { %450 = vrot.lane.b32.xlu1 %v448_v10, %s1081_s25  ;;  %385 = vst.msk [vmem:[#allocation2 + $0x24] sm:$0xf] %vm334_vm0, %v384_v30  ;;  %v333_v48 = vld [vmem:[%s1198_s12] sm:$0xf]  ;;  %v954_v10 = vld [vmem:[%s1329_s3 + $0x24] sm:$0xf]  ;;  %s329_s12 = sadd.s32 %s858_s11, %s1349_s18 }
  0x2f   : > { %335 = vst.msk [vmem:[#allocation2] sm:$0xf] %vm334_vm0, %v333_v48  ;;  %v718_v7 = vld [vmem:[%s1330_s4] sm:$0xff]  ;;  %s859_s26 = sshll.u32 %s329_s12, 2 }
  0x31   : > { %388 = vrot.lane.b32.xlu2 %v386_v11, %s1083_s30  ;;  %v880_v11 = vld [vmem:[%s1329_s3 + $0x28] sm:$0xf0] }
  0x35   : > { %394 = vrot.lane.b32.xlu0 %v392_v13, %s1082_s27  ;;  %v883_v13 = vor.u32 %v954_v10, %v880_v11 }
  0x36   : > { %438 = vrot.lane.b32.xlu1 %v436_v12, %s1083_s30 }
  0x39   : > { %380 = vrot.lane.b32.xlu2 %v378_v14, %s1076_s8  ;;  %v862_v14 = vld [vmem:[%s1329_s3] sm:$0xf] }
  0x3d   : > { %424 = vrot.lane.b32.xlu0 %v422_v16, %s1077_s9 }
  0x3e   : > { %430 = vrot.lane.b32.xlu1 %v428_v15, %s1076_s8  ;;  %v951_v15 = vld [vmem:[%s1329_s3 + $0x4] sm:$0xf0] }
  0x41   : > { %368 = vrot.lane.b32.xlu2 %v366_v17, %s1078_s15  ;;  %v878_v17 = vld [vmem:[%s1329_s3 + $0x20] sm:$0xf] }
  0x45   : > { %374 = vrot.lane.b32.xlu0 %v372_v18, %s1077_s9  ;;  %v955_v18 = vld [vmem:[%s1329_s3 + $0x24] sm:$0xf0]  ;;  %s331_s9 = scalar_lea.vmem %s1331_s5, %s859_s26 }
  0x46   : > { %356 = vrot.lane.b32.xlu1 %v354_v19, %s1080_s17  ;;  %v863_v19 = vor.u32 %v951_v15, %v862_v14 }
  0x49   : > { %362 = vrot.lane.b32.xlu2 %v360_v20, %s1079_s16  ;;  %v879_v20 = vor.u32 %v955_v18, %v878_v17 }
  0x4d   : > { %344 = vrot.lane.b32.xlu0 %v342_v22, %s1082_s27  ;;  %v888_v22 = vld [vmem:[%s1329_s3 + $0x38] sm:$0xf0] }
  0x4e   : > { %350 = vrot.lane.b32.xlu1 %v348_v21, %s1081_s25  ;;  %v956_v21 = vld [vmem:[%s1329_s3 + $0x34] sm:$0xf] }
  0x51   : > { %338 = vrot.lane.b32.xlu2 %v336_v23, %s1083_s30  ;;  %v891_v23 = vor.u32 %v956_v21, %v888_v22 }
  0x55   : > { %721 = vperm.xlu0 %1035, %v718_v7  }
  0x73   : > { %v419_v24 = vpop.permute.xlu2 %418 }
  0x74   : > { %421 = vst.msk [vmem:[#allocation2 + $0x3c] sm:$0xf] %vm334_vm0, %v419_v24  ;;  %v870_v24 = vld [vmem:[%s1329_s3 + $0x10] sm:$0xf] }
  0x7b   : > { %v457_v25 = vpop.permute.xlu2 %456 }
  0x7c   : > { %459 = vst.msk [vmem:[#allocation2 + $0x58] sm:$0xf] %vm334_vm0, %v457_v25  ;;  %v953_v25 = vld [vmem:[%s1329_s3 + $0x14] sm:$0xf0] }
  0x83   : > { %v407_v26 = vpop.permute.xlu2 %406 }
  0x84   : > { %409 = vst.msk [vmem:[#allocation2 + $0x34] sm:$0xf] %vm334_vm0, %v407_v26  ;;  %v886_v26 = vld [vmem:[%s1329_s3 + $0x30] sm:$0xf] }
  0x87   : > { %v481_v27 = vpop.permute.xlu0 %480 }
  0x88   : > { %v475_v28 = vpop.permute.xlu1 %474  ;;  %483 = vst.msk [vmem:[#allocation2 + $0x68] sm:$0xf] %vm334_vm0, %v481_v27  ;;  %v957_v27 = vld [vmem:[%s1329_s3 + $0x34] sm:$0xf0] }
  0x89   : > { %477 = vst.msk [vmem:[#allocation2 + $0x64] sm:$0xf] %vm334_vm0, %v475_v28  ;;  %v871_v28 = vor.u32 %v953_v25, %v870_v24  ;;  %v887_v29 = vor.u32 %v957_v27, %v886_v26 }
  0x8b   : > { %v389_v31 = vpop.permute.xlu2 %388 }
  0x8c   : > { %391 = vst.msk [vmem:[#allocation2 + $0x28] sm:$0xf] %vm334_vm0, %v389_v31 }
  0x8f   : > { %v469_v32 = vpop.permute.xlu0 %468  ;;  %v518_v34 = vld [vmem:[#allocation2 + $0x68] sm:$0xf] }
  0x90   : > { %v413_v33 = vpop.permute.xlu1 %412  ;;  %471 = vst.msk [vmem:[#allocation2 + $0x60] sm:$0xf] %vm334_vm0, %v469_v32  ;;  %v608_v35 = vunpack.c.l.b16 %v518_v34 }
  0x91   : > { %415 = vst.msk [vmem:[#allocation2 + $0x38] sm:$0xf] %vm334_vm0, %v413_v33 }
  0x92   : > { %v622_v36 = vpack.c.b16 %v608_v35, %v608_v35 }
  0x93   : > { %v381_v38 = vpop.permute.xlu2 %380 }
  0x94   : > { %v651_v37 = vsel %vm649_vm1, %v622_v36, 0  ;;  %383 = vst.msk [vmem:[#allocation2 + $0x20] sm:$0xf] %vm334_vm0, %v381_v38 }
  0x95   : > { %684 = vmatpush.bf16.msra.mxu1 %v651_v37  ;;  %979 = vmatpush.bf16.msra.mxu3 %v651_v37 }
  0x97   : > { %v463_v39 = vpop.permute.xlu0 %462  ;;  %v970_v41 = vld [vmem:[#allocation2 + $0x60] sm:$0xff] }
  0x98   : > { %v401_v40 = vpop.permute.xlu1 %400  ;;  %465 = vst.msk [vmem:[#allocation2 + $0x5c] sm:$0xf] %vm334_vm0, %v463_v39  ;;  %v965_v42 = vld [vmem:[#allocation2 + $0x38] sm:$0xff] }
  0x99   : > { %403 = vst.msk [vmem:[#allocation2 + $0x30] sm:$0xf] %vm334_vm0, %v401_v40  ;;  %685 = vmatpush.bf16.msra.mxu1 %v970_v41  ;;  %980 = vmatpush.bf16.msra.mxu3 %v970_v41 }
  0x9a   : > { %653 = vmatpush.bf16.msra.mxu0 %v965_v42  ;;  %971 = vmatpush.bf16.msra.mxu2 %v965_v42 }
  0x9b   : > { %v369_v43 = vpop.permute.xlu2 %368  ;;  %v962_v58 = vld [vmem:[#allocation2 + $0x20] sm:$0xff] }
  0x9c   : > { %371 = vst.msk [vmem:[#allocation2 + $0x18] sm:$0xf] %vm334_vm0, %v369_v43 }
  0x9f   : > { %v445_v44 = vpop.permute.xlu0 %444  ;;  %v969_v46 = vld [vmem:[#allocation2 + $0x58] sm:$0xff] }
  0xa0   : > { %v451_v45 = vpop.permute.xlu1 %450  ;;  %447 = vst.msk [vmem:[#allocation2 + $0x50] sm:$0xf] %vm334_vm0, %v445_v44  ;;  %v964_v47 = vld [vmem:[#allocation2 + $0x30] sm:$0xff]  ;;  %686 = vmatpush.bf16.msra.mxu1 %v969_v46  ;;  %981 = vmatpush.bf16.msra.mxu3 %v969_v46 }
  0xa1   : > { %453 = vst.msk [vmem:[#allocation2 + $0x54] sm:$0xf] %vm334_vm0, %v451_v45  ;;  %654 = vmatpush.bf16.msra.mxu0 %v964_v47  ;;  %972 = vmatpush.bf16.msra.mxu2 %v964_v47 }
  0xa3   : > { %v363_v49 = vpop.permute.xlu2 %362 }
  0xa4   : > { %365 = vst.msk [vmem:[#allocation2 + $0x14] sm:$0xf] %vm334_vm0, %v363_v49 }
  0xa7   : > { %v395_v51 = vpop.permute.xlu0 %394 }
  0xa8   : > { %v439_v50 = vpop.permute.xlu1 %438  ;;  %v968_v52 = vld [vmem:[#allocation2 + $0x50] sm:$0xff]  ;;  %397 = vst.msk [vmem:[#allocation2 + $0x2c] sm:$0xf] %vm334_vm0, %v395_v51 }
  0xa9   : > { %441 = vst.msk [vmem:[#allocation2 + $0x4c] sm:$0xf] %vm334_vm0, %v439_v50  ;;  %687 = vmatpush.bf16.msra.mxu1 %v968_v52  ;;  %982 = vmatpush.bf16.msra.mxu3 %v968_v52 }
  0xab   : > { %v339_v53 = vpop.permute.xlu2 %338 }
  0xac   : > { %341 = vst.msk [vmem:[#allocation2 + $0x4] sm:$0xf] %vm334_vm0, %v339_v53 }
  0xaf   : > { %v425_v55 = vpop.permute.xlu0 %424  ;;  %v963_v57 = vld [vmem:[#allocation2 + $0x28] sm:$0xff] }
  0xb0   : > { %v431_v54 = vpop.permute.xlu1 %430  ;;  %v967_v56 = vld [vmem:[#allocation2 + $0x48] sm:$0xff]  ;;  %427 = vst.msk [vmem:[#allocation2 + $0x40] sm:$0xf] %vm334_vm0, %v425_v55  ;;  %655 = vmatpush.bf16.msra.mxu0 %v963_v57  ;;  %973 = vmatpush.bf16.msra.mxu2 %v963_v57 }
  0xb1   : > { %433 = vst.msk [vmem:[#allocation2 + $0x44] sm:$0xf] %vm334_vm0, %v431_v54  ;;  %688 = vmatpush.bf16.msra.mxu1 %v967_v56  ;;  %983 = vmatpush.bf16.msra.mxu3 %v967_v56 }
  0xb3   : > { %v958_v16 = vld [vmem:[#allocation2] sm:$0xff] }
  0xb4   : > { %656 = vmatpush.bf16.msra.mxu0 %v962_v58  ;;  %974 = vmatpush.bf16.msra.mxu2 %v962_v58 }
  0xb7   : > { %v375_v63 = vpop.permute.xlu0 %374 }
  0xb8   : > { %v357_v0 = vpop.permute.xlu1 %356  ;;  %377 = vst.msk [vmem:[#allocation2 + $0x1c] sm:$0xf] %vm334_vm0, %v375_v63  ;;  %v966_v1 = vld [vmem:[#allocation2 + $0x40] sm:$0xff] }
  0xb9   : > { %359 = vst.msk [vmem:[#allocation2 + $0x10] sm:$0xf] %vm334_vm0, %v357_v0  ;;  %689 = vmatpush.bf16.msra.mxu1 %v966_v1  ;;  %984 = vmatpush.bf16.msra.mxu3 %v966_v1 }
  0xbc   : > { %945 = vmatmul.msk.bf16.vlgmr.msra.gmra.mxu3 %vm636_vm2, %v875_v2  ;;  %944 = vmatmul.msk.bf16.vlgmr.msra.gmra.mxu1 %vm636_vm2, %v867_v3 }
  0xbf   : > { %v345_v5 = vpop.permute.xlu0 %344  ;;  %v961_v6 = vld [vmem:[#allocation2 + $0x18] sm:$0xff] }
  0xc0   : > { %v351_v4 = vpop.permute.xlu1 %350  ;;  %347 = vst.msk [vmem:[#allocation2 + $0x8] sm:$0xf] %vm334_vm0, %v345_v5  ;;  %657 = vmatpush.bf16.msra.mxu0 %v961_v6  ;;  %975 = vmatpush.bf16.msra.mxu2 %v961_v6  ;;  %v960_v9 = vld [vmem:[#allocation2 + $0x10] sm:$0xff] }
  0xc1   : > { %353 = vst.msk [vmem:[#allocation2 + $0xc] sm:$0xf] %vm334_vm0, %v351_v4 }
  0xc4   : > { %658 = vmatpush.bf16.msra.mxu0 %v960_v9  ;;  %976 = vmatpush.bf16.msra.mxu2 %v960_v9 }
  0xc7   : > { %v722_v60 = vpop.permute.xlu0 %721 }
  0xc8   : > { %v959_v12 = vld [vmem:[#allocation2 + $0x8] sm:$0xff] }
  0xc9   : > { %659 = vmatpush.bf16.msra.mxu0 %v959_v12  ;;  %977 = vmatpush.bf16.msra.mxu2 %v959_v12 }
  0xcc   : > { %946 = vmatmul.msk.bf16.gmra.mxu3 %vm636_vm2, %v883_v13 }
  0xcd   : > { %660 = vmatpush.bf16.msra.mxu0 %v958_v16  ;;  %978 = vmatpush.bf16.msra.mxu2 %v958_v16 }
  0xd0   : > { %661 = vmatmul.bf16.vlgmr.msra.gmra.mxu0 %v863_v19  ;;  %671 = vmatmul.bf16.vlgmr.msra.gmra.mxu2 %v879_v20 }
  0xdc   : > { %947 = vmatmul.msk.bf16.gmra.mxu3 %vm636_vm2, %v891_v23 }
  0xe0   : > { %666 = vmatmul.bf16.gmra.mxu0 %v871_v28  ;;  %676 = vmatmul.bf16.gmra.mxu2 %v887_v29 }
 0x139   : > { %v691_v34 = vpop.f32.mrf.mxu1 }
 0x13f   : > { %v696_v30 = vpop.f32.mrf.mxu3 }
 0x141   : > { %v693_v39 = vpop.f32.mrf.mxu1 }
 0x147   : > { %v698_v31 = vpop.f32.mrf.mxu3 }
 0x14d   : > { %v662_v32 = vpop.f32.mrf.mxu0 }
 0x14e   : > { %v692_v42 = vadd.f32 %v691_v34, %v662_v32 }
 0x14f   : > { %v701_v33 = vpop.f32.mrf.mxu3 }
 0x153   : > { %v672_v35 = vpop.f32.mrf.mxu2 }
 0x154   : > { %v702_v50 = vadd.f32 %v701_v33, %v672_v35 }
 0x155   : > { %v664_v36 = vpop.f32.mrf.mxu0 }
 0x156   : > { %v694_v41 = vadd.f32 %v693_v39, %v664_v36 }
 0x157   : > { %v703_v37 = vpop.f32.mrf.mxu3 }
 0x158   : > { %v711_v46 = vmax.f32 %v692_v42, %v694_v41 }
 0x15b   : > { %v674_v38 = vpop.f32.mrf.mxu2 }
 0x15c   : > { %v704_v52 = vadd.f32 %v703_v37, %v674_v38 }
 0x15d   : > { %v667_v40 = vpop.f32.mrf.mxu0 }
 0x15e   : > { %v697_v43 = vadd.f32 %v696_v30, %v667_v40 }
 0x15f   : > { %v706_v44 = vpop.f32.mrf.mxu3 }
 0x160   : > { %v712_v48 = vmax.f32 %v711_v46, %v697_v43 }
 0x163   : > { %v677_v45 = vpop.f32.mrf.mxu2 }
 0x164   : > { %v707_v55 = vadd.f32 %v706_v44, %v677_v45 }
 0x165   : > { %v669_v47 = vpop.f32.mrf.mxu0 }
 0x166   : > { %v699_v49 = vadd.f32 %v698_v31, %v669_v47 }
 0x167   : > { %v708_v57 = vpop.f32.mrf.mxu3 }
 0x168   : > { %v713_v51 = vmax.f32 %v712_v48, %v699_v49 }
 0x16a   : > { %v714_v53 = vmax.f32 %v713_v51, %v702_v50 }
 0x16b   : > { %v679_v54 = vpop.f32.mrf.mxu2 }
 0x16c   : > { %v715_v56 = vmax.f32 %v714_v53, %v704_v52  ;;  %v709_v58 = vadd.f32 %v708_v57, %v679_v54 }
 0x16e   : > { %v716_v59 = vmax.f32 %v715_v56, %v707_v55 }
 0x170   : > { %v717_v61 = vmax.f32 %v716_v59, %v709_v58 }
 0x172   : > { %v724_v62 = vadd.f32 %v722_v60, %v717_v61 }
 0x174   : > { %v725_v63 = vmax.f32 %v724_v62, 0.0 }
 0x176   : > { %v726_v0 = vpack.c.bf16 %v725_v63, %v725_v63 }
 0x178   : > { %727 = vst.msk [vmem:[%s331_s9] sm:$0xf] %vm334_vm0, %v726_v0 }
 0x179 PF: > { %s15_s22 = sadd.s32 1, %s1074_s22   ;;  %s1332_s18 = smov %s1066_s20 }
 0x17a   : > { %p12_p10 = scmp.ge.s32.totalorder %s15_s22, 18   ;;  %s1333_s19 = smov %s1070_s21 }
 0x17b   : > { %s1334_s20 = smov %s1337_s23  ;;  %s1335_s21 = smov %s1341_s24 }
 0x17c   :  { %14 = sbr.rel (!%p12_p10) target bundleno = 3 (0x3), region = 76 }

// kernel: dsa_3d_cnn_forward.6
= control target key start
LH: loop header
LB: loop body
LE: loop exit
PB: predicated region body
PF: predicated region fallthrough
CT: control target
= control target key end

     0   :  { %s4291_s18 = smov 0   ;;  %s4293_s19 = smov 0   ;;  %s5405_s0 = inlined_call_operand.vmem [shape: bf16[2,6,64,50], index: 0, kind: input, shape index: {}, may-alias: {0,1,2}]   ;;  %s5406_s1 = inlined_call_operand.vmem [shape: bf16[2,6,64,50], index: 1, kind: input, shape index: {}, may-alias: {0,1,2}]   ;;  %s5407_s2 = inlined_call_operand.vmem [shape: bf16[2,6,64,50], index: 2, kind: input, shape index: {}, may-alias: {0,1,2}]   ;;  %s5408_s3 = inlined_call_operand.vmem [shape: bf16[64,1728], index: 3, kind: input, shape index: {}]   ;;  %s5409_s4 = inlined_call_operand.vmem [shape: f32[8,1], index: 4, kind: input, shape index: {}]   ;;  %s5410_s5 = inlined_call_operand.vmem [shape: bf16[2,4,8,36], index: 5, kind: output, shape index: {}]  }
   0x1   :  { %s4295_s20 = smov 0   ;;  %s4297_s21 = smov 0  }
   0x2   :  { %s4299_s22 = smov 0  }
   0x3 LB: > { %s24_s23 = sadd.s32 1, %s4242_s20  ;;  %s27_s24 = sadd.s32 1, %s4246_s21  ;;  %s4250_s22 = sphi %s4299_s22, %s15_s22   ;;  %s4246_s21 = sphi %s4297_s21, %s5417_s21   ;;  %s4242_s20 = sphi %s4295_s20, %s5416_s20   ;;  %s4238_s19 = sphi %s4293_s19, %s5415_s19   ;;  %s4234_s18 = sphi %s4291_s18, %s5414_s18  }
   0x4   : > { %p25_p0 = scmp.ge.s32.totalorder %s24_s23, 4  ;;  %p3310_p1 = scmp.ge.s32.totalorder %s4250_s22, 1 }
   0x5   : > { %p247_p2 = scmp.lt.s32.totalorder %s4250_s22, 9 }
   0x6   : > { %s5419_s23 = smov (%p25_p0, %s24_s23), 0  ;;  %s5421_s24 = smov (!%p25_p0, %s27_s24), %s4246_s21 }
   0x7   : > { %p248_p3 = pnand %p3310_p1, %p247_p2  ;;  %p29_p4 = scmp.ge.s32.totalorder %s5421_s24, 2 }
   0x8   : > { %p302_p5 = scmp.lt.s32.totalorder (!%p248_p3), %s4238_s19, 1  ;;  %p304_p6 = scmp.lt.s32.totalorder (!%p248_p3), %s4234_s18, 5 }
   0x9   : > { %s5423_s24 = smov (%p29_p4, %s5421_s24), 0  ;;  %251 = sbr.rel (%p248_p3) target bundleno = 847 (0x34f), region = 40 }
   0xa   : > { %s4252_s8 = smov (!%p248_p3), 127   ;;  %s4253_s9 = smov (!%p248_p3), 126  }
   0xb   : > { %s4254_s10 = smov (!%p248_p3), 122   ;;  %s4255_s11 = smov (!%p248_p3), 121  }
   0xc   : > { %s4256_s12 = smov (!%p248_p3), 120   ;;  %s4257_s13 = smov (!%p248_p3), 116  }
   0xd   : > { %s4258_s14 = smov (!%p248_p3), 115   ;;  %s311_s15 = sadd.s32 (!%p248_p3), 1, %s4234_s18 }
   0xe   : > { %s5425_s19 = smov (!%p302_p5, %s4238_s19), 1  ;;  %vm350_vm0 = vcmask 289792   ;;  %p314_p7 = scmp.lt.s32.totalorder %s311_s15, 5  ;;  %vm2739_vm1 = vcmask 523264  }
   0xf   : > { %s305_s25 = scalar_select %p304_p6, %s4234_s18, 5 }
  0x10   : > { %s4328_s26 = smul.u32 48, %s5425_s19  ;;  %s5427_s15 = smov (!%p314_p7, %s311_s15), 5 }
  0x11   : > { %s3311_s27 = sshll.u32 %s305_s25, 3  ;;  %s3313_s16 = sshll.u32 %s5427_s15, 3 }
  0x12   : > { %s308_s28 = sadd.s32 %s4328_s26, %s3311_s27  ;;  %s5411_s17 = smov 114  }
  0x13   : > { %s3312_s29 = sshll.u32 %s308_s28, 2  ;;  %s318_s25 = sadd.s32 %s4328_s26, %s3313_s16 }
  0x14   : > { %s4334_s7 = scalar_lea.vmem %s5405_s0, %s3312_s29  ;;  %s3314_s27 = sshll.u32 %s318_s25, 2 }
  0x15   : > { %v361_v0 = vld [vmem:[%s4334_s7 + $0x8] sm:$0xf]  ;;  %v359_v1 = vld [vmem:[%s4334_s7] sm:$0xf]  ;;  %v363_v2 = vld [vmem:[%s4334_s7 + $0x10] sm:$0xf]  ;;  %s4478_s30 = scalar_lea.vmem %s5406_s1, %s3314_s27 }
  0x16   : > { %379 = vrot.lane.b32.xlu1 %v361_v0, %s4252_s8  ;;  %375 = vrot.lane.b32.xlu0 %v359_v1, %s4252_s8  ;;  %v362_v3 = vld [vmem:[%s4334_s7 + $0xc] sm:$0xf]  ;;  %v360_v4 = vld [vmem:[%s4334_s7 + $0x4] sm:$0xf]  ;;  %s322_s6 = sadd.s32 2, %s4234_s18  ;;  %p335_p9 = scmp.lt.s32.totalorder %s4234_s18, 3 }
  0x17   : > { %383 = vrot.lane.b32.xlu2 %v363_v2, %s4252_s8  ;;  %v364_v5 = vld [vmem:[%s4334_s7 + $0x14] sm:$0xf]  ;;  %v366_v6 = vld [vmem:[%s4334_s7 + $0x1c] sm:$0xf]  ;;  %v365_v7 = vld [vmem:[%s4334_s7 + $0x18] sm:$0xf] }
  0x18   : > { %v407_v8 = vld [vmem:[%s4334_s7] sm:$0xf]  ;;  %v409_v9 = vld [vmem:[%s4334_s7 + $0x8] sm:$0xf]  ;;  %v408_v10 = vld [vmem:[%s4334_s7 + $0x4] sm:$0xf] }
  0x19   : > { %v410_v11 = vld [vmem:[%s4334_s7 + $0xc] sm:$0xf]  ;;  %v412_v12 = vld [vmem:[%s4334_s7 + $0x14] sm:$0xf]  ;;  %v411_v13 = vld [vmem:[%s4334_s7 + $0x10] sm:$0xf] }
  0x1a   : > { %v413_v14 = vld [vmem:[%s4334_s7 + $0x18] sm:$0xf]  ;;  %v455_v15 = vld [vmem:[%s4334_s7] sm:$0xf]  ;;  %v414_v16 = vld [vmem:[%s4334_s7 + $0x1c] sm:$0xf] }
  0x1b   : > { %v456_v17 = vld [vmem:[%s4334_s7 + $0x4] sm:$0xf]  ;;  %v458_v18 = vld [vmem:[%s4334_s7 + $0xc] sm:$0xf]  ;;  %v457_v19 = vld [vmem:[%s4334_s7 + $0x8] sm:$0xf] }
  0x1c   : > { %v459_v20 = vld [vmem:[%s4334_s7 + $0x10] sm:$0xf]  ;;  %v461_v21 = vld [vmem:[%s4334_s7 + $0x18] sm:$0xf]  ;;  %v460_v22 = vld [vmem:[%s4334_s7 + $0x14] sm:$0xf] }
  0x1d   : > { %v462_v23 = vld [vmem:[%s4334_s7 + $0x1c] sm:$0xf]  ;;  %v504_v24 = vld [vmem:[%s4334_s7 + $0x4] sm:$0xf]  ;;  %v503_v25 = vld [vmem:[%s4334_s7] sm:$0xf] }
  0x1e   : > { %381 = vrot.lane.b32.xlu1 %v362_v3, %s4252_s8  ;;  %377 = vrot.lane.b32.xlu0 %v360_v4, %s4252_s8  ;;  %v505_v26 = vld [vmem:[%s4334_s7 + $0x8] sm:$0xf]  ;;  %v507_v27 = vld [vmem:[%s4334_s7 + $0x10] sm:$0xf]  ;;  %p325_p8 = scmp.lt.s32.totalorder %s322_s6, 5  ;;  %s5431_s18 = smov (!%p335_p9, %s4234_s18), 3 }
  0x1f   : > { %385 = vrot.lane.b32.xlu2 %v364_v5, %s4252_s8  ;;  %v506_v28 = vld [vmem:[%s4334_s7 + $0xc] sm:$0xf]  ;;  %v508_v29 = vld [vmem:[%s4334_s7 + $0x14] sm:$0xf]  ;;  %v510_v30 = vld [vmem:[%s4334_s7 + $0x1c] sm:$0xf] }
  0x20   : > { %v509_v31 = vld [vmem:[%s4334_s7 + $0x18] sm:$0xf]  ;;  %v551_v32 = vld [vmem:[%s4334_s7] sm:$0xf]  ;;  %v553_v33 = vld [vmem:[%s4334_s7 + $0x8] sm:$0xf] }
  0x21   : > { %v552_v34 = vld [vmem:[%s4334_s7 + $0x4] sm:$0xf]  ;;  %v554_v35 = vld [vmem:[%s4334_s7 + $0xc] sm:$0xf]  ;;  %v556_v37 = vld [vmem:[%s4334_s7 + $0x14] sm:$0xf] }
  0x22   : > { %v555_v38 = vld [vmem:[%s4334_s7 + $0x10] sm:$0xf]  ;;  %v557_v39 = vld [vmem:[%s4334_s7 + $0x18] sm:$0xf]  ;;  %v599_v41 = vld [vmem:[%s4334_s7] sm:$0xf] }
  0x23   : > { %v558_v42 = vld [vmem:[%s4334_s7 + $0x1c] sm:$0xf]  ;;  %v600_v43 = vld [vmem:[%s4334_s7 + $0x4] sm:$0xf]  ;;  %v602_v45 = vld [vmem:[%s4334_s7 + $0xc] sm:$0xf] }
  0x24   : > { %v601_v46 = vld [vmem:[%s4334_s7 + $0x8] sm:$0xf]  ;;  %v603_v47 = vld [vmem:[%s4334_s7 + $0x10] sm:$0xf]  ;;  %v605_v51 = vld [vmem:[%s4334_s7 + $0x18] sm:$0xf] }
  0x25   : > { %v604_v52 = vld [vmem:[%s4334_s7 + $0x14] sm:$0xf]  ;;  %v606_v53 = vld [vmem:[%s4334_s7 + $0x1c] sm:$0xf]  ;;  %v648_v57 = vld [vmem:[%s4334_s7 + $0x4] sm:$0xf] }
  0x26   : > { %389 = vrot.lane.b32.xlu1 %v366_v6, %s4252_s8  ;;  %387 = vrot.lane.b32.xlu0 %v365_v7, %s4252_s8  ;;  %v647_v58 = vld [vmem:[%s4334_s7] sm:$0xf]  ;;  %v649_v59 = vld [vmem:[%s4334_s7 + $0x8] sm:$0xf]  ;;  %s5429_s6 = smov (!%p325_p8, %s322_s6), 5 }
  0x27   : > { %423 = vrot.lane.b32.xlu2 %v407_v8, %s4253_s9  ;;  %v651_v63 = vld [vmem:[%s4334_s7 + $0x10] sm:$0xf]  ;;  %v650_v0 = vld [vmem:[%s4334_s7 + $0xc] sm:$0xf]  ;;  %v652_v1 = vld [vmem:[%s4334_s7 + $0x14] sm:$0xf] }
  0x28   : > { %v654_v6 = vld [vmem:[%s4334_s7 + $0x1c] sm:$0xf]  ;;  %v653_v7 = vld [vmem:[%s4334_s7 + $0x18] sm:$0xf] }
  0x2e   : > { %427 = vrot.lane.b32.xlu1 %v409_v9, %s4253_s9  ;;  %425 = vrot.lane.b32.xlu0 %v408_v10, %s4253_s9  ;;  %v695_v9 = vld [vmem:[%s4334_s7] sm:$0xf] }
  0x2f   : > { %429 = vrot.lane.b32.xlu2 %v410_v11, %s4253_s9 }
  0x36   : > { %433 = vrot.lane.b32.xlu1 %v412_v12, %s4253_s9  ;;  %431 = vrot.lane.b32.xlu0 %v411_v13, %s4253_s9 }
  0x37   : > { %435 = vrot.lane.b32.xlu2 %v413_v14, %s4253_s9  ;;  %v697_v14 = vld [vmem:[%s4334_s7 + $0x8] sm:$0xf] }
  0x3e   : > { %471 = vrot.lane.b32.xlu1 %v455_v15, %s4254_s10  ;;  %437 = vrot.lane.b32.xlu0 %v414_v16, %s4253_s9  ;;  %v696_v15 = vld [vmem:[%s4334_s7 + $0x4] sm:$0xf] }
  0x3f   : > { %473 = vrot.lane.b32.xlu2 %v456_v17, %s4254_s10  ;;  %v698_v17 = vld [vmem:[%s4334_s7 + $0xc] sm:$0xf] }
  0x46   : > { %477 = vrot.lane.b32.xlu1 %v458_v18, %s4254_s10  ;;  %475 = vrot.lane.b32.xlu0 %v457_v19, %s4254_s10 }
  0x47   : > { %479 = vrot.lane.b32.xlu2 %v459_v20, %s4254_s10 }
  0x4e   : > { %483 = vrot.lane.b32.xlu1 %v461_v21, %s4254_s10  ;;  %481 = vrot.lane.b32.xlu0 %v460_v22, %s4254_s10  ;;  %v813_v21 = vld [vmem:[%s4478_s30 + $0x18] sm:$0xf]  ;;  %v699_v22 = vld [vmem:[%s4334_s7 + $0x10] sm:$0xf] }
  0x4f   : > { %485 = vrot.lane.b32.xlu2 %v462_v23, %s4254_s10  ;;  %v814_v23 = vld [vmem:[%s4478_s30 + $0x1c] sm:$0xf] }
  0x56   : > { %521 = vrot.lane.b32.xlu1 %v504_v24, %s4255_s11  ;;  %519 = vrot.lane.b32.xlu0 %v503_v25, %s4255_s11 }
  0x57   : > { %523 = vrot.lane.b32.xlu2 %v505_v26, %s4255_s11 }
  0x5e   : > { %527 = vrot.lane.b32.xlu1 %v507_v27, %s4255_s11  ;;  %525 = vrot.lane.b32.xlu0 %v506_v28, %s4255_s11  ;;  %v812_v27 = vld [vmem:[%s4478_s30 + $0x14] sm:$0xf]  ;;  %v811_v28 = vld [vmem:[%s4478_s30 + $0x10] sm:$0xf] }
  0x5f   : > { %529 = vrot.lane.b32.xlu2 %v508_v29, %s4255_s11  ;;  %v809_v29 = vld [vmem:[%s4478_s30 + $0x8] sm:$0xf] }
  0x66   : > { %533 = vrot.lane.b32.xlu1 %v510_v30, %s4255_s11  ;;  %531 = vrot.lane.b32.xlu0 %v509_v31, %s4255_s11 }
  0x67   : > { %567 = vrot.lane.b32.xlu2 %v551_v32, %s4256_s12 }
  0x6e   : > { %571 = vrot.lane.b32.xlu1 %v553_v33, %s4256_s12  ;;  %569 = vrot.lane.b32.xlu0 %v552_v34, %s4256_s12  ;;  %v807_v33 = vld [vmem:[%s4478_s30] sm:$0xf]  ;;  %v810_v34 = vld [vmem:[%s4478_s30 + $0xc] sm:$0xf] }
  0x6f   : > { %573 = vrot.lane.b32.xlu2 %v554_v35, %s4256_s12  ;;  %v348_v35 = vld [vmem:[%s4334_s7 + $0x18] sm:$0xf] }
  0x70   : > { %357 = vst.msk [vmem:[#allocation2 + $0x18] sm:$0xf] %vm350_vm0, %v348_v35  ;;  %v906_v35 = vld [vmem:[%s4478_s30 + $0xc] sm:$0xf] }
  0x71   : > { %v384_v36 = vpop.permute.xlu2 %383 }
  0x72   : > { %403 = vst.msk [vmem:[#allocation2 + $0x30] sm:$0xf] %vm350_vm0, %v384_v36  ;;  %v349_v36 = vld [vmem:[%s4334_s7 + $0x1c] sm:$0xf] }
  0x73   : > { %358 = vst.msk [vmem:[#allocation2 + $0x1c] sm:$0xf] %vm350_vm0, %v349_v36 }
  0x76   : > { %577 = vrot.lane.b32.xlu1 %v556_v37, %s4256_s12  ;;  %575 = vrot.lane.b32.xlu0 %v555_v38, %s4256_s12  ;;  %v808_v37 = vld [vmem:[%s4478_s30 + $0x4] sm:$0xf] }
  0x77   : > { %579 = vrot.lane.b32.xlu2 %v557_v39, %s4256_s12 }
  0x79   : > { %v386_v40 = vpop.permute.xlu2 %385 }
  0x7a   : > { %404 = vst.msk [vmem:[#allocation2 + $0x34] sm:$0xf] %vm350_vm0, %v386_v40 }
  0x7e   : > { %615 = vrot.lane.b32.xlu1 %v599_v41, %s4257_s13  ;;  %581 = vrot.lane.b32.xlu0 %v558_v42, %s4256_s12  ;;  %v346_v41 = vld [vmem:[%s4334_s7 + $0x10] sm:$0xf] }
  0x7f   : > { %617 = vrot.lane.b32.xlu2 %v600_v43, %s4257_s13  ;;  %v347_v43 = vld [vmem:[%s4334_s7 + $0x14] sm:$0xf]  ;;  %355 = vst.msk [vmem:[#allocation2 + $0x10] sm:$0xf] %vm350_vm0, %v346_v41  ;;  %v1001_v41 = vld [vmem:[%s4478_s30 + $0x8] sm:$0xf] }
  0x80   : > { %356 = vst.msk [vmem:[#allocation2 + $0x14] sm:$0xf] %vm350_vm0, %v347_v43  ;;  %v1101_v43 = vld [vmem:[%s4478_s30 + $0x18] sm:$0xf] }
  0x81   : > { %v424_v44 = vpop.permute.xlu2 %423  ;;  %v4043_v8 = vld [vmem:[#allocation2 + $0x30] sm:$0xff] }
  0x82   : > { %447 = vst.msk [vmem:[#allocation2 + $0x40] sm:$0xf] %vm350_vm0, %v424_v44  ;;  %v702_v44 = vld [vmem:[%s4334_s7 + $0x1c] sm:$0xf] }
  0x86   : > { %621 = vrot.lane.b32.xlu1 %v602_v45, %s4257_s13  ;;  %619 = vrot.lane.b32.xlu0 %v601_v46, %s4257_s13  ;;  %v701_v45 = vld [vmem:[%s4334_s7 + $0x18] sm:$0xf]  ;;  %v344_v46 = vld [vmem:[%s4334_s7 + $0x8] sm:$0xf] }
  0x87   : > { %623 = vrot.lane.b32.xlu2 %v603_v47, %s4257_s13  ;;  %v345_v47 = vld [vmem:[%s4334_s7 + $0xc] sm:$0xf]  ;;  %353 = vst.msk [vmem:[#allocation2 + $0x8] sm:$0xf] %vm350_vm0, %v344_v46 }
  0x88   : > { %v380_v48 = vpop.permute.xlu1 %379  ;;  %v376_v49 = vpop.permute.xlu0 %375  ;;  %354 = vst.msk [vmem:[#allocation2 + $0xc] sm:$0xf] %vm350_vm0, %v345_v47 }
  0x89   : > { %401 = vst.msk [vmem:[#allocation2 + $0x28] sm:$0xf] %vm350_vm0, %v380_v48  ;;  %v430_v50 = vpop.permute.xlu2 %429 }
  0x8a   : > { %399 = vst.msk [vmem:[#allocation2 + $0x20] sm:$0xf] %vm350_vm0, %v376_v49  ;;  %v765_v49 = vld [vmem:[%s4478_s30 + $0x18] sm:$0xf] }
  0x8b   : > { %450 = vst.msk [vmem:[#allocation2 + $0x4c] sm:$0xf] %vm350_vm0, %v430_v50  ;;  %v4040_v50 = vld [vmem:[#allocation2 + $0x18] sm:$0xff] }
  0x8e   : > { %627 = vrot.lane.b32.xlu1 %v605_v51, %s4257_s13  ;;  %625 = vrot.lane.b32.xlu0 %v604_v52, %s4257_s13 }
  0x8f   : > { %629 = vrot.lane.b32.xlu2 %v606_v53, %s4257_s13 }
  0x90   : > { %v382_v54 = vpop.permute.xlu1 %381  ;;  %v378_v55 = vpop.permute.xlu0 %377 }
  0x91   : > { %402 = vst.msk [vmem:[#allocation2 + $0x2c] sm:$0xf] %vm350_vm0, %v382_v54  ;;  %v436_v56 = vpop.permute.xlu2 %435  ;;  %v342_v54 = vld [vmem:[%s4334_s7] sm:$0xf] }
  0x92   : > { %400 = vst.msk [vmem:[#allocation2 + $0x24] sm:$0xf] %vm350_vm0, %v378_v55 }
  0x93   : > { %453 = vst.msk [vmem:[#allocation2 + $0x58] sm:$0xf] %vm350_vm0, %v436_v56  ;;  %v343_v56 = vld [vmem:[%s4334_s7 + $0x4] sm:$0xf] }
  0x94   : > { %351 = vst.msk [vmem:[#allocation2] sm:$0xf] %vm350_vm0, %v342_v54 }
  0x95   : > { %352 = vst.msk [vmem:[#allocation2 + $0x4] sm:$0xf] %vm350_vm0, %v343_v56 }
  0x96   : > { %665 = vrot.lane.b32.xlu1 %v648_v57, %s4258_s14  ;;  %663 = vrot.lane.b32.xlu0 %v647_v58, %s4258_s14  ;;  %v700_v57 = vld [vmem:[%s4334_s7 + $0x14] sm:$0xf]  ;;  %v766_v58 = vld [vmem:[%s4478_s30 + $0x1c] sm:$0xf]  ;;  %s3315_s7 = sshll.u32 %s5429_s6, 3 }
  0x97   : > { %667 = vrot.lane.b32.xlu2 %v649_v59, %s4258_s14  ;;  %v4039_v59 = vld [vmem:[#allocation2 + $0x10] sm:$0xff]  ;;  %s329_s15 = sadd.s32 %s4328_s26, %s3315_s7  ;;  %s3317_s7 = sshll.u32 %s5425_s19, 2 }
  0x98   : > { %v390_v60 = vpop.permute.xlu1 %389  ;;  %v388_v61 = vpop.permute.xlu0 %387  ;;  %v4042_v12 = vld [vmem:[#allocation2 + $0x28] sm:$0xff]  ;;  %s3316_s16 = sshll.u32 %s329_s15, 2  ;;  %s338_s15 = sadd.s32 %s3317_s7, %s5431_s18 }
  0x99   : > { %406 = vst.msk [vmem:[#allocation2 + $0x3c] sm:$0xf] %vm350_vm0, %v390_v60  ;;  %v474_v62 = vpop.permute.xlu2 %473  ;;  %v4041_v16 = vld [vmem:[#allocation2 + $0x20] sm:$0xff]  ;;  %s4609_s27 = scalar_lea.vmem %s5407_s2, %s3316_s16  ;;  %s5413_s16 = smov 114  }
  0x9a   : > { %405 = vst.msk [vmem:[#allocation2 + $0x38] sm:$0xf] %vm350_vm0, %v388_v61  ;;  %v763_v61 = vld [vmem:[%s4478_s30 + $0x10] sm:$0xf] }
  0x9b   : > { %496 = vst.msk [vmem:[#allocation2 + $0x64] sm:$0xf] %vm350_vm0, %v474_v62 }
  0x9e   : > { %671 = vrot.lane.b32.xlu1 %v651_v63, %s4258_s14  ;;  %669 = vrot.lane.b32.xlu0 %v650_v0, %s4258_s14  ;;  %v4038_v0 = vld [vmem:[#allocation2 + $0x8] sm:$0xff] }
  0x9f   : > { %673 = vrot.lane.b32.xlu2 %v652_v1, %s4258_s14 }
  0xa0   : > { %v428_v2 = vpop.permute.xlu1 %427  ;;  %v426_v3 = vpop.permute.xlu0 %425 }
  0xa1   : > { %449 = vst.msk [vmem:[#allocation2 + $0x48] sm:$0xf] %vm350_vm0, %v428_v2  ;;  %v4044_v4 = vld [vmem:[#allocation2 + $0x38] sm:$0xff]  ;;  %v480_v5 = vpop.permute.xlu2 %479 }
  0xa2   : > { %448 = vst.msk [vmem:[#allocation2 + $0x44] sm:$0xf] %vm350_vm0, %v426_v3  ;;  %2752 = vmatpush.bf16.msra.mxu0 %v4044_v4  ;;  %4145 = vmatpush.bf16.msra.mxu2 %v4044_v4  ;;  %v761_v3 = vld [vmem:[%s4478_s30 + $0x8] sm:$0xf]  ;;  %v764_v4 = vld [vmem:[%s4478_s30 + $0x14] sm:$0xf] }
  0xa3   : > { %499 = vst.msk [vmem:[#allocation2 + $0x70] sm:$0xf] %vm350_vm0, %v480_v5  ;;  %v4037_v5 = vld [vmem:[#allocation2] sm:$0xff] }
  0xa6   : > { %677 = vrot.lane.b32.xlu1 %v654_v6, %s4258_s14  ;;  %675 = vrot.lane.b32.xlu0 %v653_v7, %s4258_s14  ;;  %v762_v7 = vld [vmem:[%s4478_s30 + $0xc] sm:$0xf] }
  0xa7   : > { %2753 = vmatpush.bf16.msra.mxu0 %v4043_v8  ;;  %4146 = vmatpush.bf16.msra.mxu2 %v4043_v8 }
  0xa8   : > { %v434_v10 = vpop.permute.xlu1 %433  ;;  %v432_v11 = vpop.permute.xlu0 %431  ;;  %711 = vrot.lane.b32.xlu2 %v695_v9, %s5411_s17 }
  0xa9   : > { %452 = vst.msk [vmem:[#allocation2 + $0x54] sm:$0xf] %vm350_vm0, %v434_v10  ;;  %v486_v13 = vpop.permute.xlu2 %485  ;;  %v4046_v10 = vld [vmem:[#allocation2 + $0x48] sm:$0xff] }
  0xaa   : > { %451 = vst.msk [vmem:[#allocation2 + $0x50] sm:$0xf] %vm350_vm0, %v432_v11 }
  0xab   : > { %2754 = vmatpush.bf16.msra.mxu0 %v4042_v12  ;;  %4147 = vmatpush.bf16.msra.mxu2 %v4042_v12  ;;  %502 = vst.msk [vmem:[#allocation2 + $0x7c] sm:$0xf] %vm350_vm0, %v486_v13  ;;  %v760_v12 = vld [vmem:[%s4478_s30 + $0x4] sm:$0xf]  ;;  %v759_v13 = vld [vmem:[%s4478_s30] sm:$0xf] }
  0xae   : > { %715 = vrot.lane.b32.xlu1 %v697_v14, %s5411_s17  ;;  %713 = vrot.lane.b32.xlu0 %v696_v15, %s5411_s17  ;;  %v4045_v14 = vld [vmem:[#allocation2 + $0x40] sm:$0xff]  ;;  %v909_v15 = vld [vmem:[%s4478_s30 + $0x18] sm:$0xf] }
  0xaf   : > { %2755 = vmatpush.bf16.msra.mxu0 %v4041_v16  ;;  %4148 = vmatpush.bf16.msra.mxu2 %v4041_v16 }
  0xb0   : > { %v472_v18 = vpop.permute.xlu1 %471  ;;  %v438_v19 = vpop.permute.xlu0 %437  ;;  %717 = vrot.lane.b32.xlu2 %v698_v17, %s5411_s17 }
  0xb1   : > { %495 = vst.msk [vmem:[#allocation2 + $0x60] sm:$0xf] %vm350_vm0, %v472_v18  ;;  %v524_v20 = vpop.permute.xlu2 %523  ;;  %v4047_v6 = vld [vmem:[#allocation2 + $0x50] sm:$0xff] }
  0xb2   : > { %454 = vst.msk [vmem:[#allocation2 + $0x5c] sm:$0xf] %vm350_vm0, %v438_v19  ;;  %v1005_v19 = vld [vmem:[%s4478_s30 + $0x18] sm:$0xf] }
  0xb3   : > { %545 = vst.msk [vmem:[#allocation2 + $0x88] sm:$0xf] %vm350_vm0, %v524_v20  ;;  %4149 = vmatpush.bf16.msra.mxu2 %v4040_v50  ;;  %2756 = vmatpush.bf16.msra.mxu0 %v4040_v50  ;;  %v910_v20 = vld [vmem:[%s4478_s30 + $0x1c] sm:$0xf] }
  0xb6   : > { %835 = vrot.lane.b32.xlu1 %v813_v21, %s4253_s9  ;;  %719 = vrot.lane.b32.xlu0 %v699_v22, %s5411_s17  ;;  %v1006_v21 = vld [vmem:[%s4478_s30 + $0x1c] sm:$0xf] }
  0xb7   : > { %4150 = vmatpush.bf16.msra.mxu2 %v4039_v59  ;;  %2757 = vmatpush.bf16.msra.mxu0 %v4039_v59  ;;  %v1165_v59 = vld [vmem:[%s4609_s27 + $0x18] sm:$0xf] }
  0xb8   : > { %v478_v24 = vpop.permute.xlu1 %477  ;;  %v476_v25 = vpop.permute.xlu0 %475  ;;  %837 = vrot.lane.b32.xlu2 %v814_v23, %s4253_s9  ;;  %v4049_v60 = vld [vmem:[#allocation2 + $0x60] sm:$0xff] }
  0xb9   : > { %498 = vst.msk [vmem:[#allocation2 + $0x6c] sm:$0xf] %vm350_vm0, %v478_v24  ;;  %v530_v26 = vpop.permute.xlu2 %529  ;;  %v4048_v1 = vld [vmem:[#allocation2 + $0x58] sm:$0xff] }
  0xba   : > { %497 = vst.msk [vmem:[#allocation2 + $0x68] sm:$0xf] %vm350_vm0, %v476_v25  ;;  %v908_v25 = vld [vmem:[%s4478_s30 + $0x14] sm:$0xf] }
  0xbb   : > { %548 = vst.msk [vmem:[#allocation2 + $0x94] sm:$0xf] %vm350_vm0, %v530_v26  ;;  %4151 = vmatpush.bf16.msra.mxu2 %v4038_v0  ;;  %2758 = vmatpush.bf16.msra.mxu0 %v4038_v0  ;;  %v907_v26 = vld [vmem:[%s4478_s30 + $0x10] sm:$0xf] }
  0xbe   : > { %833 = vrot.lane.b32.xlu1 %v812_v27, %s4253_s9  ;;  %831 = vrot.lane.b32.xlu0 %v811_v28, %s4253_s9  ;;  %v1003_v27 = vld [vmem:[%s4478_s30 + $0x10] sm:$0xf] }
  0xbf   : > { %4152 = vmatpush.bf16.msra.mxu2 %v4037_v5  ;;  %2759 = vmatpush.bf16.msra.mxu0 %v4037_v5  ;;  %v1099_v5 = vld [vmem:[%s4478_s30 + $0x10] sm:$0xf] }
  0xc0   : > { %v484_v30 = vpop.permute.xlu1 %483  ;;  %v482_v31 = vpop.permute.xlu0 %481  ;;  %827 = vrot.lane.b32.xlu2 %v809_v29, %s4253_s9 }
  0xc1   : > { %501 = vst.msk [vmem:[#allocation2 + $0x78] sm:$0xf] %vm350_vm0, %v484_v30  ;;  %v568_v32 = vpop.permute.xlu2 %567  ;;  %v4050_v53 = vld [vmem:[#allocation2 + $0x68] sm:$0xff] }
  0xc2   : > { %500 = vst.msk [vmem:[#allocation2 + $0x74] sm:$0xf] %vm350_vm0, %v482_v31 }
  0xc3   : > { %591 = vst.msk [vmem:[#allocation2 + $0xa0] sm:$0xf] %vm350_vm0, %v568_v32  ;;  %v905_v32 = vld [vmem:[%s4478_s30 + $0x8] sm:$0xf] }
  0xc6   : > { %823 = vrot.lane.b32.xlu1 %v807_v33, %s4253_s9  ;;  %829 = vrot.lane.b32.xlu0 %v810_v34, %s4253_s9  ;;  %v1004_v33 = vld [vmem:[%s4478_s30 + $0x14] sm:$0xf] }
  0xc8   : > { %v522_v38 = vpop.permute.xlu1 %521  ;;  %v520_v39 = vpop.permute.xlu0 %519  ;;  %v4052_v40 = vld [vmem:[#allocation2 + $0x78] sm:$0xff]  ;;  %825 = vrot.lane.b32.xlu2 %v808_v37, %s4253_s9 }
  0xc9   : > { %544 = vst.msk [vmem:[#allocation2 + $0x84] sm:$0xf] %vm350_vm0, %v522_v38  ;;  %2781 = vmatpush.bf16.msra.mxu1 %v4052_v40  ;;  %4153 = vmatpush.bf16.msra.mxu3 %v4052_v40  ;;  %v574_v42 = vpop.permute.xlu2 %573  ;;  %v4051_v48 = vld [vmem:[#allocation2 + $0x70] sm:$0xff]  ;;  %v1002_v40 = vld [vmem:[%s4478_s30 + $0xc] sm:$0xf] }
  0xca   : > { %543 = vst.msk [vmem:[#allocation2 + $0x80] sm:$0xf] %vm350_vm0, %v520_v39 }
  0xcb   : > { %594 = vst.msk [vmem:[#allocation2 + $0xac] sm:$0xf] %vm350_vm0, %v574_v42 }
  0xcd   : > { %2782 = vmatpush.bf16.msra.mxu1 %v4051_v48  ;;  %4154 = vmatpush.bf16.msra.mxu3 %v4051_v48  ;;  %v903_v48 = vld [vmem:[%s4478_s30] sm:$0xf] }
  0xce   : > { %725 = vrot.lane.b32.xlu1 %v702_v44, %s5411_s17  ;;  %723 = vrot.lane.b32.xlu0 %v701_v45, %s5411_s17 }
  0xd0   : > { %v528_v51 = vpop.permute.xlu1 %527  ;;  %v526_v52 = vpop.permute.xlu0 %525  ;;  %787 = vrot.lane.b32.xlu2 %v765_v49, %s4252_s8  ;;  %v1102_v49 = vld [vmem:[%s4478_s30 + $0x1c] sm:$0xf] }
  0xd1   : > { %547 = vst.msk [vmem:[#allocation2 + $0x90] sm:$0xf] %vm350_vm0, %v528_v51  ;;  %v580_v55 = vpop.permute.xlu2 %579  ;;  %2783 = vmatpush.bf16.msra.mxu1 %v4050_v53  ;;  %4155 = vmatpush.bf16.msra.mxu3 %v4050_v53  ;;  %v904_v51 = vld [vmem:[%s4478_s30 + $0x4] sm:$0xf] }
  0xd2   : > { %546 = vst.msk [vmem:[#allocation2 + $0x8c] sm:$0xf] %vm350_vm0, %v526_v52 }
  0xd3   : > { %597 = vst.msk [vmem:[#allocation2 + $0xb8] sm:$0xf] %vm350_vm0, %v580_v55  ;;  %v749_v55 = vld [vmem:[%s4478_s30 + $0x18] sm:$0xf] }
  0xd4   : > { %757 = vst.msk [vmem:[#allocation2 + $0x138] sm:$0xf] %vm350_vm0, %v749_v55  ;;  %v1095_v55 = vld [vmem:[%s4478_s30] sm:$0xf] }
  0xd5   : > { %2784 = vmatpush.bf16.msra.mxu1 %v4049_v60  ;;  %4156 = vmatpush.bf16.msra.mxu3 %v4049_v60  ;;  %v4053_v60 = vld [vmem:[#allocation2 + $0x80] sm:$0xff] }
  0xd6   : > { %721 = vrot.lane.b32.xlu1 %v700_v57, %s5411_s17  ;;  %789 = vrot.lane.b32.xlu0 %v766_v58, %s4252_s8  ;;  %v750_v57 = vld [vmem:[%s4478_s30 + $0x1c] sm:$0xf] }
  0xd7   : > { %v1166_v58 = vld [vmem:[%s4609_s27 + $0x1c] sm:$0xf]  ;;  %758 = vst.msk [vmem:[#allocation2 + $0x13c] sm:$0xf] %vm350_vm0, %v750_v57 }
  0xd8   : > { %v534_v62 = vpop.permute.xlu1 %533  ;;  %v532_v63 = vpop.permute.xlu0 %531  ;;  %783 = vrot.lane.b32.xlu2 %v763_v61, %s4252_s8  ;;  %v4055_v50 = vld [vmem:[#allocation2 + $0x90] sm:$0xff]  ;;  %v999_v61 = vld [vmem:[%s4478_s30] sm:$0xf] }
  0xd9   : > { %550 = vst.msk [vmem:[#allocation2 + $0x9c] sm:$0xf] %vm350_vm0, %v534_v62  ;;  %v618_v2 = vpop.permute.xlu2 %617  ;;  %2785 = vmatpush.bf16.msra.mxu1 %v4048_v1  ;;  %4157 = vmatpush.bf16.msra.mxu3 %v4048_v1  ;;  %v4054_v54 = vld [vmem:[#allocation2 + $0x88] sm:$0xff]  ;;  %v747_v62 = vld [vmem:[%s4478_s30 + $0x10] sm:$0xf] }
  0xda   : > { %549 = vst.msk [vmem:[#allocation2 + $0x98] sm:$0xf] %vm350_vm0, %v532_v63  ;;  %v748_v63 = vld [vmem:[%s4478_s30 + $0x14] sm:$0xf] }
  0xdb   : > { %640 = vst.msk [vmem:[#allocation2 + $0xc4] sm:$0xf] %vm350_vm0, %v618_v2  ;;  %v745_v2 = vld [vmem:[%s4478_s30 + $0x8] sm:$0xf] }
  0xdc   : > { %755 = vst.msk [vmem:[#allocation2 + $0x130] sm:$0xf] %vm350_vm0, %v747_v62 }
  0xdd   : > { %2786 = vmatpush.bf16.msra.mxu1 %v4047_v6  ;;  %4158 = vmatpush.bf16.msra.mxu3 %v4047_v6  ;;  %756 = vst.msk [vmem:[#allocation2 + $0x134] sm:$0xf] %vm350_vm0, %v748_v63  ;;  %v1000_v6 = vld [vmem:[%s4478_s30 + $0x4] sm:$0xf] }
  0xde   : > { %779 = vrot.lane.b32.xlu1 %v761_v3, %s4252_s8  ;;  %785 = vrot.lane.b32.xlu0 %v764_v4, %s4252_s8  ;;  %v746_v4 = vld [vmem:[%s4478_s30 + $0xc] sm:$0xf]  ;;  %753 = vst.msk [vmem:[#allocation2 + $0x128] sm:$0xf] %vm350_vm0, %v745_v2  ;;  %v4009_v63 = vld [vmem:[%s5408_s3 + $0xe4] sm:$0xf] }
  0xdf   : > { %754 = vst.msk [vmem:[#allocation2 + $0x12c] sm:$0xf] %vm350_vm0, %v746_v4  ;;  %v1096_v2 = vld [vmem:[%s4478_s30 + $0x4] sm:$0xf]  ;;  %v858_v4 = vld [vmem:[%s4478_s30 + $0xc] sm:$0xf] }
  0xe0   : > { %v572_v8 = vpop.permute.xlu1 %571  ;;  %v570_v9 = vpop.permute.xlu0 %569  ;;  %781 = vrot.lane.b32.xlu2 %v762_v7, %s4252_s8  ;;  %v1100_v7 = vld [vmem:[%s4478_s30 + $0x14] sm:$0xf] }
  0xe1   : > { %593 = vst.msk [vmem:[#allocation2 + $0xa8] sm:$0xf] %vm350_vm0, %v572_v8  ;;  %v624_v11 = vpop.permute.xlu2 %623  ;;  %2787 = vmatpush.bf16.msra.mxu1 %v4046_v10  ;;  %4159 = vmatpush.bf16.msra.mxu3 %v4046_v10  ;;  %v4056_v46 = vld [vmem:[#allocation2 + $0x98] sm:$0xff]  ;;  %v744_v10 = vld [vmem:[%s4478_s30 + $0x4] sm:$0xf] }
  0xe2   : > { %592 = vst.msk [vmem:[#allocation2 + $0xa4] sm:$0xf] %vm350_vm0, %v570_v9  ;;  %v4076_v8 = vld [vmem:[#allocation2 + $0x138] sm:$0xff]  ;;  %v743_v9 = vld [vmem:[%s4478_s30] sm:$0xf] }
  0xe3   : > { %643 = vst.msk [vmem:[#allocation2 + $0xd0] sm:$0xf] %vm350_vm0, %v624_v11  ;;  %2868 = vmatpush.bf16.msrb.mxu0 %v4076_v8 }
  0xe4   : > { %751 = vst.msk [vmem:[#allocation2 + $0x120] sm:$0xf] %vm350_vm0, %v743_v9  ;;  %v4075_v11 = vld [vmem:[#allocation2 + $0x130] sm:$0xff] }
  0xe5   : > { %2788 = vmatpush.bf16.msra.mxu1 %v4045_v14  ;;  %4160 = vmatpush.bf16.msra.mxu3 %v4045_v14  ;;  %752 = vst.msk [vmem:[#allocation2 + $0x124] sm:$0xf] %vm350_vm0, %v744_v10  ;;  %v1160_v10 = vld [vmem:[%s4609_s27 + $0x4] sm:$0xf] }
  0xe6   : > { %777 = vrot.lane.b32.xlu1 %v760_v12, %s4252_s8  ;;  %775 = vrot.lane.b32.xlu0 %v759_v13, %s4252_s8 }
  0xe7   : > { %2869 = vmatpush.bf16.msrb.mxu0 %v4075_v11  ;;  %v1159_v11 = vld [vmem:[%s4609_s27] sm:$0xf] }
  0xe8   : > { %v578_v16 = vpop.permute.xlu1 %577  ;;  %v576_v17 = vpop.permute.xlu0 %575  ;;  %931 = vrot.lane.b32.xlu2 %v909_v15, %s4255_s11  ;;  %v4058_v38 = vld [vmem:[#allocation2 + $0xa8] sm:$0xff] }
  0xe9   : > { %596 = vst.msk [vmem:[#allocation2 + $0xb4] sm:$0xf] %vm350_vm0, %v578_v16  ;;  %v630_v18 = vpop.permute.xlu2 %629  ;;  %v4057_v42 = vld [vmem:[#allocation2 + $0xa0] sm:$0xff]  ;;  %v862_v16 = vld [vmem:[%s4478_s30 + $0x1c] sm:$0xf] }
  0xea   : > { %595 = vst.msk [vmem:[#allocation2 + $0xb0] sm:$0xf] %vm350_vm0, %v576_v17  ;;  %v861_v17 = vld [vmem:[%s4478_s30 + $0x18] sm:$0xf] }
  0xeb   : > { %646 = vst.msk [vmem:[#allocation2 + $0xdc] sm:$0xf] %vm350_vm0, %v630_v18  ;;  %v4074_v18 = vld [vmem:[#allocation2 + $0x128] sm:$0xff] }
  0xec   : > { %2870 = vmatpush.bf16.msrb.mxu0 %v4074_v18 }
  0xee   : > { %1027 = vrot.lane.b32.xlu1 %v1005_v19, %s4257_s13  ;;  %933 = vrot.lane.b32.xlu0 %v910_v20, %s4255_s11  ;;  %v1163_v20 = vld [vmem:[%s4609_s27 + $0x10] sm:$0xf] }
  0xf0   : > { %v616_v22 = vpop.permute.xlu1 %615  ;;  %v582_v23 = vpop.permute.xlu0 %581  ;;  %1029 = vrot.lane.b32.xlu2 %v1006_v21, %s4257_s13  ;;  %v4073_v21 = vld [vmem:[#allocation2 + $0x120] sm:$0xff] }
  0xf1   : > { %639 = vst.msk [vmem:[#allocation2 + $0xc0] sm:$0xf] %vm350_vm0, %v616_v22  ;;  %v668_v24 = vpop.permute.xlu2 %667  ;;  %v4059_v34 = vld [vmem:[#allocation2 + $0xb0] sm:$0xff]  ;;  %2871 = vmatpush.bf16.msrb.mxu0 %v4073_v21 }
  0xf2   : > { %598 = vst.msk [vmem:[#allocation2 + $0xbc] sm:$0xf] %vm350_vm0, %v582_v23 }
  0xf3   : > { %689 = vst.msk [vmem:[#allocation2 + $0xe8] sm:$0xf] %vm350_vm0, %v668_v24 }
  0xf6   : > { %929 = vrot.lane.b32.xlu1 %v908_v25, %s4255_s11  ;;  %927 = vrot.lane.b32.xlu0 %v907_v26, %s4255_s11  ;;  %v957_v26 = vld [vmem:[%s4478_s30 + $0x18] sm:$0xf] }
  0xf8   : > { %v622_v28 = vpop.permute.xlu1 %621  ;;  %v620_v29 = vpop.permute.xlu0 %619  ;;  %1023 = vrot.lane.b32.xlu2 %v1003_v27, %s4257_s13  ;;  %v1164_v27 = vld [vmem:[%s4609_s27 + $0x14] sm:$0xf] }
  0xf9   : > { %642 = vst.msk [vmem:[#allocation2 + $0xcc] sm:$0xf] %vm350_vm0, %v622_v28  ;;  %v4060_v30 = vld [vmem:[#allocation2 + $0xb8] sm:$0xff]  ;;  %v674_v31 = vpop.permute.xlu2 %673 }
  0xfa   : > { %641 = vst.msk [vmem:[#allocation2 + $0xc8] sm:$0xf] %vm350_vm0, %v620_v29  ;;  %2810 = vmatpush.bf16.msrb.mxu2 %v4060_v30  ;;  %v958_v29 = vld [vmem:[%s4478_s30 + $0x1c] sm:$0xf] }
  0xfb   : > { %692 = vst.msk [vmem:[#allocation2 + $0xf4] sm:$0xf] %vm350_vm0, %v674_v31 }
  0xfe   : > { %923 = vrot.lane.b32.xlu1 %v905_v32, %s4255_s11  ;;  %1025 = vrot.lane.b32.xlu0 %v1004_v33, %s4257_s13 }
  0xff   : > { %2811 = vmatpush.bf16.msrb.mxu2 %v4059_v34 }
 0x100   : > { %v628_v36 = vpop.permute.xlu1 %627  ;;  %v626_v37 = vpop.permute.xlu0 %625  ;;  %925 = vrot.lane.b32.xlu2 %v906_v35, %s4255_s11  ;;  %v1098_v35 = vld [vmem:[%s4478_s30 + $0xc] sm:$0xf] }
 0x101   : > { %645 = vst.msk [vmem:[#allocation2 + $0xd8] sm:$0xf] %vm350_vm0, %v628_v36  ;;  %v1097_v36 = vld [vmem:[%s4478_s30 + $0x8] sm:$0xf] }
 0x102   : > { %644 = vst.msk [vmem:[#allocation2 + $0xd4] sm:$0xf] %vm350_vm0, %v626_v37  ;;  %v712_v39 = vpop.permute.xlu2 %711 }
 0x103   : > { %2812 = vmatpush.bf16.msrb.mxu2 %v4058_v38  ;;  %735 = vst.msk [vmem:[#allocation2 + $0x100] sm:$0xf] %vm350_vm0, %v712_v39  ;;  %v859_v38 = vld [vmem:[%s4478_s30 + $0x10] sm:$0xf] }
 0x106   : > { %1021 = vrot.lane.b32.xlu1 %v1002_v40, %s4257_s13  ;;  %1019 = vrot.lane.b32.xlu0 %v1001_v41, %s4257_s13  ;;  %v4062_v41 = vld [vmem:[#allocation2 + $0xc8] sm:$0xff] }
 0x107   : > { %2813 = vmatpush.bf16.msrb.mxu2 %v4057_v42 }
 0x108   : > { %v666_v44 = vpop.permute.xlu1 %665  ;;  %v664_v45 = vpop.permute.xlu0 %663  ;;  %1123 = vrot.lane.b32.xlu2 %v1101_v43, %s5411_s17  ;;  %v4064_v33 = vld [vmem:[#allocation2 + $0xd8] sm:$0xff] }
 0x109   : > { %688 = vst.msk [vmem:[#allocation2 + $0xe4] sm:$0xf] %vm350_vm0, %v666_v44  ;;  %v4063_v37 = vld [vmem:[#allocation2 + $0xd0] sm:$0xff]  ;;  %v1161_v44 = vld [vmem:[%s4609_s27 + $0x8] sm:$0xf] }
 0x10a   : > { %687 = vst.msk [vmem:[#allocation2 + $0xe0] sm:$0xf] %vm350_vm0, %v664_v45  ;;  %v718_v47 = vpop.permute.xlu2 %717  ;;  %v860_v45 = vld [vmem:[%s4478_s30 + $0x14] sm:$0xf] }
 0x10b   : > { %2814 = vmatpush.bf16.msrb.mxu2 %v4056_v46  ;;  %738 = vst.msk [vmem:[#allocation2 + $0x10c] sm:$0xf] %vm350_vm0, %v718_v47  ;;  %v4061_v46 = vld [vmem:[#allocation2 + $0xc0] sm:$0xff]  ;;  %v1162_v47 = vld [vmem:[%s4609_s27 + $0xc] sm:$0xf] }
 0x10e   : > { %919 = vrot.lane.b32.xlu1 %v903_v48, %s4255_s11  ;;  %1125 = vrot.lane.b32.xlu0 %v1102_v49, %s5411_s17 }
 0x10f   : > { %2815 = vmatpush.bf16.msrb.mxu2 %v4055_v50 }
 0x110   : > { %v672_v52 = vpop.permute.xlu1 %671  ;;  %v670_v53 = vpop.permute.xlu0 %669  ;;  %921 = vrot.lane.b32.xlu2 %v904_v51, %s4255_s11 }
 0x111   : > { %691 = vst.msk [vmem:[#allocation2 + $0xf0] sm:$0xf] %vm350_vm0, %v672_v52  ;;  %v4065_v28 = vld [vmem:[#allocation2 + $0xe0] sm:$0xff]  ;;  %v956_v52 = vld [vmem:[%s4478_s30 + $0x14] sm:$0xf] }
 0x112   : > { %690 = vst.msk [vmem:[#allocation2 + $0xec] sm:$0xf] %vm350_vm0, %v670_v53  ;;  %v838_v56 = vpop.permute.xlu2 %837  ;;  %v955_v53 = vld [vmem:[%s4478_s30 + $0x10] sm:$0xf] }
 0x113   : > { %2816 = vmatpush.bf16.msrb.mxu2 %v4054_v54  ;;  %854 = vst.msk [vmem:[#allocation2 + $0x17c] sm:$0xf] %vm350_vm0, %v838_v56 }
 0x116   : > { %1189 = vrot.lane.b32.xlu1 %v1166_v58, %s4252_s8  ;;  %1187 = vrot.lane.b32.xlu0 %v1165_v59, %s4252_s8  ;;  %v3433_v58 = vld [vmem:[%s5408_s3 + $0xe0] sm:$0xf]  ;;  %v4016_v59 = vld [vmem:[%s5408_s3 + $0x114] sm:$0xf0] }
 0x117   : > { %2817 = vmatpush.bf16.msrb.mxu2 %v4053_v60 }
 0x118   : > { %v678_v0 = vpop.permute.xlu1 %677  ;;  %v676_v1 = vpop.permute.xlu0 %675  ;;  %1015 = vrot.lane.b32.xlu2 %v999_v61, %s4257_s13  ;;  %v4067_v19 = vld [vmem:[#allocation2 + $0xf0] sm:$0xff]  ;;  %v3434_v61 = vor.u32 %v4016_v59, %v3433_v58  ;;  %v1261_v59 = vld [vmem:[%s4609_s27 + $0x18] sm:$0xf] }
 0x119   : > { %694 = vst.msk [vmem:[#allocation2 + $0xfc] sm:$0xf] %vm350_vm0, %v678_v0  ;;  %v4066_v24 = vld [vmem:[#allocation2 + $0xe8] sm:$0xff]  ;;  %v3435_v0 = vld [vmem:[%s5408_s3 + $0x118] sm:$0xf0] }
 0x11a   : > { %693 = vst.msk [vmem:[#allocation2 + $0xf8] sm:$0xf] %vm350_vm0, %v676_v1  ;;  %v828_v3 = vpop.permute.xlu2 %827  ;;  %v857_v1 = vld [vmem:[%s4478_s30 + $0x8] sm:$0xf]  ;;  %2770 = vmatmul.bf16.vlgmr.msra.gmra.mxu2 %v3434_v61  ;;  %v4023_v61 = vld [vmem:[%s5408_s3 + $0x154] sm:$0xf] }
 0x11b   : > { %849 = vst.msk [vmem:[#allocation2 + $0x168] sm:$0xf] %vm350_vm0, %v828_v3  ;;  %v3438_v3 = vor.u32 %v4009_v63, %v3435_v0  ;;  %v1262_v63 = vld [vmem:[%s4609_s27 + $0x1c] sm:$0xf] }
 0x11d   : > { %2799 = vmatmul.bf16.vlgmr.msra.gmra.mxu3 %v3438_v3 }
 0x11e   : > { %1119 = vrot.lane.b32.xlu1 %v1099_v5, %s5411_s17  ;;  %1017 = vrot.lane.b32.xlu0 %v1000_v6, %s4257_s13 }
 0x120   : > { %v716_v12 = vpop.permute.xlu1 %715  ;;  %v714_v13 = vpop.permute.xlu0 %713  ;;  %1121 = vrot.lane.b32.xlu2 %v1100_v7, %s5411_s17 }
 0x121   : > { %737 = vst.msk [vmem:[#allocation2 + $0x108] sm:$0xf] %vm350_vm0, %v716_v12  ;;  %v4068_v14 = vld [vmem:[#allocation2 + $0xf8] sm:$0xff] }
 0x122   : > { %736 = vst.msk [vmem:[#allocation2 + $0x104] sm:$0xf] %vm350_vm0, %v714_v13  ;;  %v826_v15 = vpop.permute.xlu2 %825  ;;  %2839 = vmatpush.bf16.msrb.mxu3 %v4068_v14  ;;  %v953_v13 = vld [vmem:[%s4478_s30 + $0x8] sm:$0xf] }
 0x123   : > { %848 = vst.msk [vmem:[#allocation2 + $0x164] sm:$0xf] %vm350_vm0, %v826_v15 }
 0x126   : > { %885 = vrot.lane.b32.xlu1 %v862_v16, %s4254_s10  ;;  %883 = vrot.lane.b32.xlu0 %v861_v17, %s4254_s10 }
 0x127   : > { %2840 = vmatpush.bf16.msrb.mxu3 %v4067_v19  ;;  %v1053_v19 = vld [vmem:[%s4478_s30 + $0x18] sm:$0xf] }
 0x128   : > { %v836_v22 = vpop.permute.xlu1 %835  ;;  %v720_v23 = vpop.permute.xlu0 %719  ;;  %1183 = vrot.lane.b32.xlu2 %v1163_v20, %s4252_s8  ;;  %v4070_v12 = vld [vmem:[#allocation2 + $0x108] sm:$0xff] }
 0x129   : > { %853 = vst.msk [vmem:[#allocation2 + $0x178] sm:$0xf] %vm350_vm0, %v836_v22  ;;  %v4069_v16 = vld [vmem:[#allocation2 + $0x100] sm:$0xff]  ;;  %v954_v20 = vld [vmem:[%s4478_s30 + $0xc] sm:$0xf] }
 0x12a   : > { %739 = vst.msk [vmem:[#allocation2 + $0x110] sm:$0xf] %vm350_vm0, %v720_v23  ;;  %v788_v25 = vpop.permute.xlu2 %787  ;;  %v1054_v22 = vld [vmem:[%s4478_s30 + $0x1c] sm:$0xf] }
 0x12b   : > { %2841 = vmatpush.bf16.msrb.mxu3 %v4066_v24  ;;  %805 = vst.msk [vmem:[#allocation2 + $0x158] sm:$0xf] %vm350_vm0, %v788_v25 }
 0x12e   : > { %979 = vrot.lane.b32.xlu1 %v957_v26, %s4256_s12  ;;  %1185 = vrot.lane.b32.xlu0 %v1164_v27, %s4252_s8  ;;  %v856_v27 = vld [vmem:[%s4478_s30 + $0x4] sm:$0xf] }
 0x12f   : > { %2842 = vmatpush.bf16.msrb.mxu3 %v4065_v28  ;;  %v855_v28 = vld [vmem:[%s4478_s30] sm:$0xf] }
 0x130   : > { %v834_v30 = vpop.permute.xlu1 %833  ;;  %v832_v31 = vpop.permute.xlu0 %831  ;;  %v4084_v32 = vld [vmem:[#allocation2 + $0x178] sm:$0xff]  ;;  %981 = vrot.lane.b32.xlu2 %v958_v29, %s4256_s12  ;;  %v951_v29 = vld [vmem:[%s4478_s30] sm:$0xf] }
 0x131   : > { %852 = vst.msk [vmem:[#allocation2 + $0x174] sm:$0xf] %vm350_vm0, %v834_v30  ;;  %2897 = vmatpush.bf16.msrb.mxu1 %v4084_v32 }
 0x132   : > { %851 = vst.msk [vmem:[#allocation2 + $0x170] sm:$0xf] %vm350_vm0, %v832_v31  ;;  %v784_v34 = vpop.permute.xlu2 %783 }
 0x133   : > { %2843 = vmatpush.bf16.msrb.mxu3 %v4064_v33  ;;  %803 = vst.msk [vmem:[#allocation2 + $0x150] sm:$0xf] %vm350_vm0, %v784_v34  ;;  %v3321_v33 = vld [vmem:[%s5408_s3] sm:$0xf]  ;;  %v3988_v34 = vld [vmem:[%s5408_s3 + $0x34] sm:$0xf0] }
 0x136   : > { %1117 = vrot.lane.b32.xlu1 %v1098_v35, %s5411_s17  ;;  %1115 = vrot.lane.b32.xlu0 %v1097_v36, %s5411_s17  ;;  %v3322_v36 = vor.u32 %v3988_v34, %v3321_v33  ;;  %v1257_v33 = vld [vmem:[%s4609_s27 + $0x8] sm:$0xf]  ;;  %v3385_v34 = vld [vmem:[%s5408_s3 + $0x78] sm:$0xf] }
 0x137   : > { %2844 = vmatpush.bf16.msrb.mxu3 %v4063_v37 }
 0x138   : > { %v824_v39 = vpop.permute.xlu1 %823  ;;  %v830_v40 = vpop.permute.xlu0 %829  ;;  %879 = vrot.lane.b32.xlu2 %v859_v38, %s4254_s10  ;;  %v1051_v38 = vld [vmem:[%s4478_s30 + $0x10] sm:$0xf]  ;;  %2760 = vmatmul.bf16.vlgmr.msra.gmra.mxu0 %v3322_v36  ;;  %v1353_v36 = vld [vmem:[%s4609_s27 + $0x8] sm:$0xf] }
 0x139   : > { %847 = vst.msk [vmem:[#allocation2 + $0x160] sm:$0xf] %vm350_vm0, %v824_v39  ;;  %v4083_v42 = vld [vmem:[#allocation2 + $0x170] sm:$0xff]  ;;  %v952_v39 = vld [vmem:[%s4478_s30 + $0x4] sm:$0xf] }
 0x13a   : > { %850 = vst.msk [vmem:[#allocation2 + $0x16c] sm:$0xf] %vm350_vm0, %v830_v40  ;;  %v782_v43 = vpop.permute.xlu2 %781  ;;  %2898 = vmatpush.bf16.msrb.mxu1 %v4083_v42  ;;  %v1052_v40 = vld [vmem:[%s4478_s30 + $0x14] sm:$0xf] }
 0x13b   : > { %2845 = vmatpush.bf16.msrb.mxu3 %v4062_v41  ;;  %802 = vst.msk [vmem:[#allocation2 + $0x14c] sm:$0xf] %vm350_vm0, %v782_v43  ;;  %v3981_v43 = vld [vmem:[%s5408_s3 + $0x4] sm:$0xf] }
 0x13e   : > { %1179 = vrot.lane.b32.xlu1 %v1161_v44, %s4252_s8  ;;  %881 = vrot.lane.b32.xlu0 %v860_v45, %s4254_s10  ;;  %v3323_v44 = vld [vmem:[%s5408_s3 + $0x38] sm:$0xf0] }
 0x13f   : > { %2846 = vmatpush.bf16.msrb.mxu3 %v4061_v46  ;;  %v3326_v46 = vor.u32 %v3981_v43, %v3323_v44  ;;  %v1354_v44 = vld [vmem:[%s4609_s27 + $0xc] sm:$0xf] }
 0x140   : > { %v726_v48 = vpop.permute.xlu1 %725  ;;  %v724_v49 = vpop.permute.xlu0 %723  ;;  %1181 = vrot.lane.b32.xlu2 %v1162_v47, %s4252_s8  ;;  %v4081_v54 = vld [vmem:[#allocation2 + $0x160] sm:$0xff] }
 0x141   : > { %742 = vst.msk [vmem:[#allocation2 + $0x11c] sm:$0xf] %vm350_vm0, %v726_v48  ;;  %v4082_v50 = vld [vmem:[#allocation2 + $0x168] sm:$0xff]  ;;  %2789 = vmatmul.bf16.vlgmr.msra.gmra.mxu1 %v3326_v46  ;;  %v3996_v46 = vld [vmem:[%s5408_s3 + $0x7c] sm:$0xf] }
 0x142   : > { %741 = vst.msk [vmem:[#allocation2 + $0x118] sm:$0xf] %vm350_vm0, %v724_v49  ;;  %v932_v51 = vpop.permute.xlu2 %931  ;;  %2899 = vmatpush.bf16.msrb.mxu1 %v4082_v50  ;;  %v1050_v48 = vld [vmem:[%s4478_s30 + $0xc] sm:$0xf]  ;;  %v1049_v49 = vld [vmem:[%s4478_s30 + $0x8] sm:$0xf] }
 0x143   : > { %949 = vst.msk [vmem:[#allocation2 + $0x1b8] sm:$0xf] %vm350_vm0, %v932_v51  ;;  %v3489_v50 = vld [vmem:[%s5408_s3 + $0x150] sm:$0xf]  ;;  %v4030_v51 = vld [vmem:[%s5408_s3 + $0x184] sm:$0xf0] }
 0x146   : > { %977 = vrot.lane.b32.xlu1 %v956_v52, %s4256_s12  ;;  %975 = vrot.lane.b32.xlu0 %v955_v53, %s4256_s12  ;;  %v1047_v52 = vld [vmem:[%s4478_s30] sm:$0xf]  ;;  %v3490_v53 = vor.u32 %v4030_v51, %v3489_v50  ;;  %v3990_v50 = vld [vmem:[%s5408_s3 + $0x44] sm:$0xf0] }
 0x147   : > { %2900 = vmatpush.bf16.msrb.mxu1 %v4081_v54  ;;  %v3983_v51 = vld [vmem:[%s5408_s3 + $0x14] sm:$0xf] }
 0x148   : > { %v722_v56 = vpop.permute.xlu1 %721  ;;  %v790_v57 = vpop.permute.xlu0 %789  ;;  %1111 = vrot.lane.b32.xlu2 %v1095_v55, %s5411_s17  ;;  %2775 = vmatmul.bf16.gmra.mxu2 %v3490_v53 }
 0x149   : > { %740 = vst.msk [vmem:[#allocation2 + $0x114] sm:$0xf] %vm350_vm0, %v722_v56  ;;  %v4072_v60 = vld [vmem:[#allocation2 + $0x118] sm:$0xff] }
 0x14a   : > { %806 = vst.msk [vmem:[#allocation2 + $0x15c] sm:$0xf] %vm350_vm0, %v790_v57  ;;  %v1030_v62 = vpop.permute.xlu2 %1029  ;;  %2872 = vmatpush.bf16.msrb.mxu0 %v4072_v60  ;;  %v1048_v60 = vld [vmem:[%s4478_s30 + $0x4] sm:$0xf] }
 0x14b   : > { %1046 = vst.msk [vmem:[#allocation2 + $0x1fc] sm:$0xf] %vm350_vm0, %v1030_v62  ;;  %v3491_v62 = vld [vmem:[%s5408_s3 + $0x188] sm:$0xf0] }
 0x14c   : > { %v3494_v0 = vor.u32 %v4023_v61, %v3491_v62  ;;  %v3441_v61 = vld [vmem:[%s5408_s3 + $0xe8] sm:$0xf]  ;;  %v4017_v62 = vld [vmem:[%s5408_s3 + $0x11c] sm:$0xf0] }
 0x14e   : > { %875 = vrot.lane.b32.xlu1 %v857_v1, %s4254_s10  ;;  %1113 = vrot.lane.b32.xlu0 %v1096_v2, %s5411_s17 }
 0x14f   : > { %2804 = vmatmul.bf16.gmra.mxu3 %v3494_v0  ;;  %v3442_v0 = vor.u32 %v4017_v62, %v3441_v61  ;;  %v3505_v61 = vld [vmem:[%s5408_s3 + $0x160] sm:$0xf]  ;;  %v4032_v62 = vld [vmem:[%s5408_s3 + $0x194] sm:$0xf0] }
 0x150   : > { %v780_v5 = vpop.permute.xlu1 %779  ;;  %v786_v6 = vpop.permute.xlu0 %785  ;;  %v4071_v7 = vld [vmem:[#allocation2 + $0x110] sm:$0xff]  ;;  %877 = vrot.lane.b32.xlu2 %v858_v4, %s4254_s10 }
 0x151   : > { %801 = vst.msk [vmem:[#allocation2 + $0x148] sm:$0xf] %vm350_vm0, %v780_v5  ;;  %v4080_v8 = vld [vmem:[#allocation2 + $0x158] sm:$0xff]  ;;  %2873 = vmatpush.bf16.msrb.mxu0 %v4071_v7  ;;  %v3329_v7 = vld [vmem:[%s5408_s3 + $0x8] sm:$0xf] }
 0x152   : > { %804 = vst.msk [vmem:[#allocation2 + $0x154] sm:$0xf] %vm350_vm0, %v786_v6  ;;  %v1024_v9 = vpop.permute.xlu2 %1023  ;;  %2901 = vmatpush.bf16.msrb.mxu1 %v4080_v8  ;;  %v1358_v5 = vld [vmem:[%s4609_s27 + $0x1c] sm:$0xf]  ;;  %v1357_v6 = vld [vmem:[%s4609_s27 + $0x18] sm:$0xf] }
 0x153   : > { %1043 = vst.msk [vmem:[#allocation2 + $0x1f0] sm:$0xf] %vm350_vm0, %v1024_v9  ;;  %v3989_v8 = vld [vmem:[%s5408_s3 + $0x3c] sm:$0xf0]  ;;  %v1259_v9 = vld [vmem:[%s4609_s27 + $0x10] sm:$0xf] }
 0x155   : > { %2874 = vmatpush.bf16.msrb.mxu0 %v4070_v12 }
 0x156   : > { %1177 = vrot.lane.b32.xlu1 %v1160_v10, %s4252_s8  ;;  %1175 = vrot.lane.b32.xlu0 %v1159_v11, %s4252_s8  ;;  %v3330_v10 = vor.u32 %v3989_v8, %v3329_v7  ;;  %v1352_v7 = vld [vmem:[%s4609_s27 + $0x4] sm:$0xf]  ;;  %v1452_v8 = vld [vmem:[%s4609_s27 + $0x14] sm:$0xf] }
 0x158   : > { %v778_v14 = vpop.permute.xlu1 %777  ;;  %v776_v15 = vpop.permute.xlu0 %775  ;;  %971 = vrot.lane.b32.xlu2 %v953_v13, %s4256_s12  ;;  %v4078_v21 = vld [vmem:[#allocation2 + $0x148] sm:$0xff]  ;;  %2818 = vmatmul.bf16.vlgmr.msrb.gmra.mxu2 %v3330_v10  ;;  %v3443_v10 = vld [vmem:[%s5408_s3 + $0x120] sm:$0xf0] }
 0x159   : > { %800 = vst.msk [vmem:[#allocation2 + $0x144] sm:$0xf] %vm350_vm0, %v778_v14  ;;  %v4079_v17 = vld [vmem:[#allocation2 + $0x150] sm:$0xff]  ;;  %2875 = vmatpush.bf16.msrb.mxu0 %v4069_v16 }
 0x15a   : > { %799 = vst.msk [vmem:[#allocation2 + $0x140] sm:$0xf] %vm350_vm0, %v776_v15  ;;  %v926_v18 = vpop.permute.xlu2 %925  ;;  %2902 = vmatpush.bf16.msrb.mxu1 %v4079_v17  ;;  %v1355_v15 = vld [vmem:[%s4609_s27 + $0x10] sm:$0xf]  ;;  %v1260_v17 = vld [vmem:[%s4609_s27 + $0x14] sm:$0xf] }
 0x15b   : > { %946 = vst.msk [vmem:[#allocation2 + $0x1ac] sm:$0xf] %vm350_vm0, %v926_v18  ;;  %v1356_v18 = vld [vmem:[%s4609_s27 + $0x14] sm:$0xf] }
 0x15e   : > { %1075 = vrot.lane.b32.xlu1 %v1053_v19, %s4258_s14  ;;  %973 = vrot.lane.b32.xlu0 %v954_v20, %s4256_s12  ;;  %v3377_v19 = vld [vmem:[%s5408_s3 + $0x70] sm:$0xf]  ;;  %v4002_v20 = vld [vmem:[%s5408_s3 + $0xa4] sm:$0xf0] }
 0x15f   : > { %2903 = vmatpush.bf16.msrb.mxu1 %v4078_v21  ;;  %v3982_v21 = vld [vmem:[%s5408_s3 + $0xc] sm:$0xf] }
 0x160   : > { %v1028_v23 = vpop.permute.xlu1 %1027  ;;  %v934_v24 = vpop.permute.xlu0 %933  ;;  %1077 = vrot.lane.b32.xlu2 %v1054_v22, %s4258_s14  ;;  %v3378_v22 = vor.u32 %v4002_v20, %v3377_v19 }
 0x161   : > { %1045 = vst.msk [vmem:[#allocation2 + $0x1f8] sm:$0xf] %vm350_vm0, %v1028_v23  ;;  %v4077_v25 = vld [vmem:[#allocation2 + $0x140] sm:$0xff] }
 0x162   : > { %950 = vst.msk [vmem:[#allocation2 + $0x1bc] sm:$0xf] %vm350_vm0, %v934_v24  ;;  %v1124_v26 = vpop.permute.xlu2 %1123  ;;  %v3331_v23 = vld [vmem:[%s5408_s3 + $0x40] sm:$0xf0]  ;;  %v3995_v24 = vld [vmem:[%s5408_s3 + $0x74] sm:$0xf]  ;;  %2765 = vmatmul.bf16.gmra.mxu0 %v3378_v22 }
 0x163   : > { %2904 = vmatpush.bf16.msrb.mxu1 %v4077_v25  ;;  %1141 = vst.msk [vmem:[#allocation2 + $0x238] sm:$0xf] %vm350_vm0, %v1124_v26  ;;  %v3379_v25 = vld [vmem:[%s5408_s3 + $0xa8] sm:$0xf0]  ;;  %v3334_v26 = vor.u32 %v3982_v21, %v3331_v23  ;;  %v1214_v22 = vld [vmem:[%s4609_s27 + $0x1c] sm:$0xf] }
 0x164   : > { %v1213_v23 = vld [vmem:[%s4609_s27 + $0x18] sm:$0xf] }
 0x165   : > { %2847 = vmatmul.bf16.vlgmr.msrb.gmra.mxu3 %v3334_v26  ;;  %v1309_v26 = vld [vmem:[%s4609_s27 + $0x18] sm:$0xf] }
 0x166   : > { %873 = vrot.lane.b32.xlu1 %v856_v27, %s4254_s10  ;;  %871 = vrot.lane.b32.xlu0 %v855_v28, %s4254_s10  ;;  %v3382_v27 = vor.u32 %v3995_v24, %v3379_v25  ;;  %v3497_v24 = vld [vmem:[%s5408_s3 + $0x158] sm:$0xf]  ;;  %v4031_v25 = vld [vmem:[%s5408_s3 + $0x18c] sm:$0xf0] }
 0x168   : > { %v930_v30 = vpop.permute.xlu1 %929  ;;  %v928_v31 = vpop.permute.xlu0 %927  ;;  %v4100_v32 = vld [vmem:[#allocation2 + $0x1f8] sm:$0xff]  ;;  %967 = vrot.lane.b32.xlu2 %v951_v29, %s4256_s12  ;;  %2794 = vmatmul.bf16.gmra.mxu1 %v3382_v27  ;;  %v3498_v27 = vor.u32 %v4031_v25, %v3497_v24  ;;  %v1306_v25 = vld [vmem:[%s4609_s27 + $0xc] sm:$0xf] }
 0x169   : > { %948 = vst.msk [vmem:[#allocation2 + $0x1b4] sm:$0xf] %vm350_vm0, %v930_v30  ;;  %v4092_v35 = vld [vmem:[#allocation2 + $0x1b8] sm:$0xff]  ;;  %2955 = vmatpush.bf16.msra.mxu3 %v4100_v32  ;;  %v1258_v32 = vld [vmem:[%s4609_s27 + $0xc] sm:$0xf] }
 0x16a   : > { %947 = vst.msk [vmem:[#allocation2 + $0x1b0] sm:$0xf] %vm350_vm0, %v928_v31  ;;  %v922_v37 = vpop.permute.xlu2 %921  ;;  %2926 = vmatpush.bf16.msra.mxu2 %v4092_v35  ;;  %v4003_v35 = vld [vmem:[%s5408_s3 + $0xac] sm:$0xf0]  ;;  %v1405_v24 = vld [vmem:[%s4609_s27 + $0x18] sm:$0xf] }
 0x16b   : > { %944 = vst.msk [vmem:[#allocation2 + $0x1a4] sm:$0xf] %vm350_vm0, %v922_v37  ;;  %v3386_v37 = vor.u32 %v4003_v35, %v3385_v34  ;;  %v1310_v34 = vld [vmem:[%s4609_s27 + $0x1c] sm:$0xf]  ;;  %v1450_v35 = vld [vmem:[%s4609_s27 + $0xc] sm:$0xf] }
 0x16d   : > { %2823 = vmatmul.bf16.gmra.mxu2 %v3386_v37  ;;  %v3499_v37 = vld [vmem:[%s5408_s3 + $0x190] sm:$0xf0] }
 0x16e   : > { %1071 = vrot.lane.b32.xlu1 %v1051_v38, %s4258_s14  ;;  %969 = vrot.lane.b32.xlu0 %v952_v39, %s4256_s12 }
 0x170   : > { %v924_v41 = vpop.permute.xlu1 %923  ;;  %v1026_v42 = vpop.permute.xlu0 %1025  ;;  %1073 = vrot.lane.b32.xlu2 %v1052_v40, %s4258_s14 }
 0x171   : > { %945 = vst.msk [vmem:[#allocation2 + $0x1a8] sm:$0xf] %vm350_vm0, %v924_v41  ;;  %v4091_v45 = vld [vmem:[#allocation2 + $0x1b0] sm:$0xff] }
 0x172   : > { %1044 = vst.msk [vmem:[#allocation2 + $0x1f4] sm:$0xf] %vm350_vm0, %v1026_v42  ;;  %v1016_v47 = vpop.permute.xlu2 %1015  ;;  %2927 = vmatpush.bf16.msra.mxu2 %v4091_v45  ;;  %v1453_v42 = vld [vmem:[%s4609_s27 + $0x18] sm:$0xf]  ;;  %v1454_v45 = vld [vmem:[%s4609_s27 + $0x1c] sm:$0xf] }
 0x173   : > { %1039 = vst.msk [vmem:[#allocation2 + $0x1e0] sm:$0xf] %vm350_vm0, %v1016_v47  ;;  %v3387_v47 = vld [vmem:[%s5408_s3 + $0xb0] sm:$0xf0] }
 0x176   : > { %1069 = vrot.lane.b32.xlu1 %v1050_v48, %s4258_s14  ;;  %1067 = vrot.lane.b32.xlu0 %v1049_v49, %s4258_s14  ;;  %v3337_v48 = vld [vmem:[%s5408_s3 + $0x10] sm:$0xf]  ;;  %v3390_v49 = vor.u32 %v3996_v46, %v3387_v47 }
 0x177   : > { %v3338_v53 = vor.u32 %v3990_v50, %v3337_v48  ;;  %v1211_v50 = vld [vmem:[%s4609_s27 + $0x10] sm:$0xf] }
 0x178   : > { %v1022_v54 = vpop.permute.xlu1 %1021  ;;  %v1020_v55 = vpop.permute.xlu0 %1019  ;;  %v4090_v56 = vld [vmem:[#allocation2 + $0x1a8] sm:$0xff]  ;;  %1063 = vrot.lane.b32.xlu2 %v1047_v52, %s4258_s14  ;;  %2852 = vmatmul.bf16.gmra.mxu3 %v3390_v49  ;;  %v1212_v49 = vld [vmem:[%s4609_s27 + $0x14] sm:$0xf] }
 0x179   : > { %1042 = vst.msk [vmem:[#allocation2 + $0x1ec] sm:$0xf] %vm350_vm0, %v1022_v54  ;;  %v4099_v57 = vld [vmem:[#allocation2 + $0x1f0] sm:$0xff]  ;;  %2928 = vmatpush.bf16.msra.mxu2 %v4090_v56  ;;  %v3339_v52 = vld [vmem:[%s5408_s3 + $0x48] sm:$0xf0]  ;;  %2876 = vmatmul.bf16.vlgmr.msrb.gmra.mxu0 %v3338_v53 }
 0x17a   : > { %1041 = vst.msk [vmem:[#allocation2 + $0x1e8] sm:$0xf] %vm350_vm0, %v1020_v55  ;;  %v1122_v58 = vpop.permute.xlu2 %1121  ;;  %2956 = vmatpush.bf16.msra.mxu3 %v4099_v57  ;;  %v3342_v54 = vor.u32 %v3983_v51, %v3339_v52  ;;  %v1307_v51 = vld [vmem:[%s4609_s27 + $0x10] sm:$0xf] }
 0x17b   : > { %1140 = vst.msk [vmem:[#allocation2 + $0x234] sm:$0xf] %vm350_vm0, %v1122_v58 }
 0x17c   : > { %2905 = vmatmul.bf16.vlgmr.msrb.gmra.mxu1 %v3342_v54 }
 0x17d   : > { %2828 = vmatmul.bf16.gmra.mxu2 %v3442_v0  ;;  %v3506_v0 = vor.u32 %v4032_v62, %v3505_v61 }
 0x17e   : > { %1283 = vrot.lane.b32.xlu1 %v1261_v59, %s4254_s10  ;;  %1065 = vrot.lane.b32.xlu0 %v1048_v60, %s4258_s14  ;;  %v1256_v59 = vld [vmem:[%s4609_s27 + $0x4] sm:$0xf]  ;;  %v1255_v60 = vld [vmem:[%s4609_s27] sm:$0xf] }
 0x180   : > { %v920_v1 = vpop.permute.xlu1 %919  ;;  %v1126_v2 = vpop.permute.xlu0 %1125  ;;  %1285 = vrot.lane.b32.xlu2 %v1262_v63, %s4254_s10  ;;  %v1351_v63 = vld [vmem:[%s4609_s27] sm:$0xf] }
 0x181   : > { %943 = vst.msk [vmem:[#allocation2 + $0x1a0] sm:$0xf] %vm350_vm0, %v920_v1  ;;  %v4098_v3 = vld [vmem:[#allocation2 + $0x1e8] sm:$0xff] }
 0x182   : > { %1142 = vst.msk [vmem:[#allocation2 + $0x23c] sm:$0xf] %vm350_vm0, %v1126_v2  ;;  %v1184_v4 = vpop.permute.xlu2 %1183  ;;  %2957 = vmatpush.bf16.msra.mxu3 %v4098_v3 }
 0x183   : > { %1203 = vst.msk [vmem:[#allocation2 + $0x270] sm:$0xf] %vm350_vm0, %v1184_v4 }
 0x186   : > { %1381 = vrot.lane.b32.xlu1 %v1358_v5, %s4256_s12  ;;  %1379 = vrot.lane.b32.xlu0 %v1357_v6, %s4256_s12  ;;  %v1451_v5 = vld [vmem:[%s4609_s27 + $0x10] sm:$0xf] }
 0x188   : > { %v1190_v11 = vpop.permute.xlu1 %1189  ;;  %v1188_v12 = vpop.permute.xlu0 %1187  ;;  %v4089_v13 = vld [vmem:[#allocation2 + $0x1a0] sm:$0xff]  ;;  %1279 = vrot.lane.b32.xlu2 %v1259_v9, %s4254_s10  ;;  %v4010_v9 = vld [vmem:[%s5408_s3 + $0xec] sm:$0xf] }
 0x189   : > { %1206 = vst.msk [vmem:[#allocation2 + $0x27c] sm:$0xf] %vm350_vm0, %v1190_v11  ;;  %v4108_v14 = vld [vmem:[#allocation2 + $0x238] sm:$0xff]  ;;  %2929 = vmatpush.bf16.msra.mxu2 %v4089_v13  ;;  %v3393_v11 = vld [vmem:[%s5408_s3 + $0x80] sm:$0xf] }
 0x18a   : > { %1205 = vst.msk [vmem:[#allocation2 + $0x278] sm:$0xf] %vm350_vm0, %v1188_v12  ;;  %v982_v16 = vpop.permute.xlu2 %981  ;;  %2984 = vmatpush.bf16.msra.mxu0 %v4108_v14  ;;  %v3446_v12 = vor.u32 %v4010_v9, %v3443_v10  ;;  %v4004_v13 = vld [vmem:[%s5408_s3 + $0xb4] sm:$0xf0]  ;;  %v3997_v14 = vld [vmem:[%s5408_s3 + $0x84] sm:$0xf] }
 0x18b   : > { %998 = vst.msk [vmem:[#allocation2 + $0x1dc] sm:$0xf] %vm350_vm0, %v982_v16  ;;  %v3394_v16 = vor.u32 %v4004_v13, %v3393_v11  ;;  %v1145_v9 = vld [vmem:[%s4609_s27 + $0x8] sm:$0xf]  ;;  %v1146_v11 = vld [vmem:[%s4609_s27 + $0xc] sm:$0xf] }
 0x18c   : > { %2857 = vmatmul.bf16.gmra.mxu3 %v3446_v12  ;;  %v1210_v12 = vld [vmem:[%s4609_s27 + $0xc] sm:$0xf]  ;;  %v1209_v13 = vld [vmem:[%s4609_s27 + $0x8] sm:$0xf]  ;;  %1153 = vst.msk [vmem:[#allocation2 + $0x248] sm:$0xf] %vm350_vm0, %v1145_v9 }
 0x18d   : > { %2881 = vmatmul.bf16.gmra.mxu0 %v3394_v16  ;;  %2833 = vmatmul.bf16.gmra.mxu2 %v3498_v27  ;;  %1154 = vst.msk [vmem:[#allocation2 + $0x24c] sm:$0xf] %vm350_vm0, %v1146_v11  ;;  %v1143_v16 = vld [vmem:[%s4609_s27] sm:$0xf]  ;;  %v1406_v27 = vld [vmem:[%s4609_s27 + $0x1c] sm:$0xf] }
 0x18e   : > { %1375 = vrot.lane.b32.xlu1 %v1355_v15, %s4256_s12  ;;  %1281 = vrot.lane.b32.xlu0 %v1260_v17, %s4254_s10  ;;  %v3395_v15 = vld [vmem:[%s5408_s3 + $0xb8] sm:$0xf0]  ;;  %1151 = vst.msk [vmem:[#allocation2 + $0x240] sm:$0xf] %vm350_vm0, %v1143_v16  ;;  %v3403_v11 = vld [vmem:[%s5408_s3 + $0xc0] sm:$0xf0] }
 0x18f   : > { %v3398_v17 = vor.u32 %v3997_v14, %v3395_v15  ;;  %v1305_v14 = vld [vmem:[%s4609_s27 + $0x8] sm:$0xf] }
 0x190   : > { %v1120_v28 = vpop.permute.xlu1 %1119  ;;  %v1018_v29 = vpop.permute.xlu0 %1017  ;;  %1377 = vrot.lane.b32.xlu2 %v1356_v18, %s4256_s12 }
 0x191   : > { %1139 = vst.msk [vmem:[#allocation2 + $0x230] sm:$0xf] %vm350_vm0, %v1120_v28  ;;  %v4116_v30 = vld [vmem:[#allocation2 + $0x278] sm:$0xff]  ;;  %2910 = vmatmul.bf16.gmra.mxu1 %v3398_v17  ;;  %v1144_v17 = vld [vmem:[%s4609_s27 + $0x4] sm:$0xf] }
 0x192   : > { %1040 = vst.msk [vmem:[#allocation2 + $0x1e4] sm:$0xf] %vm350_vm0, %v1018_v29  ;;  %v880_v31 = vpop.permute.xlu2 %879  ;;  %3013 = vmatpush.bf16.msra.mxu1 %v4116_v30 }
 0x193   : > { %899 = vst.msk [vmem:[#allocation2 + $0x190] sm:$0xf] %vm350_vm0, %v880_v31 }
 0x194   : > { %1152 = vst.msk [vmem:[#allocation2 + $0x244] sm:$0xf] %vm350_vm0, %v1144_v17  ;;  %v1500_v17 = vld [vmem:[%s4609_s27 + $0x14] sm:$0xf] }
 0x196   : > { %1277 = vrot.lane.b32.xlu1 %v1258_v32, %s4254_s10  ;;  %1275 = vrot.lane.b32.xlu0 %v1257_v33, %s4254_s10  ;;  %v1449_v32 = vld [vmem:[%s4609_s27 + $0x8] sm:$0xf] }
 0x198   : > { %v886_v38 = vpop.permute.xlu1 %885  ;;  %v884_v39 = vpop.permute.xlu0 %883  ;;  %v4107_v40 = vld [vmem:[#allocation2 + $0x230] sm:$0xff]  ;;  %1371 = vrot.lane.b32.xlu2 %v1353_v36, %s4256_s12  ;;  %v4024_v36 = vld [vmem:[%s5408_s3 + $0x15c] sm:$0xf] }
 0x199   : > { %902 = vst.msk [vmem:[#allocation2 + $0x19c] sm:$0xf] %vm350_vm0, %v886_v38  ;;  %v4097_v41 = vld [vmem:[#allocation2 + $0x1e0] sm:$0xff]  ;;  %2985 = vmatpush.bf16.msra.mxu0 %v4107_v40  ;;  %v3449_v38 = vld [vmem:[%s5408_s3 + $0xf0] sm:$0xf] }
 0x19a   : > { %901 = vst.msk [vmem:[#allocation2 + $0x198] sm:$0xf] %vm350_vm0, %v884_v39  ;;  %v1182_v43 = vpop.permute.xlu2 %1181  ;;  %2958 = vmatpush.bf16.msra.mxu3 %v4097_v41  ;;  %v3502_v39 = vor.u32 %v4024_v36, %v3499_v37  ;;  %v4018_v40 = vld [vmem:[%s5408_s3 + $0x124] sm:$0xf0]  ;;  %v4011_v41 = vld [vmem:[%s5408_s3 + $0xf4] sm:$0xf] }
 0x19b   : > { %1202 = vst.msk [vmem:[#allocation2 + $0x26c] sm:$0xf] %vm350_vm0, %v1182_v43  ;;  %v3450_v43 = vor.u32 %v4018_v40, %v3449_v38  ;;  %v1208_v37 = vld [vmem:[%s4609_s27 + $0x4] sm:$0xf]  ;;  %v1207_v38 = vld [vmem:[%s4609_s27] sm:$0xf] }
 0x19c   : > { %2862 = vmatmul.bf16.gmra.mxu3 %v3502_v39 }
 0x19d   : > { %2886 = vmatmul.bf16.gmra.mxu0 %v3450_v43 }
 0x19e   : > { %1475 = vrot.lane.b32.xlu1 %v1453_v42, %s4258_s14  ;;  %1373 = vrot.lane.b32.xlu0 %v1354_v44, %s4256_s12  ;;  %v3451_v42 = vld [vmem:[%s5408_s3 + $0x128] sm:$0xf0] }
 0x19f   : > { %v3454_v44 = vor.u32 %v4011_v41, %v3451_v42  ;;  %v1501_v41 = vld [vmem:[%s4609_s27 + $0x18] sm:$0xf] }
 0x1a0   : > { %v980_v55 = vpop.permute.xlu1 %979  ;;  %v1186_v56 = vpop.permute.xlu0 %1185  ;;  %1477 = vrot.lane.b32.xlu2 %v1454_v45, %s4258_s14 }
 0x1a1   : > { %997 = vst.msk [vmem:[#allocation2 + $0x1d8] sm:$0xf] %vm350_vm0, %v980_v55  ;;  %v4088_v57 = vld [vmem:[#allocation2 + $0x198] sm:$0xff]  ;;  %2915 = vmatmul.bf16.gmra.mxu1 %v3454_v44 }
 0x1a2   : > { %1204 = vst.msk [vmem:[#allocation2 + $0x274] sm:$0xf] %vm350_vm0, %v1186_v56  ;;  %v1112_v58 = vpop.permute.xlu2 %1111  ;;  %2930 = vmatpush.bf16.msra.mxu2 %v4088_v57  ;;  %v1447_v56 = vld [vmem:[%s4609_s27] sm:$0xf]  ;;  %v3984_v44 = vld [vmem:[%s5408_s3 + $0x1c] sm:$0xf] }
 0x1a3   : > { %1135 = vst.msk [vmem:[#allocation2 + $0x220] sm:$0xf] %vm350_vm0, %v1112_v58  ;;  %v1149_v58 = vld [vmem:[%s4609_s27 + $0x18] sm:$0xf] }
 0x1a4   : > { %1157 = vst.msk [vmem:[#allocation2 + $0x258] sm:$0xf] %vm350_vm0, %v1149_v58  ;;  %v3999_v58 = vld [vmem:[%s5408_s3 + $0x94] sm:$0xf] }
 0x1a6   : > { %1273 = vrot.lane.b32.xlu1 %v1256_v59, %s4254_s10  ;;  %1271 = vrot.lane.b32.xlu0 %v1255_v60, %s4254_s10  ;;  %v1308_v59 = vld [vmem:[%s4609_s27 + $0x14] sm:$0xf]  ;;  %v1150_v60 = vld [vmem:[%s4609_s27 + $0x1c] sm:$0xf] }
 0x1a7   : > { %1158 = vst.msk [vmem:[#allocation2 + $0x25c] sm:$0xf] %vm350_vm0, %v1150_v60 }
 0x1a8   : > { %v1118_v1 = vpop.permute.xlu1 %1117  ;;  %v1116_v2 = vpop.permute.xlu0 %1115  ;;  %v4096_v3 = vld [vmem:[#allocation2 + $0x1d8] sm:$0xff]  ;;  %1367 = vrot.lane.b32.xlu2 %v1351_v63, %s4256_s12  ;;  %v1448_v63 = vld [vmem:[%s4609_s27 + $0x4] sm:$0xf] }
 0x1a9   : > { %1138 = vst.msk [vmem:[#allocation2 + $0x22c] sm:$0xf] %vm350_vm0, %v1118_v1  ;;  %v4115_v4 = vld [vmem:[#allocation2 + $0x270] sm:$0xff]  ;;  %2959 = vmatpush.bf16.msra.mxu3 %v4096_v3  ;;  %v3507_v3 = vld [vmem:[%s5408_s3 + $0x198] sm:$0xf0] }
 0x1aa   : > { %1137 = vst.msk [vmem:[#allocation2 + $0x228] sm:$0xf] %vm350_vm0, %v1116_v2  ;;  %v878_v6 = vpop.permute.xlu2 %877  ;;  %3014 = vmatpush.bf16.msra.mxu1 %v4115_v4  ;;  %v1147_v1 = vld [vmem:[%s4609_s27 + $0x10] sm:$0xf]  ;;  %v4025_v2 = vld [vmem:[%s5408_s3 + $0x164] sm:$0xf] }
 0x1ab   : > { %898 = vst.msk [vmem:[#allocation2 + $0x18c] sm:$0xf] %vm350_vm0, %v878_v6  ;;  %v1148_v4 = vld [vmem:[%s4609_s27 + $0x14] sm:$0xf] }
 0x1ac   : > { %1155 = vst.msk [vmem:[#allocation2 + $0x250] sm:$0xf] %vm350_vm0, %v1147_v1 }
 0x1ad   : > { %1156 = vst.msk [vmem:[#allocation2 + $0x254] sm:$0xf] %vm350_vm0, %v1148_v4  ;;  %2891 = vmatmul.bf16.gmra.mxu0 %v3506_v0  ;;  %v1403_v0 = vld [vmem:[%s4609_s27 + $0x10] sm:$0xf] }
 0x1ae   : > { %1471 = vrot.lane.b32.xlu1 %v1451_v5, %s4258_s14  ;;  %1369 = vrot.lane.b32.xlu0 %v1352_v7, %s4256_s12  ;;  %v3510_v7 = vor.u32 %v4025_v2, %v3507_v3  ;;  %v4112_v15 = vld [vmem:[#allocation2 + $0x258] sm:$0xff]  ;;  %v2800_v3 = vpop.f32.mrf.mxu3 }
 0x1b0   : > { %v1180_v18 = vpop.permute.xlu1 %1179  ;;  %v882_v19 = vpop.permute.xlu0 %881  ;;  %1473 = vrot.lane.b32.xlu2 %v1452_v8, %s4258_s14 }
 0x1b1   : > { %1201 = vst.msk [vmem:[#allocation2 + $0x268] sm:$0xf] %vm350_vm0, %v1180_v18  ;;  %v4106_v20 = vld [vmem:[#allocation2 + $0x228] sm:$0xff]  ;;  %2920 = vmatmul.bf16.gmra.mxu1 %v3510_v7  ;;  %v3992_v7 = vld [vmem:[%s5408_s3 + $0x54] sm:$0xf0] }
 0x1b2   : > { %900 = vst.msk [vmem:[#allocation2 + $0x194] sm:$0xf] %vm350_vm0, %v882_v19  ;;  %v972_v21 = vpop.permute.xlu2 %971  ;;  %2986 = vmatpush.bf16.msra.mxu0 %v4106_v20 }
 0x1b3   : > { %993 = vst.msk [vmem:[#allocation2 + $0x1c8] sm:$0xf] %vm350_vm0, %v972_v21 }
 0x1b4   : > { %v4111_v18 = vld [vmem:[#allocation2 + $0x250] sm:$0xff] }
 0x1b6   : > { %1237 = vrot.lane.b32.xlu1 %v1214_v22, %s4253_s9  ;;  %1235 = vrot.lane.b32.xlu0 %v1213_v23, %s4253_s9 }
 0x1b8   : > { %v978_v28 = vpop.permute.xlu1 %977  ;;  %v976_v29 = vpop.permute.xlu0 %975  ;;  %v4114_v30 = vld [vmem:[#allocation2 + $0x268] sm:$0xff]  ;;  %1331 = vrot.lane.b32.xlu2 %v1309_v26, %s4255_s11 }
 0x1b9   : > { %996 = vst.msk [vmem:[#allocation2 + $0x1d4] sm:$0xf] %vm350_vm0, %v978_v28  ;;  %v4087_v31 = vld [vmem:[#allocation2 + $0x190] sm:$0xff]  ;;  %3015 = vmatpush.bf16.msra.mxu1 %v4114_v30  ;;  %v4110_v26 = vld [vmem:[#allocation2 + $0x248] sm:$0xff]  ;;  %v3345_v28 = vld [vmem:[%s5408_s3 + $0x18] sm:$0xf] }
 0x1ba   : > { %995 = vst.msk [vmem:[#allocation2 + $0x1d0] sm:$0xf] %vm350_vm0, %v976_v29  ;;  %v1078_v33 = vpop.permute.xlu2 %1077  ;;  %2931 = vmatpush.bf16.msra.mxu2 %v4087_v31  ;;  %v4109_v29 = vld [vmem:[#allocation2 + $0x240] sm:$0xff] }
 0x1bb   : > { %1094 = vst.msk [vmem:[#allocation2 + $0x21c] sm:$0xf] %vm350_vm0, %v1078_v33  ;;  %v3985_v33 = vld [vmem:[%s5408_s3 + $0x24] sm:$0xf] }
 0x1be   : > { %1467 = vrot.lane.b32.xlu1 %v1449_v32, %s4258_s14  ;;  %1333 = vrot.lane.b32.xlu0 %v1310_v34, %s4255_s11  ;;  %v3991_v32 = vld [vmem:[%s5408_s3 + $0x4c] sm:$0xf0]  ;;  %v3355_v34 = vld [vmem:[%s5408_s3 + $0x58] sm:$0xf0] }
 0x1bf   : > { %v3346_v39 = vor.u32 %v3991_v32, %v3345_v28  ;;  %v3358_v40 = vor.u32 %v3985_v33, %v3355_v34  ;;  %v4019_v28 = vld [vmem:[%s5408_s3 + $0x12c] sm:$0xf0]  ;;  %v1497_v34 = vld [vmem:[%s4609_s27 + $0x8] sm:$0xf] }
 0x1c0   : > { %v876_v45 = vpop.permute.xlu1 %875  ;;  %v1114_v46 = vpop.permute.xlu0 %1113  ;;  %1469 = vrot.lane.b32.xlu2 %v1450_v35, %s4258_s14 }
 0x1c1   : > { %897 = vst.msk [vmem:[#allocation2 + $0x188] sm:$0xf] %vm350_vm0, %v876_v45  ;;  %v4095_v47 = vld [vmem:[#allocation2 + $0x1d0] sm:$0xff] }
 0x1c2   : > { %1136 = vst.msk [vmem:[#allocation2 + $0x224] sm:$0xf] %vm350_vm0, %v1114_v46  ;;  %v968_v48 = vpop.permute.xlu2 %967  ;;  %2960 = vmatpush.bf16.msra.mxu3 %v4095_v47  ;;  %v3347_v45 = vld [vmem:[%s5408_s3 + $0x50] sm:$0xf0] }
 0x1c3   : > { %991 = vst.msk [vmem:[#allocation2 + $0x1c0] sm:$0xf] %vm350_vm0, %v968_v48 }
 0x1c6   : > { %1233 = vrot.lane.b32.xlu1 %v1212_v49, %s4253_s9  ;;  %1231 = vrot.lane.b32.xlu0 %v1211_v50, %s4253_s9  ;;  %v2771_v49 = vpop.f32.mrf.mxu2  ;;  %v1303_v50 = vld [vmem:[%s4609_s27] sm:$0xf] }
 0x1c7   : > { %v5077_v4 = vadd.f32 %v2800_v3, %v2771_v49  ;;  %v4033_v3 = vld [vmem:[%s5408_s3 + $0x19c] sm:$0xf0] }
 0x1c8   : > { %v1178_v52 = vpop.permute.xlu1 %1177  ;;  %v1176_v53 = vpop.permute.xlu0 %1175  ;;  %v4086_v54 = vld [vmem:[#allocation2 + $0x188] sm:$0xff]  ;;  %1327 = vrot.lane.b32.xlu2 %v1307_v51, %s4255_s11  ;;  %v1502_v51 = vld [vmem:[%s4609_s27 + $0x1c] sm:$0xf] }
 0x1c9   : > { %1200 = vst.msk [vmem:[#allocation2 + $0x264] sm:$0xf] %vm350_vm0, %v1178_v52  ;;  %v4105_v55 = vld [vmem:[#allocation2 + $0x220] sm:$0xff]  ;;  %2932 = vmatpush.bf16.msra.mxu2 %v4086_v54  ;;  %v3350_v52 = vor.u32 %v3984_v44, %v3347_v45  ;;  %v3401_v54 = vld [vmem:[%s5408_s3 + $0x88] sm:$0xf] }
 0x1ca   : > { %1199 = vst.msk [vmem:[#allocation2 + $0x260] sm:$0xf] %vm350_vm0, %v1176_v53  ;;  %v1074_v57 = vpop.permute.xlu2 %1073  ;;  %2987 = vmatpush.bf16.msra.mxu0 %v4105_v55  ;;  %v1304_v53 = vld [vmem:[%s4609_s27 + $0x4] sm:$0xf]  ;;  %v4006_v44 = vld [vmem:[%s5408_s3 + $0xc4] sm:$0xf0] }
 0x1cb   : > { %1092 = vst.msk [vmem:[#allocation2 + $0x214] sm:$0xf] %vm350_vm0, %v1074_v57  ;;  %v4005_v57 = vld [vmem:[%s5408_s3 + $0xbc] sm:$0xf0] }
 0x1cc   : > { %v3402_v1 = vor.u32 %v4005_v57, %v3401_v54  ;;  %v1400_v54 = vld [vmem:[%s4609_s27 + $0x4] sm:$0xf] }
 0x1ce   : > { %1463 = vrot.lane.b32.xlu1 %v1447_v56, %s4258_s14  ;;  %1329 = vrot.lane.b32.xlu0 %v1308_v59, %s4255_s11  ;;  %v3411_v59 = vld [vmem:[%s5408_s3 + $0xc8] sm:$0xf0]  ;;  %v5072_v62 = vpop.f32.mrf.mxu2 }
 0x1cf   : > { %v3414_v2 = vor.u32 %v3999_v58, %v3411_v59  ;;  %v1495_v58 = vld [vmem:[%s4609_s27] sm:$0xf] }
 0x1d0   : > { %v1076_v5 = vpop.permute.xlu1 %1075  ;;  %v974_v6 = vpop.permute.xlu0 %973  ;;  %1465 = vrot.lane.b32.xlu2 %v1448_v63, %s4258_s14  ;;  %v1404_v63 = vld [vmem:[%s4609_s27 + $0x14] sm:$0xf] }
 0x1d1   : > { %1093 = vst.msk [vmem:[#allocation2 + $0x218] sm:$0xf] %vm350_vm0, %v1076_v5  ;;  %v4113_v8 = vld [vmem:[#allocation2 + $0x260] sm:$0xff]  ;;  %v1499_v5 = vld [vmem:[%s4609_s27 + $0x10] sm:$0xf] }
 0x1d2   : > { %994 = vst.msk [vmem:[#allocation2 + $0x1cc] sm:$0xf] %vm350_vm0, %v974_v6  ;;  %v1064_v10 = vpop.permute.xlu2 %1063  ;;  %3016 = vmatpush.bf16.msra.mxu1 %v4113_v8  ;;  %v3353_v6 = vld [vmem:[%s5408_s3 + $0x20] sm:$0xf] }
 0x1d3   : > { %1087 = vst.msk [vmem:[#allocation2 + $0x200] sm:$0xf] %vm350_vm0, %v1064_v10  ;;  %v3998_v10 = vld [vmem:[%s5408_s3 + $0x8c] sm:$0xf] }
 0x1d6   : > { %1229 = vrot.lane.b32.xlu1 %v1210_v12, %s4253_s9  ;;  %1227 = vrot.lane.b32.xlu0 %v1209_v13, %s4253_s9  ;;  %v2776_v16 = vpop.f32.mrf.mxu2 }
 0x1d7   : > { %3017 = vmatpush.bf16.msra.mxu1 %v4112_v15 }
 0x1d8   : > { %v874_v19 = vpop.permute.xlu1 %873  ;;  %v872_v20 = vpop.permute.xlu0 %871  ;;  %v4104_v21 = vld [vmem:[#allocation2 + $0x218] sm:$0xff]  ;;  %1323 = vrot.lane.b32.xlu2 %v1305_v14, %s4255_s11  ;;  %v3354_v14 = vor.u32 %v3992_v7, %v3353_v6  ;;  %v3523_v7 = vld [vmem:[%s5408_s3 + $0x1a8] sm:$0xf0] }
 0x1d9   : > { %896 = vst.msk [vmem:[#allocation2 + $0x184] sm:$0xf] %vm350_vm0, %v874_v19  ;;  %v4094_v22 = vld [vmem:[#allocation2 + $0x1c8] sm:$0xff]  ;;  %2988 = vmatpush.bf16.msra.mxu0 %v4104_v21  ;;  %v5099_v19 = vpop.f32.mrf.mxu3 }
 0x1da   : > { %895 = vst.msk [vmem:[#allocation2 + $0x180] sm:$0xf] %vm350_vm0, %v872_v20  ;;  %v1286_v23 = vpop.permute.xlu2 %1285  ;;  %2961 = vmatpush.bf16.msra.mxu3 %v4094_v22  ;;  %v2761_v20 = vpop.f32.mrf.mxu0  ;;  %v1401_v21 = vld [vmem:[%s4609_s27 + $0x8] sm:$0xf] }
 0x1db   : > { %1302 = vst.msk [vmem:[#allocation2 + $0x2bc] sm:$0xf] %vm350_vm0, %v1286_v23  ;;  %3018 = vmatpush.bf16.msra.mxu1 %v4111_v18  ;;  %v3406_v18 = vor.u32 %v3998_v10, %v3403_v11  ;;  %v2790_v22 = vpop.f32.mrf.mxu1  ;;  %v1402_v23 = vld [vmem:[%s4609_s27 + $0xc] sm:$0xf] }
 0x1de   : > { %1427 = vrot.lane.b32.xlu1 %v1405_v24, %s4257_s13  ;;  %1325 = vrot.lane.b32.xlu0 %v1306_v25, %s4255_s11  ;;  %v2791_v24 = vadd.f32 %v2790_v22, %v2761_v20  ;;  %v5120_v33 = vpop.f32.mrf.mxu2  ;;  %v4026_v22 = vld [vmem:[%s5408_s3 + $0x16c] sm:$0xf] }
 0x1df   : > { %3019 = vmatpush.bf16.msra.mxu1 %v4110_v26 }
 0x1e0   : > { %v1072_v30 = vpop.permute.xlu1 %1071  ;;  %v970_v31 = vpop.permute.xlu0 %969  ;;  %1429 = vrot.lane.b32.xlu2 %v1406_v27, %s4257_s13  ;;  %v3457_v27 = vld [vmem:[%s5408_s3 + $0xf8] sm:$0xf] }
 0x1e1   : > { %1091 = vst.msk [vmem:[#allocation2 + $0x210] sm:$0xf] %vm350_vm0, %v1072_v30  ;;  %v4085_v35 = vld [vmem:[#allocation2 + $0x180] sm:$0xff] }
 0x1e2   : > { %992 = vst.msk [vmem:[#allocation2 + $0x1c4] sm:$0xf] %vm350_vm0, %v970_v31  ;;  %v1280_v36 = vpop.permute.xlu2 %1279  ;;  %2933 = vmatpush.bf16.msra.mxu2 %v4085_v35  ;;  %v3467_v31 = vld [vmem:[%s5408_s3 + $0x138] sm:$0xf0]  ;;  %v3458_v35 = vor.u32 %v4019_v28, %v3457_v27 }
 0x1e3   : > { %1299 = vst.msk [vmem:[#allocation2 + $0x2b0] sm:$0xf] %vm350_vm0, %v1280_v36  ;;  %3020 = vmatpush.bf16.msra.mxu1 %v4109_v29  ;;  %v4013_v29 = vld [vmem:[%s5408_s3 + $0x104] sm:$0xf]  ;;  %v2805_v36 = vpop.f32.mrf.mxu3 }
 0x1e5   : > { %2934 = vmatmul.bf16.vlgmr.msra.gmra.mxu2 %v3346_v39  ;;  %v3470_v39 = vor.u32 %v4013_v29, %v3467_v31 }
 0x1e6   : > { %1225 = vrot.lane.b32.xlu1 %v1208_v37, %s4253_s9  ;;  %1223 = vrot.lane.b32.xlu0 %v1207_v38, %s4253_s9  ;;  %v2763_v37 = vpop.f32.mrf.mxu0  ;;  %v1498_v38 = vld [vmem:[%s4609_s27 + $0xc] sm:$0xf]  ;;  %s3318_s9 = sshll.u32 %s338_s15, 2 }
 0x1e7   : > { %3021 = vmatmul.bf16.vlgmr.msra.gmra.mxu1 %v3358_v40  ;;  %v5125_v40 = vadd.f32 %v2805_v36, %v2776_v16  ;;  %s340_s26 = scalar_lea.vmem %s5410_s5, %s3318_s9 }
 0x1e8   : > { %v1070_v42 = vpop.permute.xlu1 %1069  ;;  %v1068_v43 = vpop.permute.xlu0 %1067  ;;  %v4103_v46 = vld [vmem:[#allocation2 + $0x210] sm:$0xff]  ;;  %1523 = vrot.lane.b32.xlu2 %v1501_v41, %s5413_s16 }
 0x1e9   : > { %1090 = vst.msk [vmem:[#allocation2 + $0x20c] sm:$0xf] %vm350_vm0, %v1070_v42  ;;  %v4093_v47 = vld [vmem:[#allocation2 + $0x1c0] sm:$0xff]  ;;  %2989 = vmatpush.bf16.msra.mxu0 %v4103_v46  ;;  %v2792_v41 = vpop.f32.mrf.mxu1 }
 0x1ea   : > { %1089 = vst.msk [vmem:[#allocation2 + $0x208] sm:$0xf] %vm350_vm0, %v1068_v43  ;;  %v1378_v48 = vpop.permute.xlu2 %1377  ;;  %2962 = vmatpush.bf16.msra.mxu3 %v4093_v47  ;;  %v1399_v42 = vld [vmem:[%s4609_s27] sm:$0xf]  ;;  %v3409_v43 = vld [vmem:[%s5408_s3 + $0x90] sm:$0xf] }
 0x1eb   : > { %1396 = vst.msk [vmem:[#allocation2 + $0x2f4] sm:$0xf] %vm350_vm0, %v1378_v48  ;;  %v4012_v47 = vld [vmem:[%s5408_s3 + $0xfc] sm:$0xf]  ;;  %v3459_v48 = vld [vmem:[%s5408_s3 + $0x130] sm:$0xf0] }
 0x1ed   : > { %2963 = vmatmul.bf16.vlgmr.msra.gmra.mxu3 %v3350_v52 }
 0x1ee   : > { %1319 = vrot.lane.b32.xlu1 %v1303_v50, %s4255_s11  ;;  %1525 = vrot.lane.b32.xlu0 %v1502_v51, %s5413_s16  ;;  %v3410_v51 = vor.u32 %v4006_v44, %v3409_v43  ;;  %v2766_v59 = vpop.f32.mrf.mxu0 }
 0x1f0   : > { %v1284_v55 = vpop.permute.xlu1 %1283  ;;  %v1066_v56 = vpop.permute.xlu0 %1065  ;;  %1321 = vrot.lane.b32.xlu2 %v1304_v53, %s4255_s11 }
 0x1f1   : > { %1301 = vst.msk [vmem:[#allocation2 + $0x2b8] sm:$0xf] %vm350_vm0, %v1284_v55  ;;  %v4102_v60 = vld [vmem:[#allocation2 + $0x208] sm:$0xff]  ;;  %v2819_v53 = vpop.f32.mrf.mxu2  ;;  %v3462_v55 = vor.u32 %v4012_v47, %v3459_v48 }
 0x1f2   : > { %1088 = vst.msk [vmem:[#allocation2 + $0x204] sm:$0xf] %vm350_vm0, %v1066_v56  ;;  %v1372_v61 = vpop.permute.xlu2 %1371  ;;  %2990 = vmatpush.bf16.msra.mxu0 %v4102_v60  ;;  %v5147_v56 = vpop.f32.mrf.mxu3  ;;  %v2820_v57 = vadd.f32 %v2819_v53, %v2791_v24  ;;  %v1496_v60 = vld [vmem:[%s4609_s27 + $0x4] sm:$0xf] }
 0x1f3   : > { %1393 = vst.msk [vmem:[#allocation2 + $0x2e8] sm:$0xf] %vm350_vm0, %v1372_v61  ;;  %v2795_v61 = vpop.f32.mrf.mxu1 }
 0x1f5   : > { %2939 = vmatmul.bf16.gmra.mxu2 %v3402_v1 }
 0x1f6   : > { %1425 = vrot.lane.b32.xlu1 %v1404_v63, %s4257_s13  ;;  %1423 = vrot.lane.b32.xlu0 %v1403_v0, %s4257_s13  ;;  %v2796_v63 = vadd.f32 %v2795_v61, %v2766_v59 }
 0x1f7   : > { %3026 = vmatmul.bf16.gmra.mxu1 %v3414_v2  ;;  %v3513_v2 = vld [vmem:[%s5408_s3 + $0x168] sm:$0xf] }
 0x1f8   : > { %v1382_v8 = vpop.permute.xlu1 %1381  ;;  %v1380_v9 = vpop.permute.xlu0 %1379  ;;  %v4124_v12 = vld [vmem:[#allocation2 + $0x2b8] sm:$0xff]  ;;  %1519 = vrot.lane.b32.xlu2 %v1499_v5, %s5413_s16  ;;  %v4027_v5 = vld [vmem:[%s5408_s3 + $0x174] sm:$0xf]  ;;  %v3514_v10 = vor.u32 %v4033_v3, %v3513_v2 }
 0x1f9   : > { %1398 = vst.msk [vmem:[#allocation2 + $0x2fc] sm:$0xf] %vm350_vm0, %v1382_v8  ;;  %v4101_v13 = vld [vmem:[#allocation2 + $0x200] sm:$0xff]  ;;  %3042 = vmatpush.bf16.msrb.mxu2 %v4124_v12  ;;  %v2793_v12 = vadd.f32 %v2792_v41, %v2763_v37 }
 0x1fa   : > { %1397 = vst.msk [vmem:[#allocation2 + $0x2f8] sm:$0xf] %vm350_vm0, %v1380_v9  ;;  %v1478_v15 = vpop.permute.xlu2 %1477  ;;  %2991 = vmatpush.bf16.msra.mxu0 %v4101_v13  ;;  %v2821_v9 = vpop.f32.mrf.mxu2  ;;  %v3526_v13 = vor.u32 %v4027_v5, %v3523_v7 }
 0x1fb   : > { %1494 = vst.msk [vmem:[#allocation2 + $0x33c] sm:$0xf] %vm350_vm0, %v1478_v15  ;;  %v2848_v11 = vpop.f32.mrf.mxu3  ;;  %v2768_v15 = vpop.f32.mrf.mxu0 }
 0x1fc   : > { %v2797_v16 = vpop.f32.mrf.mxu1 }
 0x1fd   : > { %2992 = vmatmul.bf16.vlgmr.msra.gmra.mxu0 %v3354_v14  ;;  %2968 = vmatmul.bf16.gmra.mxu3 %v3406_v18  ;;  %v2849_v14 = vadd.f32 %v2848_v11, %v2820_v57  ;;  %v4020_v18 = vld [vmem:[%s5408_s3 + $0x134] sm:$0xf0] }
 0x1fe   : > { %1521 = vrot.lane.b32.xlu0 %v1500_v17, %s5413_s16  ;;  %1419 = vrot.lane.b32.xlu1 %v1401_v21, %s4257_s13  ;;  %v3465_v17 = vld [vmem:[%s5408_s3 + $0x100] sm:$0xf] }
 0x1ff   : > { %v3466_v27 = vor.u32 %v4020_v18, %v3465_v17 }
 0x200   : > { %v1376_v25 = vpop.permute.xlu1 %1375  ;;  %v1282_v26 = vpop.permute.xlu0 %1281  ;;  %1421 = vrot.lane.b32.xlu2 %v1402_v23, %s4257_s13  ;;  %v3515_v23 = vld [vmem:[%s5408_s3 + $0x1a0] sm:$0xf0] }
 0x201   : > { %1395 = vst.msk [vmem:[#allocation2 + $0x2f0] sm:$0xf] %vm350_vm0, %v1376_v25  ;;  %v4132_v30 = vld [vmem:[#allocation2 + $0x2f8] sm:$0xff]  ;;  %v2822_v25 = vadd.f32 %v2821_v9, %v2793_v12 }
 0x202   : > { %1300 = vst.msk [vmem:[#allocation2 + $0x2b4] sm:$0xf] %vm350_vm0, %v1282_v26  ;;  %v1368_v32 = vpop.permute.xlu2 %1367  ;;  %3071 = vmatpush.bf16.msrb.mxu3 %v4132_v30  ;;  %v2824_v29 = vpop.f32.mrf.mxu2  ;;  %v3518_v30 = vor.u32 %v4026_v22, %v3515_v23 }
 0x203   : > { %1391 = vst.msk [vmem:[#allocation2 + $0x2e0] sm:$0xf] %vm350_vm0, %v1368_v32  ;;  %v2825_v31 = vadd.f32 %v2824_v29, %v2796_v63  ;;  %v2850_v32 = vpop.f32.mrf.mxu3 }
 0x204   : > { %v2906_v36 = vpop.f32.mrf.mxu1 }
 0x205   : > { %2944 = vmatmul.bf16.gmra.mxu2 %v3458_v35  ;;  %v2877_v35 = vpop.f32.mrf.mxu0 }
 0x206   : > { %1515 = vrot.lane.b32.xlu0 %v1497_v34, %s5413_s16  ;;  %1517 = vrot.lane.b32.xlu1 %v1498_v38, %s5413_s16  ;;  %v2851_v34 = vadd.f32 %v2850_v32, %v2822_v25  ;;  %v2878_v37 = vadd.f32 %v2877_v35, %v2849_v14 }
 0x207   : > { %3031 = vmatmul.bf16.gmra.mxu1 %v3470_v39 }
 0x208   : > { %v1278_v45 = vpop.permute.xlu1 %1277  ;;  %v1276_v46 = vpop.permute.xlu0 %1275  ;;  %v4131_v49 = vld [vmem:[#allocation2 + $0x2f0] sm:$0xff]  ;;  %1415 = vrot.lane.b32.xlu2 %v1399_v42, %s4257_s13  ;;  %v5185_v42 = vadd.f32 %v2906_v36, %v2878_v37 }
 0x209   : > { %1298 = vst.msk [vmem:[#allocation2 + $0x2ac] sm:$0xf] %vm350_vm0, %v1278_v45  ;;  %v4123_v50 = vld [vmem:[#allocation2 + $0x2b0] sm:$0xff]  ;;  %3072 = vmatpush.bf16.msrb.mxu3 %v4131_v49 }
 0x20a   : > { %1297 = vst.msk [vmem:[#allocation2 + $0x2a8] sm:$0xf] %vm350_vm0, %v1276_v46  ;;  %v1474_v52 = vpop.permute.xlu2 %1473  ;;  %3043 = vmatpush.bf16.msrb.mxu2 %v4123_v50  ;;  %v2826_v44 = vpop.f32.mrf.mxu2  ;;  %v2798_v46 = vadd.f32 %v2797_v16, %v2768_v15  ;;  %v3521_v50 = vld [vmem:[%s5408_s3 + $0x170] sm:$0xf] }
 0x20b   : > { %1492 = vst.msk [vmem:[#allocation2 + $0x334] sm:$0xf] %vm350_vm0, %v1474_v52  ;;  %v2853_v45 = vpop.f32.mrf.mxu3 }
 0x20c   : > { %v2854_v47 = vadd.f32 %v2853_v45, %v2825_v31  ;;  %v2908_v49 = vpop.f32.mrf.mxu1  ;;  %v2827_v57 = vadd.f32 %v2826_v44, %v2798_v46 }
 0x20d   : > { %2997 = vmatmul.bf16.gmra.mxu0 %v3410_v51  ;;  %2973 = vmatmul.bf16.gmra.mxu3 %v3462_v55  ;;  %v2879_v48 = vpop.f32.mrf.mxu0  ;;  %v4034_v51 = vld [vmem:[%s5408_s3 + $0x1a4] sm:$0xf0] }
 0x20e   : > { %1417 = vrot.lane.b32.xlu0 %v1400_v54, %s4257_s13  ;;  %1511 = vrot.lane.b32.xlu1 %v1495_v58, %s5413_s16  ;;  %v2880_v52 = vadd.f32 %v2879_v48, %v2851_v34 }
 0x210   : > { %v1476_v0 = vpop.permute.xlu1 %1475  ;;  %v1374_v1 = vpop.permute.xlu0 %1373  ;;  %1513 = vrot.lane.b32.xlu2 %v1496_v60, %s5413_s16  ;;  %v5196_v59 = vadd.f32 %v2908_v49, %v2880_v52  ;;  %v3522_v60 = vor.u32 %v4034_v51, %v3521_v50 }
 0x211   : > { %1493 = vst.msk [vmem:[#allocation2 + $0x338] sm:$0xf] %vm350_vm0, %v1476_v0  ;;  %v4122_v6 = vld [vmem:[#allocation2 + $0x2a8] sm:$0xff] }
 0x212   : > { %1394 = vst.msk [vmem:[#allocation2 + $0x2ec] sm:$0xf] %vm350_vm0, %v1374_v1  ;;  %v1332_v8 = vpop.permute.xlu2 %1331  ;;  %3044 = vmatpush.bf16.msrb.mxu2 %v4122_v6  ;;  %v2829_v63 = vpop.f32.mrf.mxu2 }
 0x213   : > { %1349 = vst.msk [vmem:[#allocation2 + $0x2d8] sm:$0xf] %vm350_vm0, %v1332_v8  ;;  %v2830_v0 = vadd.f32 %v2829_v63, %v5077_v4  ;;  %v2855_v1 = vpop.f32.mrf.mxu3 }
 0x214   : > { %v2856_v2 = vadd.f32 %v2855_v1, %v2827_v57  ;;  %v2911_v5 = vpop.f32.mrf.mxu1 }
 0x215   : > { %2949 = vmatmul.bf16.gmra.mxu2 %v3514_v10  ;;  %v2882_v3 = vpop.f32.mrf.mxu0 }
 0x216   : > { %v2883_v6 = vadd.f32 %v2882_v3, %v2854_v47 }
 0x217   : > { %3036 = vmatmul.bf16.gmra.mxu1 %v3526_v13  ;;  %v2803_v13 = vadd.f32 %v5099_v19, %v5072_v62 }
 0x218   : > { %v1274_v20 = vpop.permute.xlu1 %1273  ;;  %v1272_v21 = vpop.permute.xlu0 %1271  ;;  %v4140_v24 = vld [vmem:[#allocation2 + $0x338] sm:$0xff]  ;;  %v5202_v10 = vadd.f32 %v2911_v5, %v2883_v6 }
 0x219   : > { %1296 = vst.msk [vmem:[#allocation2 + $0x2a4] sm:$0xf] %vm350_vm0, %v1274_v20  ;;  %v4130_v26 = vld [vmem:[#allocation2 + $0x2e8] sm:$0xff]  ;;  %3100 = vmatpush.bf16.msrb.mxu0 %v4140_v24 }
 0x21a   : > { %1295 = vst.msk [vmem:[#allocation2 + $0x2a0] sm:$0xf] %vm350_vm0, %v1272_v21  ;;  %v1470_v28 = vpop.permute.xlu2 %1469  ;;  %3073 = vmatpush.bf16.msrb.mxu3 %v4130_v26  ;;  %v2831_v12 = vpop.f32.mrf.mxu2 }
 0x21b   : > { %1490 = vst.msk [vmem:[#allocation2 + $0x32c] sm:$0xf] %vm350_vm0, %v1470_v28  ;;  %v2858_v4 = vpop.f32.mrf.mxu3  ;;  %v2832_v22 = vadd.f32 %v2831_v12, %v2803_v13 }
 0x21c   : > { %v2859_v14 = vadd.f32 %v2858_v4, %v2830_v0  ;;  %v2913_v16 = vpop.f32.mrf.mxu1 }
 0x21d   : > { %3002 = vmatmul.bf16.gmra.mxu0 %v3466_v27  ;;  %2978 = vmatmul.bf16.gmra.mxu3 %v3518_v30  ;;  %v2884_v15 = vpop.f32.mrf.mxu0 }
 0x21e   : > { %v2885_v17 = vadd.f32 %v2884_v15, %v2856_v2 }
 0x220   : > { %v1472_v38 = vpop.permute.xlu1 %1471  ;;  %v1370_v39 = vpop.permute.xlu0 %1369  ;;  %v5209_v24 = vadd.f32 %v2913_v16, %v2885_v17  ;;  %v3986_v16 = vld [vmem:[%s5408_s3 + $0x2c] sm:$0xf]  ;;  %v3363_v17 = vld [vmem:[%s5408_s3 + $0x60] sm:$0xf0] }
 0x221   : > { %1491 = vst.msk [vmem:[#allocation2 + $0x330] sm:$0xf] %vm350_vm0, %v1472_v38  ;;  %v4121_v41 = vld [vmem:[#allocation2 + $0x2a0] sm:$0xff] }
 0x222   : > { %1392 = vst.msk [vmem:[#allocation2 + $0x2e4] sm:$0xf] %vm350_vm0, %v1370_v39  ;;  %v1328_v43 = vpop.permute.xlu2 %1327  ;;  %3045 = vmatpush.bf16.msrb.mxu2 %v4121_v41  ;;  %v2834_v26 = vpop.f32.mrf.mxu2 }
 0x223   : > { %1347 = vst.msk [vmem:[#allocation2 + $0x2d0] sm:$0xf] %vm350_vm0, %v1328_v43  ;;  %v2835_v62 = vadd.f32 %v2834_v26, %v5125_v40  ;;  %v2860_v19 = vpop.f32.mrf.mxu3  ;;  %v2808_v40 = vadd.f32 %v5147_v56, %v5120_v33 }
 0x224   : > { %v2861_v27 = vadd.f32 %v2860_v19, %v2832_v22  ;;  %v2916_v29 = vpop.f32.mrf.mxu1  ;;  %v3417_v19 = vld [vmem:[%s5408_s3 + $0x98] sm:$0xf] }
 0x225   : > { %v2887_v28 = vpop.f32.mrf.mxu0 }
 0x226   : > { %v2888_v30 = vadd.f32 %v2887_v28, %v2859_v14 }
 0x228   : > { %v1238_v53 = vpop.permute.xlu1 %1237  ;;  %v1236_v54 = vpop.permute.xlu0 %1235  ;;  %v4139_v55 = vld [vmem:[#allocation2 + $0x330] sm:$0xff]  ;;  %v5215_v35 = vadd.f32 %v2916_v29, %v2888_v30 }
 0x229   : > { %1254 = vst.msk [vmem:[#allocation2 + $0x29c] sm:$0xf] %vm350_vm0, %v1238_v53  ;;  %v4129_v58 = vld [vmem:[#allocation2 + $0x2e0] sm:$0xff]  ;;  %3101 = vmatpush.bf16.msrb.mxu0 %v4139_v55 }
 0x22a   : > { %1253 = vst.msk [vmem:[#allocation2 + $0x298] sm:$0xf] %vm350_vm0, %v1236_v54  ;;  %v1466_v61 = vpop.permute.xlu2 %1465  ;;  %3074 = vmatpush.bf16.msrb.mxu3 %v4129_v58  ;;  %v2836_v43 = vpop.f32.mrf.mxu2 }
 0x22b   : > { %1488 = vst.msk [vmem:[#allocation2 + $0x324] sm:$0xf] %vm350_vm0, %v1466_v61  ;;  %v2863_v37 = vpop.f32.mrf.mxu3  ;;  %v2837_v48 = vadd.f32 %v2836_v43, %v2808_v40  ;;  %v4000_v40 = vld [vmem:[%s5408_s3 + $0x9c] sm:$0xf] }
 0x22c   : > { %v2864_v38 = vadd.f32 %v2863_v37, %v2835_v62  ;;  %v2918_v41 = vpop.f32.mrf.mxu1 }
 0x22d   : > { %3007 = vmatmul.bf16.gmra.mxu0 %v3522_v60  ;;  %v2889_v39 = vpop.f32.mrf.mxu0 }
 0x22e   : > { %v2890_v44 = vadd.f32 %v2889_v39, %v2861_v27  ;;  %v4007_v27 = vld [vmem:[%s5408_s3 + $0xcc] sm:$0xf0] }
 0x230   : > { %v1468_v7 = vpop.permute.xlu1 %1467  ;;  %v1334_v8 = vpop.permute.xlu0 %1333  ;;  %v5222_v50 = vadd.f32 %v2918_v41, %v2890_v44 }
 0x231   : > { %1489 = vst.msk [vmem:[#allocation2 + $0x328] sm:$0xf] %vm350_vm0, %v1468_v7  ;;  %v4120_v9 = vld [vmem:[#allocation2 + $0x298] sm:$0xff] }
 0x232   : > { %1350 = vst.msk [vmem:[#allocation2 + $0x2dc] sm:$0xf] %vm350_vm0, %v1334_v8  ;;  %v1324_v11 = vpop.permute.xlu2 %1323  ;;  %3046 = vmatpush.bf16.msrb.mxu2 %v4120_v9  ;;  %v3361_v9 = vld [vmem:[%s5408_s3 + $0x28] sm:$0xf] }
 0x233   : > { %1345 = vst.msk [vmem:[#allocation2 + $0x2c8] sm:$0xf] %vm350_vm0, %v1324_v11  ;;  %v2865_v33 = vpop.f32.mrf.mxu3  ;;  %v3993_v11 = vld [vmem:[%s5408_s3 + $0x5c] sm:$0xf0] }
 0x234   : > { %v2866_v56 = vadd.f32 %v2865_v33, %v2837_v48  ;;  %v2921_v54 = vpop.f32.mrf.mxu1  ;;  %v3362_v14 = vor.u32 %v3993_v11, %v3361_v9  ;;  %v3994_v9 = vld [vmem:[%s5408_s3 + $0x64] sm:$0xf0]  ;;  %v3987_v11 = vld [vmem:[%s5408_s3 + $0x34] sm:$0xf] }
 0x235   : > { %v2892_v52 = vpop.f32.mrf.mxu0 }
 0x236   : > { %v2893_v53 = vadd.f32 %v2892_v52, %v2864_v38  ;;  %v3419_v38 = vld [vmem:[%s5408_s3 + $0xd0] sm:$0xf0]  ;;  %v3473_v52 = vld [vmem:[%s5408_s3 + $0x108] sm:$0xf] }
 0x237   : > { %v3422_v44 = vor.u32 %v4000_v40, %v3419_v38  ;;  %v4001_v40 = vld [vmem:[%s5408_s3 + $0xa4] sm:$0xf]  ;;  %v3427_v38 = vld [vmem:[%s5408_s3 + $0xd8] sm:$0xf0] }
 0x238   : > { %v1234_v18 = vpop.permute.xlu1 %1233  ;;  %v1232_v20 = vpop.permute.xlu0 %1231  ;;  %v4138_v21 = vld [vmem:[#allocation2 + $0x328] sm:$0xff]  ;;  %v5227_v60 = vadd.f32 %v2921_v54, %v2893_v53  ;;  %v4021_v53 = vld [vmem:[%s5408_s3 + $0x13c] sm:$0xf0] }
 0x239   : > { %1252 = vst.msk [vmem:[#allocation2 + $0x294] sm:$0xf] %vm350_vm0, %v1234_v18  ;;  %v4128_v23 = vld [vmem:[#allocation2 + $0x2d8] sm:$0xff]  ;;  %3102 = vmatpush.bf16.msrb.mxu0 %v4138_v21 }
 0x23a   : > { %1251 = vst.msk [vmem:[#allocation2 + $0x290] sm:$0xf] %vm350_vm0, %v1232_v20  ;;  %v1430_v25 = vpop.permute.xlu2 %1429  ;;  %3075 = vmatpush.bf16.msrb.mxu3 %v4128_v23  ;;  %v3366_v23 = vor.u32 %v3986_v16, %v3363_v17 }
 0x23b   : > { %1446 = vst.msk [vmem:[#allocation2 + $0x31c] sm:$0xf] %vm350_vm0, %v1430_v25 }
 0x23c   : > { %v2923_v1 = vpop.f32.mrf.mxu1 }
 0x23d   : > { %v2894_v63 = vpop.f32.mrf.mxu0 }
 0x23e   : > { %v2895_v0 = vadd.f32 %v2894_v63, %v2866_v56 }
 0x240   : > { %v1464_v31 = vpop.permute.xlu1 %1463  ;;  %v1330_v32 = vpop.permute.xlu0 %1329  ;;  %v5232_v7 = vadd.f32 %v2923_v1, %v2895_v0 }
 0x241   : > { %1487 = vst.msk [vmem:[#allocation2 + $0x320] sm:$0xf] %vm350_vm0, %v1464_v31  ;;  %v4119_v34 = vld [vmem:[#allocation2 + $0x290] sm:$0xff] }
 0x242   : > { %1348 = vst.msk [vmem:[#allocation2 + $0x2d4] sm:$0xf] %vm350_vm0, %v1330_v32  ;;  %v1524_v36 = vpop.permute.xlu2 %1523  ;;  %3047 = vmatpush.bf16.msrb.mxu2 %v4119_v34  ;;  %v3418_v34 = vor.u32 %v4007_v27, %v3417_v19 }
 0x243   : > { %1541 = vst.msk [vmem:[#allocation2 + $0x358] sm:$0xf] %vm350_vm0, %v1524_v36 }
 0x248   : > { %v1230_v45 = vpop.permute.xlu1 %1229  ;;  %v1228_v46 = vpop.permute.xlu0 %1227  ;;  %v4137_v47 = vld [vmem:[#allocation2 + $0x320] sm:$0xff] }
 0x249   : > { %1250 = vst.msk [vmem:[#allocation2 + $0x28c] sm:$0xf] %vm350_vm0, %v1230_v45  ;;  %v4127_v49 = vld [vmem:[#allocation2 + $0x2d0] sm:$0xff]  ;;  %3103 = vmatpush.bf16.msrb.mxu0 %v4137_v47 }
 0x24a   : > { %1249 = vst.msk [vmem:[#allocation2 + $0x288] sm:$0xf] %vm350_vm0, %v1228_v46  ;;  %v1322_v51 = vpop.permute.xlu2 %1321  ;;  %3076 = vmatpush.bf16.msrb.mxu3 %v4127_v49 }
 0x24b   : > { %1344 = vst.msk [vmem:[#allocation2 + $0x2c4] sm:$0xf] %vm350_vm0, %v1322_v51 }
 0x250   : > { %v1428_v55 = vpop.permute.xlu1 %1427  ;;  %v1326_v57 = vpop.permute.xlu0 %1325 }
 0x251   : > { %1445 = vst.msk [vmem:[#allocation2 + $0x318] sm:$0xf] %vm350_vm0, %v1428_v55  ;;  %v4118_v58 = vld [vmem:[#allocation2 + $0x288] sm:$0xff] }
 0x252   : > { %1346 = vst.msk [vmem:[#allocation2 + $0x2cc] sm:$0xf] %vm350_vm0, %v1326_v57  ;;  %v1520_v61 = vpop.permute.xlu2 %1519  ;;  %3048 = vmatpush.bf16.msrb.mxu2 %v4118_v58 }
 0x253   : > { %1539 = vst.msk [vmem:[#allocation2 + $0x350] sm:$0xf] %vm350_vm0, %v1520_v61  ;;  %v3474_v61 = vor.u32 %v4021_v53, %v3473_v52 }
 0x258   : > { %v1226_v2 = vpop.permute.xlu1 %1225  ;;  %v1224_v3 = vpop.permute.xlu0 %1223  ;;  %v4136_v5 = vld [vmem:[#allocation2 + $0x318] sm:$0xff] }
 0x259   : > { %1248 = vst.msk [vmem:[#allocation2 + $0x284] sm:$0xf] %vm350_vm0, %v1226_v2  ;;  %v4126_v6 = vld [vmem:[#allocation2 + $0x2c8] sm:$0xff]  ;;  %3104 = vmatpush.bf16.msrb.mxu0 %v4136_v5 }
 0x25a   : > { %1247 = vst.msk [vmem:[#allocation2 + $0x280] sm:$0xf] %vm350_vm0, %v1224_v3  ;;  %v1422_v8 = vpop.permute.xlu2 %1421  ;;  %3077 = vmatpush.bf16.msrb.mxu3 %v4126_v6  ;;  %v4014_v5 = vld [vmem:[%s5408_s3 + $0x10c] sm:$0xf] }
 0x25b   : > { %1442 = vst.msk [vmem:[#allocation2 + $0x30c] sm:$0xf] %vm350_vm0, %v1422_v8  ;;  %v3475_v8 = vld [vmem:[%s5408_s3 + $0x140] sm:$0xf0] }
 0x260   : > { %v1320_v12 = vpop.permute.xlu1 %1319  ;;  %v1526_v4 = vpop.permute.xlu0 %1525 }
 0x261   : > { %1343 = vst.msk [vmem:[#allocation2 + $0x2c0] sm:$0xf] %vm350_vm0, %v1320_v12  ;;  %v4117_v13 = vld [vmem:[#allocation2 + $0x280] sm:$0xff]  ;;  %v3371_v12 = vld [vmem:[%s5408_s3 + $0x68] sm:$0xf0] }
 0x262   : > { %1542 = vst.msk [vmem:[#allocation2 + $0x35c] sm:$0xf] %vm350_vm0, %v1526_v4  ;;  %v1416_v15 = vpop.permute.xlu2 %1415  ;;  %3049 = vmatpush.bf16.msrb.mxu2 %v4117_v13 }
 0x263   : > { %1439 = vst.msk [vmem:[#allocation2 + $0x300] sm:$0xf] %vm350_vm0, %v1416_v15 }
 0x264   : > { %v3022_v31 = vpop.f32.mrf.mxu1 }
 0x265   : > { %3050 = vmatmul.bf16.vlgmr.msrb.gmra.mxu2 %v3362_v14  ;;  %v3478_v14 = vor.u32 %v4014_v5, %v3475_v8 }
 0x268   : > { %v1426_v18 = vpop.permute.xlu1 %1425  ;;  %v1424_v20 = vpop.permute.xlu0 %1423  ;;  %v4125_v21 = vld [vmem:[#allocation2 + $0x2c0] sm:$0xff] }
 0x269   : > { %1444 = vst.msk [vmem:[#allocation2 + $0x314] sm:$0xf] %vm350_vm0, %v1426_v18  ;;  %v4144_v22 = vld [vmem:[#allocation2 + $0x358] sm:$0xff]  ;;  %v2935_v25 = vpop.f32.mrf.mxu2  ;;  %3078 = vmatpush.bf16.msrb.mxu3 %v4125_v21  ;;  %v3374_v18 = vor.u32 %v3987_v11, %v3371_v12 }
 0x26a   : > { %1443 = vst.msk [vmem:[#allocation2 + $0x310] sm:$0xf] %vm350_vm0, %v1424_v20  ;;  %v1514_v26 = vpop.permute.xlu2 %1513  ;;  %v2936_v62 = vadd.f32 %v2935_v25, %v5185_v42  ;;  %3133 = vmatpush.bf16.msrb.mxu1 %v4144_v22 }
 0x26b   : > { %1536 = vst.msk [vmem:[#allocation2 + $0x344] sm:$0xf] %vm350_vm0, %v1514_v26 }
 0x26c   : > { %3079 = vmatmul.bf16.vlgmr.msrb.gmra.mxu3 %v3366_v23  ;;  %v3024_v51 = vpop.f32.mrf.mxu1 }
 0x270   : > { %v1522_v28 = vpop.permute.xlu0 %1521  ;;  %v1420_v29 = vpop.permute.xlu1 %1419 }
 0x271   : > { %1540 = vst.msk [vmem:[#allocation2 + $0x354] sm:$0xf] %vm350_vm0, %v1522_v28  ;;  %v4135_v30 = vld [vmem:[#allocation2 + $0x310] sm:$0xff]  ;;  %v2937_v32 = vpop.f32.mrf.mxu2  ;;  %v2964_v42 = vpop.f32.mrf.mxu3 }
 0x272   : > { %1441 = vst.msk [vmem:[#allocation2 + $0x308] sm:$0xf] %vm350_vm0, %v1420_v29  ;;  %v2938_v36 = vadd.f32 %v2937_v32, %v5196_v59  ;;  %v2965_v37 = vadd.f32 %v2964_v42, %v2936_v62  ;;  %3105 = vmatpush.bf16.msrb.mxu0 %v4135_v30  ;;  %v3529_v62 = vld [vmem:[%s5408_s3 + $0x178] sm:$0xf]  ;;  %v4028_v42 = vld [vmem:[%s5408_s3 + $0x17c] sm:$0xf] }
 0x274   : > { %v3027_v3 = vpop.f32.mrf.mxu1 }
 0x275   : > { %3055 = vmatmul.bf16.gmra.mxu2 %v3418_v34 }
 0x278   : > { %v1516_v39 = vpop.permute.xlu0 %1515  ;;  %v4143_v41 = vld [vmem:[#allocation2 + $0x350] sm:$0xff]  ;;  %v1518_v43 = vpop.permute.xlu1 %1517 }
 0x279   : > { %1537 = vst.msk [vmem:[#allocation2 + $0x348] sm:$0xf] %vm350_vm0, %v1516_v39  ;;  %v4134_v45 = vld [vmem:[#allocation2 + $0x308] sm:$0xff]  ;;  %v2940_v46 = vpop.f32.mrf.mxu2  ;;  %v2966_v59 = vpop.f32.mrf.mxu3  ;;  %3134 = vmatpush.bf16.msrb.mxu1 %v4143_v41 }
 0x27a   : > { %1538 = vst.msk [vmem:[#allocation2 + $0x34c] sm:$0xf] %vm350_vm0, %v1518_v43  ;;  %v2941_v47 = vadd.f32 %v2940_v46, %v5202_v10  ;;  %v2967_v48 = vadd.f32 %v2966_v59, %v2938_v36  ;;  %v2993_v49 = vpop.f32.mrf.mxu0  ;;  %3106 = vmatpush.bf16.msrb.mxu0 %v4134_v45  ;;  %v3531_v36 = vld [vmem:[%s5408_s3 + $0x1b0] sm:$0xf0]  ;;  %v3430_v45 = vor.u32 %v4001_v40, %v3427_v38 }
 0x27b   : > { %v2994_v33 = vadd.f32 %v2993_v49, %v2965_v37  ;;  %v3425_v37 = vld [vmem:[%s5408_s3 + $0xa0] sm:$0xf]  ;;  %v3534_v41 = vor.u32 %v4028_v42, %v3531_v36 }
 0x27c   : > { %3084 = vmatmul.bf16.gmra.mxu3 %v3422_v44  ;;  %v3029_v26 = vpop.f32.mrf.mxu1  ;;  %v3165_v49 = vld [vmem:[%s5409_s4] sm:$0xff] }
 0x27d   : > { %v5273_v56 = vadd.f32 %v3022_v31, %v2994_v33 }
 0x280   : > { %v1418_v54 = vpop.permute.xlu0 %1417  ;;  %v1512_v10 = vpop.permute.xlu1 %1511 }
 0x281   : > { %1440 = vst.msk [vmem:[#allocation2 + $0x304] sm:$0xf] %vm350_vm0, %v1418_v54  ;;  %v4142_v55 = vld [vmem:[#allocation2 + $0x348] sm:$0xff]  ;;  %v2942_v57 = vpop.f32.mrf.mxu2  ;;  %v2969_v58 = vpop.f32.mrf.mxu3 }
 0x282   : > { %1535 = vst.msk [vmem:[#allocation2 + $0x340] sm:$0xf] %vm350_vm0, %v1512_v10  ;;  %v2943_v63 = vadd.f32 %v2942_v57, %v5209_v24  ;;  %v2970_v0 = vadd.f32 %v2969_v58, %v2941_v47  ;;  %v2995_v1 = vpop.f32.mrf.mxu0  ;;  %3135 = vmatpush.bf16.msrb.mxu1 %v4142_v55  ;;  %v3369_v24 = vld [vmem:[%s5408_s3 + $0x30] sm:$0xf]  ;;  %v4022_v55 = vld [vmem:[%s5408_s3 + $0x144] sm:$0xf0] }
 0x283   : > { %v2996_v2 = vadd.f32 %v2995_v1, %v2967_v48  ;;  %v3370_v15 = vor.u32 %v3994_v9, %v3369_v24  ;;  %v3481_v10 = vld [vmem:[%s5408_s3 + $0x110] sm:$0xf]  ;;  %v4015_v57 = vld [vmem:[%s5408_s3 + $0x114] sm:$0xf]  ;;  %v3483_v58 = vld [vmem:[%s5408_s3 + $0x148] sm:$0xf0] }
 0x284   : > { %v3032_v39 = vpop.f32.mrf.mxu1  ;;  %v4036_v1 = vld [vmem:[%s5408_s3 + $0x1b4] sm:$0xf0] }
 0x285   : > { %v5287_v6 = vadd.f32 %v3024_v51, %v2996_v2  ;;  %3060 = vmatmul.bf16.gmra.mxu2 %v3474_v61  ;;  %v4260_v51 = vmov 0   ;;  %v3482_v61 = vor.u32 %v4022_v55, %v3481_v10  ;;  %v4029_v2 = vld [vmem:[%s5408_s3 + $0x184] sm:$0xf] }
 0x286   : > { %4211 = vset.pattern.permute.xlu0 %v4260_v51 }
 0x287   : > { %3168 = vperm.xlu0 %4211, %v3165_v49  }
 0x288   : > { %v4133_v4 = vld [vmem:[#allocation2 + $0x300] sm:$0xff] }
 0x289   : > { %v4141_v13 = vld [vmem:[#allocation2 + $0x340] sm:$0xff]  ;;  %v2945_v16 = vpop.f32.mrf.mxu2  ;;  %v2971_v17 = vpop.f32.mrf.mxu3  ;;  %3107 = vmatpush.bf16.msrb.mxu0 %v4133_v4 }
 0x28a   : > { %v2946_v20 = vadd.f32 %v2945_v16, %v5215_v35  ;;  %v2972_v21 = vadd.f32 %v2971_v17, %v2943_v63  ;;  %v2998_v22 = vpop.f32.mrf.mxu0  ;;  %3136 = vmatpush.bf16.msrb.mxu1 %v4141_v13  ;;  %v4035_v35 = vld [vmem:[%s5408_s3 + $0x1ac] sm:$0xf0]  ;;  %v3486_v63 = vor.u32 %v4015_v57, %v3483_v58 }
 0x28b   : > { %v2999_v23 = vadd.f32 %v2998_v22, %v2970_v0  ;;  %v3530_v28 = vor.u32 %v4035_v35, %v3529_v62  ;;  %v3537_v0 = vld [vmem:[%s5408_s3 + $0x180] sm:$0xf] }
 0x28c   : > { %3089 = vmatmul.bf16.gmra.mxu3 %v3478_v14  ;;  %3108 = vmatmul.bf16.vlgmr.msrb.gmra.mxu0 %v3370_v15  ;;  %v3034_v52 = vpop.f32.mrf.mxu1  ;;  %v3538_v5 = vor.u32 %v4036_v1, %v3537_v0 }
 0x28d   : > { %v5305_v25 = vadd.f32 %v3027_v3, %v2999_v23  ;;  %3975 = vmatmul.msk.bf16.vlgmr.msrb.gmra.mxu1 %vm2739_vm1, %v3374_v18  ;;  %v3539_v3 = vld [vmem:[%s5408_s3 + $0x1b8] sm:$0xf0] }
 0x28e   : > { %v3542_v8 = vor.u32 %v4029_v2, %v3539_v3 }
 0x291   : > { %v2947_v19 = vpop.f32.mrf.mxu2  ;;  %v2974_v27 = vpop.f32.mrf.mxu3 }
 0x292   : > { %v2948_v29 = vadd.f32 %v2947_v19, %v5222_v50  ;;  %v2975_v30 = vadd.f32 %v2974_v27, %v2946_v20  ;;  %v3000_v31 = vpop.f32.mrf.mxu0  ;;  %v4008_v50 = vld [vmem:[%s5408_s3 + $0xd4] sm:$0xf0] }
 0x293   : > { %v3001_v32 = vadd.f32 %v3000_v31, %v2972_v21  ;;  %v3426_v43 = vor.u32 %v4008_v50, %v3425_v37 }
 0x294   : > { %v3037_v15 = vpop.f32.mrf.mxu1 }
 0x295   : > { %v5318_v34 = vadd.f32 %v3029_v26, %v3001_v32  ;;  %3065 = vmatmul.bf16.gmra.mxu2 %v3530_v28 }
 0x299   : > { %v2976_v44 = vpop.f32.mrf.mxu3  ;;  %v2950_v24 = vpop.f32.mrf.mxu2 }
 0x29a   : > { %v2977_v46 = vadd.f32 %v2976_v44, %v2948_v29  ;;  %v3003_v59 = vpop.f32.mrf.mxu0 }
 0x29b   : > { %v3004_v47 = vadd.f32 %v3003_v59, %v2975_v30 }
 0x29c   : > { %3094 = vmatmul.bf16.gmra.mxu3 %v3534_v41  ;;  %3113 = vmatmul.bf16.gmra.mxu0 %v3426_v43  ;;  %v5371_v20 = vpop.f32.mrf.mxu1 }
 0x29d   : > { %v5335_v48 = vadd.f32 %v3032_v39, %v3004_v47  ;;  %3976 = vmatmul.msk.bf16.gmra.mxu1 %vm2739_vm1, %v3430_v45 }
 0x2a1   : > { %v2979_v9 = vpop.f32.mrf.mxu3  ;;  %v2952_v11 = vpop.f32.mrf.mxu2 }
 0x2a2   : > { %v3005_v33 = vpop.f32.mrf.mxu0 }
 0x2a3   : > { %v3006_v53 = vadd.f32 %v3005_v33, %v2977_v46 }
 0x2a5   : > { %v5341_v54 = vadd.f32 %v3034_v52, %v3006_v53 }
 0x2a9   : > { %v5369_v12 = vpop.f32.mrf.mxu3 }
 0x2aa   : > { %v3008_v13 = vpop.f32.mrf.mxu0 }
 0x2ac   : > { %3118 = vmatmul.bf16.gmra.mxu0 %v3482_v61 }
 0x2ad   : > { %3977 = vmatmul.msk.bf16.gmra.mxu1 %vm2739_vm1, %v3486_v63  ;;  %v2951_v63 = vadd.f32 %v2950_v24, %v5227_v60 }
 0x2b2   : > { %v3010_v17 = vpop.f32.mrf.mxu0 }
 0x2bc   : > { %3123 = vmatmul.bf16.gmra.mxu0 %v3538_v5 }
 0x2bd   : > { %3978 = vmatmul.msk.bf16.gmra.mxu1 %vm2739_vm1, %v3542_v8 }
 0x2e8   : > { %v3051_v4 = vpop.f32.mrf.mxu2 }
 0x2e9   : > { %v3052_v62 = vadd.f32 %v3051_v4, %v5273_v56 }
 0x2ef   : > { %v3080_v14 = vpop.f32.mrf.mxu3 }
 0x2f0   : > { %v3053_v16 = vpop.f32.mrf.mxu2  ;;  %v3081_v19 = vadd.f32 %v3080_v14, %v3052_v62 }
 0x2f1   : > { %v3054_v35 = vadd.f32 %v3053_v16, %v5287_v6 }
 0x2f7   : > { %v3082_v18 = vpop.f32.mrf.mxu3 }
 0x2f8   : > { %v3056_v21 = vpop.f32.mrf.mxu2  ;;  %v3083_v27 = vadd.f32 %v3082_v18, %v3054_v35  ;;  %v2953_v18 = vadd.f32 %v2952_v11, %v5232_v7 }
 0x2f9   : > { %v3057_v50 = vadd.f32 %v3056_v21, %v5305_v25 }
 0x2ff   : > { %v3085_v26 = vpop.f32.mrf.mxu3 }
 0x300   : > { %v3058_v32 = vpop.f32.mrf.mxu2  ;;  %v3086_v38 = vadd.f32 %v3085_v26, %v3057_v50 }
 0x301   : > { %v3059_v6 = vadd.f32 %v3058_v32, %v5318_v34  ;;  %v2980_v34 = vadd.f32 %v2979_v9, %v2951_v63 }
 0x303   : > { %v3009_v3 = vadd.f32 %v3008_v13, %v2980_v34 }
 0x305   : > { %v3038_v21 = vadd.f32 %v3037_v15, %v3009_v3 }
 0x307   : > { %v3087_v37 = vpop.f32.mrf.mxu3 }
 0x308   : > { %v3061_v44 = vpop.f32.mrf.mxu2  ;;  %v3088_v59 = vadd.f32 %v3087_v37, %v3059_v6 }
 0x309   : > { %v3109_v22 = vpop.f32.mrf.mxu0  ;;  %v3062_v52 = vadd.f32 %v3061_v44, %v5335_v48 }
 0x30a   : > { %v3138_v23 = vpop.f32.mrf.mxu1  ;;  %v3110_v28 = vadd.f32 %v3109_v22, %v3081_v19 }
 0x30c   : > { %v3139_v42 = vadd.f32 %v3138_v23, %v3110_v28  ;;  %v2982_v23 = vadd.f32 %v5369_v12, %v2953_v18 }
 0x30e   : > { %v3011_v9 = vadd.f32 %v3010_v17, %v2982_v23 }
 0x30f   : > { %v3090_v46 = vpop.f32.mrf.mxu3 }
 0x310   : > { %v3063_v25 = vpop.f32.mrf.mxu2  ;;  %v3091_v10 = vadd.f32 %v3090_v46, %v3062_v52  ;;  %v3040_v19 = vadd.f32 %v5371_v20, %v3011_v9 }
 0x311   : > { %v3111_v29 = vpop.f32.mrf.mxu0  ;;  %v3064_v1 = vadd.f32 %v3063_v25, %v5341_v54 }
 0x312   : > { %v3112_v30 = vadd.f32 %v3111_v29, %v3083_v27  ;;  %v3140_v31 = vpop.f32.mrf.mxu1 }
 0x314   : > { %v3141_v36 = vadd.f32 %v3140_v31, %v3112_v30  ;;  %v3169_v31 = vpop.permute.xlu0 %3168 }
 0x316   : > { %v3158_v40 = vmax.f32 %v3139_v42, %v3141_v36 }
 0x317   : > { %v3092_v55 = vpop.f32.mrf.mxu3 }
 0x318   : > { %v3093_v5 = vadd.f32 %v3092_v55, %v3064_v1  ;;  %v3066_v8 = vpop.f32.mrf.mxu2 }
 0x319   : > { %v3114_v39 = vpop.f32.mrf.mxu0  ;;  %v3067_v60 = vadd.f32 %v3066_v8, %v3038_v21 }
 0x31a   : > { %v3115_v41 = vadd.f32 %v3114_v39, %v3086_v38  ;;  %v3143_v43 = vpop.f32.mrf.mxu1 }
 0x31c   : > { %v3144_v56 = vadd.f32 %v3143_v43, %v3115_v41 }
 0x31e   : > { %v3159_v45 = vmax.f32 %v3158_v40, %v3144_v56 }
 0x31f   : > { %v3095_v16 = vpop.f32.mrf.mxu3 }
 0x320   : > { %v3096_v54 = vadd.f32 %v3095_v16, %v3067_v60  ;;  %v3068_v35 = vpop.f32.mrf.mxu2 }
 0x321   : > { %v3116_v47 = vpop.f32.mrf.mxu0  ;;  %v3069_v7 = vadd.f32 %v3068_v35, %v3040_v19 }
 0x322   : > { %v3117_v49 = vadd.f32 %v3116_v47, %v3088_v59  ;;  %v3145_v51 = vpop.f32.mrf.mxu1 }
 0x324   : > { %v3146_v33 = vadd.f32 %v3145_v51, %v3117_v49 }
 0x326   : > { %v3160_v53 = vmax.f32 %v3159_v45, %v3146_v33 }
 0x327   : > { %v3097_v28 = vpop.f32.mrf.mxu3 }
 0x328   : > { %v3098_v15 = vadd.f32 %v3097_v28, %v3069_v7 }
 0x329   : > { %v3119_v57 = vpop.f32.mrf.mxu0 }
 0x32a   : > { %v3120_v58 = vadd.f32 %v3119_v57, %v3091_v10  ;;  %v3148_v61 = vpop.f32.mrf.mxu1 }
 0x32c   : > { %v3149_v0 = vadd.f32 %v3148_v61, %v3120_v58 }
 0x32e   : > { %v3161_v2 = vmax.f32 %v3160_v53, %v3149_v0 }
 0x331   : > { %v3121_v4 = vpop.f32.mrf.mxu0 }
 0x332   : > { %v3122_v14 = vadd.f32 %v3121_v4, %v3093_v5  ;;  %v3150_v48 = vpop.f32.mrf.mxu1 }
 0x334   : > { %v3151_v22 = vadd.f32 %v3150_v48, %v3122_v14 }
 0x336   : > { %v3162_v24 = vmax.f32 %v3161_v2, %v3151_v22 }
 0x339   : > { %v3124_v13 = vpop.f32.mrf.mxu0 }
 0x33a   : > { %v3125_v26 = vadd.f32 %v3124_v13, %v3096_v54  ;;  %v3153_v62 = vpop.f32.mrf.mxu1 }
 0x33c   : > { %v3154_v27 = vadd.f32 %v3153_v62, %v3125_v26 }
 0x33e   : > { %v3163_v11 = vmax.f32 %v3162_v24, %v3154_v27 }
 0x341   : > { %v3126_v29 = vpop.f32.mrf.mxu0 }
 0x342   : > { %v3127_v12 = vadd.f32 %v3126_v29, %v3098_v15  ;;  %v3155_v30 = vpop.f32.mrf.mxu1 }
 0x344   : > { %v3156_v17 = vadd.f32 %v3155_v30, %v3127_v12 }
 0x346   : > { %v3164_v32 = vmax.f32 %v3163_v11, %v3156_v17 }
 0x348   : > { %v3171_v42 = vadd.f32 %v3169_v31, %v3164_v32 }
 0x34a   : > { %v3172_v36 = vmax.f32 %v3171_v42, 0.0 }
 0x34c   : > { %v3173_v20 = vpack.c.bf16 %v3172_v36, %v3172_v36 }
 0x34e   : > { %3174 = vst.msk [vmem:[%s340_s26] sm:$0xf] %vm350_vm0, %v3173_v20 }
 0x34f PF: > { %s15_s22 = sadd.s32 1, %s4250_s22   ;;  %s5414_s18 = smov %s4242_s20 }
 0x350   : > { %p12_p10 = scmp.ge.s32.totalorder %s15_s22, 10   ;;  %s5415_s19 = smov %s4246_s21 }
 0x351   : > { %s5416_s20 = smov %s5419_s23  ;;  %s5417_s21 = smov %s5423_s24 }
 0x352   :  { %14 = sbr.rel (!%p12_p10) target bundleno = 3 (0x3), region = 76 }

// kernel: dsa_3d_cnn_forward.7
= control target key start
LH: loop header
LB: loop body
LE: loop exit
PB: predicated region body
PF: predicated region fallthrough
CT: control target
= control target key end

     0   :  { %s4293_s18 = smov 0   ;;  %s4295_s19 = smov 0   ;;  %s5407_s0 = inlined_call_operand.vmem [shape: bf16[2,4,64,26], index: 0, kind: input, shape index: {}, may-alias: {0,1,2}]   ;;  %s5408_s1 = inlined_call_operand.vmem [shape: bf16[2,4,64,26], index: 1, kind: input, shape index: {}, may-alias: {0,1,2}]   ;;  %s5409_s2 = inlined_call_operand.vmem [shape: bf16[2,4,64,26], index: 2, kind: input, shape index: {}, may-alias: {0,1,2}]   ;;  %s5410_s3 = inlined_call_operand.vmem [shape: bf16[64,1728], index: 3, kind: input, shape index: {}]   ;;  %s5411_s4 = inlined_call_operand.vmem [shape: f32[8,1], index: 4, kind: input, shape index: {}]   ;;  %s5412_s5 = inlined_call_operand.vmem [shape: bf16[2,2,8,16], index: 5, kind: output, shape index: {}]  }
   0x1   :  { %s4297_s20 = smov 0   ;;  %s4299_s21 = smov 0  }
   0x2   :  { %s4301_s22 = smov 0  }
   0x3 LB: > { %s24_s23 = sadd.s32 1, %s4244_s20  ;;  %s27_s24 = sadd.s32 1, %s4248_s21  ;;  %s4252_s22 = sphi %s4301_s22, %s15_s22   ;;  %s4248_s21 = sphi %s4299_s21, %s5419_s21   ;;  %s4244_s20 = sphi %s4297_s20, %s5418_s20   ;;  %s4240_s19 = sphi %s4295_s19, %s5417_s19   ;;  %s4236_s18 = sphi %s4293_s18, %s5416_s18  }
   0x4   : > { %p25_p0 = scmp.ge.s32.totalorder %s24_s23, 2  ;;  %p3310_p1 = scmp.ge.s32.totalorder %s4252_s22, 1 }
   0x5   : > { %p247_p2 = scmp.lt.s32.totalorder %s4252_s22, 5 }
   0x6   : > { %s5421_s23 = smov (%p25_p0, %s24_s23), 0  ;;  %s5423_s24 = smov (!%p25_p0, %s27_s24), %s4248_s21 }
   0x7   : > { %p248_p3 = pnand %p3310_p1, %p247_p2  ;;  %p29_p4 = scmp.ge.s32.totalorder %s5423_s24, 2 }
   0x8   : > { %p302_p5 = scmp.lt.s32.totalorder (!%p248_p3), %s4240_s19, 1  ;;  %p304_p6 = scmp.lt.s32.totalorder (!%p248_p3), %s4236_s18, 3 }
   0x9   : > { %s5425_s24 = smov (%p29_p4, %s5423_s24), 0  ;;  %251 = sbr.rel (%p248_p3) target bundleno = 847 (0x34f), region = 40 }
   0xa   : > { %s4254_s8 = smov (!%p248_p3), 127   ;;  %s4255_s9 = smov (!%p248_p3), 126  }
   0xb   : > { %s4256_s10 = smov (!%p248_p3), 124   ;;  %s4257_s11 = smov (!%p248_p3), 123  }
   0xc   : > { %s4258_s12 = smov (!%p248_p3), 122   ;;  %s4259_s13 = smov (!%p248_p3), 120  }
   0xd   : > { %s4260_s14 = smov (!%p248_p3), 119   ;;  %s311_s15 = sadd.s32 (!%p248_p3), 1, %s4236_s18 }
   0xe   : > { %s5427_s19 = smov (!%p302_p5, %s4240_s19), 1  ;;  %vm350_vm0 = vcmask 125952   ;;  %p314_p7 = scmp.lt.s32.totalorder %s311_s15, 3  ;;  %vm2739_vm1 = vcmask 523264  }
   0xf   : > { %s305_s25 = scalar_select %p304_p6, %s4236_s18, 3 }
  0x10   : > { %s4330_s26 = sshll.u32 %s5427_s19, 5  ;;  %s5429_s15 = smov (!%p314_p7, %s311_s15), 3 }
  0x11   : > { %s3311_s27 = sshll.u32 %s305_s25, 3  ;;  %s3314_s16 = sshll.u32 %s5429_s15, 3 }
  0x12   : > { %s308_s28 = sadd.s32 %s4330_s26, %s3311_s27  ;;  %s5413_s17 = smov 118  }
  0x13   : > { %s3313_s29 = sshll.u32 %s308_s28, 2  ;;  %s318_s25 = sadd.s32 %s3314_s16, %s4330_s26 }
  0x14   : > { %s4336_s7 = scalar_lea.vmem %s5407_s0, %s3313_s29  ;;  %s3316_s27 = sshll.u32 %s318_s25, 2 }
  0x15   : > { %v361_v0 = vld [vmem:[%s4336_s7 + $0x8] sm:$0xf]  ;;  %v359_v1 = vld [vmem:[%s4336_s7] sm:$0xf]  ;;  %v363_v2 = vld [vmem:[%s4336_s7 + $0x10] sm:$0xf]  ;;  %s4480_s30 = scalar_lea.vmem %s5408_s1, %s3316_s27 }
  0x16   : > { %379 = vrot.lane.b32.xlu1 %v361_v0, %s4254_s8  ;;  %375 = vrot.lane.b32.xlu0 %v359_v1, %s4254_s8  ;;  %v362_v3 = vld [vmem:[%s4336_s7 + $0xc] sm:$0xf]  ;;  %v360_v4 = vld [vmem:[%s4336_s7 + $0x4] sm:$0xf]  ;;  %s322_s6 = sadd.s32 2, %s4236_s18  ;;  %p335_p9 = scmp.lt.s32.totalorder %s4236_s18, 1 }
  0x17   : > { %383 = vrot.lane.b32.xlu2 %v363_v2, %s4254_s8  ;;  %v364_v5 = vld [vmem:[%s4336_s7 + $0x14] sm:$0xf]  ;;  %v366_v6 = vld [vmem:[%s4336_s7 + $0x1c] sm:$0xf]  ;;  %v365_v7 = vld [vmem:[%s4336_s7 + $0x18] sm:$0xf] }
  0x18   : > { %v407_v8 = vld [vmem:[%s4336_s7] sm:$0xf]  ;;  %v409_v9 = vld [vmem:[%s4336_s7 + $0x8] sm:$0xf]  ;;  %v408_v10 = vld [vmem:[%s4336_s7 + $0x4] sm:$0xf] }
  0x19   : > { %v410_v11 = vld [vmem:[%s4336_s7 + $0xc] sm:$0xf]  ;;  %v412_v12 = vld [vmem:[%s4336_s7 + $0x14] sm:$0xf]  ;;  %v411_v13 = vld [vmem:[%s4336_s7 + $0x10] sm:$0xf] }
  0x1a   : > { %v413_v14 = vld [vmem:[%s4336_s7 + $0x18] sm:$0xf]  ;;  %v455_v15 = vld [vmem:[%s4336_s7] sm:$0xf]  ;;  %v414_v16 = vld [vmem:[%s4336_s7 + $0x1c] sm:$0xf] }
  0x1b   : > { %v456_v17 = vld [vmem:[%s4336_s7 + $0x4] sm:$0xf]  ;;  %v458_v18 = vld [vmem:[%s4336_s7 + $0xc] sm:$0xf]  ;;  %v457_v19 = vld [vmem:[%s4336_s7 + $0x8] sm:$0xf] }
  0x1c   : > { %v459_v20 = vld [vmem:[%s4336_s7 + $0x10] sm:$0xf]  ;;  %v461_v21 = vld [vmem:[%s4336_s7 + $0x18] sm:$0xf]  ;;  %v460_v22 = vld [vmem:[%s4336_s7 + $0x14] sm:$0xf] }
  0x1d   : > { %v462_v23 = vld [vmem:[%s4336_s7 + $0x1c] sm:$0xf]  ;;  %v504_v24 = vld [vmem:[%s4336_s7 + $0x4] sm:$0xf]  ;;  %v503_v25 = vld [vmem:[%s4336_s7] sm:$0xf] }
  0x1e   : > { %381 = vrot.lane.b32.xlu1 %v362_v3, %s4254_s8  ;;  %377 = vrot.lane.b32.xlu0 %v360_v4, %s4254_s8  ;;  %v505_v26 = vld [vmem:[%s4336_s7 + $0x8] sm:$0xf]  ;;  %v507_v27 = vld [vmem:[%s4336_s7 + $0x10] sm:$0xf]  ;;  %p325_p8 = scmp.lt.s32.totalorder %s322_s6, 3  ;;  %s5433_s18 = smov (!%p335_p9, %s4236_s18), 1 }
  0x1f   : > { %385 = vrot.lane.b32.xlu2 %v364_v5, %s4254_s8  ;;  %v506_v28 = vld [vmem:[%s4336_s7 + $0xc] sm:$0xf]  ;;  %v508_v29 = vld [vmem:[%s4336_s7 + $0x14] sm:$0xf]  ;;  %v510_v30 = vld [vmem:[%s4336_s7 + $0x1c] sm:$0xf] }
  0x20   : > { %v509_v31 = vld [vmem:[%s4336_s7 + $0x18] sm:$0xf]  ;;  %v551_v32 = vld [vmem:[%s4336_s7] sm:$0xf]  ;;  %v553_v33 = vld [vmem:[%s4336_s7 + $0x8] sm:$0xf] }
  0x21   : > { %v552_v34 = vld [vmem:[%s4336_s7 + $0x4] sm:$0xf]  ;;  %v554_v35 = vld [vmem:[%s4336_s7 + $0xc] sm:$0xf]  ;;  %v556_v37 = vld [vmem:[%s4336_s7 + $0x14] sm:$0xf] }
  0x22   : > { %v555_v38 = vld [vmem:[%s4336_s7 + $0x10] sm:$0xf]  ;;  %v557_v39 = vld [vmem:[%s4336_s7 + $0x18] sm:$0xf]  ;;  %v599_v41 = vld [vmem:[%s4336_s7] sm:$0xf] }
  0x23   : > { %v558_v42 = vld [vmem:[%s4336_s7 + $0x1c] sm:$0xf]  ;;  %v600_v43 = vld [vmem:[%s4336_s7 + $0x4] sm:$0xf]  ;;  %v602_v45 = vld [vmem:[%s4336_s7 + $0xc] sm:$0xf] }
  0x24   : > { %v601_v46 = vld [vmem:[%s4336_s7 + $0x8] sm:$0xf]  ;;  %v603_v47 = vld [vmem:[%s4336_s7 + $0x10] sm:$0xf]  ;;  %v605_v51 = vld [vmem:[%s4336_s7 + $0x18] sm:$0xf] }
  0x25   : > { %v604_v52 = vld [vmem:[%s4336_s7 + $0x14] sm:$0xf]  ;;  %v606_v53 = vld [vmem:[%s4336_s7 + $0x1c] sm:$0xf]  ;;  %v648_v57 = vld [vmem:[%s4336_s7 + $0x4] sm:$0xf] }
  0x26   : > { %389 = vrot.lane.b32.xlu1 %v366_v6, %s4254_s8  ;;  %387 = vrot.lane.b32.xlu0 %v365_v7, %s4254_s8  ;;  %v647_v58 = vld [vmem:[%s4336_s7] sm:$0xf]  ;;  %v649_v59 = vld [vmem:[%s4336_s7 + $0x8] sm:$0xf]  ;;  %s5431_s6 = smov (!%p325_p8, %s322_s6), 3 }
  0x27   : > { %423 = vrot.lane.b32.xlu2 %v407_v8, %s4255_s9  ;;  %v651_v63 = vld [vmem:[%s4336_s7 + $0x10] sm:$0xf]  ;;  %v650_v0 = vld [vmem:[%s4336_s7 + $0xc] sm:$0xf]  ;;  %v652_v1 = vld [vmem:[%s4336_s7 + $0x14] sm:$0xf] }
  0x28   : > { %v654_v6 = vld [vmem:[%s4336_s7 + $0x1c] sm:$0xf]  ;;  %v653_v7 = vld [vmem:[%s4336_s7 + $0x18] sm:$0xf] }
  0x2e   : > { %427 = vrot.lane.b32.xlu1 %v409_v9, %s4255_s9  ;;  %425 = vrot.lane.b32.xlu0 %v408_v10, %s4255_s9  ;;  %v695_v9 = vld [vmem:[%s4336_s7] sm:$0xf] }
  0x2f   : > { %429 = vrot.lane.b32.xlu2 %v410_v11, %s4255_s9 }
  0x36   : > { %433 = vrot.lane.b32.xlu1 %v412_v12, %s4255_s9  ;;  %431 = vrot.lane.b32.xlu0 %v411_v13, %s4255_s9 }
  0x37   : > { %435 = vrot.lane.b32.xlu2 %v413_v14, %s4255_s9  ;;  %v697_v14 = vld [vmem:[%s4336_s7 + $0x8] sm:$0xf] }
  0x3e   : > { %471 = vrot.lane.b32.xlu1 %v455_v15, %s4256_s10  ;;  %437 = vrot.lane.b32.xlu0 %v414_v16, %s4255_s9  ;;  %v696_v15 = vld [vmem:[%s4336_s7 + $0x4] sm:$0xf] }
  0x3f   : > { %473 = vrot.lane.b32.xlu2 %v456_v17, %s4256_s10  ;;  %v698_v17 = vld [vmem:[%s4336_s7 + $0xc] sm:$0xf] }
  0x46   : > { %477 = vrot.lane.b32.xlu1 %v458_v18, %s4256_s10  ;;  %475 = vrot.lane.b32.xlu0 %v457_v19, %s4256_s10 }
  0x47   : > { %479 = vrot.lane.b32.xlu2 %v459_v20, %s4256_s10 }
  0x4e   : > { %483 = vrot.lane.b32.xlu1 %v461_v21, %s4256_s10  ;;  %481 = vrot.lane.b32.xlu0 %v460_v22, %s4256_s10  ;;  %v813_v21 = vld [vmem:[%s4480_s30 + $0x18] sm:$0xf]  ;;  %v699_v22 = vld [vmem:[%s4336_s7 + $0x10] sm:$0xf] }
  0x4f   : > { %485 = vrot.lane.b32.xlu2 %v462_v23, %s4256_s10  ;;  %v814_v23 = vld [vmem:[%s4480_s30 + $0x1c] sm:$0xf] }
  0x56   : > { %521 = vrot.lane.b32.xlu1 %v504_v24, %s4257_s11  ;;  %519 = vrot.lane.b32.xlu0 %v503_v25, %s4257_s11 }
  0x57   : > { %523 = vrot.lane.b32.xlu2 %v505_v26, %s4257_s11 }
  0x5e   : > { %527 = vrot.lane.b32.xlu1 %v507_v27, %s4257_s11  ;;  %525 = vrot.lane.b32.xlu0 %v506_v28, %s4257_s11  ;;  %v812_v27 = vld [vmem:[%s4480_s30 + $0x14] sm:$0xf]  ;;  %v811_v28 = vld [vmem:[%s4480_s30 + $0x10] sm:$0xf] }
  0x5f   : > { %529 = vrot.lane.b32.xlu2 %v508_v29, %s4257_s11  ;;  %v809_v29 = vld [vmem:[%s4480_s30 + $0x8] sm:$0xf] }
  0x66   : > { %533 = vrot.lane.b32.xlu1 %v510_v30, %s4257_s11  ;;  %531 = vrot.lane.b32.xlu0 %v509_v31, %s4257_s11 }
  0x67   : > { %567 = vrot.lane.b32.xlu2 %v551_v32, %s4258_s12 }
  0x6e   : > { %571 = vrot.lane.b32.xlu1 %v553_v33, %s4258_s12  ;;  %569 = vrot.lane.b32.xlu0 %v552_v34, %s4258_s12  ;;  %v807_v33 = vld [vmem:[%s4480_s30] sm:$0xf]  ;;  %v810_v34 = vld [vmem:[%s4480_s30 + $0xc] sm:$0xf] }
  0x6f   : > { %573 = vrot.lane.b32.xlu2 %v554_v35, %s4258_s12  ;;  %v348_v35 = vld [vmem:[%s4336_s7 + $0x18] sm:$0xf] }
  0x70   : > { %357 = vst.msk [vmem:[#allocation2 + $0x18] sm:$0xf] %vm350_vm0, %v348_v35  ;;  %v906_v35 = vld [vmem:[%s4480_s30 + $0xc] sm:$0xf] }
  0x71   : > { %v384_v36 = vpop.permute.xlu2 %383 }
  0x72   : > { %403 = vst.msk [vmem:[#allocation2 + $0x30] sm:$0xf] %vm350_vm0, %v384_v36  ;;  %v349_v36 = vld [vmem:[%s4336_s7 + $0x1c] sm:$0xf] }
  0x73   : > { %358 = vst.msk [vmem:[#allocation2 + $0x1c] sm:$0xf] %vm350_vm0, %v349_v36 }
  0x76   : > { %577 = vrot.lane.b32.xlu1 %v556_v37, %s4258_s12  ;;  %575 = vrot.lane.b32.xlu0 %v555_v38, %s4258_s12  ;;  %v808_v37 = vld [vmem:[%s4480_s30 + $0x4] sm:$0xf] }
  0x77   : > { %579 = vrot.lane.b32.xlu2 %v557_v39, %s4258_s12 }
  0x79   : > { %v386_v40 = vpop.permute.xlu2 %385 }
  0x7a   : > { %404 = vst.msk [vmem:[#allocation2 + $0x34] sm:$0xf] %vm350_vm0, %v386_v40 }
  0x7e   : > { %615 = vrot.lane.b32.xlu1 %v599_v41, %s4259_s13  ;;  %581 = vrot.lane.b32.xlu0 %v558_v42, %s4258_s12  ;;  %v346_v41 = vld [vmem:[%s4336_s7 + $0x10] sm:$0xf] }
  0x7f   : > { %617 = vrot.lane.b32.xlu2 %v600_v43, %s4259_s13  ;;  %v347_v43 = vld [vmem:[%s4336_s7 + $0x14] sm:$0xf]  ;;  %355 = vst.msk [vmem:[#allocation2 + $0x10] sm:$0xf] %vm350_vm0, %v346_v41  ;;  %v1001_v41 = vld [vmem:[%s4480_s30 + $0x8] sm:$0xf] }
  0x80   : > { %356 = vst.msk [vmem:[#allocation2 + $0x14] sm:$0xf] %vm350_vm0, %v347_v43  ;;  %v1101_v43 = vld [vmem:[%s4480_s30 + $0x18] sm:$0xf] }
  0x81   : > { %v424_v44 = vpop.permute.xlu2 %423  ;;  %v4046_v8 = vld [vmem:[#allocation2 + $0x30] sm:$0xff] }
  0x82   : > { %447 = vst.msk [vmem:[#allocation2 + $0x40] sm:$0xf] %vm350_vm0, %v424_v44  ;;  %v702_v44 = vld [vmem:[%s4336_s7 + $0x1c] sm:$0xf] }
  0x86   : > { %621 = vrot.lane.b32.xlu1 %v602_v45, %s4259_s13  ;;  %619 = vrot.lane.b32.xlu0 %v601_v46, %s4259_s13  ;;  %v701_v45 = vld [vmem:[%s4336_s7 + $0x18] sm:$0xf]  ;;  %v344_v46 = vld [vmem:[%s4336_s7 + $0x8] sm:$0xf] }
  0x87   : > { %623 = vrot.lane.b32.xlu2 %v603_v47, %s4259_s13  ;;  %v345_v47 = vld [vmem:[%s4336_s7 + $0xc] sm:$0xf]  ;;  %353 = vst.msk [vmem:[#allocation2 + $0x8] sm:$0xf] %vm350_vm0, %v344_v46 }
  0x88   : > { %v380_v48 = vpop.permute.xlu1 %379  ;;  %v376_v49 = vpop.permute.xlu0 %375  ;;  %354 = vst.msk [vmem:[#allocation2 + $0xc] sm:$0xf] %vm350_vm0, %v345_v47 }
  0x89   : > { %401 = vst.msk [vmem:[#allocation2 + $0x28] sm:$0xf] %vm350_vm0, %v380_v48  ;;  %v430_v50 = vpop.permute.xlu2 %429 }
  0x8a   : > { %399 = vst.msk [vmem:[#allocation2 + $0x20] sm:$0xf] %vm350_vm0, %v376_v49  ;;  %v765_v49 = vld [vmem:[%s4480_s30 + $0x18] sm:$0xf] }
  0x8b   : > { %450 = vst.msk [vmem:[#allocation2 + $0x4c] sm:$0xf] %vm350_vm0, %v430_v50  ;;  %v4043_v50 = vld [vmem:[#allocation2 + $0x18] sm:$0xff] }
  0x8e   : > { %627 = vrot.lane.b32.xlu1 %v605_v51, %s4259_s13  ;;  %625 = vrot.lane.b32.xlu0 %v604_v52, %s4259_s13 }
  0x8f   : > { %629 = vrot.lane.b32.xlu2 %v606_v53, %s4259_s13 }
  0x90   : > { %v382_v54 = vpop.permute.xlu1 %381  ;;  %v378_v55 = vpop.permute.xlu0 %377 }
  0x91   : > { %402 = vst.msk [vmem:[#allocation2 + $0x2c] sm:$0xf] %vm350_vm0, %v382_v54  ;;  %v436_v56 = vpop.permute.xlu2 %435  ;;  %v342_v54 = vld [vmem:[%s4336_s7] sm:$0xf] }
  0x92   : > { %400 = vst.msk [vmem:[#allocation2 + $0x24] sm:$0xf] %vm350_vm0, %v378_v55 }
  0x93   : > { %453 = vst.msk [vmem:[#allocation2 + $0x58] sm:$0xf] %vm350_vm0, %v436_v56  ;;  %v343_v56 = vld [vmem:[%s4336_s7 + $0x4] sm:$0xf] }
  0x94   : > { %351 = vst.msk [vmem:[#allocation2] sm:$0xf] %vm350_vm0, %v342_v54 }
  0x95   : > { %352 = vst.msk [vmem:[#allocation2 + $0x4] sm:$0xf] %vm350_vm0, %v343_v56 }
  0x96   : > { %665 = vrot.lane.b32.xlu1 %v648_v57, %s4260_s14  ;;  %663 = vrot.lane.b32.xlu0 %v647_v58, %s4260_s14  ;;  %v700_v57 = vld [vmem:[%s4336_s7 + $0x14] sm:$0xf]  ;;  %v766_v58 = vld [vmem:[%s4480_s30 + $0x1c] sm:$0xf]  ;;  %s3317_s7 = sshll.u32 %s5431_s6, 3 }
  0x97   : > { %667 = vrot.lane.b32.xlu2 %v649_v59, %s4260_s14  ;;  %v4042_v59 = vld [vmem:[#allocation2 + $0x10] sm:$0xff]  ;;  %s329_s15 = sadd.s32 %s3317_s7, %s4330_s26  ;;  %s3320_s7 = sshll.u32 %s5427_s19, 1 }
  0x98   : > { %v390_v60 = vpop.permute.xlu1 %389  ;;  %v388_v61 = vpop.permute.xlu0 %387  ;;  %v4045_v12 = vld [vmem:[#allocation2 + $0x28] sm:$0xff]  ;;  %s3319_s16 = sshll.u32 %s329_s15, 2  ;;  %s338_s15 = sadd.s32 %s3320_s7, %s5433_s18 }
  0x99   : > { %406 = vst.msk [vmem:[#allocation2 + $0x3c] sm:$0xf] %vm350_vm0, %v390_v60  ;;  %v474_v62 = vpop.permute.xlu2 %473  ;;  %v4044_v16 = vld [vmem:[#allocation2 + $0x20] sm:$0xff]  ;;  %s4611_s27 = scalar_lea.vmem %s5409_s2, %s3319_s16  ;;  %s5415_s16 = smov 118  }
  0x9a   : > { %405 = vst.msk [vmem:[#allocation2 + $0x38] sm:$0xf] %vm350_vm0, %v388_v61  ;;  %v763_v61 = vld [vmem:[%s4480_s30 + $0x10] sm:$0xf] }
  0x9b   : > { %496 = vst.msk [vmem:[#allocation2 + $0x64] sm:$0xf] %vm350_vm0, %v474_v62 }
  0x9e   : > { %671 = vrot.lane.b32.xlu1 %v651_v63, %s4260_s14  ;;  %669 = vrot.lane.b32.xlu0 %v650_v0, %s4260_s14  ;;  %v4041_v0 = vld [vmem:[#allocation2 + $0x8] sm:$0xff] }
  0x9f   : > { %673 = vrot.lane.b32.xlu2 %v652_v1, %s4260_s14 }
  0xa0   : > { %v428_v2 = vpop.permute.xlu1 %427  ;;  %v426_v3 = vpop.permute.xlu0 %425 }
  0xa1   : > { %449 = vst.msk [vmem:[#allocation2 + $0x48] sm:$0xf] %vm350_vm0, %v428_v2  ;;  %v4047_v4 = vld [vmem:[#allocation2 + $0x38] sm:$0xff]  ;;  %v480_v5 = vpop.permute.xlu2 %479 }
  0xa2   : > { %448 = vst.msk [vmem:[#allocation2 + $0x44] sm:$0xf] %vm350_vm0, %v426_v3  ;;  %2752 = vmatpush.bf16.msra.mxu0 %v4047_v4  ;;  %4148 = vmatpush.bf16.msra.mxu2 %v4047_v4  ;;  %v761_v3 = vld [vmem:[%s4480_s30 + $0x8] sm:$0xf]  ;;  %v764_v4 = vld [vmem:[%s4480_s30 + $0x14] sm:$0xf] }
  0xa3   : > { %499 = vst.msk [vmem:[#allocation2 + $0x70] sm:$0xf] %vm350_vm0, %v480_v5  ;;  %v4040_v5 = vld [vmem:[#allocation2] sm:$0xff] }
  0xa6   : > { %677 = vrot.lane.b32.xlu1 %v654_v6, %s4260_s14  ;;  %675 = vrot.lane.b32.xlu0 %v653_v7, %s4260_s14  ;;  %v762_v7 = vld [vmem:[%s4480_s30 + $0xc] sm:$0xf] }
  0xa7   : > { %2753 = vmatpush.bf16.msra.mxu0 %v4046_v8  ;;  %4149 = vmatpush.bf16.msra.mxu2 %v4046_v8 }
  0xa8   : > { %v434_v10 = vpop.permute.xlu1 %433  ;;  %v432_v11 = vpop.permute.xlu0 %431  ;;  %711 = vrot.lane.b32.xlu2 %v695_v9, %s5413_s17 }
  0xa9   : > { %452 = vst.msk [vmem:[#allocation2 + $0x54] sm:$0xf] %vm350_vm0, %v434_v10  ;;  %v486_v13 = vpop.permute.xlu2 %485  ;;  %v4049_v10 = vld [vmem:[#allocation2 + $0x48] sm:$0xff] }
  0xaa   : > { %451 = vst.msk [vmem:[#allocation2 + $0x50] sm:$0xf] %vm350_vm0, %v432_v11 }
  0xab   : > { %2754 = vmatpush.bf16.msra.mxu0 %v4045_v12  ;;  %4150 = vmatpush.bf16.msra.mxu2 %v4045_v12  ;;  %502 = vst.msk [vmem:[#allocation2 + $0x7c] sm:$0xf] %vm350_vm0, %v486_v13  ;;  %v760_v12 = vld [vmem:[%s4480_s30 + $0x4] sm:$0xf]  ;;  %v759_v13 = vld [vmem:[%s4480_s30] sm:$0xf] }
  0xae   : > { %715 = vrot.lane.b32.xlu1 %v697_v14, %s5413_s17  ;;  %713 = vrot.lane.b32.xlu0 %v696_v15, %s5413_s17  ;;  %v4048_v14 = vld [vmem:[#allocation2 + $0x40] sm:$0xff]  ;;  %v909_v15 = vld [vmem:[%s4480_s30 + $0x18] sm:$0xf] }
  0xaf   : > { %2755 = vmatpush.bf16.msra.mxu0 %v4044_v16  ;;  %4151 = vmatpush.bf16.msra.mxu2 %v4044_v16 }
  0xb0   : > { %v472_v18 = vpop.permute.xlu1 %471  ;;  %v438_v19 = vpop.permute.xlu0 %437  ;;  %717 = vrot.lane.b32.xlu2 %v698_v17, %s5413_s17 }
  0xb1   : > { %495 = vst.msk [vmem:[#allocation2 + $0x60] sm:$0xf] %vm350_vm0, %v472_v18  ;;  %v524_v20 = vpop.permute.xlu2 %523  ;;  %v4050_v6 = vld [vmem:[#allocation2 + $0x50] sm:$0xff] }
  0xb2   : > { %454 = vst.msk [vmem:[#allocation2 + $0x5c] sm:$0xf] %vm350_vm0, %v438_v19  ;;  %v1005_v19 = vld [vmem:[%s4480_s30 + $0x18] sm:$0xf] }
  0xb3   : > { %545 = vst.msk [vmem:[#allocation2 + $0x88] sm:$0xf] %vm350_vm0, %v524_v20  ;;  %4152 = vmatpush.bf16.msra.mxu2 %v4043_v50  ;;  %2756 = vmatpush.bf16.msra.mxu0 %v4043_v50  ;;  %v910_v20 = vld [vmem:[%s4480_s30 + $0x1c] sm:$0xf] }
  0xb6   : > { %835 = vrot.lane.b32.xlu1 %v813_v21, %s4255_s9  ;;  %719 = vrot.lane.b32.xlu0 %v699_v22, %s5413_s17  ;;  %v1006_v21 = vld [vmem:[%s4480_s30 + $0x1c] sm:$0xf] }
  0xb7   : > { %4153 = vmatpush.bf16.msra.mxu2 %v4042_v59  ;;  %2757 = vmatpush.bf16.msra.mxu0 %v4042_v59  ;;  %v1165_v59 = vld [vmem:[%s4611_s27 + $0x18] sm:$0xf] }
  0xb8   : > { %v478_v24 = vpop.permute.xlu1 %477  ;;  %v476_v25 = vpop.permute.xlu0 %475  ;;  %837 = vrot.lane.b32.xlu2 %v814_v23, %s4255_s9  ;;  %v4052_v60 = vld [vmem:[#allocation2 + $0x60] sm:$0xff] }
  0xb9   : > { %498 = vst.msk [vmem:[#allocation2 + $0x6c] sm:$0xf] %vm350_vm0, %v478_v24  ;;  %v530_v26 = vpop.permute.xlu2 %529  ;;  %v4051_v1 = vld [vmem:[#allocation2 + $0x58] sm:$0xff] }
  0xba   : > { %497 = vst.msk [vmem:[#allocation2 + $0x68] sm:$0xf] %vm350_vm0, %v476_v25  ;;  %v908_v25 = vld [vmem:[%s4480_s30 + $0x14] sm:$0xf] }
  0xbb   : > { %548 = vst.msk [vmem:[#allocation2 + $0x94] sm:$0xf] %vm350_vm0, %v530_v26  ;;  %4154 = vmatpush.bf16.msra.mxu2 %v4041_v0  ;;  %2758 = vmatpush.bf16.msra.mxu0 %v4041_v0  ;;  %v907_v26 = vld [vmem:[%s4480_s30 + $0x10] sm:$0xf] }
  0xbe   : > { %833 = vrot.lane.b32.xlu1 %v812_v27, %s4255_s9  ;;  %831 = vrot.lane.b32.xlu0 %v811_v28, %s4255_s9  ;;  %v1003_v27 = vld [vmem:[%s4480_s30 + $0x10] sm:$0xf] }
  0xbf   : > { %4155 = vmatpush.bf16.msra.mxu2 %v4040_v5  ;;  %2759 = vmatpush.bf16.msra.mxu0 %v4040_v5  ;;  %v1099_v5 = vld [vmem:[%s4480_s30 + $0x10] sm:$0xf] }
  0xc0   : > { %v484_v30 = vpop.permute.xlu1 %483  ;;  %v482_v31 = vpop.permute.xlu0 %481  ;;  %827 = vrot.lane.b32.xlu2 %v809_v29, %s4255_s9 }
  0xc1   : > { %501 = vst.msk [vmem:[#allocation2 + $0x78] sm:$0xf] %vm350_vm0, %v484_v30  ;;  %v568_v32 = vpop.permute.xlu2 %567  ;;  %v4053_v53 = vld [vmem:[#allocation2 + $0x68] sm:$0xff] }
  0xc2   : > { %500 = vst.msk [vmem:[#allocation2 + $0x74] sm:$0xf] %vm350_vm0, %v482_v31 }
  0xc3   : > { %591 = vst.msk [vmem:[#allocation2 + $0xa0] sm:$0xf] %vm350_vm0, %v568_v32  ;;  %v905_v32 = vld [vmem:[%s4480_s30 + $0x8] sm:$0xf] }
  0xc6   : > { %823 = vrot.lane.b32.xlu1 %v807_v33, %s4255_s9  ;;  %829 = vrot.lane.b32.xlu0 %v810_v34, %s4255_s9  ;;  %v1004_v33 = vld [vmem:[%s4480_s30 + $0x14] sm:$0xf] }
  0xc8   : > { %v522_v38 = vpop.permute.xlu1 %521  ;;  %v520_v39 = vpop.permute.xlu0 %519  ;;  %v4055_v40 = vld [vmem:[#allocation2 + $0x78] sm:$0xff]  ;;  %825 = vrot.lane.b32.xlu2 %v808_v37, %s4255_s9 }
  0xc9   : > { %544 = vst.msk [vmem:[#allocation2 + $0x84] sm:$0xf] %vm350_vm0, %v522_v38  ;;  %2781 = vmatpush.bf16.msra.mxu1 %v4055_v40  ;;  %4156 = vmatpush.bf16.msra.mxu3 %v4055_v40  ;;  %v574_v42 = vpop.permute.xlu2 %573  ;;  %v4054_v48 = vld [vmem:[#allocation2 + $0x70] sm:$0xff]  ;;  %v1002_v40 = vld [vmem:[%s4480_s30 + $0xc] sm:$0xf] }
  0xca   : > { %543 = vst.msk [vmem:[#allocation2 + $0x80] sm:$0xf] %vm350_vm0, %v520_v39 }
  0xcb   : > { %594 = vst.msk [vmem:[#allocation2 + $0xac] sm:$0xf] %vm350_vm0, %v574_v42 }
  0xcd   : > { %2782 = vmatpush.bf16.msra.mxu1 %v4054_v48  ;;  %4157 = vmatpush.bf16.msra.mxu3 %v4054_v48  ;;  %v903_v48 = vld [vmem:[%s4480_s30] sm:$0xf] }
  0xce   : > { %725 = vrot.lane.b32.xlu1 %v702_v44, %s5413_s17  ;;  %723 = vrot.lane.b32.xlu0 %v701_v45, %s5413_s17 }
  0xd0   : > { %v528_v51 = vpop.permute.xlu1 %527  ;;  %v526_v52 = vpop.permute.xlu0 %525  ;;  %787 = vrot.lane.b32.xlu2 %v765_v49, %s4254_s8  ;;  %v1102_v49 = vld [vmem:[%s4480_s30 + $0x1c] sm:$0xf] }
  0xd1   : > { %547 = vst.msk [vmem:[#allocation2 + $0x90] sm:$0xf] %vm350_vm0, %v528_v51  ;;  %v580_v55 = vpop.permute.xlu2 %579  ;;  %2783 = vmatpush.bf16.msra.mxu1 %v4053_v53  ;;  %4158 = vmatpush.bf16.msra.mxu3 %v4053_v53  ;;  %v904_v51 = vld [vmem:[%s4480_s30 + $0x4] sm:$0xf] }
  0xd2   : > { %546 = vst.msk [vmem:[#allocation2 + $0x8c] sm:$0xf] %vm350_vm0, %v526_v52 }
  0xd3   : > { %597 = vst.msk [vmem:[#allocation2 + $0xb8] sm:$0xf] %vm350_vm0, %v580_v55  ;;  %v749_v55 = vld [vmem:[%s4480_s30 + $0x18] sm:$0xf] }
  0xd4   : > { %757 = vst.msk [vmem:[#allocation2 + $0x138] sm:$0xf] %vm350_vm0, %v749_v55  ;;  %v1095_v55 = vld [vmem:[%s4480_s30] sm:$0xf] }
  0xd5   : > { %2784 = vmatpush.bf16.msra.mxu1 %v4052_v60  ;;  %4159 = vmatpush.bf16.msra.mxu3 %v4052_v60  ;;  %v4056_v60 = vld [vmem:[#allocation2 + $0x80] sm:$0xff] }
  0xd6   : > { %721 = vrot.lane.b32.xlu1 %v700_v57, %s5413_s17  ;;  %789 = vrot.lane.b32.xlu0 %v766_v58, %s4254_s8  ;;  %v750_v57 = vld [vmem:[%s4480_s30 + $0x1c] sm:$0xf] }
  0xd7   : > { %v1166_v58 = vld [vmem:[%s4611_s27 + $0x1c] sm:$0xf]  ;;  %758 = vst.msk [vmem:[#allocation2 + $0x13c] sm:$0xf] %vm350_vm0, %v750_v57 }
  0xd8   : > { %v534_v62 = vpop.permute.xlu1 %533  ;;  %v532_v63 = vpop.permute.xlu0 %531  ;;  %783 = vrot.lane.b32.xlu2 %v763_v61, %s4254_s8  ;;  %v4058_v50 = vld [vmem:[#allocation2 + $0x90] sm:$0xff]  ;;  %v999_v61 = vld [vmem:[%s4480_s30] sm:$0xf] }
  0xd9   : > { %550 = vst.msk [vmem:[#allocation2 + $0x9c] sm:$0xf] %vm350_vm0, %v534_v62  ;;  %v618_v2 = vpop.permute.xlu2 %617  ;;  %2785 = vmatpush.bf16.msra.mxu1 %v4051_v1  ;;  %4160 = vmatpush.bf16.msra.mxu3 %v4051_v1  ;;  %v4057_v54 = vld [vmem:[#allocation2 + $0x88] sm:$0xff]  ;;  %v747_v62 = vld [vmem:[%s4480_s30 + $0x10] sm:$0xf] }
  0xda   : > { %549 = vst.msk [vmem:[#allocation2 + $0x98] sm:$0xf] %vm350_vm0, %v532_v63  ;;  %v748_v63 = vld [vmem:[%s4480_s30 + $0x14] sm:$0xf] }
  0xdb   : > { %640 = vst.msk [vmem:[#allocation2 + $0xc4] sm:$0xf] %vm350_vm0, %v618_v2  ;;  %v745_v2 = vld [vmem:[%s4480_s30 + $0x8] sm:$0xf] }
  0xdc   : > { %755 = vst.msk [vmem:[#allocation2 + $0x130] sm:$0xf] %vm350_vm0, %v747_v62 }
  0xdd   : > { %2786 = vmatpush.bf16.msra.mxu1 %v4050_v6  ;;  %4161 = vmatpush.bf16.msra.mxu3 %v4050_v6  ;;  %756 = vst.msk [vmem:[#allocation2 + $0x134] sm:$0xf] %vm350_vm0, %v748_v63  ;;  %v1000_v6 = vld [vmem:[%s4480_s30 + $0x4] sm:$0xf] }
  0xde   : > { %779 = vrot.lane.b32.xlu1 %v761_v3, %s4254_s8  ;;  %785 = vrot.lane.b32.xlu0 %v764_v4, %s4254_s8  ;;  %v746_v4 = vld [vmem:[%s4480_s30 + $0xc] sm:$0xf]  ;;  %753 = vst.msk [vmem:[#allocation2 + $0x128] sm:$0xf] %vm350_vm0, %v745_v2  ;;  %v4012_v63 = vld [vmem:[%s5410_s3 + $0xe4] sm:$0xf] }
  0xdf   : > { %754 = vst.msk [vmem:[#allocation2 + $0x12c] sm:$0xf] %vm350_vm0, %v746_v4  ;;  %v1096_v2 = vld [vmem:[%s4480_s30 + $0x4] sm:$0xf]  ;;  %v858_v4 = vld [vmem:[%s4480_s30 + $0xc] sm:$0xf] }
  0xe0   : > { %v572_v8 = vpop.permute.xlu1 %571  ;;  %v570_v9 = vpop.permute.xlu0 %569  ;;  %781 = vrot.lane.b32.xlu2 %v762_v7, %s4254_s8  ;;  %v1100_v7 = vld [vmem:[%s4480_s30 + $0x14] sm:$0xf] }
  0xe1   : > { %593 = vst.msk [vmem:[#allocation2 + $0xa8] sm:$0xf] %vm350_vm0, %v572_v8  ;;  %v624_v11 = vpop.permute.xlu2 %623  ;;  %2787 = vmatpush.bf16.msra.mxu1 %v4049_v10  ;;  %4162 = vmatpush.bf16.msra.mxu3 %v4049_v10  ;;  %v4059_v46 = vld [vmem:[#allocation2 + $0x98] sm:$0xff]  ;;  %v744_v10 = vld [vmem:[%s4480_s30 + $0x4] sm:$0xf] }
  0xe2   : > { %592 = vst.msk [vmem:[#allocation2 + $0xa4] sm:$0xf] %vm350_vm0, %v570_v9  ;;  %v4079_v8 = vld [vmem:[#allocation2 + $0x138] sm:$0xff]  ;;  %v743_v9 = vld [vmem:[%s4480_s30] sm:$0xf] }
  0xe3   : > { %643 = vst.msk [vmem:[#allocation2 + $0xd0] sm:$0xf] %vm350_vm0, %v624_v11  ;;  %2868 = vmatpush.bf16.msrb.mxu0 %v4079_v8 }
  0xe4   : > { %751 = vst.msk [vmem:[#allocation2 + $0x120] sm:$0xf] %vm350_vm0, %v743_v9  ;;  %v4078_v11 = vld [vmem:[#allocation2 + $0x130] sm:$0xff] }
  0xe5   : > { %2788 = vmatpush.bf16.msra.mxu1 %v4048_v14  ;;  %4163 = vmatpush.bf16.msra.mxu3 %v4048_v14  ;;  %752 = vst.msk [vmem:[#allocation2 + $0x124] sm:$0xf] %vm350_vm0, %v744_v10  ;;  %v1160_v10 = vld [vmem:[%s4611_s27 + $0x4] sm:$0xf] }
  0xe6   : > { %777 = vrot.lane.b32.xlu1 %v760_v12, %s4254_s8  ;;  %775 = vrot.lane.b32.xlu0 %v759_v13, %s4254_s8 }
  0xe7   : > { %2869 = vmatpush.bf16.msrb.mxu0 %v4078_v11  ;;  %v1159_v11 = vld [vmem:[%s4611_s27] sm:$0xf] }
  0xe8   : > { %v578_v16 = vpop.permute.xlu1 %577  ;;  %v576_v17 = vpop.permute.xlu0 %575  ;;  %931 = vrot.lane.b32.xlu2 %v909_v15, %s4257_s11  ;;  %v4061_v38 = vld [vmem:[#allocation2 + $0xa8] sm:$0xff] }
  0xe9   : > { %596 = vst.msk [vmem:[#allocation2 + $0xb4] sm:$0xf] %vm350_vm0, %v578_v16  ;;  %v630_v18 = vpop.permute.xlu2 %629  ;;  %v4060_v42 = vld [vmem:[#allocation2 + $0xa0] sm:$0xff]  ;;  %v862_v16 = vld [vmem:[%s4480_s30 + $0x1c] sm:$0xf] }
  0xea   : > { %595 = vst.msk [vmem:[#allocation2 + $0xb0] sm:$0xf] %vm350_vm0, %v576_v17  ;;  %v861_v17 = vld [vmem:[%s4480_s30 + $0x18] sm:$0xf] }
  0xeb   : > { %646 = vst.msk [vmem:[#allocation2 + $0xdc] sm:$0xf] %vm350_vm0, %v630_v18  ;;  %v4077_v18 = vld [vmem:[#allocation2 + $0x128] sm:$0xff] }
  0xec   : > { %2870 = vmatpush.bf16.msrb.mxu0 %v4077_v18 }
  0xee   : > { %1027 = vrot.lane.b32.xlu1 %v1005_v19, %s4259_s13  ;;  %933 = vrot.lane.b32.xlu0 %v910_v20, %s4257_s11  ;;  %v1163_v20 = vld [vmem:[%s4611_s27 + $0x10] sm:$0xf] }
  0xf0   : > { %v616_v22 = vpop.permute.xlu1 %615  ;;  %v582_v23 = vpop.permute.xlu0 %581  ;;  %1029 = vrot.lane.b32.xlu2 %v1006_v21, %s4259_s13  ;;  %v4076_v21 = vld [vmem:[#allocation2 + $0x120] sm:$0xff] }
  0xf1   : > { %639 = vst.msk [vmem:[#allocation2 + $0xc0] sm:$0xf] %vm350_vm0, %v616_v22  ;;  %v668_v24 = vpop.permute.xlu2 %667  ;;  %v4062_v34 = vld [vmem:[#allocation2 + $0xb0] sm:$0xff]  ;;  %2871 = vmatpush.bf16.msrb.mxu0 %v4076_v21 }
  0xf2   : > { %598 = vst.msk [vmem:[#allocation2 + $0xbc] sm:$0xf] %vm350_vm0, %v582_v23 }
  0xf3   : > { %689 = vst.msk [vmem:[#allocation2 + $0xe8] sm:$0xf] %vm350_vm0, %v668_v24 }
  0xf6   : > { %929 = vrot.lane.b32.xlu1 %v908_v25, %s4257_s11  ;;  %927 = vrot.lane.b32.xlu0 %v907_v26, %s4257_s11  ;;  %v957_v26 = vld [vmem:[%s4480_s30 + $0x18] sm:$0xf] }
  0xf8   : > { %v622_v28 = vpop.permute.xlu1 %621  ;;  %v620_v29 = vpop.permute.xlu0 %619  ;;  %1023 = vrot.lane.b32.xlu2 %v1003_v27, %s4259_s13  ;;  %v1164_v27 = vld [vmem:[%s4611_s27 + $0x14] sm:$0xf] }
  0xf9   : > { %642 = vst.msk [vmem:[#allocation2 + $0xcc] sm:$0xf] %vm350_vm0, %v622_v28  ;;  %v4063_v30 = vld [vmem:[#allocation2 + $0xb8] sm:$0xff]  ;;  %v674_v31 = vpop.permute.xlu2 %673 }
  0xfa   : > { %641 = vst.msk [vmem:[#allocation2 + $0xc8] sm:$0xf] %vm350_vm0, %v620_v29  ;;  %2810 = vmatpush.bf16.msrb.mxu2 %v4063_v30  ;;  %v958_v29 = vld [vmem:[%s4480_s30 + $0x1c] sm:$0xf] }
  0xfb   : > { %692 = vst.msk [vmem:[#allocation2 + $0xf4] sm:$0xf] %vm350_vm0, %v674_v31 }
  0xfe   : > { %923 = vrot.lane.b32.xlu1 %v905_v32, %s4257_s11  ;;  %1025 = vrot.lane.b32.xlu0 %v1004_v33, %s4259_s13 }
  0xff   : > { %2811 = vmatpush.bf16.msrb.mxu2 %v4062_v34 }
 0x100   : > { %v628_v36 = vpop.permute.xlu1 %627  ;;  %v626_v37 = vpop.permute.xlu0 %625  ;;  %925 = vrot.lane.b32.xlu2 %v906_v35, %s4257_s11  ;;  %v1098_v35 = vld [vmem:[%s4480_s30 + $0xc] sm:$0xf] }
 0x101   : > { %645 = vst.msk [vmem:[#allocation2 + $0xd8] sm:$0xf] %vm350_vm0, %v628_v36  ;;  %v1097_v36 = vld [vmem:[%s4480_s30 + $0x8] sm:$0xf] }
 0x102   : > { %644 = vst.msk [vmem:[#allocation2 + $0xd4] sm:$0xf] %vm350_vm0, %v626_v37  ;;  %v712_v39 = vpop.permute.xlu2 %711 }
 0x103   : > { %2812 = vmatpush.bf16.msrb.mxu2 %v4061_v38  ;;  %735 = vst.msk [vmem:[#allocation2 + $0x100] sm:$0xf] %vm350_vm0, %v712_v39  ;;  %v859_v38 = vld [vmem:[%s4480_s30 + $0x10] sm:$0xf] }
 0x106   : > { %1021 = vrot.lane.b32.xlu1 %v1002_v40, %s4259_s13  ;;  %1019 = vrot.lane.b32.xlu0 %v1001_v41, %s4259_s13  ;;  %v4065_v41 = vld [vmem:[#allocation2 + $0xc8] sm:$0xff] }
 0x107   : > { %2813 = vmatpush.bf16.msrb.mxu2 %v4060_v42 }
 0x108   : > { %v666_v44 = vpop.permute.xlu1 %665  ;;  %v664_v45 = vpop.permute.xlu0 %663  ;;  %1123 = vrot.lane.b32.xlu2 %v1101_v43, %s5413_s17  ;;  %v4067_v33 = vld [vmem:[#allocation2 + $0xd8] sm:$0xff] }
 0x109   : > { %688 = vst.msk [vmem:[#allocation2 + $0xe4] sm:$0xf] %vm350_vm0, %v666_v44  ;;  %v4066_v37 = vld [vmem:[#allocation2 + $0xd0] sm:$0xff]  ;;  %v1161_v44 = vld [vmem:[%s4611_s27 + $0x8] sm:$0xf] }
 0x10a   : > { %687 = vst.msk [vmem:[#allocation2 + $0xe0] sm:$0xf] %vm350_vm0, %v664_v45  ;;  %v718_v47 = vpop.permute.xlu2 %717  ;;  %v860_v45 = vld [vmem:[%s4480_s30 + $0x14] sm:$0xf] }
 0x10b   : > { %2814 = vmatpush.bf16.msrb.mxu2 %v4059_v46  ;;  %738 = vst.msk [vmem:[#allocation2 + $0x10c] sm:$0xf] %vm350_vm0, %v718_v47  ;;  %v4064_v46 = vld [vmem:[#allocation2 + $0xc0] sm:$0xff]  ;;  %v1162_v47 = vld [vmem:[%s4611_s27 + $0xc] sm:$0xf] }
 0x10e   : > { %919 = vrot.lane.b32.xlu1 %v903_v48, %s4257_s11  ;;  %1125 = vrot.lane.b32.xlu0 %v1102_v49, %s5413_s17 }
 0x10f   : > { %2815 = vmatpush.bf16.msrb.mxu2 %v4058_v50 }
 0x110   : > { %v672_v52 = vpop.permute.xlu1 %671  ;;  %v670_v53 = vpop.permute.xlu0 %669  ;;  %921 = vrot.lane.b32.xlu2 %v904_v51, %s4257_s11 }
 0x111   : > { %691 = vst.msk [vmem:[#allocation2 + $0xf0] sm:$0xf] %vm350_vm0, %v672_v52  ;;  %v4068_v28 = vld [vmem:[#allocation2 + $0xe0] sm:$0xff]  ;;  %v956_v52 = vld [vmem:[%s4480_s30 + $0x14] sm:$0xf] }
 0x112   : > { %690 = vst.msk [vmem:[#allocation2 + $0xec] sm:$0xf] %vm350_vm0, %v670_v53  ;;  %v838_v56 = vpop.permute.xlu2 %837  ;;  %v955_v53 = vld [vmem:[%s4480_s30 + $0x10] sm:$0xf] }
 0x113   : > { %2816 = vmatpush.bf16.msrb.mxu2 %v4057_v54  ;;  %854 = vst.msk [vmem:[#allocation2 + $0x17c] sm:$0xf] %vm350_vm0, %v838_v56 }
 0x116   : > { %1189 = vrot.lane.b32.xlu1 %v1166_v58, %s4254_s8  ;;  %1187 = vrot.lane.b32.xlu0 %v1165_v59, %s4254_s8  ;;  %v3436_v58 = vld [vmem:[%s5410_s3 + $0xe0] sm:$0xf]  ;;  %v4019_v59 = vld [vmem:[%s5410_s3 + $0x114] sm:$0xf0] }
 0x117   : > { %2817 = vmatpush.bf16.msrb.mxu2 %v4056_v60 }
 0x118   : > { %v678_v0 = vpop.permute.xlu1 %677  ;;  %v676_v1 = vpop.permute.xlu0 %675  ;;  %1015 = vrot.lane.b32.xlu2 %v999_v61, %s4259_s13  ;;  %v4070_v19 = vld [vmem:[#allocation2 + $0xf0] sm:$0xff]  ;;  %v3437_v61 = vor.u32 %v4019_v59, %v3436_v58  ;;  %v1261_v59 = vld [vmem:[%s4611_s27 + $0x18] sm:$0xf] }
 0x119   : > { %694 = vst.msk [vmem:[#allocation2 + $0xfc] sm:$0xf] %vm350_vm0, %v678_v0  ;;  %v4069_v24 = vld [vmem:[#allocation2 + $0xe8] sm:$0xff]  ;;  %v3438_v0 = vld [vmem:[%s5410_s3 + $0x118] sm:$0xf0] }
 0x11a   : > { %693 = vst.msk [vmem:[#allocation2 + $0xf8] sm:$0xf] %vm350_vm0, %v676_v1  ;;  %v828_v3 = vpop.permute.xlu2 %827  ;;  %v857_v1 = vld [vmem:[%s4480_s30 + $0x8] sm:$0xf]  ;;  %2770 = vmatmul.bf16.vlgmr.msra.gmra.mxu2 %v3437_v61  ;;  %v4026_v61 = vld [vmem:[%s5410_s3 + $0x154] sm:$0xf] }
 0x11b   : > { %849 = vst.msk [vmem:[#allocation2 + $0x168] sm:$0xf] %vm350_vm0, %v828_v3  ;;  %v3441_v3 = vor.u32 %v4012_v63, %v3438_v0  ;;  %v1262_v63 = vld [vmem:[%s4611_s27 + $0x1c] sm:$0xf] }
 0x11d   : > { %2799 = vmatmul.bf16.vlgmr.msra.gmra.mxu3 %v3441_v3 }
 0x11e   : > { %1119 = vrot.lane.b32.xlu1 %v1099_v5, %s5413_s17  ;;  %1017 = vrot.lane.b32.xlu0 %v1000_v6, %s4259_s13 }
 0x120   : > { %v716_v12 = vpop.permute.xlu1 %715  ;;  %v714_v13 = vpop.permute.xlu0 %713  ;;  %1121 = vrot.lane.b32.xlu2 %v1100_v7, %s5413_s17 }
 0x121   : > { %737 = vst.msk [vmem:[#allocation2 + $0x108] sm:$0xf] %vm350_vm0, %v716_v12  ;;  %v4071_v14 = vld [vmem:[#allocation2 + $0xf8] sm:$0xff] }
 0x122   : > { %736 = vst.msk [vmem:[#allocation2 + $0x104] sm:$0xf] %vm350_vm0, %v714_v13  ;;  %v826_v15 = vpop.permute.xlu2 %825  ;;  %2839 = vmatpush.bf16.msrb.mxu3 %v4071_v14  ;;  %v953_v13 = vld [vmem:[%s4480_s30 + $0x8] sm:$0xf] }
 0x123   : > { %848 = vst.msk [vmem:[#allocation2 + $0x164] sm:$0xf] %vm350_vm0, %v826_v15 }
 0x126   : > { %885 = vrot.lane.b32.xlu1 %v862_v16, %s4256_s10  ;;  %883 = vrot.lane.b32.xlu0 %v861_v17, %s4256_s10 }
 0x127   : > { %2840 = vmatpush.bf16.msrb.mxu3 %v4070_v19  ;;  %v1053_v19 = vld [vmem:[%s4480_s30 + $0x18] sm:$0xf] }
 0x128   : > { %v836_v22 = vpop.permute.xlu1 %835  ;;  %v720_v23 = vpop.permute.xlu0 %719  ;;  %1183 = vrot.lane.b32.xlu2 %v1163_v20, %s4254_s8  ;;  %v4073_v12 = vld [vmem:[#allocation2 + $0x108] sm:$0xff] }
 0x129   : > { %853 = vst.msk [vmem:[#allocation2 + $0x178] sm:$0xf] %vm350_vm0, %v836_v22  ;;  %v4072_v16 = vld [vmem:[#allocation2 + $0x100] sm:$0xff]  ;;  %v954_v20 = vld [vmem:[%s4480_s30 + $0xc] sm:$0xf] }
 0x12a   : > { %739 = vst.msk [vmem:[#allocation2 + $0x110] sm:$0xf] %vm350_vm0, %v720_v23  ;;  %v788_v25 = vpop.permute.xlu2 %787  ;;  %v1054_v22 = vld [vmem:[%s4480_s30 + $0x1c] sm:$0xf] }
 0x12b   : > { %2841 = vmatpush.bf16.msrb.mxu3 %v4069_v24  ;;  %805 = vst.msk [vmem:[#allocation2 + $0x158] sm:$0xf] %vm350_vm0, %v788_v25 }
 0x12e   : > { %979 = vrot.lane.b32.xlu1 %v957_v26, %s4258_s12  ;;  %1185 = vrot.lane.b32.xlu0 %v1164_v27, %s4254_s8  ;;  %v856_v27 = vld [vmem:[%s4480_s30 + $0x4] sm:$0xf] }
 0x12f   : > { %2842 = vmatpush.bf16.msrb.mxu3 %v4068_v28  ;;  %v855_v28 = vld [vmem:[%s4480_s30] sm:$0xf] }
 0x130   : > { %v834_v30 = vpop.permute.xlu1 %833  ;;  %v832_v31 = vpop.permute.xlu0 %831  ;;  %v4087_v32 = vld [vmem:[#allocation2 + $0x178] sm:$0xff]  ;;  %981 = vrot.lane.b32.xlu2 %v958_v29, %s4258_s12  ;;  %v951_v29 = vld [vmem:[%s4480_s30] sm:$0xf] }
 0x131   : > { %852 = vst.msk [vmem:[#allocation2 + $0x174] sm:$0xf] %vm350_vm0, %v834_v30  ;;  %2897 = vmatpush.bf16.msrb.mxu1 %v4087_v32 }
 0x132   : > { %851 = vst.msk [vmem:[#allocation2 + $0x170] sm:$0xf] %vm350_vm0, %v832_v31  ;;  %v784_v34 = vpop.permute.xlu2 %783 }
 0x133   : > { %2843 = vmatpush.bf16.msrb.mxu3 %v4067_v33  ;;  %803 = vst.msk [vmem:[#allocation2 + $0x150] sm:$0xf] %vm350_vm0, %v784_v34  ;;  %v3324_v33 = vld [vmem:[%s5410_s3] sm:$0xf]  ;;  %v3991_v34 = vld [vmem:[%s5410_s3 + $0x34] sm:$0xf0] }
 0x136   : > { %1117 = vrot.lane.b32.xlu1 %v1098_v35, %s5413_s17  ;;  %1115 = vrot.lane.b32.xlu0 %v1097_v36, %s5413_s17  ;;  %v3325_v36 = vor.u32 %v3991_v34, %v3324_v33  ;;  %v1257_v33 = vld [vmem:[%s4611_s27 + $0x8] sm:$0xf]  ;;  %v3388_v34 = vld [vmem:[%s5410_s3 + $0x78] sm:$0xf] }
 0x137   : > { %2844 = vmatpush.bf16.msrb.mxu3 %v4066_v37 }
 0x138   : > { %v824_v39 = vpop.permute.xlu1 %823  ;;  %v830_v40 = vpop.permute.xlu0 %829  ;;  %879 = vrot.lane.b32.xlu2 %v859_v38, %s4256_s10  ;;  %v1051_v38 = vld [vmem:[%s4480_s30 + $0x10] sm:$0xf]  ;;  %2760 = vmatmul.bf16.vlgmr.msra.gmra.mxu0 %v3325_v36  ;;  %v1353_v36 = vld [vmem:[%s4611_s27 + $0x8] sm:$0xf] }
 0x139   : > { %847 = vst.msk [vmem:[#allocation2 + $0x160] sm:$0xf] %vm350_vm0, %v824_v39  ;;  %v4086_v42 = vld [vmem:[#allocation2 + $0x170] sm:$0xff]  ;;  %v952_v39 = vld [vmem:[%s4480_s30 + $0x4] sm:$0xf] }
 0x13a   : > { %850 = vst.msk [vmem:[#allocation2 + $0x16c] sm:$0xf] %vm350_vm0, %v830_v40  ;;  %v782_v43 = vpop.permute.xlu2 %781  ;;  %2898 = vmatpush.bf16.msrb.mxu1 %v4086_v42  ;;  %v1052_v40 = vld [vmem:[%s4480_s30 + $0x14] sm:$0xf] }
 0x13b   : > { %2845 = vmatpush.bf16.msrb.mxu3 %v4065_v41  ;;  %802 = vst.msk [vmem:[#allocation2 + $0x14c] sm:$0xf] %vm350_vm0, %v782_v43  ;;  %v3984_v43 = vld [vmem:[%s5410_s3 + $0x4] sm:$0xf] }
 0x13e   : > { %1179 = vrot.lane.b32.xlu1 %v1161_v44, %s4254_s8  ;;  %881 = vrot.lane.b32.xlu0 %v860_v45, %s4256_s10  ;;  %v3326_v44 = vld [vmem:[%s5410_s3 + $0x38] sm:$0xf0] }
 0x13f   : > { %2846 = vmatpush.bf16.msrb.mxu3 %v4064_v46  ;;  %v3329_v46 = vor.u32 %v3984_v43, %v3326_v44  ;;  %v1354_v44 = vld [vmem:[%s4611_s27 + $0xc] sm:$0xf] }
 0x140   : > { %v726_v48 = vpop.permute.xlu1 %725  ;;  %v724_v49 = vpop.permute.xlu0 %723  ;;  %1181 = vrot.lane.b32.xlu2 %v1162_v47, %s4254_s8  ;;  %v4084_v54 = vld [vmem:[#allocation2 + $0x160] sm:$0xff] }
 0x141   : > { %742 = vst.msk [vmem:[#allocation2 + $0x11c] sm:$0xf] %vm350_vm0, %v726_v48  ;;  %v4085_v50 = vld [vmem:[#allocation2 + $0x168] sm:$0xff]  ;;  %2789 = vmatmul.bf16.vlgmr.msra.gmra.mxu1 %v3329_v46  ;;  %v3999_v46 = vld [vmem:[%s5410_s3 + $0x7c] sm:$0xf] }
 0x142   : > { %741 = vst.msk [vmem:[#allocation2 + $0x118] sm:$0xf] %vm350_vm0, %v724_v49  ;;  %v932_v51 = vpop.permute.xlu2 %931  ;;  %2899 = vmatpush.bf16.msrb.mxu1 %v4085_v50  ;;  %v1050_v48 = vld [vmem:[%s4480_s30 + $0xc] sm:$0xf]  ;;  %v1049_v49 = vld [vmem:[%s4480_s30 + $0x8] sm:$0xf] }
 0x143   : > { %949 = vst.msk [vmem:[#allocation2 + $0x1b8] sm:$0xf] %vm350_vm0, %v932_v51  ;;  %v3492_v50 = vld [vmem:[%s5410_s3 + $0x150] sm:$0xf]  ;;  %v4033_v51 = vld [vmem:[%s5410_s3 + $0x184] sm:$0xf0] }
 0x146   : > { %977 = vrot.lane.b32.xlu1 %v956_v52, %s4258_s12  ;;  %975 = vrot.lane.b32.xlu0 %v955_v53, %s4258_s12  ;;  %v1047_v52 = vld [vmem:[%s4480_s30] sm:$0xf]  ;;  %v3493_v53 = vor.u32 %v4033_v51, %v3492_v50  ;;  %v3993_v50 = vld [vmem:[%s5410_s3 + $0x44] sm:$0xf0] }
 0x147   : > { %2900 = vmatpush.bf16.msrb.mxu1 %v4084_v54  ;;  %v3986_v51 = vld [vmem:[%s5410_s3 + $0x14] sm:$0xf] }
 0x148   : > { %v722_v56 = vpop.permute.xlu1 %721  ;;  %v790_v57 = vpop.permute.xlu0 %789  ;;  %1111 = vrot.lane.b32.xlu2 %v1095_v55, %s5413_s17  ;;  %2775 = vmatmul.bf16.gmra.mxu2 %v3493_v53 }
 0x149   : > { %740 = vst.msk [vmem:[#allocation2 + $0x114] sm:$0xf] %vm350_vm0, %v722_v56  ;;  %v4075_v60 = vld [vmem:[#allocation2 + $0x118] sm:$0xff] }
 0x14a   : > { %806 = vst.msk [vmem:[#allocation2 + $0x15c] sm:$0xf] %vm350_vm0, %v790_v57  ;;  %v1030_v62 = vpop.permute.xlu2 %1029  ;;  %2872 = vmatpush.bf16.msrb.mxu0 %v4075_v60  ;;  %v1048_v60 = vld [vmem:[%s4480_s30 + $0x4] sm:$0xf] }
 0x14b   : > { %1046 = vst.msk [vmem:[#allocation2 + $0x1fc] sm:$0xf] %vm350_vm0, %v1030_v62  ;;  %v3494_v62 = vld [vmem:[%s5410_s3 + $0x188] sm:$0xf0] }
 0x14c   : > { %v3497_v0 = vor.u32 %v4026_v61, %v3494_v62  ;;  %v3444_v61 = vld [vmem:[%s5410_s3 + $0xe8] sm:$0xf]  ;;  %v4020_v62 = vld [vmem:[%s5410_s3 + $0x11c] sm:$0xf0] }
 0x14e   : > { %875 = vrot.lane.b32.xlu1 %v857_v1, %s4256_s10  ;;  %1113 = vrot.lane.b32.xlu0 %v1096_v2, %s5413_s17 }
 0x14f   : > { %2804 = vmatmul.bf16.gmra.mxu3 %v3497_v0  ;;  %v3445_v0 = vor.u32 %v4020_v62, %v3444_v61  ;;  %v3508_v61 = vld [vmem:[%s5410_s3 + $0x160] sm:$0xf]  ;;  %v4035_v62 = vld [vmem:[%s5410_s3 + $0x194] sm:$0xf0] }
 0x150   : > { %v780_v5 = vpop.permute.xlu1 %779  ;;  %v786_v6 = vpop.permute.xlu0 %785  ;;  %v4074_v7 = vld [vmem:[#allocation2 + $0x110] sm:$0xff]  ;;  %877 = vrot.lane.b32.xlu2 %v858_v4, %s4256_s10 }
 0x151   : > { %801 = vst.msk [vmem:[#allocation2 + $0x148] sm:$0xf] %vm350_vm0, %v780_v5  ;;  %v4083_v8 = vld [vmem:[#allocation2 + $0x158] sm:$0xff]  ;;  %2873 = vmatpush.bf16.msrb.mxu0 %v4074_v7  ;;  %v3332_v7 = vld [vmem:[%s5410_s3 + $0x8] sm:$0xf] }
 0x152   : > { %804 = vst.msk [vmem:[#allocation2 + $0x154] sm:$0xf] %vm350_vm0, %v786_v6  ;;  %v1024_v9 = vpop.permute.xlu2 %1023  ;;  %2901 = vmatpush.bf16.msrb.mxu1 %v4083_v8  ;;  %v1358_v5 = vld [vmem:[%s4611_s27 + $0x1c] sm:$0xf]  ;;  %v1357_v6 = vld [vmem:[%s4611_s27 + $0x18] sm:$0xf] }
 0x153   : > { %1043 = vst.msk [vmem:[#allocation2 + $0x1f0] sm:$0xf] %vm350_vm0, %v1024_v9  ;;  %v3992_v8 = vld [vmem:[%s5410_s3 + $0x3c] sm:$0xf0]  ;;  %v1259_v9 = vld [vmem:[%s4611_s27 + $0x10] sm:$0xf] }
 0x155   : > { %2874 = vmatpush.bf16.msrb.mxu0 %v4073_v12 }
 0x156   : > { %1177 = vrot.lane.b32.xlu1 %v1160_v10, %s4254_s8  ;;  %1175 = vrot.lane.b32.xlu0 %v1159_v11, %s4254_s8  ;;  %v3333_v10 = vor.u32 %v3992_v8, %v3332_v7  ;;  %v1352_v7 = vld [vmem:[%s4611_s27 + $0x4] sm:$0xf]  ;;  %v1452_v8 = vld [vmem:[%s4611_s27 + $0x14] sm:$0xf] }
 0x158   : > { %v778_v14 = vpop.permute.xlu1 %777  ;;  %v776_v15 = vpop.permute.xlu0 %775  ;;  %971 = vrot.lane.b32.xlu2 %v953_v13, %s4258_s12  ;;  %v4081_v21 = vld [vmem:[#allocation2 + $0x148] sm:$0xff]  ;;  %2818 = vmatmul.bf16.vlgmr.msrb.gmra.mxu2 %v3333_v10  ;;  %v3446_v10 = vld [vmem:[%s5410_s3 + $0x120] sm:$0xf0] }
 0x159   : > { %800 = vst.msk [vmem:[#allocation2 + $0x144] sm:$0xf] %vm350_vm0, %v778_v14  ;;  %v4082_v17 = vld [vmem:[#allocation2 + $0x150] sm:$0xff]  ;;  %2875 = vmatpush.bf16.msrb.mxu0 %v4072_v16 }
 0x15a   : > { %799 = vst.msk [vmem:[#allocation2 + $0x140] sm:$0xf] %vm350_vm0, %v776_v15  ;;  %v926_v18 = vpop.permute.xlu2 %925  ;;  %2902 = vmatpush.bf16.msrb.mxu1 %v4082_v17  ;;  %v1355_v15 = vld [vmem:[%s4611_s27 + $0x10] sm:$0xf]  ;;  %v1260_v17 = vld [vmem:[%s4611_s27 + $0x14] sm:$0xf] }
 0x15b   : > { %946 = vst.msk [vmem:[#allocation2 + $0x1ac] sm:$0xf] %vm350_vm0, %v926_v18  ;;  %v1356_v18 = vld [vmem:[%s4611_s27 + $0x14] sm:$0xf] }
 0x15e   : > { %1075 = vrot.lane.b32.xlu1 %v1053_v19, %s4260_s14  ;;  %973 = vrot.lane.b32.xlu0 %v954_v20, %s4258_s12  ;;  %v3380_v19 = vld [vmem:[%s5410_s3 + $0x70] sm:$0xf]  ;;  %v4005_v20 = vld [vmem:[%s5410_s3 + $0xa4] sm:$0xf0] }
 0x15f   : > { %2903 = vmatpush.bf16.msrb.mxu1 %v4081_v21  ;;  %v3985_v21 = vld [vmem:[%s5410_s3 + $0xc] sm:$0xf] }
 0x160   : > { %v1028_v23 = vpop.permute.xlu1 %1027  ;;  %v934_v24 = vpop.permute.xlu0 %933  ;;  %1077 = vrot.lane.b32.xlu2 %v1054_v22, %s4260_s14  ;;  %v3381_v22 = vor.u32 %v4005_v20, %v3380_v19 }
 0x161   : > { %1045 = vst.msk [vmem:[#allocation2 + $0x1f8] sm:$0xf] %vm350_vm0, %v1028_v23  ;;  %v4080_v25 = vld [vmem:[#allocation2 + $0x140] sm:$0xff] }
 0x162   : > { %950 = vst.msk [vmem:[#allocation2 + $0x1bc] sm:$0xf] %vm350_vm0, %v934_v24  ;;  %v1124_v26 = vpop.permute.xlu2 %1123  ;;  %v3334_v23 = vld [vmem:[%s5410_s3 + $0x40] sm:$0xf0]  ;;  %v3998_v24 = vld [vmem:[%s5410_s3 + $0x74] sm:$0xf]  ;;  %2765 = vmatmul.bf16.gmra.mxu0 %v3381_v22 }
 0x163   : > { %2904 = vmatpush.bf16.msrb.mxu1 %v4080_v25  ;;  %1141 = vst.msk [vmem:[#allocation2 + $0x238] sm:$0xf] %vm350_vm0, %v1124_v26  ;;  %v3382_v25 = vld [vmem:[%s5410_s3 + $0xa8] sm:$0xf0]  ;;  %v3337_v26 = vor.u32 %v3985_v21, %v3334_v23  ;;  %v1214_v22 = vld [vmem:[%s4611_s27 + $0x1c] sm:$0xf] }
 0x164   : > { %v1213_v23 = vld [vmem:[%s4611_s27 + $0x18] sm:$0xf] }
 0x165   : > { %2847 = vmatmul.bf16.vlgmr.msrb.gmra.mxu3 %v3337_v26  ;;  %v1309_v26 = vld [vmem:[%s4611_s27 + $0x18] sm:$0xf] }
 0x166   : > { %873 = vrot.lane.b32.xlu1 %v856_v27, %s4256_s10  ;;  %871 = vrot.lane.b32.xlu0 %v855_v28, %s4256_s10  ;;  %v3385_v27 = vor.u32 %v3998_v24, %v3382_v25  ;;  %v3500_v24 = vld [vmem:[%s5410_s3 + $0x158] sm:$0xf]  ;;  %v4034_v25 = vld [vmem:[%s5410_s3 + $0x18c] sm:$0xf0] }
 0x168   : > { %v930_v30 = vpop.permute.xlu1 %929  ;;  %v928_v31 = vpop.permute.xlu0 %927  ;;  %v4103_v32 = vld [vmem:[#allocation2 + $0x1f8] sm:$0xff]  ;;  %967 = vrot.lane.b32.xlu2 %v951_v29, %s4258_s12  ;;  %2794 = vmatmul.bf16.gmra.mxu1 %v3385_v27  ;;  %v3501_v27 = vor.u32 %v4034_v25, %v3500_v24  ;;  %v1306_v25 = vld [vmem:[%s4611_s27 + $0xc] sm:$0xf] }
 0x169   : > { %948 = vst.msk [vmem:[#allocation2 + $0x1b4] sm:$0xf] %vm350_vm0, %v930_v30  ;;  %v4095_v35 = vld [vmem:[#allocation2 + $0x1b8] sm:$0xff]  ;;  %2955 = vmatpush.bf16.msra.mxu3 %v4103_v32  ;;  %v1258_v32 = vld [vmem:[%s4611_s27 + $0xc] sm:$0xf] }
 0x16a   : > { %947 = vst.msk [vmem:[#allocation2 + $0x1b0] sm:$0xf] %vm350_vm0, %v928_v31  ;;  %v922_v37 = vpop.permute.xlu2 %921  ;;  %2926 = vmatpush.bf16.msra.mxu2 %v4095_v35  ;;  %v4006_v35 = vld [vmem:[%s5410_s3 + $0xac] sm:$0xf0]  ;;  %v1405_v24 = vld [vmem:[%s4611_s27 + $0x18] sm:$0xf] }
 0x16b   : > { %944 = vst.msk [vmem:[#allocation2 + $0x1a4] sm:$0xf] %vm350_vm0, %v922_v37  ;;  %v3389_v37 = vor.u32 %v4006_v35, %v3388_v34  ;;  %v1310_v34 = vld [vmem:[%s4611_s27 + $0x1c] sm:$0xf]  ;;  %v1450_v35 = vld [vmem:[%s4611_s27 + $0xc] sm:$0xf] }
 0x16d   : > { %2823 = vmatmul.bf16.gmra.mxu2 %v3389_v37  ;;  %v3502_v37 = vld [vmem:[%s5410_s3 + $0x190] sm:$0xf0] }
 0x16e   : > { %1071 = vrot.lane.b32.xlu1 %v1051_v38, %s4260_s14  ;;  %969 = vrot.lane.b32.xlu0 %v952_v39, %s4258_s12 }
 0x170   : > { %v924_v41 = vpop.permute.xlu1 %923  ;;  %v1026_v42 = vpop.permute.xlu0 %1025  ;;  %1073 = vrot.lane.b32.xlu2 %v1052_v40, %s4260_s14 }
 0x171   : > { %945 = vst.msk [vmem:[#allocation2 + $0x1a8] sm:$0xf] %vm350_vm0, %v924_v41  ;;  %v4094_v45 = vld [vmem:[#allocation2 + $0x1b0] sm:$0xff] }
 0x172   : > { %1044 = vst.msk [vmem:[#allocation2 + $0x1f4] sm:$0xf] %vm350_vm0, %v1026_v42  ;;  %v1016_v47 = vpop.permute.xlu2 %1015  ;;  %2927 = vmatpush.bf16.msra.mxu2 %v4094_v45  ;;  %v1453_v42 = vld [vmem:[%s4611_s27 + $0x18] sm:$0xf]  ;;  %v1454_v45 = vld [vmem:[%s4611_s27 + $0x1c] sm:$0xf] }
 0x173   : > { %1039 = vst.msk [vmem:[#allocation2 + $0x1e0] sm:$0xf] %vm350_vm0, %v1016_v47  ;;  %v3390_v47 = vld [vmem:[%s5410_s3 + $0xb0] sm:$0xf0] }
 0x176   : > { %1069 = vrot.lane.b32.xlu1 %v1050_v48, %s4260_s14  ;;  %1067 = vrot.lane.b32.xlu0 %v1049_v49, %s4260_s14  ;;  %v3340_v48 = vld [vmem:[%s5410_s3 + $0x10] sm:$0xf]  ;;  %v3393_v49 = vor.u32 %v3999_v46, %v3390_v47 }
 0x177   : > { %v3341_v53 = vor.u32 %v3993_v50, %v3340_v48  ;;  %v1211_v50 = vld [vmem:[%s4611_s27 + $0x10] sm:$0xf] }
 0x178   : > { %v1022_v54 = vpop.permute.xlu1 %1021  ;;  %v1020_v55 = vpop.permute.xlu0 %1019  ;;  %v4093_v56 = vld [vmem:[#allocation2 + $0x1a8] sm:$0xff]  ;;  %1063 = vrot.lane.b32.xlu2 %v1047_v52, %s4260_s14  ;;  %2852 = vmatmul.bf16.gmra.mxu3 %v3393_v49  ;;  %v1212_v49 = vld [vmem:[%s4611_s27 + $0x14] sm:$0xf] }
 0x179   : > { %1042 = vst.msk [vmem:[#allocation2 + $0x1ec] sm:$0xf] %vm350_vm0, %v1022_v54  ;;  %v4102_v57 = vld [vmem:[#allocation2 + $0x1f0] sm:$0xff]  ;;  %2928 = vmatpush.bf16.msra.mxu2 %v4093_v56  ;;  %v3342_v52 = vld [vmem:[%s5410_s3 + $0x48] sm:$0xf0]  ;;  %2876 = vmatmul.bf16.vlgmr.msrb.gmra.mxu0 %v3341_v53 }
 0x17a   : > { %1041 = vst.msk [vmem:[#allocation2 + $0x1e8] sm:$0xf] %vm350_vm0, %v1020_v55  ;;  %v1122_v58 = vpop.permute.xlu2 %1121  ;;  %2956 = vmatpush.bf16.msra.mxu3 %v4102_v57  ;;  %v3345_v54 = vor.u32 %v3986_v51, %v3342_v52  ;;  %v1307_v51 = vld [vmem:[%s4611_s27 + $0x10] sm:$0xf] }
 0x17b   : > { %1140 = vst.msk [vmem:[#allocation2 + $0x234] sm:$0xf] %vm350_vm0, %v1122_v58 }
 0x17c   : > { %2905 = vmatmul.bf16.vlgmr.msrb.gmra.mxu1 %v3345_v54 }
 0x17d   : > { %2828 = vmatmul.bf16.gmra.mxu2 %v3445_v0  ;;  %v3509_v0 = vor.u32 %v4035_v62, %v3508_v61 }
 0x17e   : > { %1283 = vrot.lane.b32.xlu1 %v1261_v59, %s4256_s10  ;;  %1065 = vrot.lane.b32.xlu0 %v1048_v60, %s4260_s14  ;;  %v1256_v59 = vld [vmem:[%s4611_s27 + $0x4] sm:$0xf]  ;;  %v1255_v60 = vld [vmem:[%s4611_s27] sm:$0xf] }
 0x180   : > { %v920_v1 = vpop.permute.xlu1 %919  ;;  %v1126_v2 = vpop.permute.xlu0 %1125  ;;  %1285 = vrot.lane.b32.xlu2 %v1262_v63, %s4256_s10  ;;  %v1351_v63 = vld [vmem:[%s4611_s27] sm:$0xf] }
 0x181   : > { %943 = vst.msk [vmem:[#allocation2 + $0x1a0] sm:$0xf] %vm350_vm0, %v920_v1  ;;  %v4101_v3 = vld [vmem:[#allocation2 + $0x1e8] sm:$0xff] }
 0x182   : > { %1142 = vst.msk [vmem:[#allocation2 + $0x23c] sm:$0xf] %vm350_vm0, %v1126_v2  ;;  %v1184_v4 = vpop.permute.xlu2 %1183  ;;  %2957 = vmatpush.bf16.msra.mxu3 %v4101_v3 }
 0x183   : > { %1203 = vst.msk [vmem:[#allocation2 + $0x270] sm:$0xf] %vm350_vm0, %v1184_v4 }
 0x186   : > { %1381 = vrot.lane.b32.xlu1 %v1358_v5, %s4258_s12  ;;  %1379 = vrot.lane.b32.xlu0 %v1357_v6, %s4258_s12  ;;  %v1451_v5 = vld [vmem:[%s4611_s27 + $0x10] sm:$0xf] }
 0x188   : > { %v1190_v11 = vpop.permute.xlu1 %1189  ;;  %v1188_v12 = vpop.permute.xlu0 %1187  ;;  %v4092_v13 = vld [vmem:[#allocation2 + $0x1a0] sm:$0xff]  ;;  %1279 = vrot.lane.b32.xlu2 %v1259_v9, %s4256_s10  ;;  %v4013_v9 = vld [vmem:[%s5410_s3 + $0xec] sm:$0xf] }
 0x189   : > { %1206 = vst.msk [vmem:[#allocation2 + $0x27c] sm:$0xf] %vm350_vm0, %v1190_v11  ;;  %v4111_v14 = vld [vmem:[#allocation2 + $0x238] sm:$0xff]  ;;  %2929 = vmatpush.bf16.msra.mxu2 %v4092_v13  ;;  %v3396_v11 = vld [vmem:[%s5410_s3 + $0x80] sm:$0xf] }
 0x18a   : > { %1205 = vst.msk [vmem:[#allocation2 + $0x278] sm:$0xf] %vm350_vm0, %v1188_v12  ;;  %v982_v16 = vpop.permute.xlu2 %981  ;;  %2984 = vmatpush.bf16.msra.mxu0 %v4111_v14  ;;  %v3449_v12 = vor.u32 %v4013_v9, %v3446_v10  ;;  %v4007_v13 = vld [vmem:[%s5410_s3 + $0xb4] sm:$0xf0]  ;;  %v4000_v14 = vld [vmem:[%s5410_s3 + $0x84] sm:$0xf] }
 0x18b   : > { %998 = vst.msk [vmem:[#allocation2 + $0x1dc] sm:$0xf] %vm350_vm0, %v982_v16  ;;  %v3397_v16 = vor.u32 %v4007_v13, %v3396_v11  ;;  %v1145_v9 = vld [vmem:[%s4611_s27 + $0x8] sm:$0xf]  ;;  %v1146_v11 = vld [vmem:[%s4611_s27 + $0xc] sm:$0xf] }
 0x18c   : > { %2857 = vmatmul.bf16.gmra.mxu3 %v3449_v12  ;;  %v1210_v12 = vld [vmem:[%s4611_s27 + $0xc] sm:$0xf]  ;;  %v1209_v13 = vld [vmem:[%s4611_s27 + $0x8] sm:$0xf]  ;;  %1153 = vst.msk [vmem:[#allocation2 + $0x248] sm:$0xf] %vm350_vm0, %v1145_v9 }
 0x18d   : > { %2881 = vmatmul.bf16.gmra.mxu0 %v3397_v16  ;;  %2833 = vmatmul.bf16.gmra.mxu2 %v3501_v27  ;;  %1154 = vst.msk [vmem:[#allocation2 + $0x24c] sm:$0xf] %vm350_vm0, %v1146_v11  ;;  %v1143_v16 = vld [vmem:[%s4611_s27] sm:$0xf]  ;;  %v1406_v27 = vld [vmem:[%s4611_s27 + $0x1c] sm:$0xf] }
 0x18e   : > { %1375 = vrot.lane.b32.xlu1 %v1355_v15, %s4258_s12  ;;  %1281 = vrot.lane.b32.xlu0 %v1260_v17, %s4256_s10  ;;  %v3398_v15 = vld [vmem:[%s5410_s3 + $0xb8] sm:$0xf0]  ;;  %1151 = vst.msk [vmem:[#allocation2 + $0x240] sm:$0xf] %vm350_vm0, %v1143_v16  ;;  %v3406_v11 = vld [vmem:[%s5410_s3 + $0xc0] sm:$0xf0] }
 0x18f   : > { %v3401_v17 = vor.u32 %v4000_v14, %v3398_v15  ;;  %v1305_v14 = vld [vmem:[%s4611_s27 + $0x8] sm:$0xf] }
 0x190   : > { %v1120_v28 = vpop.permute.xlu1 %1119  ;;  %v1018_v29 = vpop.permute.xlu0 %1017  ;;  %1377 = vrot.lane.b32.xlu2 %v1356_v18, %s4258_s12 }
 0x191   : > { %1139 = vst.msk [vmem:[#allocation2 + $0x230] sm:$0xf] %vm350_vm0, %v1120_v28  ;;  %v4119_v30 = vld [vmem:[#allocation2 + $0x278] sm:$0xff]  ;;  %2910 = vmatmul.bf16.gmra.mxu1 %v3401_v17  ;;  %v1144_v17 = vld [vmem:[%s4611_s27 + $0x4] sm:$0xf] }
 0x192   : > { %1040 = vst.msk [vmem:[#allocation2 + $0x1e4] sm:$0xf] %vm350_vm0, %v1018_v29  ;;  %v880_v31 = vpop.permute.xlu2 %879  ;;  %3013 = vmatpush.bf16.msra.mxu1 %v4119_v30 }
 0x193   : > { %899 = vst.msk [vmem:[#allocation2 + $0x190] sm:$0xf] %vm350_vm0, %v880_v31 }
 0x194   : > { %1152 = vst.msk [vmem:[#allocation2 + $0x244] sm:$0xf] %vm350_vm0, %v1144_v17  ;;  %v1500_v17 = vld [vmem:[%s4611_s27 + $0x14] sm:$0xf] }
 0x196   : > { %1277 = vrot.lane.b32.xlu1 %v1258_v32, %s4256_s10  ;;  %1275 = vrot.lane.b32.xlu0 %v1257_v33, %s4256_s10  ;;  %v1449_v32 = vld [vmem:[%s4611_s27 + $0x8] sm:$0xf] }
 0x198   : > { %v886_v38 = vpop.permute.xlu1 %885  ;;  %v884_v39 = vpop.permute.xlu0 %883  ;;  %v4110_v40 = vld [vmem:[#allocation2 + $0x230] sm:$0xff]  ;;  %1371 = vrot.lane.b32.xlu2 %v1353_v36, %s4258_s12  ;;  %v4027_v36 = vld [vmem:[%s5410_s3 + $0x15c] sm:$0xf] }
 0x199   : > { %902 = vst.msk [vmem:[#allocation2 + $0x19c] sm:$0xf] %vm350_vm0, %v886_v38  ;;  %v4100_v41 = vld [vmem:[#allocation2 + $0x1e0] sm:$0xff]  ;;  %2985 = vmatpush.bf16.msra.mxu0 %v4110_v40  ;;  %v3452_v38 = vld [vmem:[%s5410_s3 + $0xf0] sm:$0xf] }
 0x19a   : > { %901 = vst.msk [vmem:[#allocation2 + $0x198] sm:$0xf] %vm350_vm0, %v884_v39  ;;  %v1182_v43 = vpop.permute.xlu2 %1181  ;;  %2958 = vmatpush.bf16.msra.mxu3 %v4100_v41  ;;  %v3505_v39 = vor.u32 %v4027_v36, %v3502_v37  ;;  %v4021_v40 = vld [vmem:[%s5410_s3 + $0x124] sm:$0xf0]  ;;  %v4014_v41 = vld [vmem:[%s5410_s3 + $0xf4] sm:$0xf] }
 0x19b   : > { %1202 = vst.msk [vmem:[#allocation2 + $0x26c] sm:$0xf] %vm350_vm0, %v1182_v43  ;;  %v3453_v43 = vor.u32 %v4021_v40, %v3452_v38  ;;  %v1208_v37 = vld [vmem:[%s4611_s27 + $0x4] sm:$0xf]  ;;  %v1207_v38 = vld [vmem:[%s4611_s27] sm:$0xf] }
 0x19c   : > { %2862 = vmatmul.bf16.gmra.mxu3 %v3505_v39 }
 0x19d   : > { %2886 = vmatmul.bf16.gmra.mxu0 %v3453_v43 }
 0x19e   : > { %1475 = vrot.lane.b32.xlu1 %v1453_v42, %s4260_s14  ;;  %1373 = vrot.lane.b32.xlu0 %v1354_v44, %s4258_s12  ;;  %v3454_v42 = vld [vmem:[%s5410_s3 + $0x128] sm:$0xf0] }
 0x19f   : > { %v3457_v44 = vor.u32 %v4014_v41, %v3454_v42  ;;  %v1501_v41 = vld [vmem:[%s4611_s27 + $0x18] sm:$0xf] }
 0x1a0   : > { %v980_v55 = vpop.permute.xlu1 %979  ;;  %v1186_v56 = vpop.permute.xlu0 %1185  ;;  %1477 = vrot.lane.b32.xlu2 %v1454_v45, %s4260_s14 }
 0x1a1   : > { %997 = vst.msk [vmem:[#allocation2 + $0x1d8] sm:$0xf] %vm350_vm0, %v980_v55  ;;  %v4091_v57 = vld [vmem:[#allocation2 + $0x198] sm:$0xff]  ;;  %2915 = vmatmul.bf16.gmra.mxu1 %v3457_v44 }
 0x1a2   : > { %1204 = vst.msk [vmem:[#allocation2 + $0x274] sm:$0xf] %vm350_vm0, %v1186_v56  ;;  %v1112_v58 = vpop.permute.xlu2 %1111  ;;  %2930 = vmatpush.bf16.msra.mxu2 %v4091_v57  ;;  %v1447_v56 = vld [vmem:[%s4611_s27] sm:$0xf]  ;;  %v3987_v44 = vld [vmem:[%s5410_s3 + $0x1c] sm:$0xf] }
 0x1a3   : > { %1135 = vst.msk [vmem:[#allocation2 + $0x220] sm:$0xf] %vm350_vm0, %v1112_v58  ;;  %v1149_v58 = vld [vmem:[%s4611_s27 + $0x18] sm:$0xf] }
 0x1a4   : > { %1157 = vst.msk [vmem:[#allocation2 + $0x258] sm:$0xf] %vm350_vm0, %v1149_v58  ;;  %v4002_v58 = vld [vmem:[%s5410_s3 + $0x94] sm:$0xf] }
 0x1a6   : > { %1273 = vrot.lane.b32.xlu1 %v1256_v59, %s4256_s10  ;;  %1271 = vrot.lane.b32.xlu0 %v1255_v60, %s4256_s10  ;;  %v1308_v59 = vld [vmem:[%s4611_s27 + $0x14] sm:$0xf]  ;;  %v1150_v60 = vld [vmem:[%s4611_s27 + $0x1c] sm:$0xf] }
 0x1a7   : > { %1158 = vst.msk [vmem:[#allocation2 + $0x25c] sm:$0xf] %vm350_vm0, %v1150_v60 }
 0x1a8   : > { %v1118_v1 = vpop.permute.xlu1 %1117  ;;  %v1116_v2 = vpop.permute.xlu0 %1115  ;;  %v4099_v3 = vld [vmem:[#allocation2 + $0x1d8] sm:$0xff]  ;;  %1367 = vrot.lane.b32.xlu2 %v1351_v63, %s4258_s12  ;;  %v1448_v63 = vld [vmem:[%s4611_s27 + $0x4] sm:$0xf] }
 0x1a9   : > { %1138 = vst.msk [vmem:[#allocation2 + $0x22c] sm:$0xf] %vm350_vm0, %v1118_v1  ;;  %v4118_v4 = vld [vmem:[#allocation2 + $0x270] sm:$0xff]  ;;  %2959 = vmatpush.bf16.msra.mxu3 %v4099_v3  ;;  %v3510_v3 = vld [vmem:[%s5410_s3 + $0x198] sm:$0xf0] }
 0x1aa   : > { %1137 = vst.msk [vmem:[#allocation2 + $0x228] sm:$0xf] %vm350_vm0, %v1116_v2  ;;  %v878_v6 = vpop.permute.xlu2 %877  ;;  %3014 = vmatpush.bf16.msra.mxu1 %v4118_v4  ;;  %v1147_v1 = vld [vmem:[%s4611_s27 + $0x10] sm:$0xf]  ;;  %v4028_v2 = vld [vmem:[%s5410_s3 + $0x164] sm:$0xf] }
 0x1ab   : > { %898 = vst.msk [vmem:[#allocation2 + $0x18c] sm:$0xf] %vm350_vm0, %v878_v6  ;;  %v1148_v4 = vld [vmem:[%s4611_s27 + $0x14] sm:$0xf] }
 0x1ac   : > { %1155 = vst.msk [vmem:[#allocation2 + $0x250] sm:$0xf] %vm350_vm0, %v1147_v1 }
 0x1ad   : > { %1156 = vst.msk [vmem:[#allocation2 + $0x254] sm:$0xf] %vm350_vm0, %v1148_v4  ;;  %2891 = vmatmul.bf16.gmra.mxu0 %v3509_v0  ;;  %v1403_v0 = vld [vmem:[%s4611_s27 + $0x10] sm:$0xf] }
 0x1ae   : > { %1471 = vrot.lane.b32.xlu1 %v1451_v5, %s4260_s14  ;;  %1369 = vrot.lane.b32.xlu0 %v1352_v7, %s4258_s12  ;;  %v3513_v7 = vor.u32 %v4028_v2, %v3510_v3  ;;  %v4115_v15 = vld [vmem:[#allocation2 + $0x258] sm:$0xff]  ;;  %v2800_v3 = vpop.f32.mrf.mxu3 }
 0x1b0   : > { %v1180_v18 = vpop.permute.xlu1 %1179  ;;  %v882_v19 = vpop.permute.xlu0 %881  ;;  %1473 = vrot.lane.b32.xlu2 %v1452_v8, %s4260_s14 }
 0x1b1   : > { %1201 = vst.msk [vmem:[#allocation2 + $0x268] sm:$0xf] %vm350_vm0, %v1180_v18  ;;  %v4109_v20 = vld [vmem:[#allocation2 + $0x228] sm:$0xff]  ;;  %2920 = vmatmul.bf16.gmra.mxu1 %v3513_v7  ;;  %v3995_v7 = vld [vmem:[%s5410_s3 + $0x54] sm:$0xf0] }
 0x1b2   : > { %900 = vst.msk [vmem:[#allocation2 + $0x194] sm:$0xf] %vm350_vm0, %v882_v19  ;;  %v972_v21 = vpop.permute.xlu2 %971  ;;  %2986 = vmatpush.bf16.msra.mxu0 %v4109_v20 }
 0x1b3   : > { %993 = vst.msk [vmem:[#allocation2 + $0x1c8] sm:$0xf] %vm350_vm0, %v972_v21 }
 0x1b4   : > { %v4114_v18 = vld [vmem:[#allocation2 + $0x250] sm:$0xff] }
 0x1b6   : > { %1237 = vrot.lane.b32.xlu1 %v1214_v22, %s4255_s9  ;;  %1235 = vrot.lane.b32.xlu0 %v1213_v23, %s4255_s9 }
 0x1b8   : > { %v978_v28 = vpop.permute.xlu1 %977  ;;  %v976_v29 = vpop.permute.xlu0 %975  ;;  %v4117_v30 = vld [vmem:[#allocation2 + $0x268] sm:$0xff]  ;;  %1331 = vrot.lane.b32.xlu2 %v1309_v26, %s4257_s11 }
 0x1b9   : > { %996 = vst.msk [vmem:[#allocation2 + $0x1d4] sm:$0xf] %vm350_vm0, %v978_v28  ;;  %v4090_v31 = vld [vmem:[#allocation2 + $0x190] sm:$0xff]  ;;  %3015 = vmatpush.bf16.msra.mxu1 %v4117_v30  ;;  %v4113_v26 = vld [vmem:[#allocation2 + $0x248] sm:$0xff]  ;;  %v3348_v28 = vld [vmem:[%s5410_s3 + $0x18] sm:$0xf] }
 0x1ba   : > { %995 = vst.msk [vmem:[#allocation2 + $0x1d0] sm:$0xf] %vm350_vm0, %v976_v29  ;;  %v1078_v33 = vpop.permute.xlu2 %1077  ;;  %2931 = vmatpush.bf16.msra.mxu2 %v4090_v31  ;;  %v4112_v29 = vld [vmem:[#allocation2 + $0x240] sm:$0xff] }
 0x1bb   : > { %1094 = vst.msk [vmem:[#allocation2 + $0x21c] sm:$0xf] %vm350_vm0, %v1078_v33  ;;  %v3988_v33 = vld [vmem:[%s5410_s3 + $0x24] sm:$0xf] }
 0x1be   : > { %1467 = vrot.lane.b32.xlu1 %v1449_v32, %s4260_s14  ;;  %1333 = vrot.lane.b32.xlu0 %v1310_v34, %s4257_s11  ;;  %v3994_v32 = vld [vmem:[%s5410_s3 + $0x4c] sm:$0xf0]  ;;  %v3358_v34 = vld [vmem:[%s5410_s3 + $0x58] sm:$0xf0] }
 0x1bf   : > { %v3349_v39 = vor.u32 %v3994_v32, %v3348_v28  ;;  %v3361_v40 = vor.u32 %v3988_v33, %v3358_v34  ;;  %v4022_v28 = vld [vmem:[%s5410_s3 + $0x12c] sm:$0xf0]  ;;  %v1497_v34 = vld [vmem:[%s4611_s27 + $0x8] sm:$0xf] }
 0x1c0   : > { %v876_v45 = vpop.permute.xlu1 %875  ;;  %v1114_v46 = vpop.permute.xlu0 %1113  ;;  %1469 = vrot.lane.b32.xlu2 %v1450_v35, %s4260_s14 }
 0x1c1   : > { %897 = vst.msk [vmem:[#allocation2 + $0x188] sm:$0xf] %vm350_vm0, %v876_v45  ;;  %v4098_v47 = vld [vmem:[#allocation2 + $0x1d0] sm:$0xff] }
 0x1c2   : > { %1136 = vst.msk [vmem:[#allocation2 + $0x224] sm:$0xf] %vm350_vm0, %v1114_v46  ;;  %v968_v48 = vpop.permute.xlu2 %967  ;;  %2960 = vmatpush.bf16.msra.mxu3 %v4098_v47  ;;  %v3350_v45 = vld [vmem:[%s5410_s3 + $0x50] sm:$0xf0] }
 0x1c3   : > { %991 = vst.msk [vmem:[#allocation2 + $0x1c0] sm:$0xf] %vm350_vm0, %v968_v48 }
 0x1c6   : > { %1233 = vrot.lane.b32.xlu1 %v1212_v49, %s4255_s9  ;;  %1231 = vrot.lane.b32.xlu0 %v1211_v50, %s4255_s9  ;;  %v2771_v49 = vpop.f32.mrf.mxu2  ;;  %v1303_v50 = vld [vmem:[%s4611_s27] sm:$0xf] }
 0x1c7   : > { %v5079_v4 = vadd.f32 %v2800_v3, %v2771_v49  ;;  %v4036_v3 = vld [vmem:[%s5410_s3 + $0x19c] sm:$0xf0] }
 0x1c8   : > { %v1178_v52 = vpop.permute.xlu1 %1177  ;;  %v1176_v53 = vpop.permute.xlu0 %1175  ;;  %v4089_v54 = vld [vmem:[#allocation2 + $0x188] sm:$0xff]  ;;  %1327 = vrot.lane.b32.xlu2 %v1307_v51, %s4257_s11  ;;  %v1502_v51 = vld [vmem:[%s4611_s27 + $0x1c] sm:$0xf] }
 0x1c9   : > { %1200 = vst.msk [vmem:[#allocation2 + $0x264] sm:$0xf] %vm350_vm0, %v1178_v52  ;;  %v4108_v55 = vld [vmem:[#allocation2 + $0x220] sm:$0xff]  ;;  %2932 = vmatpush.bf16.msra.mxu2 %v4089_v54  ;;  %v3353_v52 = vor.u32 %v3987_v44, %v3350_v45  ;;  %v3404_v54 = vld [vmem:[%s5410_s3 + $0x88] sm:$0xf] }
 0x1ca   : > { %1199 = vst.msk [vmem:[#allocation2 + $0x260] sm:$0xf] %vm350_vm0, %v1176_v53  ;;  %v1074_v57 = vpop.permute.xlu2 %1073  ;;  %2987 = vmatpush.bf16.msra.mxu0 %v4108_v55  ;;  %v1304_v53 = vld [vmem:[%s4611_s27 + $0x4] sm:$0xf]  ;;  %v4009_v44 = vld [vmem:[%s5410_s3 + $0xc4] sm:$0xf0] }
 0x1cb   : > { %1092 = vst.msk [vmem:[#allocation2 + $0x214] sm:$0xf] %vm350_vm0, %v1074_v57  ;;  %v4008_v57 = vld [vmem:[%s5410_s3 + $0xbc] sm:$0xf0] }
 0x1cc   : > { %v3405_v1 = vor.u32 %v4008_v57, %v3404_v54  ;;  %v1400_v54 = vld [vmem:[%s4611_s27 + $0x4] sm:$0xf] }
 0x1ce   : > { %1463 = vrot.lane.b32.xlu1 %v1447_v56, %s4260_s14  ;;  %1329 = vrot.lane.b32.xlu0 %v1308_v59, %s4257_s11  ;;  %v3414_v59 = vld [vmem:[%s5410_s3 + $0xc8] sm:$0xf0]  ;;  %v5074_v62 = vpop.f32.mrf.mxu2 }
 0x1cf   : > { %v3417_v2 = vor.u32 %v4002_v58, %v3414_v59  ;;  %v1495_v58 = vld [vmem:[%s4611_s27] sm:$0xf] }
 0x1d0   : > { %v1076_v5 = vpop.permute.xlu1 %1075  ;;  %v974_v6 = vpop.permute.xlu0 %973  ;;  %1465 = vrot.lane.b32.xlu2 %v1448_v63, %s4260_s14  ;;  %v1404_v63 = vld [vmem:[%s4611_s27 + $0x14] sm:$0xf] }
 0x1d1   : > { %1093 = vst.msk [vmem:[#allocation2 + $0x218] sm:$0xf] %vm350_vm0, %v1076_v5  ;;  %v4116_v8 = vld [vmem:[#allocation2 + $0x260] sm:$0xff]  ;;  %v1499_v5 = vld [vmem:[%s4611_s27 + $0x10] sm:$0xf] }
 0x1d2   : > { %994 = vst.msk [vmem:[#allocation2 + $0x1cc] sm:$0xf] %vm350_vm0, %v974_v6  ;;  %v1064_v10 = vpop.permute.xlu2 %1063  ;;  %3016 = vmatpush.bf16.msra.mxu1 %v4116_v8  ;;  %v3356_v6 = vld [vmem:[%s5410_s3 + $0x20] sm:$0xf] }
 0x1d3   : > { %1087 = vst.msk [vmem:[#allocation2 + $0x200] sm:$0xf] %vm350_vm0, %v1064_v10  ;;  %v4001_v10 = vld [vmem:[%s5410_s3 + $0x8c] sm:$0xf] }
 0x1d6   : > { %1229 = vrot.lane.b32.xlu1 %v1210_v12, %s4255_s9  ;;  %1227 = vrot.lane.b32.xlu0 %v1209_v13, %s4255_s9  ;;  %v2776_v16 = vpop.f32.mrf.mxu2 }
 0x1d7   : > { %3017 = vmatpush.bf16.msra.mxu1 %v4115_v15 }
 0x1d8   : > { %v874_v19 = vpop.permute.xlu1 %873  ;;  %v872_v20 = vpop.permute.xlu0 %871  ;;  %v4107_v21 = vld [vmem:[#allocation2 + $0x218] sm:$0xff]  ;;  %1323 = vrot.lane.b32.xlu2 %v1305_v14, %s4257_s11  ;;  %v3357_v14 = vor.u32 %v3995_v7, %v3356_v6  ;;  %v3526_v7 = vld [vmem:[%s5410_s3 + $0x1a8] sm:$0xf0] }
 0x1d9   : > { %896 = vst.msk [vmem:[#allocation2 + $0x184] sm:$0xf] %vm350_vm0, %v874_v19  ;;  %v4097_v22 = vld [vmem:[#allocation2 + $0x1c8] sm:$0xff]  ;;  %2988 = vmatpush.bf16.msra.mxu0 %v4107_v21  ;;  %v5101_v19 = vpop.f32.mrf.mxu3 }
 0x1da   : > { %895 = vst.msk [vmem:[#allocation2 + $0x180] sm:$0xf] %vm350_vm0, %v872_v20  ;;  %v1286_v23 = vpop.permute.xlu2 %1285  ;;  %2961 = vmatpush.bf16.msra.mxu3 %v4097_v22  ;;  %v2761_v20 = vpop.f32.mrf.mxu0  ;;  %v1401_v21 = vld [vmem:[%s4611_s27 + $0x8] sm:$0xf] }
 0x1db   : > { %1302 = vst.msk [vmem:[#allocation2 + $0x2bc] sm:$0xf] %vm350_vm0, %v1286_v23  ;;  %3018 = vmatpush.bf16.msra.mxu1 %v4114_v18  ;;  %v3409_v18 = vor.u32 %v4001_v10, %v3406_v11  ;;  %v2790_v22 = vpop.f32.mrf.mxu1  ;;  %v1402_v23 = vld [vmem:[%s4611_s27 + $0xc] sm:$0xf] }
 0x1de   : > { %1427 = vrot.lane.b32.xlu1 %v1405_v24, %s4259_s13  ;;  %1325 = vrot.lane.b32.xlu0 %v1306_v25, %s4257_s11  ;;  %v2791_v24 = vadd.f32 %v2790_v22, %v2761_v20  ;;  %v5122_v33 = vpop.f32.mrf.mxu2  ;;  %v4029_v22 = vld [vmem:[%s5410_s3 + $0x16c] sm:$0xf] }
 0x1df   : > { %3019 = vmatpush.bf16.msra.mxu1 %v4113_v26 }
 0x1e0   : > { %v1072_v30 = vpop.permute.xlu1 %1071  ;;  %v970_v31 = vpop.permute.xlu0 %969  ;;  %1429 = vrot.lane.b32.xlu2 %v1406_v27, %s4259_s13  ;;  %v3460_v27 = vld [vmem:[%s5410_s3 + $0xf8] sm:$0xf] }
 0x1e1   : > { %1091 = vst.msk [vmem:[#allocation2 + $0x210] sm:$0xf] %vm350_vm0, %v1072_v30  ;;  %v4088_v35 = vld [vmem:[#allocation2 + $0x180] sm:$0xff] }
 0x1e2   : > { %992 = vst.msk [vmem:[#allocation2 + $0x1c4] sm:$0xf] %vm350_vm0, %v970_v31  ;;  %v1280_v36 = vpop.permute.xlu2 %1279  ;;  %2933 = vmatpush.bf16.msra.mxu2 %v4088_v35  ;;  %v3470_v31 = vld [vmem:[%s5410_s3 + $0x138] sm:$0xf0]  ;;  %v3461_v35 = vor.u32 %v4022_v28, %v3460_v27 }
 0x1e3   : > { %1299 = vst.msk [vmem:[#allocation2 + $0x2b0] sm:$0xf] %vm350_vm0, %v1280_v36  ;;  %3020 = vmatpush.bf16.msra.mxu1 %v4112_v29  ;;  %v4016_v29 = vld [vmem:[%s5410_s3 + $0x104] sm:$0xf]  ;;  %v2805_v36 = vpop.f32.mrf.mxu3 }
 0x1e5   : > { %2934 = vmatmul.bf16.vlgmr.msra.gmra.mxu2 %v3349_v39  ;;  %v3473_v39 = vor.u32 %v4016_v29, %v3470_v31 }
 0x1e6   : > { %1225 = vrot.lane.b32.xlu1 %v1208_v37, %s4255_s9  ;;  %1223 = vrot.lane.b32.xlu0 %v1207_v38, %s4255_s9  ;;  %v2763_v37 = vpop.f32.mrf.mxu0  ;;  %v1498_v38 = vld [vmem:[%s4611_s27 + $0xc] sm:$0xf]  ;;  %s3321_s9 = sshll.u32 %s338_s15, 2 }
 0x1e7   : > { %3021 = vmatmul.bf16.vlgmr.msra.gmra.mxu1 %v3361_v40  ;;  %v5127_v40 = vadd.f32 %v2805_v36, %v2776_v16  ;;  %s340_s26 = scalar_lea.vmem %s5412_s5, %s3321_s9 }
 0x1e8   : > { %v1070_v42 = vpop.permute.xlu1 %1069  ;;  %v1068_v43 = vpop.permute.xlu0 %1067  ;;  %v4106_v46 = vld [vmem:[#allocation2 + $0x210] sm:$0xff]  ;;  %1523 = vrot.lane.b32.xlu2 %v1501_v41, %s5415_s16 }
 0x1e9   : > { %1090 = vst.msk [vmem:[#allocation2 + $0x20c] sm:$0xf] %vm350_vm0, %v1070_v42  ;;  %v4096_v47 = vld [vmem:[#allocation2 + $0x1c0] sm:$0xff]  ;;  %2989 = vmatpush.bf16.msra.mxu0 %v4106_v46  ;;  %v2792_v41 = vpop.f32.mrf.mxu1 }
 0x1ea   : > { %1089 = vst.msk [vmem:[#allocation2 + $0x208] sm:$0xf] %vm350_vm0, %v1068_v43  ;;  %v1378_v48 = vpop.permute.xlu2 %1377  ;;  %2962 = vmatpush.bf16.msra.mxu3 %v4096_v47  ;;  %v1399_v42 = vld [vmem:[%s4611_s27] sm:$0xf]  ;;  %v3412_v43 = vld [vmem:[%s5410_s3 + $0x90] sm:$0xf] }
 0x1eb   : > { %1396 = vst.msk [vmem:[#allocation2 + $0x2f4] sm:$0xf] %vm350_vm0, %v1378_v48  ;;  %v4015_v47 = vld [vmem:[%s5410_s3 + $0xfc] sm:$0xf]  ;;  %v3462_v48 = vld [vmem:[%s5410_s3 + $0x130] sm:$0xf0] }
 0x1ed   : > { %2963 = vmatmul.bf16.vlgmr.msra.gmra.mxu3 %v3353_v52 }
 0x1ee   : > { %1319 = vrot.lane.b32.xlu1 %v1303_v50, %s4257_s11  ;;  %1525 = vrot.lane.b32.xlu0 %v1502_v51, %s5415_s16  ;;  %v3413_v51 = vor.u32 %v4009_v44, %v3412_v43  ;;  %v2766_v59 = vpop.f32.mrf.mxu0 }
 0x1f0   : > { %v1284_v55 = vpop.permute.xlu1 %1283  ;;  %v1066_v56 = vpop.permute.xlu0 %1065  ;;  %1321 = vrot.lane.b32.xlu2 %v1304_v53, %s4257_s11 }
 0x1f1   : > { %1301 = vst.msk [vmem:[#allocation2 + $0x2b8] sm:$0xf] %vm350_vm0, %v1284_v55  ;;  %v4105_v60 = vld [vmem:[#allocation2 + $0x208] sm:$0xff]  ;;  %v2819_v53 = vpop.f32.mrf.mxu2  ;;  %v3465_v55 = vor.u32 %v4015_v47, %v3462_v48 }
 0x1f2   : > { %1088 = vst.msk [vmem:[#allocation2 + $0x204] sm:$0xf] %vm350_vm0, %v1066_v56  ;;  %v1372_v61 = vpop.permute.xlu2 %1371  ;;  %2990 = vmatpush.bf16.msra.mxu0 %v4105_v60  ;;  %v5149_v56 = vpop.f32.mrf.mxu3  ;;  %v2820_v57 = vadd.f32 %v2819_v53, %v2791_v24  ;;  %v1496_v60 = vld [vmem:[%s4611_s27 + $0x4] sm:$0xf] }
 0x1f3   : > { %1393 = vst.msk [vmem:[#allocation2 + $0x2e8] sm:$0xf] %vm350_vm0, %v1372_v61  ;;  %v2795_v61 = vpop.f32.mrf.mxu1 }
 0x1f5   : > { %2939 = vmatmul.bf16.gmra.mxu2 %v3405_v1 }
 0x1f6   : > { %1425 = vrot.lane.b32.xlu1 %v1404_v63, %s4259_s13  ;;  %1423 = vrot.lane.b32.xlu0 %v1403_v0, %s4259_s13  ;;  %v2796_v63 = vadd.f32 %v2795_v61, %v2766_v59 }
 0x1f7   : > { %3026 = vmatmul.bf16.gmra.mxu1 %v3417_v2  ;;  %v3516_v2 = vld [vmem:[%s5410_s3 + $0x168] sm:$0xf] }
 0x1f8   : > { %v1382_v8 = vpop.permute.xlu1 %1381  ;;  %v1380_v9 = vpop.permute.xlu0 %1379  ;;  %v4127_v12 = vld [vmem:[#allocation2 + $0x2b8] sm:$0xff]  ;;  %1519 = vrot.lane.b32.xlu2 %v1499_v5, %s5415_s16  ;;  %v4030_v5 = vld [vmem:[%s5410_s3 + $0x174] sm:$0xf]  ;;  %v3517_v10 = vor.u32 %v4036_v3, %v3516_v2 }
 0x1f9   : > { %1398 = vst.msk [vmem:[#allocation2 + $0x2fc] sm:$0xf] %vm350_vm0, %v1382_v8  ;;  %v4104_v13 = vld [vmem:[#allocation2 + $0x200] sm:$0xff]  ;;  %3042 = vmatpush.bf16.msrb.mxu2 %v4127_v12  ;;  %v2793_v12 = vadd.f32 %v2792_v41, %v2763_v37 }
 0x1fa   : > { %1397 = vst.msk [vmem:[#allocation2 + $0x2f8] sm:$0xf] %vm350_vm0, %v1380_v9  ;;  %v1478_v15 = vpop.permute.xlu2 %1477  ;;  %2991 = vmatpush.bf16.msra.mxu0 %v4104_v13  ;;  %v2821_v9 = vpop.f32.mrf.mxu2  ;;  %v3529_v13 = vor.u32 %v4030_v5, %v3526_v7 }
 0x1fb   : > { %1494 = vst.msk [vmem:[#allocation2 + $0x33c] sm:$0xf] %vm350_vm0, %v1478_v15  ;;  %v2848_v11 = vpop.f32.mrf.mxu3  ;;  %v2768_v15 = vpop.f32.mrf.mxu0 }
 0x1fc   : > { %v2797_v16 = vpop.f32.mrf.mxu1 }
 0x1fd   : > { %2992 = vmatmul.bf16.vlgmr.msra.gmra.mxu0 %v3357_v14  ;;  %2968 = vmatmul.bf16.gmra.mxu3 %v3409_v18  ;;  %v2849_v14 = vadd.f32 %v2848_v11, %v2820_v57  ;;  %v4023_v18 = vld [vmem:[%s5410_s3 + $0x134] sm:$0xf0] }
 0x1fe   : > { %1521 = vrot.lane.b32.xlu0 %v1500_v17, %s5415_s16  ;;  %1419 = vrot.lane.b32.xlu1 %v1401_v21, %s4259_s13  ;;  %v3468_v17 = vld [vmem:[%s5410_s3 + $0x100] sm:$0xf] }
 0x1ff   : > { %v3469_v27 = vor.u32 %v4023_v18, %v3468_v17 }
 0x200   : > { %v1376_v25 = vpop.permute.xlu1 %1375  ;;  %v1282_v26 = vpop.permute.xlu0 %1281  ;;  %1421 = vrot.lane.b32.xlu2 %v1402_v23, %s4259_s13  ;;  %v3518_v23 = vld [vmem:[%s5410_s3 + $0x1a0] sm:$0xf0] }
 0x201   : > { %1395 = vst.msk [vmem:[#allocation2 + $0x2f0] sm:$0xf] %vm350_vm0, %v1376_v25  ;;  %v4135_v30 = vld [vmem:[#allocation2 + $0x2f8] sm:$0xff]  ;;  %v2822_v25 = vadd.f32 %v2821_v9, %v2793_v12 }
 0x202   : > { %1300 = vst.msk [vmem:[#allocation2 + $0x2b4] sm:$0xf] %vm350_vm0, %v1282_v26  ;;  %v1368_v32 = vpop.permute.xlu2 %1367  ;;  %3071 = vmatpush.bf16.msrb.mxu3 %v4135_v30  ;;  %v2824_v29 = vpop.f32.mrf.mxu2  ;;  %v3521_v30 = vor.u32 %v4029_v22, %v3518_v23 }
 0x203   : > { %1391 = vst.msk [vmem:[#allocation2 + $0x2e0] sm:$0xf] %vm350_vm0, %v1368_v32  ;;  %v2825_v31 = vadd.f32 %v2824_v29, %v2796_v63  ;;  %v2850_v32 = vpop.f32.mrf.mxu3 }
 0x204   : > { %v2906_v36 = vpop.f32.mrf.mxu1 }
 0x205   : > { %2944 = vmatmul.bf16.gmra.mxu2 %v3461_v35  ;;  %v2877_v35 = vpop.f32.mrf.mxu0 }
 0x206   : > { %1515 = vrot.lane.b32.xlu0 %v1497_v34, %s5415_s16  ;;  %1517 = vrot.lane.b32.xlu1 %v1498_v38, %s5415_s16  ;;  %v2851_v34 = vadd.f32 %v2850_v32, %v2822_v25  ;;  %v2878_v37 = vadd.f32 %v2877_v35, %v2849_v14 }
 0x207   : > { %3031 = vmatmul.bf16.gmra.mxu1 %v3473_v39 }
 0x208   : > { %v1278_v45 = vpop.permute.xlu1 %1277  ;;  %v1276_v46 = vpop.permute.xlu0 %1275  ;;  %v4134_v49 = vld [vmem:[#allocation2 + $0x2f0] sm:$0xff]  ;;  %1415 = vrot.lane.b32.xlu2 %v1399_v42, %s4259_s13  ;;  %v5187_v42 = vadd.f32 %v2906_v36, %v2878_v37 }
 0x209   : > { %1298 = vst.msk [vmem:[#allocation2 + $0x2ac] sm:$0xf] %vm350_vm0, %v1278_v45  ;;  %v4126_v50 = vld [vmem:[#allocation2 + $0x2b0] sm:$0xff]  ;;  %3072 = vmatpush.bf16.msrb.mxu3 %v4134_v49 }
 0x20a   : > { %1297 = vst.msk [vmem:[#allocation2 + $0x2a8] sm:$0xf] %vm350_vm0, %v1276_v46  ;;  %v1474_v52 = vpop.permute.xlu2 %1473  ;;  %3043 = vmatpush.bf16.msrb.mxu2 %v4126_v50  ;;  %v2826_v44 = vpop.f32.mrf.mxu2  ;;  %v2798_v46 = vadd.f32 %v2797_v16, %v2768_v15  ;;  %v3524_v50 = vld [vmem:[%s5410_s3 + $0x170] sm:$0xf] }
 0x20b   : > { %1492 = vst.msk [vmem:[#allocation2 + $0x334] sm:$0xf] %vm350_vm0, %v1474_v52  ;;  %v2853_v45 = vpop.f32.mrf.mxu3 }
 0x20c   : > { %v2854_v47 = vadd.f32 %v2853_v45, %v2825_v31  ;;  %v2908_v49 = vpop.f32.mrf.mxu1  ;;  %v2827_v57 = vadd.f32 %v2826_v44, %v2798_v46 }
 0x20d   : > { %2997 = vmatmul.bf16.gmra.mxu0 %v3413_v51  ;;  %2973 = vmatmul.bf16.gmra.mxu3 %v3465_v55  ;;  %v2879_v48 = vpop.f32.mrf.mxu0  ;;  %v4037_v51 = vld [vmem:[%s5410_s3 + $0x1a4] sm:$0xf0] }
 0x20e   : > { %1417 = vrot.lane.b32.xlu0 %v1400_v54, %s4259_s13  ;;  %1511 = vrot.lane.b32.xlu1 %v1495_v58, %s5415_s16  ;;  %v2880_v52 = vadd.f32 %v2879_v48, %v2851_v34 }
 0x210   : > { %v1476_v0 = vpop.permute.xlu1 %1475  ;;  %v1374_v1 = vpop.permute.xlu0 %1373  ;;  %1513 = vrot.lane.b32.xlu2 %v1496_v60, %s5415_s16  ;;  %v5198_v59 = vadd.f32 %v2908_v49, %v2880_v52  ;;  %v3525_v60 = vor.u32 %v4037_v51, %v3524_v50 }
 0x211   : > { %1493 = vst.msk [vmem:[#allocation2 + $0x338] sm:$0xf] %vm350_vm0, %v1476_v0  ;;  %v4125_v6 = vld [vmem:[#allocation2 + $0x2a8] sm:$0xff] }
 0x212   : > { %1394 = vst.msk [vmem:[#allocation2 + $0x2ec] sm:$0xf] %vm350_vm0, %v1374_v1  ;;  %v1332_v8 = vpop.permute.xlu2 %1331  ;;  %3044 = vmatpush.bf16.msrb.mxu2 %v4125_v6  ;;  %v2829_v63 = vpop.f32.mrf.mxu2 }
 0x213   : > { %1349 = vst.msk [vmem:[#allocation2 + $0x2d8] sm:$0xf] %vm350_vm0, %v1332_v8  ;;  %v2830_v0 = vadd.f32 %v2829_v63, %v5079_v4  ;;  %v2855_v1 = vpop.f32.mrf.mxu3 }
 0x214   : > { %v2856_v2 = vadd.f32 %v2855_v1, %v2827_v57  ;;  %v2911_v5 = vpop.f32.mrf.mxu1 }
 0x215   : > { %2949 = vmatmul.bf16.gmra.mxu2 %v3517_v10  ;;  %v2882_v3 = vpop.f32.mrf.mxu0 }
 0x216   : > { %v2883_v6 = vadd.f32 %v2882_v3, %v2854_v47 }
 0x217   : > { %3036 = vmatmul.bf16.gmra.mxu1 %v3529_v13  ;;  %v2803_v13 = vadd.f32 %v5101_v19, %v5074_v62 }
 0x218   : > { %v1274_v20 = vpop.permute.xlu1 %1273  ;;  %v1272_v21 = vpop.permute.xlu0 %1271  ;;  %v4143_v24 = vld [vmem:[#allocation2 + $0x338] sm:$0xff]  ;;  %v5204_v10 = vadd.f32 %v2911_v5, %v2883_v6 }
 0x219   : > { %1296 = vst.msk [vmem:[#allocation2 + $0x2a4] sm:$0xf] %vm350_vm0, %v1274_v20  ;;  %v4133_v26 = vld [vmem:[#allocation2 + $0x2e8] sm:$0xff]  ;;  %3100 = vmatpush.bf16.msrb.mxu0 %v4143_v24 }
 0x21a   : > { %1295 = vst.msk [vmem:[#allocation2 + $0x2a0] sm:$0xf] %vm350_vm0, %v1272_v21  ;;  %v1470_v28 = vpop.permute.xlu2 %1469  ;;  %3073 = vmatpush.bf16.msrb.mxu3 %v4133_v26  ;;  %v2831_v12 = vpop.f32.mrf.mxu2 }
 0x21b   : > { %1490 = vst.msk [vmem:[#allocation2 + $0x32c] sm:$0xf] %vm350_vm0, %v1470_v28  ;;  %v2858_v4 = vpop.f32.mrf.mxu3  ;;  %v2832_v22 = vadd.f32 %v2831_v12, %v2803_v13 }
 0x21c   : > { %v2859_v14 = vadd.f32 %v2858_v4, %v2830_v0  ;;  %v2913_v16 = vpop.f32.mrf.mxu1 }
 0x21d   : > { %3002 = vmatmul.bf16.gmra.mxu0 %v3469_v27  ;;  %2978 = vmatmul.bf16.gmra.mxu3 %v3521_v30  ;;  %v2884_v15 = vpop.f32.mrf.mxu0 }
 0x21e   : > { %v2885_v17 = vadd.f32 %v2884_v15, %v2856_v2 }
 0x220   : > { %v1472_v38 = vpop.permute.xlu1 %1471  ;;  %v1370_v39 = vpop.permute.xlu0 %1369  ;;  %v5211_v24 = vadd.f32 %v2913_v16, %v2885_v17  ;;  %v3989_v16 = vld [vmem:[%s5410_s3 + $0x2c] sm:$0xf]  ;;  %v3366_v17 = vld [vmem:[%s5410_s3 + $0x60] sm:$0xf0] }
 0x221   : > { %1491 = vst.msk [vmem:[#allocation2 + $0x330] sm:$0xf] %vm350_vm0, %v1472_v38  ;;  %v4124_v41 = vld [vmem:[#allocation2 + $0x2a0] sm:$0xff] }
 0x222   : > { %1392 = vst.msk [vmem:[#allocation2 + $0x2e4] sm:$0xf] %vm350_vm0, %v1370_v39  ;;  %v1328_v43 = vpop.permute.xlu2 %1327  ;;  %3045 = vmatpush.bf16.msrb.mxu2 %v4124_v41  ;;  %v2834_v26 = vpop.f32.mrf.mxu2 }
 0x223   : > { %1347 = vst.msk [vmem:[#allocation2 + $0x2d0] sm:$0xf] %vm350_vm0, %v1328_v43  ;;  %v2835_v62 = vadd.f32 %v2834_v26, %v5127_v40  ;;  %v2860_v19 = vpop.f32.mrf.mxu3  ;;  %v2808_v40 = vadd.f32 %v5149_v56, %v5122_v33 }
 0x224   : > { %v2861_v27 = vadd.f32 %v2860_v19, %v2832_v22  ;;  %v2916_v29 = vpop.f32.mrf.mxu1  ;;  %v3420_v19 = vld [vmem:[%s5410_s3 + $0x98] sm:$0xf] }
 0x225   : > { %v2887_v28 = vpop.f32.mrf.mxu0 }
 0x226   : > { %v2888_v30 = vadd.f32 %v2887_v28, %v2859_v14 }
 0x228   : > { %v1238_v53 = vpop.permute.xlu1 %1237  ;;  %v1236_v54 = vpop.permute.xlu0 %1235  ;;  %v4142_v55 = vld [vmem:[#allocation2 + $0x330] sm:$0xff]  ;;  %v5217_v35 = vadd.f32 %v2916_v29, %v2888_v30 }
 0x229   : > { %1254 = vst.msk [vmem:[#allocation2 + $0x29c] sm:$0xf] %vm350_vm0, %v1238_v53  ;;  %v4132_v58 = vld [vmem:[#allocation2 + $0x2e0] sm:$0xff]  ;;  %3101 = vmatpush.bf16.msrb.mxu0 %v4142_v55 }
 0x22a   : > { %1253 = vst.msk [vmem:[#allocation2 + $0x298] sm:$0xf] %vm350_vm0, %v1236_v54  ;;  %v1466_v61 = vpop.permute.xlu2 %1465  ;;  %3074 = vmatpush.bf16.msrb.mxu3 %v4132_v58  ;;  %v2836_v43 = vpop.f32.mrf.mxu2 }
 0x22b   : > { %1488 = vst.msk [vmem:[#allocation2 + $0x324] sm:$0xf] %vm350_vm0, %v1466_v61  ;;  %v2863_v37 = vpop.f32.mrf.mxu3  ;;  %v2837_v48 = vadd.f32 %v2836_v43, %v2808_v40  ;;  %v4003_v40 = vld [vmem:[%s5410_s3 + $0x9c] sm:$0xf] }
 0x22c   : > { %v2864_v38 = vadd.f32 %v2863_v37, %v2835_v62  ;;  %v2918_v41 = vpop.f32.mrf.mxu1 }
 0x22d   : > { %3007 = vmatmul.bf16.gmra.mxu0 %v3525_v60  ;;  %v2889_v39 = vpop.f32.mrf.mxu0 }
 0x22e   : > { %v2890_v44 = vadd.f32 %v2889_v39, %v2861_v27  ;;  %v4010_v27 = vld [vmem:[%s5410_s3 + $0xcc] sm:$0xf0] }
 0x230   : > { %v1468_v7 = vpop.permute.xlu1 %1467  ;;  %v1334_v8 = vpop.permute.xlu0 %1333  ;;  %v5224_v50 = vadd.f32 %v2918_v41, %v2890_v44 }
 0x231   : > { %1489 = vst.msk [vmem:[#allocation2 + $0x328] sm:$0xf] %vm350_vm0, %v1468_v7  ;;  %v4123_v9 = vld [vmem:[#allocation2 + $0x298] sm:$0xff] }
 0x232   : > { %1350 = vst.msk [vmem:[#allocation2 + $0x2dc] sm:$0xf] %vm350_vm0, %v1334_v8  ;;  %v1324_v11 = vpop.permute.xlu2 %1323  ;;  %3046 = vmatpush.bf16.msrb.mxu2 %v4123_v9  ;;  %v3364_v9 = vld [vmem:[%s5410_s3 + $0x28] sm:$0xf] }
 0x233   : > { %1345 = vst.msk [vmem:[#allocation2 + $0x2c8] sm:$0xf] %vm350_vm0, %v1324_v11  ;;  %v2865_v33 = vpop.f32.mrf.mxu3  ;;  %v3996_v11 = vld [vmem:[%s5410_s3 + $0x5c] sm:$0xf0] }
 0x234   : > { %v2866_v56 = vadd.f32 %v2865_v33, %v2837_v48  ;;  %v2921_v54 = vpop.f32.mrf.mxu1  ;;  %v3365_v14 = vor.u32 %v3996_v11, %v3364_v9  ;;  %v3997_v9 = vld [vmem:[%s5410_s3 + $0x64] sm:$0xf0]  ;;  %v3990_v11 = vld [vmem:[%s5410_s3 + $0x34] sm:$0xf] }
 0x235   : > { %v2892_v52 = vpop.f32.mrf.mxu0 }
 0x236   : > { %v2893_v53 = vadd.f32 %v2892_v52, %v2864_v38  ;;  %v3422_v38 = vld [vmem:[%s5410_s3 + $0xd0] sm:$0xf0]  ;;  %v3476_v52 = vld [vmem:[%s5410_s3 + $0x108] sm:$0xf] }
 0x237   : > { %v3425_v44 = vor.u32 %v4003_v40, %v3422_v38  ;;  %v4004_v40 = vld [vmem:[%s5410_s3 + $0xa4] sm:$0xf]  ;;  %v3430_v38 = vld [vmem:[%s5410_s3 + $0xd8] sm:$0xf0] }
 0x238   : > { %v1234_v18 = vpop.permute.xlu1 %1233  ;;  %v1232_v20 = vpop.permute.xlu0 %1231  ;;  %v4141_v21 = vld [vmem:[#allocation2 + $0x328] sm:$0xff]  ;;  %v5229_v60 = vadd.f32 %v2921_v54, %v2893_v53  ;;  %v4024_v53 = vld [vmem:[%s5410_s3 + $0x13c] sm:$0xf0] }
 0x239   : > { %1252 = vst.msk [vmem:[#allocation2 + $0x294] sm:$0xf] %vm350_vm0, %v1234_v18  ;;  %v4131_v23 = vld [vmem:[#allocation2 + $0x2d8] sm:$0xff]  ;;  %3102 = vmatpush.bf16.msrb.mxu0 %v4141_v21 }
 0x23a   : > { %1251 = vst.msk [vmem:[#allocation2 + $0x290] sm:$0xf] %vm350_vm0, %v1232_v20  ;;  %v1430_v25 = vpop.permute.xlu2 %1429  ;;  %3075 = vmatpush.bf16.msrb.mxu3 %v4131_v23  ;;  %v3369_v23 = vor.u32 %v3989_v16, %v3366_v17 }
 0x23b   : > { %1446 = vst.msk [vmem:[#allocation2 + $0x31c] sm:$0xf] %vm350_vm0, %v1430_v25 }
 0x23c   : > { %v2923_v1 = vpop.f32.mrf.mxu1 }
 0x23d   : > { %v2894_v63 = vpop.f32.mrf.mxu0 }
 0x23e   : > { %v2895_v0 = vadd.f32 %v2894_v63, %v2866_v56 }
 0x240   : > { %v1464_v31 = vpop.permute.xlu1 %1463  ;;  %v1330_v32 = vpop.permute.xlu0 %1329  ;;  %v5234_v7 = vadd.f32 %v2923_v1, %v2895_v0 }
 0x241   : > { %1487 = vst.msk [vmem:[#allocation2 + $0x320] sm:$0xf] %vm350_vm0, %v1464_v31  ;;  %v4122_v34 = vld [vmem:[#allocation2 + $0x290] sm:$0xff] }
 0x242   : > { %1348 = vst.msk [vmem:[#allocation2 + $0x2d4] sm:$0xf] %vm350_vm0, %v1330_v32  ;;  %v1524_v36 = vpop.permute.xlu2 %1523  ;;  %3047 = vmatpush.bf16.msrb.mxu2 %v4122_v34  ;;  %v3421_v34 = vor.u32 %v4010_v27, %v3420_v19 }
 0x243   : > { %1541 = vst.msk [vmem:[#allocation2 + $0x358] sm:$0xf] %vm350_vm0, %v1524_v36 }
 0x248   : > { %v1230_v45 = vpop.permute.xlu1 %1229  ;;  %v1228_v46 = vpop.permute.xlu0 %1227  ;;  %v4140_v47 = vld [vmem:[#allocation2 + $0x320] sm:$0xff] }
 0x249   : > { %1250 = vst.msk [vmem:[#allocation2 + $0x28c] sm:$0xf] %vm350_vm0, %v1230_v45  ;;  %v4130_v49 = vld [vmem:[#allocation2 + $0x2d0] sm:$0xff]  ;;  %3103 = vmatpush.bf16.msrb.mxu0 %v4140_v47 }
 0x24a   : > { %1249 = vst.msk [vmem:[#allocation2 + $0x288] sm:$0xf] %vm350_vm0, %v1228_v46  ;;  %v1322_v51 = vpop.permute.xlu2 %1321  ;;  %3076 = vmatpush.bf16.msrb.mxu3 %v4130_v49 }
 0x24b   : > { %1344 = vst.msk [vmem:[#allocation2 + $0x2c4] sm:$0xf] %vm350_vm0, %v1322_v51 }
 0x250   : > { %v1428_v55 = vpop.permute.xlu1 %1427  ;;  %v1326_v57 = vpop.permute.xlu0 %1325 }
 0x251   : > { %1445 = vst.msk [vmem:[#allocation2 + $0x318] sm:$0xf] %vm350_vm0, %v1428_v55  ;;  %v4121_v58 = vld [vmem:[#allocation2 + $0x288] sm:$0xff] }
 0x252   : > { %1346 = vst.msk [vmem:[#allocation2 + $0x2cc] sm:$0xf] %vm350_vm0, %v1326_v57  ;;  %v1520_v61 = vpop.permute.xlu2 %1519  ;;  %3048 = vmatpush.bf16.msrb.mxu2 %v4121_v58 }
 0x253   : > { %1539 = vst.msk [vmem:[#allocation2 + $0x350] sm:$0xf] %vm350_vm0, %v1520_v61  ;;  %v3477_v61 = vor.u32 %v4024_v53, %v3476_v52 }
 0x258   : > { %v1226_v2 = vpop.permute.xlu1 %1225  ;;  %v1224_v3 = vpop.permute.xlu0 %1223  ;;  %v4139_v5 = vld [vmem:[#allocation2 + $0x318] sm:$0xff] }
 0x259   : > { %1248 = vst.msk [vmem:[#allocation2 + $0x284] sm:$0xf] %vm350_vm0, %v1226_v2  ;;  %v4129_v6 = vld [vmem:[#allocation2 + $0x2c8] sm:$0xff]  ;;  %3104 = vmatpush.bf16.msrb.mxu0 %v4139_v5 }
 0x25a   : > { %1247 = vst.msk [vmem:[#allocation2 + $0x280] sm:$0xf] %vm350_vm0, %v1224_v3  ;;  %v1422_v8 = vpop.permute.xlu2 %1421  ;;  %3077 = vmatpush.bf16.msrb.mxu3 %v4129_v6  ;;  %v4017_v5 = vld [vmem:[%s5410_s3 + $0x10c] sm:$0xf] }
 0x25b   : > { %1442 = vst.msk [vmem:[#allocation2 + $0x30c] sm:$0xf] %vm350_vm0, %v1422_v8  ;;  %v3478_v8 = vld [vmem:[%s5410_s3 + $0x140] sm:$0xf0] }
 0x260   : > { %v1320_v12 = vpop.permute.xlu1 %1319  ;;  %v1526_v4 = vpop.permute.xlu0 %1525 }
 0x261   : > { %1343 = vst.msk [vmem:[#allocation2 + $0x2c0] sm:$0xf] %vm350_vm0, %v1320_v12  ;;  %v4120_v13 = vld [vmem:[#allocation2 + $0x280] sm:$0xff]  ;;  %v3374_v12 = vld [vmem:[%s5410_s3 + $0x68] sm:$0xf0] }
 0x262   : > { %1542 = vst.msk [vmem:[#allocation2 + $0x35c] sm:$0xf] %vm350_vm0, %v1526_v4  ;;  %v1416_v15 = vpop.permute.xlu2 %1415  ;;  %3049 = vmatpush.bf16.msrb.mxu2 %v4120_v13 }
 0x263   : > { %1439 = vst.msk [vmem:[#allocation2 + $0x300] sm:$0xf] %vm350_vm0, %v1416_v15 }
 0x264   : > { %v3022_v31 = vpop.f32.mrf.mxu1 }
 0x265   : > { %3050 = vmatmul.bf16.vlgmr.msrb.gmra.mxu2 %v3365_v14  ;;  %v3481_v14 = vor.u32 %v4017_v5, %v3478_v8 }
 0x268   : > { %v1426_v18 = vpop.permute.xlu1 %1425  ;;  %v1424_v20 = vpop.permute.xlu0 %1423  ;;  %v4128_v21 = vld [vmem:[#allocation2 + $0x2c0] sm:$0xff] }
 0x269   : > { %1444 = vst.msk [vmem:[#allocation2 + $0x314] sm:$0xf] %vm350_vm0, %v1426_v18  ;;  %v4147_v22 = vld [vmem:[#allocation2 + $0x358] sm:$0xff]  ;;  %v2935_v25 = vpop.f32.mrf.mxu2  ;;  %3078 = vmatpush.bf16.msrb.mxu3 %v4128_v21  ;;  %v3377_v18 = vor.u32 %v3990_v11, %v3374_v12 }
 0x26a   : > { %1443 = vst.msk [vmem:[#allocation2 + $0x310] sm:$0xf] %vm350_vm0, %v1424_v20  ;;  %v1514_v26 = vpop.permute.xlu2 %1513  ;;  %v2936_v62 = vadd.f32 %v2935_v25, %v5187_v42  ;;  %3133 = vmatpush.bf16.msrb.mxu1 %v4147_v22 }
 0x26b   : > { %1536 = vst.msk [vmem:[#allocation2 + $0x344] sm:$0xf] %vm350_vm0, %v1514_v26 }
 0x26c   : > { %3079 = vmatmul.bf16.vlgmr.msrb.gmra.mxu3 %v3369_v23  ;;  %v3024_v51 = vpop.f32.mrf.mxu1 }
 0x270   : > { %v1522_v28 = vpop.permute.xlu0 %1521  ;;  %v1420_v29 = vpop.permute.xlu1 %1419 }
 0x271   : > { %1540 = vst.msk [vmem:[#allocation2 + $0x354] sm:$0xf] %vm350_vm0, %v1522_v28  ;;  %v4138_v30 = vld [vmem:[#allocation2 + $0x310] sm:$0xff]  ;;  %v2937_v32 = vpop.f32.mrf.mxu2  ;;  %v2964_v42 = vpop.f32.mrf.mxu3 }
 0x272   : > { %1441 = vst.msk [vmem:[#allocation2 + $0x308] sm:$0xf] %vm350_vm0, %v1420_v29  ;;  %v2938_v36 = vadd.f32 %v2937_v32, %v5198_v59  ;;  %v2965_v37 = vadd.f32 %v2964_v42, %v2936_v62  ;;  %3105 = vmatpush.bf16.msrb.mxu0 %v4138_v30  ;;  %v3532_v62 = vld [vmem:[%s5410_s3 + $0x178] sm:$0xf]  ;;  %v4031_v42 = vld [vmem:[%s5410_s3 + $0x17c] sm:$0xf] }
 0x274   : > { %v3027_v3 = vpop.f32.mrf.mxu1 }
 0x275   : > { %3055 = vmatmul.bf16.gmra.mxu2 %v3421_v34 }
 0x278   : > { %v1516_v39 = vpop.permute.xlu0 %1515  ;;  %v4146_v41 = vld [vmem:[#allocation2 + $0x350] sm:$0xff]  ;;  %v1518_v43 = vpop.permute.xlu1 %1517 }
 0x279   : > { %1537 = vst.msk [vmem:[#allocation2 + $0x348] sm:$0xf] %vm350_vm0, %v1516_v39  ;;  %v4137_v45 = vld [vmem:[#allocation2 + $0x308] sm:$0xff]  ;;  %v2940_v46 = vpop.f32.mrf.mxu2  ;;  %v2966_v59 = vpop.f32.mrf.mxu3  ;;  %3134 = vmatpush.bf16.msrb.mxu1 %v4146_v41 }
 0x27a   : > { %1538 = vst.msk [vmem:[#allocation2 + $0x34c] sm:$0xf] %vm350_vm0, %v1518_v43  ;;  %v2941_v47 = vadd.f32 %v2940_v46, %v5204_v10  ;;  %v2967_v48 = vadd.f32 %v2966_v59, %v2938_v36  ;;  %v2993_v49 = vpop.f32.mrf.mxu0  ;;  %3106 = vmatpush.bf16.msrb.mxu0 %v4137_v45  ;;  %v3534_v36 = vld [vmem:[%s5410_s3 + $0x1b0] sm:$0xf0]  ;;  %v3433_v45 = vor.u32 %v4004_v40, %v3430_v38 }
 0x27b   : > { %v2994_v33 = vadd.f32 %v2993_v49, %v2965_v37  ;;  %v3428_v37 = vld [vmem:[%s5410_s3 + $0xa0] sm:$0xf]  ;;  %v3537_v41 = vor.u32 %v4031_v42, %v3534_v36 }
 0x27c   : > { %3084 = vmatmul.bf16.gmra.mxu3 %v3425_v44  ;;  %v3029_v26 = vpop.f32.mrf.mxu1  ;;  %v3165_v49 = vld [vmem:[%s5411_s4] sm:$0xff] }
 0x27d   : > { %v5275_v56 = vadd.f32 %v3022_v31, %v2994_v33 }
 0x280   : > { %v1418_v54 = vpop.permute.xlu0 %1417  ;;  %v1512_v10 = vpop.permute.xlu1 %1511 }
 0x281   : > { %1440 = vst.msk [vmem:[#allocation2 + $0x304] sm:$0xf] %vm350_vm0, %v1418_v54  ;;  %v4145_v55 = vld [vmem:[#allocation2 + $0x348] sm:$0xff]  ;;  %v2942_v57 = vpop.f32.mrf.mxu2  ;;  %v2969_v58 = vpop.f32.mrf.mxu3 }
 0x282   : > { %1535 = vst.msk [vmem:[#allocation2 + $0x340] sm:$0xf] %vm350_vm0, %v1512_v10  ;;  %v2943_v63 = vadd.f32 %v2942_v57, %v5211_v24  ;;  %v2970_v0 = vadd.f32 %v2969_v58, %v2941_v47  ;;  %v2995_v1 = vpop.f32.mrf.mxu0  ;;  %3135 = vmatpush.bf16.msrb.mxu1 %v4145_v55  ;;  %v3372_v24 = vld [vmem:[%s5410_s3 + $0x30] sm:$0xf]  ;;  %v4025_v55 = vld [vmem:[%s5410_s3 + $0x144] sm:$0xf0] }
 0x283   : > { %v2996_v2 = vadd.f32 %v2995_v1, %v2967_v48  ;;  %v3373_v15 = vor.u32 %v3997_v9, %v3372_v24  ;;  %v3484_v10 = vld [vmem:[%s5410_s3 + $0x110] sm:$0xf]  ;;  %v4018_v57 = vld [vmem:[%s5410_s3 + $0x114] sm:$0xf]  ;;  %v3486_v58 = vld [vmem:[%s5410_s3 + $0x148] sm:$0xf0] }
 0x284   : > { %v3032_v39 = vpop.f32.mrf.mxu1  ;;  %v4039_v1 = vld [vmem:[%s5410_s3 + $0x1b4] sm:$0xf0] }
 0x285   : > { %v5289_v6 = vadd.f32 %v3024_v51, %v2996_v2  ;;  %3060 = vmatmul.bf16.gmra.mxu2 %v3477_v61  ;;  %v4262_v51 = vmov 0   ;;  %v3485_v61 = vor.u32 %v4025_v55, %v3484_v10  ;;  %v4032_v2 = vld [vmem:[%s5410_s3 + $0x184] sm:$0xf] }
 0x286   : > { %4213 = vset.pattern.permute.xlu0 %v4262_v51 }
 0x287   : > { %3168 = vperm.xlu0 %4213, %v3165_v49  }
 0x288   : > { %v4136_v4 = vld [vmem:[#allocation2 + $0x300] sm:$0xff] }
 0x289   : > { %v4144_v13 = vld [vmem:[#allocation2 + $0x340] sm:$0xff]  ;;  %v2945_v16 = vpop.f32.mrf.mxu2  ;;  %v2971_v17 = vpop.f32.mrf.mxu3  ;;  %3107 = vmatpush.bf16.msrb.mxu0 %v4136_v4 }
 0x28a   : > { %v2946_v20 = vadd.f32 %v2945_v16, %v5217_v35  ;;  %v2972_v21 = vadd.f32 %v2971_v17, %v2943_v63  ;;  %v2998_v22 = vpop.f32.mrf.mxu0  ;;  %3136 = vmatpush.bf16.msrb.mxu1 %v4144_v13  ;;  %v4038_v35 = vld [vmem:[%s5410_s3 + $0x1ac] sm:$0xf0]  ;;  %v3489_v63 = vor.u32 %v4018_v57, %v3486_v58 }
 0x28b   : > { %v2999_v23 = vadd.f32 %v2998_v22, %v2970_v0  ;;  %v3533_v28 = vor.u32 %v4038_v35, %v3532_v62  ;;  %v3540_v0 = vld [vmem:[%s5410_s3 + $0x180] sm:$0xf] }
 0x28c   : > { %3089 = vmatmul.bf16.gmra.mxu3 %v3481_v14  ;;  %3108 = vmatmul.bf16.vlgmr.msrb.gmra.mxu0 %v3373_v15  ;;  %v3034_v52 = vpop.f32.mrf.mxu1  ;;  %v3541_v5 = vor.u32 %v4039_v1, %v3540_v0 }
 0x28d   : > { %v5307_v25 = vadd.f32 %v3027_v3, %v2999_v23  ;;  %3978 = vmatmul.msk.bf16.vlgmr.msrb.gmra.mxu1 %vm2739_vm1, %v3377_v18  ;;  %v3542_v3 = vld [vmem:[%s5410_s3 + $0x1b8] sm:$0xf0] }
 0x28e   : > { %v3545_v8 = vor.u32 %v4032_v2, %v3542_v3 }
 0x291   : > { %v2947_v19 = vpop.f32.mrf.mxu2  ;;  %v2974_v27 = vpop.f32.mrf.mxu3 }
 0x292   : > { %v2948_v29 = vadd.f32 %v2947_v19, %v5224_v50  ;;  %v2975_v30 = vadd.f32 %v2974_v27, %v2946_v20  ;;  %v3000_v31 = vpop.f32.mrf.mxu0  ;;  %v4011_v50 = vld [vmem:[%s5410_s3 + $0xd4] sm:$0xf0] }
 0x293   : > { %v3001_v32 = vadd.f32 %v3000_v31, %v2972_v21  ;;  %v3429_v43 = vor.u32 %v4011_v50, %v3428_v37 }
 0x294   : > { %v3037_v15 = vpop.f32.mrf.mxu1 }
 0x295   : > { %v5320_v34 = vadd.f32 %v3029_v26, %v3001_v32  ;;  %3065 = vmatmul.bf16.gmra.mxu2 %v3533_v28 }
 0x299   : > { %v2976_v44 = vpop.f32.mrf.mxu3  ;;  %v2950_v24 = vpop.f32.mrf.mxu2 }
 0x29a   : > { %v2977_v46 = vadd.f32 %v2976_v44, %v2948_v29  ;;  %v3003_v59 = vpop.f32.mrf.mxu0 }
 0x29b   : > { %v3004_v47 = vadd.f32 %v3003_v59, %v2975_v30 }
 0x29c   : > { %3094 = vmatmul.bf16.gmra.mxu3 %v3537_v41  ;;  %3113 = vmatmul.bf16.gmra.mxu0 %v3429_v43  ;;  %v5373_v20 = vpop.f32.mrf.mxu1 }
 0x29d   : > { %v5337_v48 = vadd.f32 %v3032_v39, %v3004_v47  ;;  %3979 = vmatmul.msk.bf16.gmra.mxu1 %vm2739_vm1, %v3433_v45 }
 0x2a1   : > { %v2979_v9 = vpop.f32.mrf.mxu3  ;;  %v2952_v11 = vpop.f32.mrf.mxu2 }
 0x2a2   : > { %v3005_v33 = vpop.f32.mrf.mxu0 }
 0x2a3   : > { %v3006_v53 = vadd.f32 %v3005_v33, %v2977_v46 }
 0x2a5   : > { %v5343_v54 = vadd.f32 %v3034_v52, %v3006_v53 }
 0x2a9   : > { %v5371_v12 = vpop.f32.mrf.mxu3 }
 0x2aa   : > { %v3008_v13 = vpop.f32.mrf.mxu0 }
 0x2ac   : > { %3118 = vmatmul.bf16.gmra.mxu0 %v3485_v61 }
 0x2ad   : > { %3980 = vmatmul.msk.bf16.gmra.mxu1 %vm2739_vm1, %v3489_v63  ;;  %v2951_v63 = vadd.f32 %v2950_v24, %v5229_v60 }
 0x2b2   : > { %v3010_v17 = vpop.f32.mrf.mxu0 }
 0x2bc   : > { %3123 = vmatmul.bf16.gmra.mxu0 %v3541_v5 }
 0x2bd   : > { %3981 = vmatmul.msk.bf16.gmra.mxu1 %vm2739_vm1, %v3545_v8 }
 0x2e8   : > { %v3051_v4 = vpop.f32.mrf.mxu2 }
 0x2e9   : > { %v3052_v62 = vadd.f32 %v3051_v4, %v5275_v56 }
 0x2ef   : > { %v3080_v14 = vpop.f32.mrf.mxu3 }
 0x2f0   : > { %v3053_v16 = vpop.f32.mrf.mxu2  ;;  %v3081_v19 = vadd.f32 %v3080_v14, %v3052_v62 }
 0x2f1   : > { %v3054_v35 = vadd.f32 %v3053_v16, %v5289_v6 }
 0x2f7   : > { %v3082_v18 = vpop.f32.mrf.mxu3 }
 0x2f8   : > { %v3056_v21 = vpop.f32.mrf.mxu2  ;;  %v3083_v27 = vadd.f32 %v3082_v18, %v3054_v35  ;;  %v2953_v18 = vadd.f32 %v2952_v11, %v5234_v7 }
 0x2f9   : > { %v3057_v50 = vadd.f32 %v3056_v21, %v5307_v25 }
 0x2ff   : > { %v3085_v26 = vpop.f32.mrf.mxu3 }
 0x300   : > { %v3058_v32 = vpop.f32.mrf.mxu2  ;;  %v3086_v38 = vadd.f32 %v3085_v26, %v3057_v50 }
 0x301   : > { %v3059_v6 = vadd.f32 %v3058_v32, %v5320_v34  ;;  %v2980_v34 = vadd.f32 %v2979_v9, %v2951_v63 }
 0x303   : > { %v3009_v3 = vadd.f32 %v3008_v13, %v2980_v34 }
 0x305   : > { %v3038_v21 = vadd.f32 %v3037_v15, %v3009_v3 }
 0x307   : > { %v3087_v37 = vpop.f32.mrf.mxu3 }
 0x308   : > { %v3061_v44 = vpop.f32.mrf.mxu2  ;;  %v3088_v59 = vadd.f32 %v3087_v37, %v3059_v6 }
 0x309   : > { %v3109_v22 = vpop.f32.mrf.mxu0  ;;  %v3062_v52 = vadd.f32 %v3061_v44, %v5337_v48 }
 0x30a   : > { %v3138_v23 = vpop.f32.mrf.mxu1  ;;  %v3110_v28 = vadd.f32 %v3109_v22, %v3081_v19 }
 0x30c   : > { %v3139_v42 = vadd.f32 %v3138_v23, %v3110_v28  ;;  %v2982_v23 = vadd.f32 %v5371_v12, %v2953_v18 }
 0x30e   : > { %v3011_v9 = vadd.f32 %v3010_v17, %v2982_v23 }
 0x30f   : > { %v3090_v46 = vpop.f32.mrf.mxu3 }
 0x310   : > { %v3063_v25 = vpop.f32.mrf.mxu2  ;;  %v3091_v10 = vadd.f32 %v3090_v46, %v3062_v52  ;;  %v3040_v19 = vadd.f32 %v5373_v20, %v3011_v9 }
 0x311   : > { %v3111_v29 = vpop.f32.mrf.mxu0  ;;  %v3064_v1 = vadd.f32 %v3063_v25, %v5343_v54 }
 0x312   : > { %v3112_v30 = vadd.f32 %v3111_v29, %v3083_v27  ;;  %v3140_v31 = vpop.f32.mrf.mxu1 }
 0x314   : > { %v3141_v36 = vadd.f32 %v3140_v31, %v3112_v30  ;;  %v3169_v31 = vpop.permute.xlu0 %3168 }
 0x316   : > { %v3158_v40 = vmax.f32 %v3139_v42, %v3141_v36 }
 0x317   : > { %v3092_v55 = vpop.f32.mrf.mxu3 }
 0x318   : > { %v3093_v5 = vadd.f32 %v3092_v55, %v3064_v1  ;;  %v3066_v8 = vpop.f32.mrf.mxu2 }
 0x319   : > { %v3114_v39 = vpop.f32.mrf.mxu0  ;;  %v3067_v60 = vadd.f32 %v3066_v8, %v3038_v21 }
 0x31a   : > { %v3115_v41 = vadd.f32 %v3114_v39, %v3086_v38  ;;  %v3143_v43 = vpop.f32.mrf.mxu1 }
 0x31c   : > { %v3144_v56 = vadd.f32 %v3143_v43, %v3115_v41 }
 0x31e   : > { %v3159_v45 = vmax.f32 %v3158_v40, %v3144_v56 }
 0x31f   : > { %v3095_v16 = vpop.f32.mrf.mxu3 }
 0x320   : > { %v3096_v54 = vadd.f32 %v3095_v16, %v3067_v60  ;;  %v3068_v35 = vpop.f32.mrf.mxu2 }
 0x321   : > { %v3116_v47 = vpop.f32.mrf.mxu0  ;;  %v3069_v7 = vadd.f32 %v3068_v35, %v3040_v19 }
 0x322   : > { %v3117_v49 = vadd.f32 %v3116_v47, %v3088_v59  ;;  %v3145_v51 = vpop.f32.mrf.mxu1 }
 0x324   : > { %v3146_v33 = vadd.f32 %v3145_v51, %v3117_v49 }
 0x326   : > { %v3160_v53 = vmax.f32 %v3159_v45, %v3146_v33 }
 0x327   : > { %v3097_v28 = vpop.f32.mrf.mxu3 }
 0x328   : > { %v3098_v15 = vadd.f32 %v3097_v28, %v3069_v7 }
 0x329   : > { %v3119_v57 = vpop.f32.mrf.mxu0 }
 0x32a   : > { %v3120_v58 = vadd.f32 %v3119_v57, %v3091_v10  ;;  %v3148_v61 = vpop.f32.mrf.mxu1 }
 0x32c   : > { %v3149_v0 = vadd.f32 %v3148_v61, %v3120_v58 }
 0x32e   : > { %v3161_v2 = vmax.f32 %v3160_v53, %v3149_v0 }
 0x331   : > { %v3121_v4 = vpop.f32.mrf.mxu0 }
 0x332   : > { %v3122_v14 = vadd.f32 %v3121_v4, %v3093_v5  ;;  %v3150_v48 = vpop.f32.mrf.mxu1 }
 0x334   : > { %v3151_v22 = vadd.f32 %v3150_v48, %v3122_v14 }
 0x336   : > { %v3162_v24 = vmax.f32 %v3161_v2, %v3151_v22 }
 0x339   : > { %v3124_v13 = vpop.f32.mrf.mxu0 }
 0x33a   : > { %v3125_v26 = vadd.f32 %v3124_v13, %v3096_v54  ;;  %v3153_v62 = vpop.f32.mrf.mxu1 }
 0x33c   : > { %v3154_v27 = vadd.f32 %v3153_v62, %v3125_v26 }
 0x33e   : > { %v3163_v11 = vmax.f32 %v3162_v24, %v3154_v27 }
 0x341   : > { %v3126_v29 = vpop.f32.mrf.mxu0 }
 0x342   : > { %v3127_v12 = vadd.f32 %v3126_v29, %v3098_v15  ;;  %v3155_v30 = vpop.f32.mrf.mxu1 }
 0x344   : > { %v3156_v17 = vadd.f32 %v3155_v30, %v3127_v12 }
 0x346   : > { %v3164_v32 = vmax.f32 %v3163_v11, %v3156_v17 }
 0x348   : > { %v3171_v42 = vadd.f32 %v3169_v31, %v3164_v32 }
 0x34a   : > { %v3172_v36 = vmax.f32 %v3171_v42, 0.0 }
 0x34c   : > { %v3173_v20 = vpack.c.bf16 %v3172_v36, %v3172_v36 }
 0x34e   : > { %3174 = vst.msk [vmem:[%s340_s26] sm:$0xf] %vm350_vm0, %v3173_v20 }
 0x34f PF: > { %s15_s22 = sadd.s32 1, %s4252_s22   ;;  %s5416_s18 = smov %s4244_s20 }
 0x350   : > { %p12_p10 = scmp.ge.s32.totalorder %s15_s22, 6   ;;  %s5417_s19 = smov %s4248_s21 }
 0x351   : > { %s5418_s20 = smov %s5421_s23  ;;  %s5419_s21 = smov %s5425_s24 }
 0x352   :  { %14 = sbr.rel (!%p12_p10) target bundleno = 3 (0x3), region = 76 }

// kernel: dsa_3d_cnn_forward.8
= control target key start
LH: loop header
LB: loop body
LE: loop exit
PB: predicated region body
PF: predicated region fallthrough
CT: control target
= control target key end

     0   :  { %v158_v2 = vmov 0.0   ;;  %s212_s1 = inlined_call_operand.vmem [shape: bf16[128,128], index: 1, kind: input, shape index: {}]   ;;  %s213_s2 = inlined_call_operand.vmem [shape: f32[1,128], index: 2, kind: input, shape index: {}]   ;;  %s214_s0 = inlined_call_operand.vmem [shape: bf16[2,128], index: 0, kind: input, shape index: {}]   ;;  %s215_s3 = inlined_call_operand.vmem [shape: bf16[2,128], index: 3, kind: output, shape index: {}]  }
   0x1   :  { %v155_v0 = vld [vmem:[%s212_s1 + $0x38] sm:$0xff]  ;;  %v154_v1 = vld [vmem:[%s212_s1 + $0x30] sm:$0xff]  ;;  %18 = vst [vmem:[#allocation2] sm:$0x3] %v158_v2  ;;  %v153_v3 = vld [vmem:[%s212_s1 + $0x28] sm:$0xff] }
   0x2   :  { %85 = vmatpush.bf16.msra.mxu0 %v155_v0  ;;  %v152_v4 = vld [vmem:[%s212_s1 + $0x20] sm:$0xff]  ;;  %v151_v5 = vld [vmem:[%s212_s1 + $0x18] sm:$0xff]  ;;  %v150_v6 = vld [vmem:[%s212_s1 + $0x10] sm:$0xff] }
   0x3   :  { %v149_v7 = vld [vmem:[%s212_s1 + $0x8] sm:$0xff]  ;;  %v148_v8 = vld [vmem:[%s212_s1] sm:$0xff] }
   0x4   :  { %v20_v9 = vld [vmem:[%s214_s0] sm:$0x1] }
   0x5   :  { %v157_v13 = vld [vmem:[%s213_s2] ss:$0 sm:$0xff] }
   0x6   :  { %86 = vmatpush.bf16.msra.mxu0 %v154_v1 }
   0x8   :  { %v19_v10 = vld [vmem:[#allocation2] sm:$0x3] }
   0xa   :  { %87 = vmatpush.bf16.msra.mxu0 %v153_v3 }
   0xe   :  { %88 = vmatpush.bf16.msra.mxu0 %v152_v4 }
  0x12   :  { %89 = vmatpush.bf16.msra.mxu0 %v151_v5 }
  0x16   :  { %90 = vmatpush.bf16.msra.mxu0 %v150_v6 }
  0x1a   :  { %91 = vmatpush.bf16.msra.mxu0 %v149_v7 }
  0x1e   :  { %92 = vmatpush.bf16.msra.mxu0 %v148_v8 }
  0x21   :  { %93 = vmatmul.bf16.vlgmr.msra.gmra.mxu0 %v20_v9 }
  0x9e   :  { %v94_v11 = vpop.f32.mrf.mxu0 }
  0x9f   :  { %v98_v12 = vadd.f32 %v94_v11, %v19_v10 }
  0xa1   :  { %99 = vst [vmem:[#allocation2] sm:$0x3] %v98_v12 }
  0xa6   :  { %v96_v14 = vpop.f32.mrf.mxu0 }
  0xa8   :  { %v103_v15 = vld [vmem:[#allocation2] sm:$0x3] }
  0xa9   :  { %v108_v16 = vadd.f32 %v157_v13, %v103_v15 }
  0xab   :  { %v109_v17 = vmax.f32 %v108_v16, 0.0 }
  0xad   :  { %v110_v18 = vpack.c.bf16 %v109_v17, %v109_v17 }
  0xaf   :  { %111 = vst [vmem:[%s215_s3] sm:$0x1] %v110_v18 }

// kernel: dsa_3d_cnn_forward.9
= control target key start
LH: loop header
LB: loop body
LE: loop exit
PB: predicated region body
PF: predicated region fallthrough
CT: control target
= control target key end

     0   :  { %s346_s0 = inlined_call_operand.vmem [shape: bf16[2,128], index: 0, kind: input, shape index: {}]   ;;  %s347_s1 = inlined_call_operand.vmem [shape: bf16[128,64], index: 1, kind: input, shape index: {}]   ;;  %s348_s2 = inlined_call_operand.vmem [shape: f32[1,64], index: 2, kind: input, shape index: {}]   ;;  %s349_s3 = inlined_call_operand.vmem [shape: bf16[64,2], index: 3, kind: input, shape index: {}]   ;;  %s350_s4 = inlined_call_operand.vmem [shape: f32[1,2], index: 4, kind: input, shape index: {}]   ;;  %s351_s5 = inlined_call_operand.hbm [shape: f32[2,2], index: 5, kind: output, shape index: {}]  }
   0x1   :  { %v233_v0 = vld [vmem:[%s347_s1 + $0x38] sm:$0xff]  ;;  %v232_v1 = vld [vmem:[%s347_s1 + $0x30] sm:$0xff] }
   0x2   :  { %91 = vmatpush.bf16.msra.mxu0 %v233_v0  ;;  %v237_v2 = vld [vmem:[%s349_s3 + $0x18] sm:$0xff] }
   0x3   :  { %10 = vsyncpa [#allocation3], 0  ;;  %150 = vmatpush.bf16.msra.mxu1 %v237_v2  ;;  %v236_v3 = vld [vmem:[%s349_s3 + $0x10] sm:$0xff]  ;;  %v231_v4 = vld [vmem:[%s347_s1 + $0x28] sm:$0xff]  ;;  %vm142_vm0 = vcmask 523264   ;;  %s267_s21 = smov [#allocation2]  }
   0x4   :  { %v230_v5 = vld [vmem:[%s347_s1 + $0x20] sm:$0xff]  ;;  %v229_v6 = vld [vmem:[%s347_s1 + $0x18] sm:$0xff]  ;;  %v228_v7 = vld [vmem:[%s347_s1 + $0x10] sm:$0xff]  ;;  %s166_s22 = sshll.u32 %s267_s21, 4  ;;  %s168_s24 = sshll.u32 %s351_s5, 4  ;;  %vm159_vm1 = vcmask 9216   ;;  %s167_s22 = int_to_ptr.vmem [resolvable:$true] %s166_s22  ;;  %s169_s24 = int_to_ptr.hbm [resolvable:$true] %s168_s24 }
   0x5   :  { %v227_v8 = vld [vmem:[%s347_s1 + $0x8] sm:$0xff]  ;;  %v226_v9 = vld [vmem:[%s347_s1] sm:$0xff] }
   0x6   :  { %92 = vmatpush.bf16.msra.mxu0 %v232_v1  ;;  %v22_v10 = vld [vmem:[%s346_s0] sm:$0x1]  ;;  %v235_v11 = vld [vmem:[%s349_s3 + $0x8] sm:$0xff] }
   0x7   :  { %151 = vmatpush.bf16.msra.mxu1 %v236_v3  ;;  %v234_v12 = vld [vmem:[%s349_s3] sm:$0xff] }
   0x8   :  { %v239_v13 = vld [vmem:[%s348_s2] ss:$0 sm:$0xff] }
   0x9   :  { %v240_v19 = vld [vmem:[%s350_s4] ss:$0 sm:$0xff] }
   0xa   :  { %93 = vmatpush.bf16.msra.mxu0 %v231_v4 }
   0xb   :  { %152 = vmatpush.bf16.msra.mxu1 %v235_v11 }
   0xe   :  { %94 = vmatpush.bf16.msra.mxu0 %v230_v5 }
   0xf   :  { %153 = vmatpush.bf16.msra.mxu1 %v234_v12 }
  0x12   :  { %95 = vmatpush.bf16.msra.mxu0 %v229_v6 }
  0x16   :  { %96 = vmatpush.bf16.msra.mxu0 %v228_v7 }
  0x1a   :  { %97 = vmatpush.bf16.msra.mxu0 %v227_v8 }
  0x1e   :  { %98 = vmatpush.bf16.msra.mxu0 %v226_v9 }
  0x21   :  { %99 = vmatmul.bf16.vlgmr.msra.gmra.mxu0 %v22_v10 }
  0x9e   :  { %v100_v14 = vpop.f32.mrf.mxu0 }
  0x9f   :  { %v101_v15 = vadd.f32 %v239_v13, %v100_v14 }
  0xa1   :  { %v104_v16 = vmax.f32 %v101_v15, 0.0 }
  0xa3   :  { %v105_v17 = vpack.c.bf16 %v104_v16, %v104_v16 }
  0xa5   :  { %225 = vmatmul.msk.bf16.vlgmr.msra.gmra.mxu1 %vm142_vm0, %v105_v17 }
  0xa6   :  { %v102_v18 = vpop.f32.mrf.mxu0 }
 0x122   :  { %v155_v20 = vpop.f32.mrf.mxu1 }
 0x123   :  { %v156_v21 = vadd.f32 %v240_v19, %v155_v20 }
 0x125   :  { %160 = vst.msk [vmem:[#allocation2] sm:$0x3] %vm159_vm1, %v156_v21 }
 0x126   :  { %171 = dma.vmem_to_hbm [thread:$0]  %s167_s22, 32, %s169_s24, [#allocation3]  }
 0x12a   :  { %v157_v22 = vpop.f32.mrf.mxu1 }
 0x12b   :  { %265 = dma.done.wait [#allocation3], 32  }
 0x12c   :  { %266 = vsyncadd [#allocation3], 4294967264 }
 0x12d   :  { %176 = vsyncpa [#allocation3], 1 }

</bundles_post_ra>
